<compile_context>
chip_gen: v7x
topology: tpu7x:2x2x1
jax: 0.10.0
libtpu: 0.0.40
codegen_flags: <defaults>
</compile_context>

<pallas_src>
import functools

import jax
import jax.numpy as jnp
from jax.experimental import pallas as pl
from jax.experimental.pallas import tpu as pltpu


def finalfc_kernel(x_ref, w1_ref, b1_ref, w2_ref, b2_ref, w3_ref, b3_ref, o_ref):
    # x_ref:  (tile_m, d_model) f32
    # w1_ref: (d_model, 2048) bf16, b1_ref: (1, 2048) f32
    # w2_ref: (2048, 512)     bf16, b2_ref: (1, 512)  f32
    # w3_ref: (1, 512)        bf16, b3_ref: (1, 1)    f32
    # o_ref:  (1, tile_m) f32  -- lane-dense row; wrapper reshapes to (M, 1)
    x = x_ref[...].astype(jnp.bfloat16)

    # fc_1 + ReLU (bf16 MXU inputs, f32 accumulate, f32 bias/ReLU)
    h1 = jnp.dot(x, w1_ref[...], preferred_element_type=jnp.float32) + b1_ref[...]
    h1 = jnp.maximum(h1, 0.0)

    # fc_2 + ReLU
    h2 = jnp.dot(h1.astype(jnp.bfloat16), w2_ref[...],
                 preferred_element_type=jnp.float32) + b2_ref[...]
    h2 = jnp.maximum(h2, 0.0)

    # fc_3 (output dim 1): (1, 512) @ (512, tile_m) -> (1, tile_m).
    # Produces the reduced "column" directly as a lane-dense row, avoiding both
    # a degenerate N=1 MXU shape and masked (tile_m, 1) stores.
    out_row = jnp.dot(w3_ref[...], h2.astype(jnp.bfloat16).T,
                      preferred_element_type=jnp.float32)
    o_ref[...] = (out_row + b3_ref[...]).astype(o_ref.dtype)


@functools.partial(jax.jit, static_argnames=("tile_m",))
def finalfc_forward(x, params, tile_m=256):
    """x: (batch, seq, d_model) float32 -> (batch, seq, 1) float32.

    tile_m: rows per grid step. Use >=256 on v6e/v7x, a multiple of 128 on v5e.
    """
    w1, b1, w2, b2, w3, b3 = params
    batch, seq, d_model = x.shape
    M = batch * seq
    num_tiles = pl.cdiv(M, tile_m)
    Mp = num_tiles * tile_m

    x2 = x.reshape(M, d_model)
    if Mp != M:
        x2 = jnp.pad(x2, ((0, Mp - M), (0, 0)))

    flops = 2 * Mp * (d_model * 2048 + 2048 * 512 + 512)
    bytes_accessed = (
        Mp * d_model * 4                       # activations in
        + (w1.size + w2.size + w3.size) * 2    # bf16 weights
        + (b1.size + b2.size + b3.size) * 4    # f32 biases
        + Mp * 4                               # output
    )
    cost = pl.CostEstimate(flops=flops, transcendentals=0,
                           bytes_accessed=bytes_accessed)

    out_rows = pl.pallas_call(
        finalfc_kernel,
        out_shape=jax.ShapeDtypeStruct((1, Mp), jnp.float32),
        grid_spec=pltpu.PrefetchScalarGridSpec(
            num_scalar_prefetch=0,
            grid=(num_tiles,),
            in_specs=[
                pl.BlockSpec((tile_m, d_model), lambda i: (i, 0)),   # x tile
                pl.BlockSpec(w1.shape, lambda i: (0, 0)),            # W1 (full, bf16)
                pl.BlockSpec(b1.shape, lambda i: (0, 0)),            # b1
                pl.BlockSpec(w2.shape, lambda i: (0, 0)),            # W2 (full, bf16)
                pl.BlockSpec(b2.shape, lambda i: (0, 0)),            # b2
                pl.BlockSpec(w3.shape, lambda i: (0, 0)),            # w3 row (bf16)
                pl.BlockSpec(b3.shape, lambda i: (0, 0)),            # b3
            ],
            out_specs=pl.BlockSpec((1, tile_m), lambda i: (0, i)),   # lane-dense
        ),
        compiler_params=pltpu.CompilerParams(
            dimension_semantics=("parallel",),
        ),
        cost_estimate=cost,
    )(x2, w1, b1, w2, b2, w3, b3)

    # Undo lane-dense packing + padding: row-major (num_tiles*tile_m,) == flat rows.
    return out_rows[0, :M].reshape(batch, seq, 1)


def init_params(key, d_model):
    """nn.Linear-style init: U(-1/sqrt(fan_in), +1/sqrt(fan_in)).

    Weights are stored in bf16 (MXU operand dtype); biases stay f32.
    """
    dims = [(d_model, 2048), (2048, 512), (512, 1)]
    keys = jax.random.split(key, 2 * len(dims))
    params = []
    for idx, (fan_in, fan_out) in enumerate(dims):
        bound = 1.0 / jnp.sqrt(float(fan_in))
        w = jax.random.uniform(keys[2 * idx], (fan_in, fan_out),
                               minval=-bound, maxval=bound, dtype=jnp.float32)
        b = jax.random.uniform(keys[2 * idx + 1], (1, fan_out),
                               minval=-bound, maxval=bound, dtype=jnp.float32)
        params.append((w.astype(jnp.bfloat16), b))
    (w1, b1), (w2, b2), (w3, b3) = params
    # Store fc_3 weight as a (1, 512) bf16 row for the row-producing dot.
    w3_row = w3.reshape(1, 512)
    return (w1, b1, w2, b2, w3_row, b3)


def finalfc_reference(x, params):
    """Pure-JAX reference with matching precision (bf16 matmuls, f32 accumulate,
    eval-mode dropout = identity)."""
    w1, b1, w2, b2, w3_row, b3 = params
    batch, seq, d_model = x.shape
    x2 = x.reshape(-1, d_model)
    h1 = jnp.maximum(
        jnp.dot(x2.astype(jnp.bfloat16), w1, preferred_element_type=jnp.float32)
        + b1, 0.0)
    h2 = jnp.maximum(
        jnp.dot(h1.astype(jnp.bfloat16), w2, preferred_element_type=jnp.float32)
        + b2, 0.0)
    out = jnp.dot(h2.astype(jnp.bfloat16), w3_row.T,
                  preferred_element_type=jnp.float32) + b3
    return out.reshape(batch, seq, 1)


if __name__ == "__main__":
    key = jax.random.PRNGKey(0)
    k_param, k_x = jax.random.split(key)

    d_model = 32
    batch, seq = 2, 8

    params = init_params(k_param, d_model)
    x = jax.random.normal(k_x, (batch, seq, d_model), dtype=jnp.float32)

    out = finalfc_forward(x, params)
    out = jax.block_until_ready(out)

    ref = finalfc_reference(x, params)
    assert out.shape == (batch, seq, 1), out.shape
    # Tolerance accounts for bf16 MXU operands (f32 accumulation keeps it tight).
    assert jnp.allclose(out, ref, atol=5e-3, rtol=5e-3), (
        float(jnp.max(jnp.abs(out - ref)))
    )

    print("KERNEL_OK")
</pallas_src>

<mosaic_0001>
module attributes {stable_mosaic.version = 11 : i64} {
  func.func @finalfc_kernel(%arg0: i32, %arg1: memref<256x32xf32, #tpu.memory_space<vmem>>, %arg2: memref<32x2048xbf16, #tpu.memory_space<vmem>>, %arg3: memref<1x2048xf32, #tpu.memory_space<vmem>>, %arg4: memref<2048x512xbf16, #tpu.memory_space<vmem>>, %arg5: memref<1x512xf32, #tpu.memory_space<vmem>>, %arg6: memref<1x512xbf16, #tpu.memory_space<vmem>>, %arg7: memref<1x1xf32, #tpu.memory_space<vmem>>, %arg8: memref<1x256xf32, #tpu.memory_space<vmem>>) attributes {dimension_semantics = [#tpu.dimension_semantics<parallel>], iteration_bounds = array<i64: 1>, scalar_prefetch = 0 : i64, scratch_operands = 0 : i64, tpu.core_type = #tpu.core_type<tc>, window_params = [{transform_indices = @transform_0, window_bounds = array<i64: 256, 32>}, {pipeline_mode = #tpu.pipeline_mode<synchronous>, transform_indices = @transform_1, window_bounds = array<i64: 32, 2048>}, {pipeline_mode = #tpu.pipeline_mode<synchronous>, transform_indices = @transform_2, window_bounds = array<i64: 1, 2048>}, {pipeline_mode = #tpu.pipeline_mode<synchronous>, transform_indices = @transform_3, window_bounds = array<i64: 2048, 512>}, {pipeline_mode = #tpu.pipeline_mode<synchronous>, transform_indices = @transform_4, window_bounds = array<i64: 1, 512>}, {pipeline_mode = #tpu.pipeline_mode<synchronous>, transform_indices = @transform_5, window_bounds = array<i64: 1, 512>}, {pipeline_mode = #tpu.pipeline_mode<synchronous>, transform_indices = @transform_6, window_bounds = array<i64: 1, 1>}, {transform_indices = @transform_7, window_bounds = array<i64: 1, 256>}]} {
    %c0 = arith.constant 0 : index
    %c0_0 = arith.constant 0 : index
    %0 = vector.load %arg1[%c0, %c0_0] : memref<256x32xf32, #tpu.memory_space<vmem>>, vector<256x32xf32>
    %1 = arith.truncf %0 : vector<256x32xf32> to vector<256x32xbf16>
    %c0_1 = arith.constant 0 : index
    %c0_2 = arith.constant 0 : index
    %2 = vector.load %arg2[%c0_1, %c0_2] : memref<32x2048xbf16, #tpu.memory_space<vmem>>, vector<32x2048xbf16>
    %cst = arith.constant dense<0.000000e+00> : vector<256x2048xf32>
    %3 = tpu.matmul %1, %2, %cst {dimension_numbers = #tpu.dot_dimension_numbers<[1], [0], [0], [1], [0, 0, 1, 1], [], []>} : vector<256x32xbf16>, vector<32x2048xbf16>, vector<256x2048xf32> -> vector<256x2048xf32>
    %c0_3 = arith.constant 0 : index
    %c0_4 = arith.constant 0 : index
    %4 = vector.load %arg3[%c0_3, %c0_4] : memref<1x2048xf32, #tpu.memory_space<vmem>>, vector<1x2048xf32>
    %5 = vector.broadcast %4 : vector<1x2048xf32> to vector<256x2048xf32>
    %6 = arith.addf %3, %5 : vector<256x2048xf32>
    %cst_5 = arith.constant 0.000000e+00 : f32
    %7 = vector.broadcast %cst_5 : f32 to vector<256x2048xf32>
    %8 = arith.maximumf %6, %7 : vector<256x2048xf32>
    %9 = arith.truncf %8 : vector<256x2048xf32> to vector<256x2048xbf16>
    %c0_6 = arith.constant 0 : index
    %c0_7 = arith.constant 0 : index
    %10 = vector.load %arg4[%c0_6, %c0_7] : memref<2048x512xbf16, #tpu.memory_space<vmem>>, vector<2048x512xbf16>
    %cst_8 = arith.constant dense<0.000000e+00> : vector<256x512xf32>
    %11 = tpu.matmul %9, %10, %cst_8 {dimension_numbers = #tpu.dot_dimension_numbers<[1], [0], [0], [1], [0, 0, 1, 1], [], []>} : vector<256x2048xbf16>, vector<2048x512xbf16>, vector<256x512xf32> -> vector<256x512xf32>
    %c0_9 = arith.constant 0 : index
    %c0_10 = arith.constant 0 : index
    %12 = vector.load %arg5[%c0_9, %c0_10] : memref<1x512xf32, #tpu.memory_space<vmem>>, vector<1x512xf32>
    %13 = vector.broadcast %12 : vector<1x512xf32> to vector<256x512xf32>
    %14 = arith.addf %11, %13 : vector<256x512xf32>
    %cst_11 = arith.constant 0.000000e+00 : f32
    %15 = vector.broadcast %cst_11 : f32 to vector<256x512xf32>
    %16 = arith.maximumf %14, %15 : vector<256x512xf32>
    %c0_12 = arith.constant 0 : index
    %c0_13 = arith.constant 0 : index
    %17 = vector.load %arg6[%c0_12, %c0_13] : memref<1x512xbf16, #tpu.memory_space<vmem>>, vector<1x512xbf16>
    %18 = arith.truncf %16 : vector<256x512xf32> to vector<256x512xbf16>
    %19 = tpu.transpose %18, [1, 0] : vector<256x512xbf16> -> vector<512x256xbf16>
    %cst_14 = arith.constant dense<0.000000e+00> : vector<1x256xf32>
    %20 = tpu.matmul %17, %19, %cst_14 {dimension_numbers = #tpu.dot_dimension_numbers<[1], [0], [0], [1], [0, 0, 1, 1], [], []>} : vector<1x512xbf16>, vector<512x256xbf16>, vector<1x256xf32> -> vector<1x256xf32>
    %c0_15 = arith.constant 0 : index
    %c0_16 = arith.constant 0 : index
    %21 = vector.load %arg7[%c0_15, %c0_16] : memref<1x1xf32, #tpu.memory_space<vmem>>, vector<1x1xf32>
    %22 = vector.broadcast %21 : vector<1x1xf32> to vector<1x256xf32>
    %23 = arith.addf %20, %22 : vector<1x256xf32>
    %c0_17 = arith.constant 0 : index
    %c0_18 = arith.constant 0 : index
    %24 = vector.load %arg8[%c0_17, %c0_18] : memref<1x256xf32, #tpu.memory_space<vmem>>, vector<1x256xf32>
    tpu.vector_store %arg8[%c0_17, %c0_18], %23 {strides = array<i32>} : memref<1x256xf32, #tpu.memory_space<vmem>>, vector<1x256xf32>,
    return
  }
  func.func @transform_0(%arg0: i32) -> (i32, i32) {
    %c0_i32 = arith.constant 0 : i32
    %c0_i32_0 = arith.constant 0 : i32
    return %arg0, %c0_i32 : i32, i32
  }
  func.func @transform_1(%arg0: i32) -> (i32, i32) {
    %c0_i32 = arith.constant 0 : i32
    %c0_i32_0 = arith.constant 0 : i32
    %c0_i32_1 = arith.constant 0 : i32
    return %c0_i32, %c0_i32_0 : i32, i32
  }
  func.func @transform_2(%arg0: i32) -> (i32, i32) {
    %c0_i32 = arith.constant 0 : i32
    %c0_i32_0 = arith.constant 0 : i32
    %c0_i32_1 = arith.constant 0 : i32
    return %c0_i32, %c0_i32_0 : i32, i32
  }
  func.func @transform_3(%arg0: i32) -> (i32, i32) {
    %c0_i32 = arith.constant 0 : i32
    %c0_i32_0 = arith.constant 0 : i32
    %c0_i32_1 = arith.constant 0 : i32
    return %c0_i32, %c0_i32_0 : i32, i32
  }
  func.func @transform_4(%arg0: i32) -> (i32, i32) {
    %c0_i32 = arith.constant 0 : i32
    %c0_i32_0 = arith.constant 0 : i32
    %c0_i32_1 = arith.constant 0 : i32
    return %c0_i32, %c0_i32_0 : i32, i32
  }
  func.func @transform_5(%arg0: i32) -> (i32, i32) {
    %c0_i32 = arith.constant 0 : i32
    %c0_i32_0 = arith.constant 0 : i32
    %c0_i32_1 = arith.constant 0 : i32
    return %c0_i32, %c0_i32_0 : i32, i32
  }
  func.func @transform_6(%arg0: i32) -> (i32, i32) {
    %c0_i32 = arith.constant 0 : i32
    %c0_i32_0 = arith.constant 0 : i32
    %c0_i32_1 = arith.constant 0 : i32
    return %c0_i32, %c0_i32_0 : i32, i32
  }
  func.func @transform_7(%arg0: i32) -> (i32, i32) {
    %c0_i32 = arith.constant 0 : i32
    %c0_i32_0 = arith.constant 0 : i32
    return %c0_i32, %arg0 : i32, i32
  }
}

</mosaic_0001>

<bundles_post_ra>
// kernel: squeeze.1
= control target key start
LH: loop header
LB: loop body
LE: loop exit
PB: predicated region body
PF: predicated region fallthrough
CT: control target
= control target key end

     0   :  { %s85_s0 = inlined_call_operand.vmem [shape: f32[16], index: 0, kind: input, shape index: {}]   ;;  %s86_s1 = inlined_call_operand.hbm [shape: f32[2,8,1], index: 1, kind: output, shape index: {}]  }
   0x1   :  { %v5_v0 = vld [vmem:[%s85_s0] sm:$0x1] }
   0x2   :  { %2 = vsyncpa [#allocation1], 0  ;;  %6 = vst [vmem:[#allocation3] sm:$0x1] %v5_v0  ;;  %vm8_vm0 = vcmask 64512   ;;  %s58_s0 = smov 120  }
   0x3   :  { %s59_s8 = smov [#allocation0]  }
   0x4   :  { %s26_s9 = sshll.u32 %s59_s8, 4  ;;  %s27_s9 = int_to_ptr.vmem [resolvable:$true] %s26_s9 }
   0x5   :  { %s34_s10 = scalar_lea.vmem %s27_s9, 32  ;;  %p39_p1 = scmp.lt.s32.totalorder %s27_s9, %s27_s9 }
   0x6   :  { %p35_p0 = scmp.ne.s32.totalorder %s27_s9, %s34_s10  ;;  %p40_p2 = scmp.lt.s32.totalorder %s34_s10, %s34_s10 }
   0x8   :  { %p41_p3 = por %p40_p2, %p39_p1 }
   0x9   :  { %v10_v1 = vld [vmem:[#allocation3] sm:$0x1]  }
   0xa   :  { %v7_v2 = vld [vmem:[#allocation3] sm:$0x1]   ;;  %11 = vrot.lane.b32.xlu0 %v10_v1, %s58_s0  ;;  %p42_p4 = pnand %p41_p3, %p35_p0 }
   0xb   :  { %9 = vst.msk [vmem:[#allocation2] sm:$0x1] %vm8_vm0, %v7_v2  }
  0x7c   :  { %v12_v3 = vpop.permute.xlu0 %11  }
  0x7d   :  { %15 = vst.msk [vmem:[#allocation2 + $0x1] sm:$0x1] %vm8_vm0, %v12_v3  }
  0x84   :  { %v19_v4 = vld [vmem:[#allocation2] sm:$0x3] }
  0x85   :  { %21 = vst [vmem:[#allocation0] sm:$0x3] %v19_v4 }
  0x86   :  { %45 = shalt.err (!%p42_p4)
}
  0x87   :  { %s46_s13 = scalar_lea.hbm %s86_s1, 32 }
  0x88   :  { %p47_p5 = scmp.ne.s32.totalorder %s86_s1, %s46_s13  ;;  %p50_p6 = scmp.lt.u32.totalorder %s46_s13, %s86_s1 }
  0x8a   :  { %p52_p7 = pnand %p50_p6, %p47_p5 }
  0x8c   :  { %55 = shalt.err (!%p52_p7)
}
  0x8d   :  { %29 = dma.vmem_to_hbm [thread:$0]  %s27_s9, 32, %s86_s1, [#allocation1]  }
  0x8e   :  { %56 = dma.done.wait [#allocation1], 32  }
  0x8f   :  { %57 = vsyncadd [#allocation1], 4294967264 }
  0x90   :  { %31 = vsyncpa [#allocation1], 1 }

// kernel: finalfc_forward.1
= control target key start
LH: loop header
LB: loop body
LE: loop exit
PB: predicated region body
PF: predicated region fallthrough
CT: control target
= control target key end

     0   :  { %s14340_s0 = inlined_call_operand.vmem [shape: f32[256,32], index: 0, kind: input, shape index: {}]   ;;  %s14341_s1 = inlined_call_operand.hbm [shape: bf16[32,2048], index: 1, kind: input, shape index: {}]   ;;  %s14342_s2 = inlined_call_operand.hbm [shape: f32[1,2048], index: 2, kind: input, shape index: {}]   ;;  %s14343_s3 = inlined_call_operand.hbm [shape: bf16[2048,512], index: 3, kind: input, shape index: {}]   ;;  %s14344_s4 = inlined_call_operand.hbm [shape: f32[1,512], index: 4, kind: input, shape index: {}]   ;;  %s14345_s5 = inlined_call_operand.hbm [shape: bf16[1,512], index: 5, kind: input, shape index: {}]   ;;  %s14346_s6 = inlined_call_operand.<no memory space> [shape: f32[1,1], index: 6, kind: input, shape index: {}]   ;;  %s14347_s7 = inlined_call_operand.vmem [shape: f32[1,256], index: 7, kind: output, shape index: {}]  }
   0x1   :  { %v12_v0 = vstv %s14346_s6 }
   0x2   :  { %13 = vst [vmem:[#allocation2] sm:$0x1] %v12_v0 }
   0x3   :  { %14 = vsyncpa [#allocation4], 0 }
   0x4   :  { %15 = vsyncpa [#allocation6], 0 }
   0x5   :  { %16 = vsyncpa [#allocation9], 0  ;;  %s11901_s26 = smov [#allocation5]   ;;  %s11902_s28 = smov [#allocation8]  }
   0x6   :  { %s37_s27 = sshll.u32 %s11901_s26, 4  ;;  %s59_s29 = sshll.u32 %s11902_s28, 4  ;;  %s38_s27 = int_to_ptr.vmem [resolvable:$true] %s37_s27  ;;  %s60_s29 = int_to_ptr.vmem [resolvable:$true] %s59_s29 }
   0x7   :  { %s11785_s9 = scalar_lea.hbm %s14342_s2, 256 }
   0x8   :  { %p11786_p0 = scmp.ne.s32.totalorder %s14342_s2, %s11785_s9  ;;  %p11789_p1 = scmp.lt.u32.totalorder %s11785_s9, %s14342_s2 }
   0xa   :  { %p11791_p2 = pnand %p11789_p1, %p11786_p0 }
   0xc   :  { %11794 = shalt.err (!%p11791_p2)
}
   0xd   :  { %s11795_s13 = scalar_lea.vmem %s38_s27, 256  ;;  %p11800_p4 = scmp.lt.s32.totalorder %s38_s27, %s38_s27 }
   0xe   :  { %p11796_p3 = scmp.ne.s32.totalorder %s38_s27, %s11795_s13  ;;  %p11801_p5 = scmp.lt.s32.totalorder %s11795_s13, %s11795_s13 }
  0x10   :  { %p11802_p6 = por %p11801_p5, %p11800_p4 }
  0x12   :  { %p11803_p7 = pnand %p11802_p6, %p11796_p3 }
  0x14   :  { %11806 = shalt.err (!%p11803_p7)
}
  0x15   :  { %40 = dma.hbm_to_vmem [thread:$0]  %s14342_s2, 256, %s38_s27, [#allocation6]  }
  0x16   :  { %s11807_s18 = scalar_lea.hbm %s14344_s4, 64 }
  0x17   :  { %p11808_p8 = scmp.ne.s32.totalorder %s14344_s4, %s11807_s18  ;;  %p11811_p9 = scmp.lt.u32.totalorder %s11807_s18, %s14344_s4 }
  0x19   :  { %p11813_p10 = pnand %p11811_p9, %p11808_p8 }
  0x1b   :  { %11816 = shalt.err (!%p11813_p10)
}
  0x1c   :  { %s11817_s23 = scalar_lea.vmem %s60_s29, 64  ;;  %p11822_p12 = scmp.lt.s32.totalorder %s60_s29, %s60_s29 }
  0x1d   :  { %p11818_p11 = scmp.ne.s32.totalorder %s60_s29, %s11817_s23  ;;  %p11823_p13 = scmp.lt.s32.totalorder %s11817_s23, %s11817_s23 }
  0x1f   :  { %p11824_p0 = por %p11823_p13, %p11822_p12 }
  0x21   :  { %p11825_p1 = pnand %p11824_p0, %p11818_p11 }
  0x23   :  { %11828 = shalt.err (!%p11825_p1)
}
  0x24   :  { %62 = dma.hbm_to_vmem [thread:$0]  %s14344_s4, 64, %s60_s29, [#allocation9]  }
  0x25   :  { %s11903_s25 = smov [#allocation3]   ;;  %s11829_s30 = scalar_lea.hbm %s14341_s1, 4096 }
  0x26   :  { %s24_s26 = sshll.u32 %s11903_s25, 4  ;;  %p11830_p2 = scmp.ne.s32.totalorder %s14341_s1, %s11829_s30  ;;  %s25_s26 = int_to_ptr.vmem [resolvable:$true] %s24_s26 }
  0x27   :  { %p11833_p3 = scmp.lt.u32.totalorder %s11829_s30, %s14341_s1 }
  0x29   :  { %p11835_p4 = pnand %p11833_p3, %p11830_p2 }
  0x2b   :  { %11838 = shalt.err (!%p11835_p4)
}
  0x2c   :  { %s11839_s12 = scalar_lea.vmem %s25_s26, 4096  ;;  %p11844_p6 = scmp.lt.s32.totalorder %s25_s26, %s25_s26 }
  0x2d   :  { %p11840_p5 = scmp.ne.s32.totalorder %s25_s26, %s11839_s12  ;;  %p11845_p7 = scmp.lt.s32.totalorder %s11839_s12, %s11839_s12 }
  0x2f   :  { %p11846_p8 = por %p11845_p7, %p11844_p6 }
  0x31   :  { %p11847_p9 = pnand %p11846_p8, %p11840_p5 }
  0x33   :  { %11850 = shalt.err (!%p11847_p9)
}
  0x34   :  { %s11904_s4 = smov 1024   ;;  %s11905_s29 = smov 64  }
  0x35   :  { %30 = dma.hbm_to_vmem [thread:$0]  %s14341_s1, 4096, %s25_s26, [#allocation4], %s11904_s4, %s11904_s4, %s11905_s29  }
  0x36   :  { %s11906_s14 = smov [#allocation7]   ;;  %s11851_s18 = scalar_lea.hbm %s14343_s3, 65536 }
  0x37   :  { %s46_s15 = sshll.u32 %s11906_s14, 4  ;;  %p11852_p10 = scmp.ne.s32.totalorder %s14343_s3, %s11851_s18  ;;  %s47_s15 = int_to_ptr.vmem [resolvable:$true] %s46_s15 }
  0x38   :  { %p11855_p11 = scmp.lt.u32.totalorder %s11851_s18, %s14343_s3 }
  0x3a   :  { %p11857_p12 = pnand %p11855_p11, %p11852_p10 }
  0x3c   :  { %11860 = shalt.err (!%p11857_p12)
}
  0x3d   :  { %s11861_s23 = scalar_lea.vmem %s47_s15, 65536  ;;  %p11866_p0 = scmp.lt.s32.totalorder %s47_s15, %s47_s15 }
  0x3e   :  { %p11862_p13 = scmp.ne.s32.totalorder %s47_s15, %s11861_s23  ;;  %p11867_p1 = scmp.lt.s32.totalorder %s11861_s23, %s11861_s23 }
  0x40   :  { %p11868_p2 = por %p11867_p1, %p11866_p0 }
  0x42   :  { %p11869_p3 = pnand %p11868_p2, %p11862_p13 }
  0x44   :  { %11872 = shalt.err (!%p11869_p3)
}
  0x45   :  { %s11907_s1 = smov 256   ;;  %s11908_s2 = smov 16  }
  0x46   :  { %52 = dma.hbm_to_vmem [thread:$0]  %s14343_s3, 65536, %s47_s15, [#allocation6], %s11907_s1, %s11907_s1, %s11908_s2  }
  0x47   :  { %s11909_s26 = smov [#allocation10]   ;;  %s11873_s8 = scalar_lea.hbm %s14345_s5, 64 }
  0x48   :  { %s69_s27 = sshll.u32 %s11909_s26, 4  ;;  %p11874_p4 = scmp.ne.s32.totalorder %s14345_s5, %s11873_s8  ;;  %s70_s27 = int_to_ptr.vmem [resolvable:$true] %s69_s27 }
  0x49   :  { %p11877_p5 = scmp.lt.u32.totalorder %s11873_s8, %s14345_s5 }
  0x4b   :  { %p11879_p6 = pnand %p11877_p5, %p11874_p4 }
  0x4d   :  { %11882 = shalt.err (!%p11879_p6)
}
  0x4e   :  { %s11883_s4 = scalar_lea.vmem %s70_s27, 64  ;;  %p11888_p8 = scmp.lt.s32.totalorder %s70_s27, %s70_s27 }
  0x4f   :  { %p11884_p7 = scmp.ne.s32.totalorder %s70_s27, %s11883_s4  ;;  %p11889_p9 = scmp.lt.s32.totalorder %s11883_s4, %s11883_s4 }
  0x51   :  { %p11890_p10 = por %p11889_p9, %p11888_p8 }
  0x53   :  { %p11891_p11 = pnand %p11890_p10, %p11884_p7 }
  0x55   :  { %11894 = shalt.err (!%p11891_p11)
}
  0x56   :  { %72 = dma.hbm_to_vmem [thread:$0]  %s14345_s5, 64, %s70_s27, [#allocation9]  }
  0x57   :  { %11895 = dma.done.wait [#allocation4], 4096  }
  0x58   :  { %11896 = vsyncadd [#allocation4], 4294963200 }
  0x59   :  { %11897 = dma.done.wait [#allocation6], 65792  }
  0x5a   :  { %11898 = vsyncadd [#allocation6], 4294901504 }
  0x5b   :  { %11899 = dma.done.wait [#allocation9], 128  }
  0x5c   :  { %11900 = vsyncadd [#allocation9], 4294967168  ;;  %v14353_v1 = vmov 0   ;;  %v139_v2 = vld [vmem:[#allocation3] sm:$0xff]  ;;  %v140_v4 = vld [vmem:[#allocation3 + $0x8] sm:$0xff]  ;;  %vm415_vm0 = vcmask 261120  }
  0x5d   :  { %496 = vmatprep.mubr.bf16.mxu0 %v14353_v1  ;;  %689 = vmatprep.mubr.bf16.mxu1 %v14353_v1  ;;  %v147_v3 = vld [vmem:[#allocation3 + $0x40] sm:$0xff]  ;;  %v148_v6 = vld [vmem:[#allocation3 + $0x48] sm:$0xff]  ;;  %v141_v17 = vld [vmem:[#allocation3 + $0x10] sm:$0xff] }
  0x5e   :  { %11014 = vset.pattern.permute.xlu0 %v14353_v1  ;;  %v9303_v5 = vcombine.high %v139_v2, %v147_v3  ;;  %v9302_v7 = vcombine.low %v139_v2, %v147_v3  ;;  %v155_v8 = vld [vmem:[#allocation3 + $0x80] sm:$0xff]  ;;  %v9305_v10 = vcombine.high %v140_v4, %v148_v6  ;;  %v9304_v11 = vcombine.low %v140_v4, %v148_v6  ;;  %v156_v13 = vld [vmem:[#allocation3 + $0x88] sm:$0xff]  ;;  %v149_v18 = vld [vmem:[#allocation3 + $0x50] sm:$0xff] }
  0x5f   :  { %v163_v9 = vld [vmem:[#allocation3 + $0xc0] sm:$0xff]  ;;  %v164_v14 = vld [vmem:[#allocation3 + $0xc8] sm:$0xff]  ;;  %v142_v21 = vld [vmem:[#allocation3 + $0x18] sm:$0xff]  ;;  %v9307_v24 = vcombine.high %v141_v17, %v149_v18  ;;  %v9306_v27 = vcombine.low %v141_v17, %v149_v18 }
  0x60   :  { %v9319_v12 = vcombine.high %v155_v8, %v163_v9  ;;  %464 = vmatprep.subr.bf16.mxu0 %v9303_v5  ;;  %v9321_v15 = vcombine.high %v156_v13, %v164_v14  ;;  %v91_v16 = vld [vmem:[%s14340_s0] sm:$0xff]  ;;  %657 = vmatprep.subr.bf16.mxu1 %v9305_v10  ;;  %v9318_v19 = vcombine.low %v155_v8, %v163_v9  ;;  %v92_v20 = vld [vmem:[%s14340_s0 + $0x8] sm:$0xff]  ;;  %v157_v29 = vld [vmem:[#allocation3 + $0x90] sm:$0xff] }
  0x61   :  { %465 = vmatpush1.bf16.msra.mxu0 %v9302_v7  ;;  %v150_v22 = vld [vmem:[#allocation3 + $0x58] sm:$0xff]  ;;  %658 = vmatpush1.bf16.msra.mxu1 %v9304_v11  ;;  %v9320_v23 = vcombine.low %v156_v13, %v164_v14  ;;  %v12024_v26 = vpack.c.bf16 %v92_v20, %v91_v16  ;;  %v165_v30 = vld [vmem:[#allocation3 + $0xd0] sm:$0xff]  ;;  %v12040_v40 = vld [vmem:[#allocation3 + $0x20] sm:$0xff] }
  0x62   :  { %466 = vmatprep.subr.bf16.mxu0 %v9319_v12  ;;  %659 = vmatprep.subr.bf16.mxu1 %v9321_v15  ;;  %v9309_v25 = vcombine.high %v142_v21, %v150_v22  ;;  %v9308_v28 = vcombine.low %v142_v21, %v150_v22  ;;  %v158_v31 = vld [vmem:[#allocation3 + $0x98] sm:$0xff]  ;;  %v9323_v32 = vcombine.high %v157_v29, %v165_v30  ;;  %v93_v34 = vld [vmem:[%s14340_s0 + $0x10] sm:$0xff]  ;;  %v12042_v41 = vld [vmem:[#allocation3 + $0x60] sm:$0xff] }
  0x63   :  { %v166_v33 = vld [vmem:[#allocation3 + $0xd8] sm:$0xff]  ;;  %v9322_v36 = vcombine.low %v157_v29, %v165_v30  ;;  %v12044_v42 = vld [vmem:[#allocation3 + $0x28] sm:$0xff]  ;;  %v9310_v43 = vcombine.low %v12040_v40, %v12042_v41  ;;  %v9311_v44 = vcombine.high %v12040_v40, %v12042_v41  ;;  %v167_v29 = vld [vmem:[#allocation3 + $0xe0] sm:$0xff] }
  0x64   :  { %v94_v35 = vld [vmem:[%s14340_s0 + $0x18] sm:$0xff]  ;;  %v9325_v37 = vcombine.high %v158_v31, %v166_v33  ;;  %v9324_v38 = vcombine.low %v158_v31, %v166_v33  ;;  %v12050_v45 = vld [vmem:[#allocation3 + $0x68] sm:$0xff]  ;;  %v95_v46 = vld [vmem:[%s14340_s0 + $0x20] sm:$0xff] }
  0x65   :  { %467 = vmatpush1.bf16.msra.mxu0 %v9318_v19  ;;  %660 = vmatpush1.bf16.msra.mxu1 %v9320_v23  ;;  %v12038_v39 = vpack.c.bf16 %v94_v35, %v93_v34  ;;  %v96_v47 = vld [vmem:[%s14340_s0 + $0x28] sm:$0xff]  ;;  %v9312_v48 = vcombine.low %v12044_v42, %v12050_v45  ;;  %v9313_v49 = vcombine.high %v12044_v42, %v12050_v45  ;;  %v97_v51 = vld [vmem:[%s14340_s0 + $0x30] sm:$0xff]  ;;  %v98_v52 = vld [vmem:[%s14340_s0 + $0x38] sm:$0xff]  ;;  %v14348_v45 = vlaneseq }
  0x66   :  { %850 = vmatprep.subr.bf16.mxu0 %v9307_v24  ;;  %1043 = vmatprep.subr.bf16.mxu1 %v9309_v25  ;;  %v12068_v50 = vpack.c.bf16 %v96_v47, %v95_v46  ;;  %v12082_v53 = vpack.c.bf16 %v98_v52, %v97_v51  ;;  %v99_v54 = vld [vmem:[%s14340_s0 + $0x40] sm:$0xff]  ;;  %v100_v55 = vld [vmem:[%s14340_s0 + $0x48] sm:$0xff]  ;;  %v101_v57 = vld [vmem:[%s14340_s0 + $0x50] sm:$0xff] }
  0x67   :  { %v12096_v56 = vpack.c.bf16 %v100_v55, %v99_v54  ;;  %v102_v58 = vld [vmem:[%s14340_s0 + $0x58] sm:$0xff]  ;;  %v103_v60 = vld [vmem:[%s14340_s0 + $0x60] sm:$0xff]  ;;  %v104_v61 = vld [vmem:[%s14340_s0 + $0x68] sm:$0xff]  ;;  %v12337_v46 = vshrl.u32 %v14348_v45, 7 }
  0x68   :  { %9334 = vmatmul.mubr.msk.bf16.vlgmr.msra.gmra.mrb[0].mxu0 %vm415_vm0, %v12024_v26  ;;  %9350 = vmatmul.mubr.msk.bf16.vlgmr.msra.gmra.mrb[0].mxu1 %vm415_vm0, %v12024_v26  ;;  %v12110_v59 = vpack.c.bf16 %v102_v58, %v101_v57  ;;  %v12124_v62 = vpack.c.bf16 %v104_v61, %v103_v60  ;;  %v105_v63 = vld [vmem:[%s14340_s0 + $0x70] sm:$0xff]  ;;  %v106_v0 = vld [vmem:[%s14340_s0 + $0x78] sm:$0xff]  ;;  %v107_v3 = vld [vmem:[%s14340_s0 + $0x80] sm:$0xff] }
  0x69   :  { %851 = vmatpush1.bf16.msra.mxu0 %v9306_v27  ;;  %1044 = vmatpush1.bf16.msra.mxu1 %v9308_v28  ;;  %v12138_v2 = vpack.c.bf16 %v106_v0, %v105_v63  ;;  %v108_v4 = vld [vmem:[%s14340_s0 + $0x88] sm:$0xff]  ;;  %v109_v6 = vld [vmem:[%s14340_s0 + $0x90] sm:$0xff]  ;;  %v110_v7 = vld [vmem:[%s14340_s0 + $0x98] sm:$0xff]  ;;  %14554 = vst [vmem:[#allocation14_spill] sm:$0xff] %v12337_v46  ;;  %v12344_v47 = vsub.s32 0, %v12337_v46  ;;  %v12350_v51 = vsub.s32 1, %v12337_v46 }
  0x6a   :  { %506 = vmatprep.mubr.bf16.mxu0 %v14353_v1  ;;  %699 = vmatprep.mubr.bf16.mxu1 %v14353_v1  ;;  %v12152_v5 = vpack.c.bf16 %v108_v4, %v107_v3  ;;  %v12166_v8 = vpack.c.bf16 %v110_v7, %v109_v6  ;;  %v111_v9 = vld [vmem:[%s14340_s0 + $0xa0] sm:$0xff]  ;;  %v112_v10 = vld [vmem:[%s14340_s0 + $0xa8] sm:$0xff]  ;;  %v113_v12 = vld [vmem:[%s14340_s0 + $0xb0] sm:$0xff]  ;;  %v12353_v52 = vsub.s32 3, %v12337_v46 }
  0x6b   :  { %852 = vmatprep.subr.bf16.mxu0 %v9323_v32  ;;  %1045 = vmatprep.subr.bf16.mxu1 %v9325_v37  ;;  %v12180_v11 = vpack.c.bf16 %v112_v10, %v111_v9  ;;  %v114_v13 = vld [vmem:[%s14340_s0 + $0xb8] sm:$0xff]  ;;  %v115_v15 = vld [vmem:[%s14340_s0 + $0xc0] sm:$0xff]  ;;  %v116_v16 = vld [vmem:[%s14340_s0 + $0xc8] sm:$0xff]  ;;  %14555 = vst [vmem:[#allocation15_spill] sm:$0xff] %v12344_v47 }
  0x6c   :  { %v12194_v14 = vpack.c.bf16 %v114_v13, %v113_v12  ;;  %v12208_v17 = vpack.c.bf16 %v116_v16, %v115_v15  ;;  %v117_v18 = vld [vmem:[%s14340_s0 + $0xd0] sm:$0xff]  ;;  %v118_v19 = vld [vmem:[%s14340_s0 + $0xd8] sm:$0xff]  ;;  %v119_v21 = vld [vmem:[%s14340_s0 + $0xe0] sm:$0xff]  ;;  %14557 = vst [vmem:[#allocation17_spill] sm:$0xff] %v12350_v51 }
  0x6d   :  { %853 = vmatpush1.bf16.msra.mxu0 %v9322_v36  ;;  %1046 = vmatpush1.bf16.msra.mxu1 %v9324_v38  ;;  %v12222_v20 = vpack.c.bf16 %v118_v19, %v117_v18  ;;  %v120_v22 = vld [vmem:[%s14340_s0 + $0xe8] sm:$0xff]  ;;  %v121_v24 = vld [vmem:[%s14340_s0 + $0xf0] sm:$0xff]  ;;  %v122_v25 = vld [vmem:[%s14340_s0 + $0xf8] sm:$0xff]  ;;  %14558 = vst [vmem:[#allocation18_spill] sm:$0xff] %v12353_v52 }
  0x6e   :  { %1236 = vmatprep.subr.bf16.mxu0 %v9311_v44  ;;  %1429 = vmatprep.subr.bf16.mxu1 %v9313_v49  ;;  %v12236_v23 = vpack.c.bf16 %v120_v22, %v119_v21  ;;  %v12250_v27 = vpack.c.bf16 %v122_v25, %v121_v24  ;;  %v159_v28 = vld [vmem:[#allocation3 + $0xa0] sm:$0xff]  ;;  %v160_v30 = vld [vmem:[#allocation3 + $0xa8] sm:$0xff]  ;;  %v12265_v35 = vld [vmem:[#allocation3 + $0x30] sm:$0xff]  ;;  %v12347_v49 = vsub.s32 2, %v12337_v46 }
  0x6f   :  { %v168_v31 = vld [vmem:[#allocation3 + $0xe8] sm:$0xff]  ;;  %v9327_v32 = vcombine.high %v159_v28, %v167_v29  ;;  %v9326_v34 = vcombine.low %v159_v28, %v167_v29  ;;  %v12267_v36 = vld [vmem:[#allocation3 + $0x70] sm:$0xff]  ;;  %v12269_v37 = vld [vmem:[#allocation3 + $0x38] sm:$0xff] }
  0x70   :  { %9335 = vmatmul.mubr.msk.bf16.gmra.mrb[4].mxu0 %vm415_vm0, %v12038_v39  ;;  %9351 = vmatmul.mubr.msk.bf16.gmra.mrb[4].mxu1 %vm415_vm0, %v12038_v39  ;;  %v9329_v33 = vcombine.high %v160_v30, %v168_v31  ;;  %v9328_v38 = vcombine.low %v160_v30, %v168_v31  ;;  %v9315_v40 = vcombine.high %v12265_v35, %v12267_v36  ;;  %v12279_v41 = vld [vmem:[#allocation3 + $0x78] sm:$0xff] }
  0x71   :  { %516 = vmatprep.mubr.bf16.mxu0 %v14353_v1  ;;  %709 = vmatprep.mubr.bf16.mxu1 %v14353_v1  ;;  %v9317_v42 = vcombine.high %v12269_v37, %v12279_v41  ;;  %14556 = vst [vmem:[#allocation16_spill] sm:$0xff] %v12347_v49 }
  0x78   :  { %9336 = vmatmul.mubr.msk.bf16.gmra.mrb[8].mxu0 %vm415_vm0, %v12068_v50  ;;  %9352 = vmatmul.mubr.msk.bf16.gmra.mrb[8].mxu1 %vm415_vm0, %v12068_v50 }
  0x79   :  { %526 = vmatprep.mubr.bf16.mxu0 %v14353_v1  ;;  %719 = vmatprep.mubr.bf16.mxu1 %v14353_v1 }
  0x80   :  { %9337 = vmatmul.mubr.msk.bf16.gmra.mrb[12].mxu0 %vm415_vm0, %v12082_v53  ;;  %9353 = vmatmul.mubr.msk.bf16.gmra.mrb[12].mxu1 %vm415_vm0, %v12082_v53 }
  0x81   :  { %536 = vmatprep.mubr.bf16.mxu0 %v14353_v1  ;;  %729 = vmatprep.mubr.bf16.mxu1 %v14353_v1 }
  0x88   :  { %9338 = vmatmul.mubr.msk.bf16.gmra.mrb[16].mxu0 %vm415_vm0, %v12096_v56  ;;  %9354 = vmatmul.mubr.msk.bf16.gmra.mrb[16].mxu1 %vm415_vm0, %v12096_v56 }
  0x89   :  { %546 = vmatprep.mubr.bf16.mxu0 %v14353_v1  ;;  %739 = vmatprep.mubr.bf16.mxu1 %v14353_v1 }
  0x90   :  { %9339 = vmatmul.mubr.msk.bf16.gmra.mrb[20].mxu0 %vm415_vm0, %v12110_v59  ;;  %9355 = vmatmul.mubr.msk.bf16.gmra.mrb[20].mxu1 %vm415_vm0, %v12110_v59 }
  0x91   :  { %556 = vmatprep.mubr.bf16.mxu0 %v14353_v1  ;;  %749 = vmatprep.mubr.bf16.mxu1 %v14353_v1 }
  0x98   :  { %9340 = vmatmul.mubr.msk.bf16.gmra.mrb[24].mxu0 %vm415_vm0, %v12124_v62  ;;  %9356 = vmatmul.mubr.msk.bf16.gmra.mrb[24].mxu1 %vm415_vm0, %v12124_v62 }
  0x99   :  { %566 = vmatprep.mubr.bf16.mxu0 %v14353_v1  ;;  %759 = vmatprep.mubr.bf16.mxu1 %v14353_v1 }
  0xa0   :  { %9341 = vmatmul.mubr.msk.bf16.gmra.mrb[28].mxu0 %vm415_vm0, %v12138_v2  ;;  %9357 = vmatmul.mubr.msk.bf16.gmra.mrb[28].mxu1 %vm415_vm0, %v12138_v2 }
  0xa1   :  { %576 = vmatprep.mubr.bf16.mxu0 %v14353_v1  ;;  %769 = vmatprep.mubr.bf16.mxu1 %v14353_v1 }
  0xa8   :  { %9342 = vmatmul.mubr.msk.bf16.gmra.mrb[32].mxu0 %vm415_vm0, %v12152_v5  ;;  %9358 = vmatmul.mubr.msk.bf16.gmra.mrb[32].mxu1 %vm415_vm0, %v12152_v5 }
  0xa9   :  { %586 = vmatprep.mubr.bf16.mxu0 %v14353_v1  ;;  %779 = vmatprep.mubr.bf16.mxu1 %v14353_v1 }
  0xb0   :  { %9343 = vmatmul.mubr.msk.bf16.gmra.mrb[36].mxu0 %vm415_vm0, %v12166_v8  ;;  %9359 = vmatmul.mubr.msk.bf16.gmra.mrb[36].mxu1 %vm415_vm0, %v12166_v8 }
  0xb1   :  { %596 = vmatprep.mubr.bf16.mxu0 %v14353_v1  ;;  %789 = vmatprep.mubr.bf16.mxu1 %v14353_v1 }
  0xb8   :  { %9344 = vmatmul.mubr.msk.bf16.gmra.mrb[40].mxu0 %vm415_vm0, %v12180_v11  ;;  %9360 = vmatmul.mubr.msk.bf16.gmra.mrb[40].mxu1 %vm415_vm0, %v12180_v11 }
  0xb9   :  { %606 = vmatprep.mubr.bf16.mxu0 %v14353_v1  ;;  %799 = vmatprep.mubr.bf16.mxu1 %v14353_v1 }
  0xc0   :  { %9345 = vmatmul.mubr.msk.bf16.gmra.mrb[44].mxu0 %vm415_vm0, %v12194_v14  ;;  %9361 = vmatmul.mubr.msk.bf16.gmra.mrb[44].mxu1 %vm415_vm0, %v12194_v14 }
  0xc1   :  { %616 = vmatprep.mubr.bf16.mxu0 %v14353_v1  ;;  %809 = vmatprep.mubr.bf16.mxu1 %v14353_v1 }
  0xc8   :  { %9346 = vmatmul.mubr.msk.bf16.gmra.mrb[48].mxu0 %vm415_vm0, %v12208_v17  ;;  %9362 = vmatmul.mubr.msk.bf16.gmra.mrb[48].mxu1 %vm415_vm0, %v12208_v17 }
  0xc9   :  { %626 = vmatprep.mubr.bf16.mxu0 %v14353_v1  ;;  %819 = vmatprep.mubr.bf16.mxu1 %v14353_v1 }
  0xd0   :  { %9347 = vmatmul.mubr.msk.bf16.gmra.mrb[52].mxu0 %vm415_vm0, %v12222_v20  ;;  %9363 = vmatmul.mubr.msk.bf16.gmra.mrb[52].mxu1 %vm415_vm0, %v12222_v20 }
  0xd1   :  { %636 = vmatprep.mubr.bf16.mxu0 %v14353_v1  ;;  %829 = vmatprep.mubr.bf16.mxu1 %v14353_v1 }
  0xd8   :  { %9348 = vmatmul.mubr.msk.bf16.gmra.mrb[56].mxu0 %vm415_vm0, %v12236_v23  ;;  %9364 = vmatmul.mubr.msk.bf16.gmra.mrb[56].mxu1 %vm415_vm0, %v12236_v23 }
  0xd9   :  { %646 = vmatprep.mubr.bf16.mxu0 %v14353_v1  ;;  %839 = vmatprep.mubr.bf16.mxu1 %v14353_v1 }
  0xe0   :  { %9349 = vmatmul.mubr.msk.bf16.gmra.mrb[60].mxu0 %vm415_vm0, %v12250_v27  ;;  %9365 = vmatmul.mubr.msk.bf16.gmra.mrb[60].mxu1 %vm415_vm0, %v12250_v27 }
  0xe1   :  { %882 = vmatprep.mubr.bf16.mxu0 %v14353_v1  ;;  %1075 = vmatprep.mubr.bf16.mxu1 %v14353_v1 }
  0xe8   :  { %9366 = vmatmul.mubr.msk.bf16.vlgmr.msra.gmra.mrb[64].mxu0 %vm415_vm0, %v12024_v26  ;;  %9382 = vmatmul.mubr.msk.bf16.vlgmr.msra.gmra.mrb[64].mxu1 %vm415_vm0, %v12024_v26 }
  0xe9   :  { %1237 = vmatpush1.bf16.msra.mxu0 %v9310_v43  ;;  %1430 = vmatpush1.bf16.msra.mxu1 %v9312_v48  ;;  %v171_v48 = vld [vmem:[#allocation5] sm:$0xff] }
  0xea   :  { %892 = vmatprep.mubr.bf16.mxu0 %v14353_v1  ;;  %1085 = vmatprep.mubr.bf16.mxu1 %v14353_v1  ;;  %v12358_v54 = vrot.slane %v171_v48, %v12344_v47  ;;  %v12363_v55 = vrot.slane %v171_v48, %v12347_v49  ;;  %v12367_v57 = vrot.slane %v171_v48, %v12350_v51 }
  0xeb   :  { %1238 = vmatprep.subr.bf16.mxu0 %v9327_v32  ;;  %1431 = vmatprep.subr.bf16.mxu1 %v9329_v33  ;;  %v12371_v58 = vrot.slane %v171_v48, %v12353_v52 }
  0xed   :  { %1239 = vmatpush1.bf16.msra.mxu0 %v9326_v34  ;;  %1432 = vmatpush1.bf16.msra.mxu1 %v9328_v38 }
  0xee   :  { %1622 = vmatprep.subr.bf16.mxu0 %v9315_v40  ;;  %1815 = vmatprep.subr.bf16.mxu1 %v9317_v42 }
  0xf0   :  { %9367 = vmatmul.mubr.msk.bf16.gmra.mrb[68].mxu0 %vm415_vm0, %v12038_v39  ;;  %9383 = vmatmul.mubr.msk.bf16.gmra.mrb[68].mxu1 %vm415_vm0, %v12038_v39 }
  0xf1   :  { %902 = vmatprep.mubr.bf16.mxu0 %v14353_v1  ;;  %1095 = vmatprep.mubr.bf16.mxu1 %v14353_v1 }
  0xf8   :  { %9368 = vmatmul.mubr.msk.bf16.gmra.mrb[72].mxu0 %vm415_vm0, %v12068_v50  ;;  %9384 = vmatmul.mubr.msk.bf16.gmra.mrb[72].mxu1 %vm415_vm0, %v12068_v50 }
  0xf9   :  { %912 = vmatprep.mubr.bf16.mxu0 %v14353_v1  ;;  %1105 = vmatprep.mubr.bf16.mxu1 %v14353_v1 }
 0x100   :  { %9369 = vmatmul.mubr.msk.bf16.gmra.mrb[76].mxu0 %vm415_vm0, %v12082_v53  ;;  %9385 = vmatmul.mubr.msk.bf16.gmra.mrb[76].mxu1 %vm415_vm0, %v12082_v53 }
 0x101   :  { %922 = vmatprep.mubr.bf16.mxu0 %v14353_v1  ;;  %1115 = vmatprep.mubr.bf16.mxu1 %v14353_v1 }
 0x108   :  { %9370 = vmatmul.mubr.msk.bf16.gmra.mrb[80].mxu0 %vm415_vm0, %v12096_v56  ;;  %9386 = vmatmul.mubr.msk.bf16.gmra.mrb[80].mxu1 %vm415_vm0, %v12096_v56 }
 0x109   :  { %932 = vmatprep.mubr.bf16.mxu0 %v14353_v1  ;;  %1125 = vmatprep.mubr.bf16.mxu1 %v14353_v1 }
 0x110   :  { %9371 = vmatmul.mubr.msk.bf16.gmra.mrb[84].mxu0 %vm415_vm0, %v12110_v59  ;;  %9387 = vmatmul.mubr.msk.bf16.gmra.mrb[84].mxu1 %vm415_vm0, %v12110_v59 }
 0x111   :  { %942 = vmatprep.mubr.bf16.mxu0 %v14353_v1  ;;  %1135 = vmatprep.mubr.bf16.mxu1 %v14353_v1 }
 0x118   :  { %9372 = vmatmul.mubr.msk.bf16.gmra.mrb[88].mxu0 %vm415_vm0, %v12124_v62  ;;  %9388 = vmatmul.mubr.msk.bf16.gmra.mrb[88].mxu1 %vm415_vm0, %v12124_v62 }
 0x119   :  { %952 = vmatprep.mubr.bf16.mxu0 %v14353_v1  ;;  %1145 = vmatprep.mubr.bf16.mxu1 %v14353_v1 }
 0x120   :  { %9373 = vmatmul.mubr.msk.bf16.gmra.mrb[92].mxu0 %vm415_vm0, %v12138_v2  ;;  %9389 = vmatmul.mubr.msk.bf16.gmra.mrb[92].mxu1 %vm415_vm0, %v12138_v2 }
 0x121   :  { %962 = vmatprep.mubr.bf16.mxu0 %v14353_v1  ;;  %1155 = vmatprep.mubr.bf16.mxu1 %v14353_v1 }
 0x128   :  { %9374 = vmatmul.mubr.msk.bf16.gmra.mrb[96].mxu0 %vm415_vm0, %v12152_v5  ;;  %9390 = vmatmul.mubr.msk.bf16.gmra.mrb[96].mxu1 %vm415_vm0, %v12152_v5 }
 0x129   :  { %972 = vmatprep.mubr.bf16.mxu0 %v14353_v1  ;;  %1165 = vmatprep.mubr.bf16.mxu1 %v14353_v1 }
 0x130   :  { %9375 = vmatmul.mubr.msk.bf16.gmra.mrb[100].mxu0 %vm415_vm0, %v12166_v8  ;;  %9391 = vmatmul.mubr.msk.bf16.gmra.mrb[100].mxu1 %vm415_vm0, %v12166_v8 }
 0x131   :  { %982 = vmatprep.mubr.bf16.mxu0 %v14353_v1  ;;  %1175 = vmatprep.mubr.bf16.mxu1 %v14353_v1 }
 0x138   :  { %9376 = vmatmul.mubr.msk.bf16.gmra.mrb[104].mxu0 %vm415_vm0, %v12180_v11  ;;  %9392 = vmatmul.mubr.msk.bf16.gmra.mrb[104].mxu1 %vm415_vm0, %v12180_v11 }
 0x139   :  { %992 = vmatprep.mubr.bf16.mxu0 %v14353_v1  ;;  %1185 = vmatprep.mubr.bf16.mxu1 %v14353_v1 }
 0x13b   :  { %v498_v60 = vpop.f32.mrb[0].mxu0  ;;  %v691_v63 = vpop.f32.mrb[0].mxu1 }
 0x13c   :  { %v499_v61 = vadd.f32 %v498_v60, %v12358_v54  ;;  %v500_v0 = vpop.f32.mrb[1].mxu0  ;;  %v692_v3 = vadd.f32 %v691_v63, %v12363_v55  ;;  %v693_v4 = vpop.f32.mrb[1].mxu1 }
 0x13d   :  { %v502_v6 = vpop.f32.mrb[2].mxu0  ;;  %v501_v7 = vadd.f32 %v500_v0, %v12367_v57  ;;  %v695_v10 = vpop.f32.mrb[2].mxu1  ;;  %v694_v13 = vadd.f32 %v693_v4, %v12371_v58 }
 0x13e   :  { %v503_v9 = vadd.f32 %v502_v6, %v12358_v54  ;;  %v504_v12 = vpop.f32.mrb[3].mxu0  ;;  %v2010_v15 = vmax.f32 %v692_v3, 0.0  ;;  %v696_v16 = vadd.f32 %v695_v10, %v12363_v55  ;;  %v697_v18 = vpop.f32.mrb[3].mxu1  ;;  %v2008_v21 = vmax.f32 %v499_v61, 0.0 }
 0x13f   :  { %v505_v19 = vadd.f32 %v504_v12, %v12367_v57  ;;  %v698_v24 = vadd.f32 %v697_v18, %v12371_v58  ;;  %v2011_v25 = vmax.f32 %v694_v13, 0.0  ;;  %v2009_v29 = vmax.f32 %v501_v7, 0.0 }
 0x140   :  { %v2024_v22 = vmax.f32 %v503_v9, 0.0  ;;  %9377 = vmatmul.mubr.msk.bf16.gmra.mrb[108].mxu0 %vm415_vm0, %v12194_v14  ;;  %v2026_v28 = vmax.f32 %v696_v16, 0.0  ;;  %9393 = vmatmul.mubr.msk.bf16.gmra.mrb[108].mxu1 %vm415_vm0, %v12194_v14 }
 0x141   :  { %1002 = vmatprep.mubr.bf16.mxu0 %v14353_v1  ;;  %v2025_v30 = vmax.f32 %v505_v19, 0.0  ;;  %1195 = vmatprep.mubr.bf16.mxu1 %v14353_v1  ;;  %v2027_v32 = vmax.f32 %v698_v24, 0.0 }
 0x142   :  { %v12386_v31 = vpack.c.bf16 %v2024_v22, %v2008_v21  ;;  %v12389_v33 = vpack.c.bf16 %v2026_v28, %v2010_v15 }
 0x143   :  { %v508_v34 = vpop.f32.mrb[4].mxu0  ;;  %v12391_v38 = vpack.c.bf16 %v2025_v30, %v2009_v29  ;;  %v701_v40 = vpop.f32.mrb[4].mxu1  ;;  %v12394_v60 = vpack.c.bf16 %v2027_v32, %v2011_v25 }
 0x144   :  { %14559 = vst [vmem:[#allocation19_spill] sm:$0xff] %v12389_v33  ;;  %v510_v42 = vpop.f32.mrb[5].mxu0  ;;  %v509_v48 = vadd.f32 %v508_v34, %v12358_v54  ;;  %v703_v61 = vpop.f32.mrb[5].mxu1  ;;  %v702_v3 = vadd.f32 %v701_v40, %v12363_v55 }
 0x145   :  { %14560 = vst [vmem:[#allocation20_spill] sm:$0xff] %v12394_v60  ;;  %v512_v63 = vpop.f32.mrb[6].mxu0  ;;  %v511_v0 = vadd.f32 %v510_v42, %v12367_v57  ;;  %v705_v4 = vpop.f32.mrb[6].mxu1  ;;  %v704_v9 = vadd.f32 %v703_v61, %v12371_v58 }
 0x146   :  { %v514_v6 = vpop.f32.mrb[7].mxu0  ;;  %v513_v7 = vadd.f32 %v512_v63, %v12358_v54  ;;  %v707_v10 = vpop.f32.mrb[7].mxu1  ;;  %v706_v13 = vadd.f32 %v705_v4, %v12363_v55  ;;  %v2042_v15 = vmax.f32 %v702_v3, 0.0  ;;  %v2040_v16 = vmax.f32 %v509_v48, 0.0 }
 0x147   :  { %v515_v12 = vadd.f32 %v514_v6, %v12367_v57  ;;  %v708_v19 = vadd.f32 %v707_v10, %v12371_v58  ;;  %v2043_v21 = vmax.f32 %v704_v9, 0.0  ;;  %v2041_v22 = vmax.f32 %v511_v0, 0.0 }
 0x148   :  { %9378 = vmatmul.mubr.msk.bf16.gmra.mrb[112].mxu0 %vm415_vm0, %v12208_v17  ;;  %v2056_v18 = vmax.f32 %v513_v7, 0.0  ;;  %9394 = vmatmul.mubr.msk.bf16.gmra.mrb[112].mxu1 %vm415_vm0, %v12208_v17  ;;  %v2058_v25 = vmax.f32 %v706_v13, 0.0 }
 0x149   :  { %1012 = vmatprep.mubr.bf16.mxu0 %v14353_v1  ;;  %v2057_v24 = vmax.f32 %v515_v12, 0.0  ;;  %1205 = vmatprep.mubr.bf16.mxu1 %v14353_v1  ;;  %v2059_v29 = vmax.f32 %v708_v19, 0.0 }
 0x14a   :  { %v12409_v28 = vpack.c.bf16 %v2056_v18, %v2040_v16  ;;  %v12413_v34 = vpack.c.bf16 %v2058_v25, %v2042_v15 }
 0x14b   :  { %v518_v30 = vpop.f32.mrb[8].mxu0  ;;  %v12411_v32 = vpack.c.bf16 %v2057_v24, %v2041_v22  ;;  %v711_v40 = vpop.f32.mrb[8].mxu1  ;;  %v12416_v61 = vpack.c.bf16 %v2059_v29, %v2043_v21 }
 0x14c   :  { %14561 = vst [vmem:[#allocation21_spill] sm:$0xff] %v12413_v34  ;;  %v520_v42 = vpop.f32.mrb[9].mxu0  ;;  %v519_v48 = vadd.f32 %v518_v30, %v12358_v54  ;;  %v713_v63 = vpop.f32.mrb[9].mxu1  ;;  %v712_v4 = vadd.f32 %v711_v40, %v12363_v55 }
 0x14d   :  { %14562 = vst [vmem:[#allocation22_spill] sm:$0xff] %v12416_v61  ;;  %v522_v0 = vpop.f32.mrb[10].mxu0  ;;  %v521_v3 = vadd.f32 %v520_v42, %v12367_v57  ;;  %v715_v6 = vpop.f32.mrb[10].mxu1  ;;  %v714_v10 = vadd.f32 %v713_v63, %v12371_v58 }
 0x14e   :  { %v524_v7 = vpop.f32.mrb[11].mxu0  ;;  %v523_v9 = vadd.f32 %v522_v0, %v12358_v54  ;;  %v717_v12 = vpop.f32.mrb[11].mxu1  ;;  %v716_v15 = vadd.f32 %v715_v6, %v12363_v55  ;;  %v2074_v16 = vmax.f32 %v712_v4, 0.0  ;;  %v2072_v18 = vmax.f32 %v519_v48, 0.0 }
 0x14f   :  { %v525_v13 = vadd.f32 %v524_v7, %v12367_v57  ;;  %v718_v21 = vadd.f32 %v717_v12, %v12371_v58  ;;  %v2075_v22 = vmax.f32 %v714_v10, 0.0  ;;  %v2073_v24 = vmax.f32 %v521_v3, 0.0 }
 0x150   :  { %9379 = vmatmul.mubr.msk.bf16.gmra.mrb[116].mxu0 %vm415_vm0, %v12222_v20  ;;  %v2088_v19 = vmax.f32 %v523_v9, 0.0  ;;  %9395 = vmatmul.mubr.msk.bf16.gmra.mrb[116].mxu1 %vm415_vm0, %v12222_v20  ;;  %v2090_v29 = vmax.f32 %v716_v15, 0.0 }
 0x151   :  { %1022 = vmatprep.mubr.bf16.mxu0 %v14353_v1  ;;  %v2089_v25 = vmax.f32 %v525_v13, 0.0  ;;  %1215 = vmatprep.mubr.bf16.mxu1 %v14353_v1  ;;  %v2091_v40 = vmax.f32 %v718_v21, 0.0 }
 0x152   :  { %v12431_v30 = vpack.c.bf16 %v2088_v19, %v2072_v18  ;;  %v12435_v48 = vpack.c.bf16 %v2090_v29, %v2074_v16 }
 0x153   :  { %v528_v42 = vpop.f32.mrb[12].mxu0  ;;  %v12433_v63 = vpack.c.bf16 %v2089_v25, %v2073_v24  ;;  %v721_v0 = vpop.f32.mrb[12].mxu1  ;;  %v12438_v7 = vpack.c.bf16 %v2091_v40, %v2075_v22 }
 0x154   :  { %14563 = vst [vmem:[#allocation23_spill] sm:$0xff] %v12435_v48  ;;  %v530_v4 = vpop.f32.mrb[13].mxu0  ;;  %v529_v6 = vadd.f32 %v528_v42, %v12358_v54  ;;  %v723_v9 = vpop.f32.mrb[13].mxu1  ;;  %v722_v12 = vadd.f32 %v721_v0, %v12363_v55  ;;  %v162_v48 = vld [vmem:[#allocation3 + $0xb8] sm:$0xff] }
 0x155   :  { %14564 = vst [vmem:[#allocation24_spill] sm:$0xff] %v12438_v7  ;;  %v532_v3 = vpop.f32.mrb[14].mxu0  ;;  %v531_v10 = vadd.f32 %v530_v4, %v12367_v57  ;;  %v725_v13 = vpop.f32.mrb[14].mxu1  ;;  %v724_v19 = vadd.f32 %v723_v9, %v12371_v58  ;;  %v170_v7 = vld [vmem:[#allocation3 + $0xf8] sm:$0xff] }
 0x156   :  { %v534_v15 = vpop.f32.mrb[15].mxu0  ;;  %v533_v18 = vadd.f32 %v532_v3, %v12358_v54  ;;  %v727_v16 = vpop.f32.mrb[15].mxu1  ;;  %v726_v24 = vadd.f32 %v725_v13, %v12363_v55  ;;  %v2106_v25 = vmax.f32 %v722_v12, 0.0  ;;  %v2104_v22 = vmax.f32 %v529_v6, 0.0 }
 0x157   :  { %v535_v21 = vadd.f32 %v534_v15, %v12367_v57  ;;  %v728_v40 = vadd.f32 %v727_v16, %v12371_v58  ;;  %v2107_v42 = vmax.f32 %v724_v19, 0.0  ;;  %v2105_v0 = vmax.f32 %v531_v10, 0.0 }
 0x158   :  { %9380 = vmatmul.mubr.msk.bf16.gmra.mrb[120].mxu0 %vm415_vm0, %v12236_v23  ;;  %v2120_v29 = vmax.f32 %v533_v18, 0.0  ;;  %9396 = vmatmul.mubr.msk.bf16.gmra.mrb[120].mxu1 %vm415_vm0, %v12236_v23  ;;  %v2122_v9 = vmax.f32 %v726_v24, 0.0 }
 0x159   :  { %1032 = vmatprep.mubr.bf16.mxu0 %v14353_v1  ;;  %v2121_v4 = vmax.f32 %v535_v21, 0.0  ;;  %1225 = vmatprep.mubr.bf16.mxu1 %v14353_v1  ;;  %v2123_v12 = vmax.f32 %v728_v40, 0.0 }
 0x15a   :  { %v12453_v3 = vpack.c.bf16 %v2120_v29, %v2104_v22  ;;  %v12457_v6 = vpack.c.bf16 %v2122_v9, %v2106_v25 }
 0x15b   :  { %v538_v13 = vpop.f32.mrb[16].mxu0  ;;  %v12455_v15 = vpack.c.bf16 %v2121_v4, %v2105_v0  ;;  %v731_v18 = vpop.f32.mrb[16].mxu1  ;;  %v12460_v45 = vpack.c.bf16 %v2123_v12, %v2107_v42 }
 0x15c   :  { %14565 = vst [vmem:[#allocation25_spill] sm:$0xff] %v12457_v6  ;;  %v540_v19 = vpop.f32.mrb[17].mxu0  ;;  %v539_v16 = vadd.f32 %v538_v13, %v12358_v54  ;;  %v733_v43 = vpop.f32.mrb[17].mxu1  ;;  %v732_v24 = vadd.f32 %v731_v18, %v12363_v55  ;;  %v161_v6 = vld [vmem:[#allocation3 + $0xb0] sm:$0xff] }
 0x15d   :  { %14566 = vst [vmem:[#allocation26_spill] sm:$0xff] %v12460_v45  ;;  %v542_v10 = vpop.f32.mrb[18].mxu0  ;;  %v541_v21 = vadd.f32 %v540_v19, %v12367_v57  ;;  %v735_v22 = vpop.f32.mrb[18].mxu1  ;;  %v734_v0 = vadd.f32 %v733_v43, %v12371_v58 }
 0x15e   :  { %v544_v29 = vpop.f32.mrb[19].mxu0  ;;  %v543_v40 = vadd.f32 %v542_v10, %v12358_v54  ;;  %v737_v25 = vpop.f32.mrb[19].mxu1  ;;  %v736_v9 = vadd.f32 %v735_v22, %v12363_v55  ;;  %v2138_v13 = vmax.f32 %v732_v24, 0.0  ;;  %v2136_v42 = vmax.f32 %v539_v16, 0.0  ;;  %v169_v16 = vld [vmem:[#allocation3 + $0xf0] sm:$0xff] }
 0x15f   :  { %v545_v4 = vadd.f32 %v544_v29, %v12367_v57  ;;  %v738_v19 = vadd.f32 %v737_v25, %v12371_v58  ;;  %v2139_v18 = vmax.f32 %v734_v0, 0.0  ;;  %v2137_v43 = vmax.f32 %v541_v21, 0.0 }
 0x160   :  { %9381 = vmatmul.mubr.msk.bf16.gmra.mrb[124].mxu0 %vm415_vm0, %v12250_v27  ;;  %v2152_v12 = vmax.f32 %v543_v40, 0.0  ;;  %9397 = vmatmul.mubr.msk.bf16.gmra.mrb[124].mxu1 %vm415_vm0, %v12250_v27  ;;  %v2154_v44 = vmax.f32 %v736_v9, 0.0 }
 0x161   :  { %1268 = vmatprep.mubr.bf16.mxu0 %v14353_v1  ;;  %v2153_v10 = vmax.f32 %v545_v4, 0.0  ;;  %1461 = vmatprep.mubr.bf16.mxu1 %v14353_v1  ;;  %v2155_v24 = vmax.f32 %v738_v19, 0.0 }
 0x162   :  { %v12475_v22 = vpack.c.bf16 %v2152_v12, %v2136_v42  ;;  %v12479_v25 = vpack.c.bf16 %v2154_v44, %v2138_v13 }
 0x163   :  { %v548_v29 = vpop.f32.mrb[20].mxu0  ;;  %v12477_v40 = vpack.c.bf16 %v2153_v10, %v2137_v43  ;;  %v741_v0 = vpop.f32.mrb[20].mxu1  ;;  %v12482_v4 = vpack.c.bf16 %v2155_v24, %v2139_v18  ;;  %v9331_v43 = vcombine.high %v161_v6, %v169_v16 }
 0x164   :  { %14567 = vst [vmem:[#allocation27_spill] sm:$0xff] %v12479_v25  ;;  %v550_v45 = vpop.f32.mrb[21].mxu0  ;;  %v549_v21 = vadd.f32 %v548_v29, %v12358_v54  ;;  %v743_v9 = vpop.f32.mrb[21].mxu1  ;;  %v742_v12 = vadd.f32 %v741_v0, %v12363_v55  ;;  %v9333_v25 = vcombine.high %v162_v48, %v170_v7 }
 0x165   :  { %14568 = vst [vmem:[#allocation28_spill] sm:$0xff] %v12482_v4  ;;  %v552_v1 = vpop.f32.mrb[22].mxu0  ;;  %v551_v42 = vadd.f32 %v550_v45, %v12367_v57  ;;  %v745_v19 = vpop.f32.mrb[22].mxu1  ;;  %v744_v13 = vadd.f32 %v743_v9, %v12371_v58  ;;  %v9330_v9 = vcombine.low %v161_v6, %v169_v16  ;;  %v11017_v16 = vld [vmem:[#allocation7 + $0x4] ss:$16 sps:$4 sm:$0xff]  }
 0x166   :  { %v554_v34 = vpop.f32.mrb[23].mxu0  ;;  %v553_v44 = vadd.f32 %v552_v1, %v12358_v54  ;;  %v747_v10 = vpop.f32.mrb[23].mxu1  ;;  %v746_v18 = vadd.f32 %v745_v19, %v12363_v55  ;;  %v2170_v24 = vmax.f32 %v742_v12, 0.0  ;;  %v2168_v45 = vmax.f32 %v549_v21, 0.0 }
 0x167   :  { %v555_v61 = vadd.f32 %v554_v34, %v12367_v57  ;;  %v748_v0 = vadd.f32 %v747_v10, %v12371_v58  ;;  %v2171_v4 = vmax.f32 %v744_v13, 0.0  ;;  %v14569_v1 = vcombine.low %v12265_v35, %v12267_v36 }
 0x168   :  { %9398 = vmatmul.mubr.msk.bf16.vlgmr.msra.gmra.mrb[128].mxu0 %vm415_vm0, %v12024_v26  ;;  %v2184_v29 = vmax.f32 %v553_v44, 0.0  ;;  %9414 = vmatmul.mubr.msk.bf16.vlgmr.msra.gmra.mrb[128].mxu1 %vm415_vm0, %v12024_v26  ;;  %v2169_v34 = vmax.f32 %v551_v42, 0.0  ;;  %v2186_v19 = vmax.f32 %v746_v18, 0.0  ;;  %v14570_v12 = vcombine.low %v12269_v37, %v12279_v41  ;;  %v11020_v42 = vld [vmem:[#allocation7 + $0xc] ss:$16 sps:$4 sm:$0xff]  }
 0x169   :  { %1623 = vmatpush1.bf16.msra.mxu0 %v14569_v1  ;;  %v2185_v33 = vmax.f32 %v555_v61, 0.0  ;;  %v14571_v21 = vmov 0   ;;  %v9332_v44 = vcombine.low %v162_v48, %v170_v7  ;;  %v2187_v13 = vmax.f32 %v748_v0, 0.0 }
 0x16a   :  { %1816 = vmatpush1.bf16.msra.mxu1 %v14570_v12  ;;  %1278 = vmatprep.mubr.bf16.mxu0 %v14571_v21  ;;  %v12502_v10 = vpack.c.bf16 %v2184_v29, %v2168_v45  ;;  %v12507_v36 = vpack.c.bf16 %v2186_v19, %v2170_v24 }
 0x16b   :  { %v558_v60 = vpop.f32.mrb[24].mxu0  ;;  %1471 = vmatprep.mubr.bf16.mxu1 %v14571_v21  ;;  %1624 = vmatprep.subr.bf16.mxu0 %v9331_v43  ;;  %v12505_v35 = vpack.c.bf16 %v2185_v33, %v2169_v34  ;;  %v751_v61 = vpop.f32.mrb[24].mxu1  ;;  %v12510_v41 = vpack.c.bf16 %v2187_v13, %v2171_v4 }
 0x16c   :  { %14572 = vst [vmem:[#allocation29_spill] sm:$0xff] %v12507_v36  ;;  %v560_v6 = vpop.f32.mrb[25].mxu0  ;;  %1817 = vmatprep.subr.bf16.mxu1 %v9333_v25  ;;  %v559_v37 = vadd.f32 %v558_v60, %v12358_v54  ;;  %v753_v48 = vpop.f32.mrb[25].mxu1  ;;  %v752_v43 = vadd.f32 %v751_v61, %v12363_v55 }
 0x16d   :  { %14573 = vst [vmem:[#allocation30_spill] sm:$0xff] %v12510_v41  ;;  %v562_v7 = vpop.f32.mrb[26].mxu0  ;;  %1625 = vmatpush1.bf16.msra.mxu0 %v9330_v9  ;;  %v561_v18 = vadd.f32 %v560_v6, %v12367_v57  ;;  %v755_v33 = vpop.f32.mrb[26].mxu1  ;;  %v754_v25 = vadd.f32 %v753_v48, %v12371_v58 }
 0x16e   :  { %v564_v45 = vpop.f32.mrb[27].mxu0  ;;  %1818 = vmatpush1.bf16.msra.mxu1 %v9332_v44  ;;  %5870 = vmatprep.subr.bf16.mxu0 %v11017_v16  ;;  %v563_v24 = vadd.f32 %v562_v7, %v12358_v54  ;;  %v757_v29 = vpop.f32.mrb[27].mxu1  ;;  %v756_v4 = vadd.f32 %v755_v33, %v12363_v55  ;;  %v2202_v0 = vmax.f32 %v752_v43, 0.0  ;;  %v2200_v1 = vmax.f32 %v559_v37, 0.0 }
 0x16f   :  { %7414 = vmatprep.subr.bf16.mxu1 %v11020_v42  ;;  %v565_v60 = vadd.f32 %v564_v45, %v12367_v57  ;;  %v758_v34 = vadd.f32 %v757_v29, %v12371_v58  ;;  %v2203_v19 = vmax.f32 %v754_v25, 0.0  ;;  %v2201_v12 = vmax.f32 %v561_v18, 0.0 }
 0x170   :  { %9399 = vmatmul.mubr.msk.bf16.gmra.mrb[132].mxu0 %vm415_vm0, %v12038_v39  ;;  %v2216_v9 = vmax.f32 %v563_v24, 0.0  ;;  %9415 = vmatmul.mubr.msk.bf16.gmra.mrb[132].mxu1 %vm415_vm0, %v12038_v39  ;;  %v2218_v13 = vmax.f32 %v756_v4, 0.0 }
 0x171   :  { %1288 = vmatprep.mubr.bf16.mxu0 %v14571_v21  ;;  %v2217_v44 = vmax.f32 %v565_v60, 0.0  ;;  %1481 = vmatprep.mubr.bf16.mxu1 %v14571_v21  ;;  %v2219_v6 = vmax.f32 %v758_v34, 0.0 }
 0x172   :  { %v12525_v61 = vpack.c.bf16 %v2216_v9, %v2200_v1  ;;  %v12529_v37 = vpack.c.bf16 %v2218_v13, %v2202_v0 }
 0x173   :  { %v568_v16 = vpop.f32.mrb[28].mxu0  ;;  %v12527_v48 = vpack.c.bf16 %v2217_v44, %v2201_v12  ;;  %v761_v7 = vpop.f32.mrb[28].mxu1  ;;  %v12532_v33 = vpack.c.bf16 %v2219_v6, %v2203_v19 }
 0x174   :  { %14574 = vst [vmem:[#allocation31_spill] sm:$0xff] %v12529_v37  ;;  %v570_v42 = vpop.f32.mrb[29].mxu0  ;;  %v569_v43 = vadd.f32 %v568_v16, %v12358_v54  ;;  %v763_v45 = vpop.f32.mrb[29].mxu1  ;;  %v762_v25 = vadd.f32 %v761_v7, %v12363_v55 }
 0x175   :  { %14575 = vst [vmem:[#allocation32_spill] sm:$0xff] %v12532_v33  ;;  %v572_v18 = vpop.f32.mrb[30].mxu0  ;;  %v571_v24 = vadd.f32 %v570_v42, %v12367_v57  ;;  %v765_v29 = vpop.f32.mrb[30].mxu1  ;;  %v764_v1 = vadd.f32 %v763_v45, %v12371_v58 }
 0x176   :  { %v574_v60 = vpop.f32.mrb[31].mxu0  ;;  %v573_v4 = vadd.f32 %v572_v18, %v12358_v54  ;;  %v767_v0 = vpop.f32.mrb[31].mxu1  ;;  %v766_v34 = vadd.f32 %v765_v29, %v12363_v55  ;;  %v2234_v12 = vmax.f32 %v762_v25, 0.0  ;;  %v2232_v19 = vmax.f32 %v569_v43, 0.0 }
 0x177   :  { %v575_v9 = vadd.f32 %v574_v60, %v12367_v57  ;;  %v768_v13 = vadd.f32 %v767_v0, %v12371_v58  ;;  %v2235_v6 = vmax.f32 %v764_v1, 0.0  ;;  %v2233_v16 = vmax.f32 %v571_v24, 0.0 }
 0x178   :  { %9400 = vmatmul.mubr.msk.bf16.gmra.mrb[136].mxu0 %vm415_vm0, %v12068_v50  ;;  %v2248_v44 = vmax.f32 %v573_v4, 0.0  ;;  %9416 = vmatmul.mubr.msk.bf16.gmra.mrb[136].mxu1 %vm415_vm0, %v12068_v50  ;;  %v2250_v42 = vmax.f32 %v766_v34, 0.0 }
 0x179   :  { %1298 = vmatprep.mubr.bf16.mxu0 %v14571_v21  ;;  %v2249_v7 = vmax.f32 %v575_v9, 0.0  ;;  %1491 = vmatprep.mubr.bf16.mxu1 %v14571_v21  ;;  %v2251_v18 = vmax.f32 %v768_v13, 0.0 }
 0x17a   :  { %v12547_v45 = vpack.c.bf16 %v2248_v44, %v2232_v19  ;;  %v12551_v43 = vpack.c.bf16 %v2250_v42, %v2234_v12 }
 0x17b   :  { %v578_v25 = vpop.f32.mrb[32].mxu0  ;;  %v12549_v29 = vpack.c.bf16 %v2249_v7, %v2233_v16  ;;  %v771_v60 = vpop.f32.mrb[32].mxu1  ;;  %v12554_v0 = vpack.c.bf16 %v2251_v18, %v2235_v6 }
 0x17c   :  { %14576 = vst [vmem:[#allocation33_spill] sm:$0xff] %v12551_v43  ;;  %v580_v4 = vpop.f32.mrb[33].mxu0  ;;  %v579_v1 = vadd.f32 %v578_v25, %v12358_v54  ;;  %v773_v37 = vpop.f32.mrb[33].mxu1  ;;  %v772_v34 = vadd.f32 %v771_v60, %v12363_v55 }
 0x17d   :  { %14577 = vst [vmem:[#allocation34_spill] sm:$0xff] %v12554_v0  ;;  %v582_v24 = vpop.f32.mrb[34].mxu0  ;;  %v581_v9 = vadd.f32 %v580_v4, %v12367_v57  ;;  %v775_v19 = vpop.f32.mrb[34].mxu1  ;;  %v774_v16 = vadd.f32 %v773_v37, %v12371_v58 }
 0x17e   :  { %v584_v44 = vpop.f32.mrb[35].mxu0  ;;  %v583_v13 = vadd.f32 %v582_v24, %v12358_v54  ;;  %v777_v12 = vpop.f32.mrb[35].mxu1  ;;  %v776_v42 = vadd.f32 %v775_v19, %v12363_v55  ;;  %v2266_v25 = vmax.f32 %v772_v34, 0.0  ;;  %v2264_v6 = vmax.f32 %v579_v1, 0.0 }
 0x17f   :  { %v585_v7 = vadd.f32 %v584_v44, %v12367_v57  ;;  %v778_v4 = vadd.f32 %v777_v12, %v12371_v58  ;;  %v2267_v60 = vmax.f32 %v774_v16, 0.0  ;;  %v2265_v37 = vmax.f32 %v581_v9, 0.0 }
 0x180   :  { %9401 = vmatmul.mubr.msk.bf16.gmra.mrb[140].mxu0 %vm415_vm0, %v12082_v53  ;;  %v2280_v18 = vmax.f32 %v583_v13, 0.0  ;;  %9417 = vmatmul.mubr.msk.bf16.gmra.mrb[140].mxu1 %vm415_vm0, %v12082_v53  ;;  %v2282_v43 = vmax.f32 %v776_v42, 0.0 }
 0x181   :  { %1308 = vmatprep.mubr.bf16.mxu0 %v14571_v21  ;;  %v2281_v24 = vmax.f32 %v585_v7, 0.0  ;;  %1501 = vmatprep.mubr.bf16.mxu1 %v14571_v21  ;;  %v2283_v34 = vmax.f32 %v778_v4, 0.0 }
 0x182   :  { %v12569_v19 = vpack.c.bf16 %v2280_v18, %v2264_v6  ;;  %v12573_v1 = vpack.c.bf16 %v2282_v43, %v2266_v25 }
 0x183   :  { %v588_v44 = vpop.f32.mrb[36].mxu0  ;;  %v12571_v0 = vpack.c.bf16 %v2281_v24, %v2265_v37  ;;  %v781_v13 = vpop.f32.mrb[36].mxu1  ;;  %v12576_v33 = vpack.c.bf16 %v2283_v34, %v2267_v60 }
 0x184   :  { %14578 = vst [vmem:[#allocation35_spill] sm:$0xff] %v12569_v19  ;;  %14579 = vst [vmem:[#allocation36_spill] sm:$0xff] %v12573_v1  ;;  %v590_v16 = vpop.f32.mrb[37].mxu0  ;;  %v589_v12 = vadd.f32 %v588_v44, %v12358_v54  ;;  %v783_v36 = vpop.f32.mrb[37].mxu1  ;;  %v782_v42 = vadd.f32 %v781_v13, %v12363_v55 }
 0x185   :  { %14580 = vst [vmem:[#allocation37_spill] sm:$0xff] %v12576_v33  ;;  %v592_v9 = vpop.f32.mrb[38].mxu0  ;;  %v591_v7 = vadd.f32 %v590_v16, %v12367_v57  ;;  %v785_v6 = vpop.f32.mrb[38].mxu1  ;;  %v784_v37 = vadd.f32 %v783_v36, %v12371_v58 }
 0x186   :  { %v594_v18 = vpop.f32.mrb[39].mxu0  ;;  %v593_v4 = vadd.f32 %v592_v9, %v12358_v54  ;;  %v787_v43 = vpop.f32.mrb[39].mxu1  ;;  %v786_v24 = vadd.f32 %v785_v6, %v12363_v55  ;;  %v2298_v44 = vmax.f32 %v782_v42, 0.0  ;;  %v2296_v60 = vmax.f32 %v589_v12, 0.0 }
 0x187   :  { %v595_v25 = vadd.f32 %v594_v18, %v12367_v57  ;;  %v788_v16 = vadd.f32 %v787_v43, %v12371_v58  ;;  %v2299_v13 = vmax.f32 %v784_v37, 0.0  ;;  %v2297_v36 = vmax.f32 %v591_v7, 0.0 }
 0x188   :  { %9402 = vmatmul.mubr.msk.bf16.gmra.mrb[144].mxu0 %vm415_vm0, %v12096_v56  ;;  %v2312_v34 = vmax.f32 %v593_v4, 0.0  ;;  %9418 = vmatmul.mubr.msk.bf16.gmra.mrb[144].mxu1 %vm415_vm0, %v12096_v56  ;;  %v2314_v1 = vmax.f32 %v786_v24, 0.0 }
 0x189   :  { %1318 = vmatprep.mubr.bf16.mxu0 %v14571_v21  ;;  %v2313_v9 = vmax.f32 %v595_v25, 0.0  ;;  %1511 = vmatprep.mubr.bf16.mxu1 %v14571_v21  ;;  %v2315_v42 = vmax.f32 %v788_v16, 0.0 }
 0x18a   :  { %v12591_v6 = vpack.c.bf16 %v2312_v34, %v2296_v60  ;;  %v12595_v12 = vpack.c.bf16 %v2314_v1, %v2298_v44 }
 0x18b   :  { %v598_v18 = vpop.f32.mrb[40].mxu0  ;;  %v12593_v33 = vpack.c.bf16 %v2313_v9, %v2297_v36  ;;  %v791_v4 = vpop.f32.mrb[40].mxu1  ;;  %v12598_v41 = vpack.c.bf16 %v2315_v42, %v2299_v13 }
 0x18c   :  { %14581 = vst [vmem:[#allocation38_spill] sm:$0xff] %v12591_v6  ;;  %14583 = vst [vmem:[#allocation40_spill] sm:$0xff] %v12595_v12  ;;  %v600_v37 = vpop.f32.mrb[41].mxu0  ;;  %v599_v43 = vadd.f32 %v598_v18, %v12358_v54  ;;  %v793_v19 = vpop.f32.mrb[41].mxu1  ;;  %v792_v24 = vadd.f32 %v791_v4, %v12363_v55 }
 0x18d   :  { %14582 = vst [vmem:[#allocation39_spill] sm:$0xff] %v12593_v33  ;;  %14584 = vst [vmem:[#allocation41_spill] sm:$0xff] %v12598_v41  ;;  %v602_v7 = vpop.f32.mrb[42].mxu0  ;;  %v601_v25 = vadd.f32 %v600_v37, %v12367_v57  ;;  %v795_v60 = vpop.f32.mrb[42].mxu1  ;;  %v794_v36 = vadd.f32 %v793_v19, %v12371_v58 }
 0x18e   :  { %v604_v34 = vpop.f32.mrb[43].mxu0  ;;  %v603_v16 = vadd.f32 %v602_v7, %v12358_v54  ;;  %v797_v1 = vpop.f32.mrb[43].mxu1  ;;  %v796_v9 = vadd.f32 %v795_v60, %v12363_v55  ;;  %v2330_v18 = vmax.f32 %v792_v24, 0.0  ;;  %v2328_v13 = vmax.f32 %v599_v43, 0.0 }
 0x18f   :  { %v605_v44 = vadd.f32 %v604_v34, %v12367_v57  ;;  %v798_v37 = vadd.f32 %v797_v1, %v12371_v58  ;;  %v2331_v4 = vmax.f32 %v794_v36, 0.0  ;;  %v2329_v19 = vmax.f32 %v601_v25, 0.0 }
 0x190   :  { %9403 = vmatmul.mubr.msk.bf16.gmra.mrb[148].mxu0 %vm415_vm0, %v12110_v59  ;;  %v2344_v42 = vmax.f32 %v603_v16, 0.0  ;;  %9419 = vmatmul.mubr.msk.bf16.gmra.mrb[148].mxu1 %vm415_vm0, %v12110_v59  ;;  %v2346_v12 = vmax.f32 %v796_v9, 0.0 }
 0x191   :  { %1328 = vmatprep.mubr.bf16.mxu0 %v14571_v21  ;;  %v2345_v7 = vmax.f32 %v605_v44, 0.0  ;;  %1521 = vmatprep.mubr.bf16.mxu1 %v14571_v21  ;;  %v2347_v24 = vmax.f32 %v798_v37, 0.0 }
 0x192   :  { %v12613_v60 = vpack.c.bf16 %v2344_v42, %v2328_v13  ;;  %v12617_v43 = vpack.c.bf16 %v2346_v12, %v2330_v18 }
 0x193   :  { %v608_v34 = vpop.f32.mrb[44].mxu0  ;;  %v12615_v41 = vpack.c.bf16 %v2345_v7, %v2329_v19  ;;  %v801_v16 = vpop.f32.mrb[44].mxu1  ;;  %v12620_v6 = vpack.c.bf16 %v2347_v24, %v2331_v4 }
 0x194   :  { %14585 = vst [vmem:[#allocation42_spill] sm:$0xff] %v12613_v60  ;;  %14587 = vst [vmem:[#allocation44_spill] sm:$0xff] %v12617_v43  ;;  %v610_v36 = vpop.f32.mrb[45].mxu0  ;;  %v609_v1 = vadd.f32 %v608_v34, %v12358_v54  ;;  %v803_v33 = vpop.f32.mrb[45].mxu1  ;;  %v802_v9 = vadd.f32 %v801_v16, %v12363_v55 }
 0x195   :  { %14586 = vst [vmem:[#allocation43_spill] sm:$0xff] %v12615_v41  ;;  %14588 = vst [vmem:[#allocation45_spill] sm:$0xff] %v12620_v6  ;;  %v612_v25 = vpop.f32.mrb[46].mxu0  ;;  %v611_v44 = vadd.f32 %v610_v36, %v12367_v57  ;;  %v805_v13 = vpop.f32.mrb[46].mxu1  ;;  %v804_v19 = vadd.f32 %v803_v33, %v12371_v58 }
 0x196   :  { %v614_v42 = vpop.f32.mrb[47].mxu0  ;;  %v613_v37 = vadd.f32 %v612_v25, %v12358_v54  ;;  %v807_v12 = vpop.f32.mrb[47].mxu1  ;;  %v806_v7 = vadd.f32 %v805_v13, %v12363_v55  ;;  %v2362_v34 = vmax.f32 %v802_v9, 0.0  ;;  %v2360_v4 = vmax.f32 %v609_v1, 0.0 }
 0x197   :  { %v615_v18 = vadd.f32 %v614_v42, %v12367_v57  ;;  %v808_v36 = vadd.f32 %v807_v12, %v12371_v58  ;;  %v2363_v16 = vmax.f32 %v804_v19, 0.0  ;;  %v2361_v33 = vmax.f32 %v611_v44, 0.0 }
 0x198   :  { %9404 = vmatmul.mubr.msk.bf16.gmra.mrb[152].mxu0 %vm415_vm0, %v12124_v62  ;;  %v2376_v24 = vmax.f32 %v613_v37, 0.0  ;;  %9420 = vmatmul.mubr.msk.bf16.gmra.mrb[152].mxu1 %vm415_vm0, %v12124_v62  ;;  %v2378_v43 = vmax.f32 %v806_v7, 0.0 }
 0x199   :  { %1338 = vmatprep.mubr.bf16.mxu0 %v14571_v21  ;;  %v2377_v25 = vmax.f32 %v615_v18, 0.0  ;;  %1531 = vmatprep.mubr.bf16.mxu1 %v14571_v21  ;;  %v2379_v9 = vmax.f32 %v808_v36, 0.0 }
 0x19a   :  { %v12635_v13 = vpack.c.bf16 %v2376_v24, %v2360_v4  ;;  %v12639_v1 = vpack.c.bf16 %v2378_v43, %v2362_v34 }
 0x19b   :  { %v618_v42 = vpop.f32.mrb[48].mxu0  ;;  %v12637_v6 = vpack.c.bf16 %v2377_v25, %v2361_v33  ;;  %v811_v37 = vpop.f32.mrb[48].mxu1  ;;  %v12642_v60 = vpack.c.bf16 %v2379_v9, %v2363_v16 }
 0x19c   :  { %14589 = vst [vmem:[#allocation46_spill] sm:$0xff] %v12635_v13  ;;  %14591 = vst [vmem:[#allocation48_spill] sm:$0xff] %v12639_v1  ;;  %v620_v19 = vpop.f32.mrb[49].mxu0  ;;  %v619_v12 = vadd.f32 %v618_v42, %v12358_v54  ;;  %v813_v41 = vpop.f32.mrb[49].mxu1  ;;  %v812_v7 = vadd.f32 %v811_v37, %v12363_v55 }
 0x19d   :  { %14590 = vst [vmem:[#allocation47_spill] sm:$0xff] %v12637_v6  ;;  %14592 = vst [vmem:[#allocation49_spill] sm:$0xff] %v12642_v60  ;;  %v622_v44 = vpop.f32.mrb[50].mxu0  ;;  %v621_v18 = vadd.f32 %v620_v19, %v12367_v57  ;;  %v815_v4 = vpop.f32.mrb[50].mxu1  ;;  %v814_v33 = vadd.f32 %v813_v41, %v12371_v58 }
 0x19e   :  { %v624_v24 = vpop.f32.mrb[51].mxu0  ;;  %v623_v36 = vadd.f32 %v622_v44, %v12358_v54  ;;  %v817_v43 = vpop.f32.mrb[51].mxu1  ;;  %v816_v25 = vadd.f32 %v815_v4, %v12363_v55  ;;  %v2394_v42 = vmax.f32 %v812_v7, 0.0  ;;  %v2392_v16 = vmax.f32 %v619_v12, 0.0 }
 0x19f   :  { %v625_v34 = vadd.f32 %v624_v24, %v12367_v57  ;;  %v818_v19 = vadd.f32 %v817_v43, %v12371_v58  ;;  %v2395_v37 = vmax.f32 %v814_v33, 0.0  ;;  %v2393_v41 = vmax.f32 %v621_v18, 0.0 }
 0x1a0   :  { %9405 = vmatmul.mubr.msk.bf16.gmra.mrb[156].mxu0 %vm415_vm0, %v12138_v2  ;;  %v2408_v9 = vmax.f32 %v623_v36, 0.0  ;;  %9421 = vmatmul.mubr.msk.bf16.gmra.mrb[156].mxu1 %vm415_vm0, %v12138_v2  ;;  %v2410_v1 = vmax.f32 %v816_v25, 0.0 }
 0x1a1   :  { %1348 = vmatprep.mubr.bf16.mxu0 %v14571_v21  ;;  %v2409_v44 = vmax.f32 %v625_v34, 0.0  ;;  %1541 = vmatprep.mubr.bf16.mxu1 %v14571_v21  ;;  %v2411_v7 = vmax.f32 %v818_v19, 0.0 }
 0x1a2   :  { %v12657_v4 = vpack.c.bf16 %v2408_v9, %v2392_v16  ;;  %v12661_v12 = vpack.c.bf16 %v2410_v1, %v2394_v42 }
 0x1a3   :  { %v628_v24 = vpop.f32.mrb[52].mxu0  ;;  %v12659_v60 = vpack.c.bf16 %v2409_v44, %v2393_v41  ;;  %v821_v36 = vpop.f32.mrb[52].mxu1  ;;  %v12664_v13 = vpack.c.bf16 %v2411_v7, %v2395_v37 }
 0x1a4   :  { %14593 = vst [vmem:[#allocation50_spill] sm:$0xff] %v12657_v4  ;;  %14595 = vst [vmem:[#allocation52_spill] sm:$0xff] %v12661_v12  ;;  %v630_v33 = vpop.f32.mrb[53].mxu0  ;;  %v629_v43 = vadd.f32 %v628_v24, %v12358_v54  ;;  %v823_v6 = vpop.f32.mrb[53].mxu1  ;;  %v822_v25 = vadd.f32 %v821_v36, %v12363_v55 }
 0x1a5   :  { %14594 = vst [vmem:[#allocation51_spill] sm:$0xff] %v12659_v60  ;;  %14596 = vst [vmem:[#allocation53_spill] sm:$0xff] %v12664_v13  ;;  %v632_v18 = vpop.f32.mrb[54].mxu0  ;;  %v631_v34 = vadd.f32 %v630_v33, %v12367_v57  ;;  %v825_v16 = vpop.f32.mrb[54].mxu1  ;;  %v824_v41 = vadd.f32 %v823_v6, %v12371_v58 }
 0x1a6   :  { %v634_v9 = vpop.f32.mrb[55].mxu0  ;;  %v633_v19 = vadd.f32 %v632_v18, %v12358_v54  ;;  %v827_v1 = vpop.f32.mrb[55].mxu1  ;;  %v826_v44 = vadd.f32 %v825_v16, %v12363_v55  ;;  %v2426_v24 = vmax.f32 %v822_v25, 0.0  ;;  %v2424_v37 = vmax.f32 %v629_v43, 0.0 }
 0x1a7   :  { %v635_v42 = vadd.f32 %v634_v9, %v12367_v57  ;;  %v828_v33 = vadd.f32 %v827_v1, %v12371_v58  ;;  %v2427_v36 = vmax.f32 %v824_v41, 0.0  ;;  %v2425_v6 = vmax.f32 %v631_v34, 0.0 }
 0x1a8   :  { %9406 = vmatmul.mubr.msk.bf16.gmra.mrb[160].mxu0 %vm415_vm0, %v12152_v5  ;;  %v2440_v7 = vmax.f32 %v633_v19, 0.0  ;;  %9422 = vmatmul.mubr.msk.bf16.gmra.mrb[160].mxu1 %vm415_vm0, %v12152_v5  ;;  %v2442_v12 = vmax.f32 %v826_v44, 0.0 }
 0x1a9   :  { %1358 = vmatprep.mubr.bf16.mxu0 %v14571_v21  ;;  %v2441_v18 = vmax.f32 %v635_v42, 0.0  ;;  %1551 = vmatprep.mubr.bf16.mxu1 %v14571_v21  ;;  %v2443_v25 = vmax.f32 %v828_v33, 0.0 }
 0x1aa   :  { %v12679_v16 = vpack.c.bf16 %v2440_v7, %v2424_v37  ;;  %v12683_v43 = vpack.c.bf16 %v2442_v12, %v2426_v24 }
 0x1ab   :  { %v638_v9 = vpop.f32.mrb[56].mxu0  ;;  %v12681_v13 = vpack.c.bf16 %v2441_v18, %v2425_v6  ;;  %v831_v19 = vpop.f32.mrb[56].mxu1  ;;  %v12686_v4 = vpack.c.bf16 %v2443_v25, %v2427_v36 }
 0x1ac   :  { %14597 = vst [vmem:[#allocation54_spill] sm:$0xff] %v12679_v16  ;;  %14599 = vst [vmem:[#allocation56_spill] sm:$0xff] %v12683_v43  ;;  %v640_v41 = vpop.f32.mrb[57].mxu0  ;;  %v639_v1 = vadd.f32 %v638_v9, %v12358_v54  ;;  %v833_v60 = vpop.f32.mrb[57].mxu1  ;;  %v832_v44 = vadd.f32 %v831_v19, %v12363_v55 }
 0x1ad   :  { %14598 = vst [vmem:[#allocation55_spill] sm:$0xff] %v12681_v13  ;;  %14600 = vst [vmem:[#allocation57_spill] sm:$0xff] %v12686_v4  ;;  %v642_v34 = vpop.f32.mrb[58].mxu0  ;;  %v641_v42 = vadd.f32 %v640_v41, %v12367_v57  ;;  %v835_v37 = vpop.f32.mrb[58].mxu1  ;;  %v834_v6 = vadd.f32 %v833_v60, %v12371_v58 }
 0x1ae   :  { %v644_v7 = vpop.f32.mrb[59].mxu0  ;;  %v643_v33 = vadd.f32 %v642_v34, %v12358_v54  ;;  %v837_v12 = vpop.f32.mrb[59].mxu1  ;;  %v836_v18 = vadd.f32 %v835_v37, %v12363_v55  ;;  %v2458_v9 = vmax.f32 %v832_v44, 0.0  ;;  %v2456_v36 = vmax.f32 %v639_v1, 0.0 }
 0x1af   :  { %v645_v24 = vadd.f32 %v644_v7, %v12367_v57  ;;  %v838_v41 = vadd.f32 %v837_v12, %v12371_v58  ;;  %v2459_v19 = vmax.f32 %v834_v6, 0.0  ;;  %v2457_v60 = vmax.f32 %v641_v42, 0.0 }
 0x1b0   :  { %9407 = vmatmul.mubr.msk.bf16.gmra.mrb[164].mxu0 %vm415_vm0, %v12166_v8  ;;  %v2472_v25 = vmax.f32 %v643_v33, 0.0  ;;  %9423 = vmatmul.mubr.msk.bf16.gmra.mrb[164].mxu1 %vm415_vm0, %v12166_v8  ;;  %v2474_v43 = vmax.f32 %v836_v18, 0.0  ;;  %v14606_v44 = vsub.s32 5, %v12337_v46 }
 0x1b1   :  { %1368 = vmatprep.mubr.bf16.mxu0 %v14571_v21  ;;  %v2473_v34 = vmax.f32 %v645_v24, 0.0  ;;  %1561 = vmatprep.mubr.bf16.mxu1 %v14571_v21  ;;  %v2475_v7 = vmax.f32 %v838_v41, 0.0 }
 0x1b2   :  { %v12702_v37 = vpack.c.bf16 %v2472_v25, %v2456_v36  ;;  %v12707_v6 = vpack.c.bf16 %v2474_v43, %v2458_v9  ;;  %v14605_v43 = vsub.s32 4, %v12337_v46 }
 0x1b3   :  { %v648_v1 = vpop.f32.mrb[60].mxu0  ;;  %v12705_v12 = vpack.c.bf16 %v2473_v34, %v2457_v60  ;;  %v841_v4 = vpop.f32.mrb[60].mxu1  ;;  %v12710_v24 = vpack.c.bf16 %v2475_v7, %v2459_v19  ;;  %v11783_v60 = vld [vmem:[#allocation5] sm:$0xff] }
 0x1b4   :  { %14601 = vst [vmem:[#allocation58_spill] sm:$0xff] %v12702_v37  ;;  %14603 = vst [vmem:[#allocation60_spill] sm:$0xff] %v12707_v6  ;;  %v650_v16 = vpop.f32.mrb[61].mxu0  ;;  %v649_v42 = vadd.f32 %v648_v1, %v12358_v54  ;;  %v843_v18 = vpop.f32.mrb[61].mxu1  ;;  %v842_v25 = vadd.f32 %v841_v4, %v12363_v55  ;;  %v12717_v9 = vrot.slane %v11783_v60, %v14605_v43 }
 0x1b5   :  { %14602 = vst [vmem:[#allocation59_spill] sm:$0xff] %v12705_v12  ;;  %14604 = vst [vmem:[#allocation61_spill] sm:$0xff] %v12710_v24  ;;  %v652_v13 = vpop.f32.mrb[62].mxu0  ;;  %v651_v36 = vadd.f32 %v650_v16, %v12367_v57  ;;  %v845_v41 = vpop.f32.mrb[62].mxu1  ;;  %v844_v7 = vadd.f32 %v843_v18, %v12371_v58  ;;  %v12724_v6 = vrot.slane %v11783_v60, %v14606_v44  ;;  %v14608_v18 = vsub.s32 7, %v12337_v46 }
 0x1b6   :  { %v654_v33 = vpop.f32.mrb[63].mxu0  ;;  %v653_v19 = vadd.f32 %v652_v13, %v12358_v54  ;;  %v847_v1 = vpop.f32.mrb[63].mxu1  ;;  %v846_v16 = vadd.f32 %v845_v41, %v12363_v55  ;;  %v2490_v24 = vmax.f32 %v842_v25, 0.0  ;;  %v2488_v43 = vmax.f32 %v649_v42, 0.0 }
 0x1b7   :  { %v655_v4 = vadd.f32 %v654_v33, %v12367_v57  ;;  %v848_v34 = vadd.f32 %v847_v1, %v12371_v58  ;;  %v2491_v54 = vmax.f32 %v844_v7, 0.0  ;;  %v14607_v13 = vsub.s32 6, %v12337_v46 }
 0x1b8   :  { %9408 = vmatmul.mubr.msk.bf16.gmra.mrb[168].mxu0 %vm415_vm0, %v12180_v11  ;;  %v2504_v37 = vmax.f32 %v653_v19, 0.0  ;;  %9424 = vmatmul.mubr.msk.bf16.gmra.mrb[168].mxu1 %vm415_vm0, %v12180_v11  ;;  %v2489_v57 = vmax.f32 %v651_v36, 0.0  ;;  %v2506_v33 = vmax.f32 %v846_v16, 0.0  ;;  %v12740_v25 = vrot.slane %v11783_v60, %v14608_v18 }
 0x1b9   :  { %v12735_v44 = vrot.slane %v11783_v60, %v14607_v13  ;;  %1378 = vmatprep.mubr.bf16.mxu0 %v14571_v21  ;;  %v2505_v55 = vmax.f32 %v655_v4, 0.0  ;;  %1571 = vmatprep.mubr.bf16.mxu1 %v14571_v21  ;;  %v2507_v42 = vmax.f32 %v848_v34, 0.0 }
 0x1ba   :  { %v12743_v58 = vpack.c.bf16 %v2504_v37, %v2488_v43  ;;  %v12747_v7 = vpack.c.bf16 %v2506_v33, %v2490_v24 }
 0x1bb   :  { %v884_v41 = vpop.f32.mrb[64].mxu0  ;;  %v12745_v19 = vpack.c.bf16 %v2505_v55, %v2489_v57  ;;  %v1077_v13 = vpop.f32.mrb[64].mxu1  ;;  %v12750_v4 = vpack.c.bf16 %v2507_v42, %v2491_v54 }
 0x1bc   :  { %14609 = vst [vmem:[#allocation62_spill] sm:$0xff] %v12743_v58  ;;  %14611 = vst [vmem:[#allocation64_spill] sm:$0xff] %v12747_v7  ;;  %v885_v1 = vadd.f32 %v884_v41, %v12717_v9  ;;  %v886_v36 = vpop.f32.mrb[65].mxu0  ;;  %v1078_v16 = vadd.f32 %v1077_v13, %v12735_v44  ;;  %v1079_v18 = vpop.f32.mrb[65].mxu1 }
 0x1bd   :  { %14610 = vst [vmem:[#allocation63_spill] sm:$0xff] %v12745_v19  ;;  %14612 = vst [vmem:[#allocation65_spill] sm:$0xff] %v12750_v4  ;;  %v887_v60 = vadd.f32 %v886_v36, %v12724_v6  ;;  %v888_v12 = vpop.f32.mrb[66].mxu0  ;;  %v1080_v37 = vadd.f32 %v1079_v18, %v12740_v25  ;;  %v1081_v43 = vpop.f32.mrb[66].mxu1 }
 0x1be   :  { %v889_v34 = vadd.f32 %v888_v12, %v12717_v9  ;;  %v890_v57 = vpop.f32.mrb[67].mxu0  ;;  %v2014_v24 = vmax.f32 %v1078_v16, 0.0  ;;  %v1082_v55 = vadd.f32 %v1081_v43, %v12735_v44  ;;  %v1083_v41 = vpop.f32.mrb[67].mxu1  ;;  %v2012_v54 = vmax.f32 %v885_v1, 0.0 }
 0x1bf   :  { %v891_v33 = vadd.f32 %v890_v57, %v12724_v6  ;;  %v2015_v42 = vmax.f32 %v1080_v37, 0.0  ;;  %v1084_v13 = vadd.f32 %v1083_v41, %v12740_v25  ;;  %v2013_v36 = vmax.f32 %v887_v60, 0.0 }
 0x1c0   :  { %v2028_v7 = vmax.f32 %v889_v34, 0.0  ;;  %9409 = vmatmul.mubr.msk.bf16.gmra.mrb[172].mxu0 %vm415_vm0, %v12194_v14  ;;  %v2030_v18 = vmax.f32 %v1082_v55, 0.0  ;;  %9425 = vmatmul.mubr.msk.bf16.gmra.mrb[172].mxu1 %vm415_vm0, %v12194_v14 }
 0x1c1   :  { %v2029_v4 = vmax.f32 %v891_v33, 0.0  ;;  %1388 = vmatprep.mubr.bf16.mxu0 %v14571_v21  ;;  %v2031_v16 = vmax.f32 %v1084_v13, 0.0  ;;  %1581 = vmatprep.mubr.bf16.mxu1 %v14571_v21 }
 0x1c2   :  { %v12764_v12 = vpack.c.bf16 %v2028_v7, %v2012_v54  ;;  %v12767_v1 = vpack.c.bf16 %v2030_v18, %v2014_v24 }
 0x1c3   :  { %v894_v37 = vpop.f32.mrb[68].mxu0  ;;  %v12769_v34 = vpack.c.bf16 %v2029_v4, %v2013_v36  ;;  %v1087_v60 = vpop.f32.mrb[68].mxu1  ;;  %v12772_v55 = vpack.c.bf16 %v2031_v16, %v2015_v42 }
 0x1c4   :  { %14613 = vst [vmem:[#allocation66_spill] sm:$0xff] %v12764_v12  ;;  %14614 = vst [vmem:[#allocation67_spill] sm:$0xff] %v12767_v1  ;;  %v895_v43 = vadd.f32 %v894_v37, %v12717_v9  ;;  %v896_v57 = vpop.f32.mrb[69].mxu0  ;;  %v1088_v33 = vadd.f32 %v1087_v60, %v12735_v44  ;;  %v1089_v7 = vpop.f32.mrb[69].mxu1 }
 0x1c5   :  { %14615 = vst [vmem:[#allocation68_spill] sm:$0xff] %v12769_v34  ;;  %14616 = vst [vmem:[#allocation69_spill] sm:$0xff] %v12772_v55  ;;  %v897_v41 = vadd.f32 %v896_v57, %v12724_v6  ;;  %v898_v54 = vpop.f32.mrb[70].mxu0  ;;  %v1090_v13 = vadd.f32 %v1089_v7, %v12740_v25  ;;  %v1091_v18 = vpop.f32.mrb[70].mxu1 }
 0x1c6   :  { %v899_v24 = vadd.f32 %v898_v54, %v12717_v9  ;;  %v900_v1 = vpop.f32.mrb[71].mxu0  ;;  %v2046_v4 = vmax.f32 %v1088_v33, 0.0  ;;  %v1092_v36 = vadd.f32 %v1091_v18, %v12735_v44  ;;  %v1093_v12 = vpop.f32.mrb[71].mxu1  ;;  %v2044_v42 = vmax.f32 %v895_v43, 0.0 }
 0x1c7   :  { %v901_v37 = vadd.f32 %v900_v1, %v12724_v6  ;;  %v2047_v16 = vmax.f32 %v1090_v13, 0.0  ;;  %v1094_v60 = vadd.f32 %v1093_v12, %v12740_v25  ;;  %v2045_v57 = vmax.f32 %v897_v41, 0.0 }
 0x1c8   :  { %v2060_v55 = vmax.f32 %v899_v24, 0.0  ;;  %9410 = vmatmul.mubr.msk.bf16.gmra.mrb[176].mxu0 %vm415_vm0, %v12208_v17  ;;  %v2062_v7 = vmax.f32 %v1092_v36, 0.0  ;;  %9426 = vmatmul.mubr.msk.bf16.gmra.mrb[176].mxu1 %vm415_vm0, %v12208_v17 }
 0x1c9   :  { %v2061_v34 = vmax.f32 %v901_v37, 0.0  ;;  %1398 = vmatprep.mubr.bf16.mxu0 %v14571_v21  ;;  %v2063_v1 = vmax.f32 %v1094_v60, 0.0  ;;  %1591 = vmatprep.mubr.bf16.mxu1 %v14571_v21 }
 0x1ca   :  { %v12786_v33 = vpack.c.bf16 %v2060_v55, %v2044_v42  ;;  %v12789_v43 = vpack.c.bf16 %v2062_v7, %v2046_v4 }
 0x1cb   :  { %v12791_v54 = vpack.c.bf16 %v2061_v34, %v2045_v57  ;;  %v904_v12 = vpop.f32.mrb[72].mxu0  ;;  %v12793_v13 = vpack.c.bf16 %v2063_v1, %v2047_v16  ;;  %v1097_v24 = vpop.f32.mrb[72].mxu1 }
 0x1cc   :  { %14617 = vst [vmem:[#allocation70_spill] sm:$0xff] %v12786_v33  ;;  %14618 = vst [vmem:[#allocation71_spill] sm:$0xff] %v12789_v43  ;;  %v905_v41 = vadd.f32 %v904_v12, %v12717_v9  ;;  %v906_v18 = vpop.f32.mrb[73].mxu0  ;;  %v1098_v36 = vadd.f32 %v1097_v24, %v12735_v44  ;;  %v1099_v55 = vpop.f32.mrb[73].mxu1 }
 0x1cd   :  { %14619 = vst [vmem:[#allocation72_spill] sm:$0xff] %v12791_v54  ;;  %14620 = vst [vmem:[#allocation73_spill] sm:$0xff] %v12793_v13  ;;  %v907_v37 = vadd.f32 %v906_v18, %v12724_v6  ;;  %v908_v42 = vpop.f32.mrb[74].mxu0  ;;  %v1100_v60 = vadd.f32 %v1099_v55, %v12740_v25  ;;  %v1101_v7 = vpop.f32.mrb[74].mxu1 }
 0x1ce   :  { %v909_v4 = vadd.f32 %v908_v42, %v12717_v9  ;;  %v910_v34 = vpop.f32.mrb[75].mxu0  ;;  %v2078_v57 = vmax.f32 %v1098_v36, 0.0  ;;  %v1102_v16 = vadd.f32 %v1101_v7, %v12735_v44  ;;  %v1103_v12 = vpop.f32.mrb[75].mxu1  ;;  %v2076_v43 = vmax.f32 %v905_v41, 0.0 }
 0x1cf   :  { %v911_v1 = vadd.f32 %v910_v34, %v12724_v6  ;;  %v2079_v13 = vmax.f32 %v1100_v60, 0.0  ;;  %v1104_v24 = vadd.f32 %v1103_v12, %v12740_v25  ;;  %v2077_v18 = vmax.f32 %v907_v37, 0.0 }
 0x1d0   :  { %v2092_v33 = vmax.f32 %v909_v4, 0.0  ;;  %9411 = vmatmul.mubr.msk.bf16.gmra.mrb[180].mxu0 %vm415_vm0, %v12222_v20  ;;  %v2094_v55 = vmax.f32 %v1102_v16, 0.0  ;;  %9427 = vmatmul.mubr.msk.bf16.gmra.mrb[180].mxu1 %vm415_vm0, %v12222_v20 }
 0x1d1   :  { %v2093_v54 = vmax.f32 %v911_v1, 0.0  ;;  %1408 = vmatprep.mubr.bf16.mxu0 %v14571_v21  ;;  %v2095_v42 = vmax.f32 %v1104_v24, 0.0  ;;  %1601 = vmatprep.mubr.bf16.mxu1 %v14571_v21 }
 0x1d2   :  { %v12808_v36 = vpack.c.bf16 %v2092_v33, %v2076_v43  ;;  %v12811_v41 = vpack.c.bf16 %v2094_v55, %v2078_v57 }
 0x1d3   :  { %v12813_v60 = vpack.c.bf16 %v2093_v54, %v2077_v18  ;;  %v914_v4 = vpop.f32.mrb[76].mxu0  ;;  %v12815_v7 = vpack.c.bf16 %v2095_v42, %v2079_v13  ;;  %v1107_v34 = vpop.f32.mrb[76].mxu1 }
 0x1d4   :  { %14621 = vst [vmem:[#allocation74_spill] sm:$0xff] %v12808_v36  ;;  %14622 = vst [vmem:[#allocation75_spill] sm:$0xff] %v12811_v41  ;;  %v915_v37 = vadd.f32 %v914_v4, %v12717_v9  ;;  %v916_v16 = vpop.f32.mrb[77].mxu0  ;;  %v1108_v1 = vadd.f32 %v1107_v34, %v12735_v44  ;;  %v1109_v33 = vpop.f32.mrb[77].mxu1 }
 0x1d5   :  { %14623 = vst [vmem:[#allocation76_spill] sm:$0xff] %v12813_v60  ;;  %14624 = vst [vmem:[#allocation77_spill] sm:$0xff] %v12815_v7  ;;  %v917_v12 = vadd.f32 %v916_v16, %v12724_v6  ;;  %v918_v43 = vpop.f32.mrb[78].mxu0  ;;  %v1110_v24 = vadd.f32 %v1109_v33, %v12740_v25  ;;  %v1111_v55 = vpop.f32.mrb[78].mxu1 }
 0x1d6   :  { %v919_v57 = vadd.f32 %v918_v43, %v12717_v9  ;;  %v920_v54 = vpop.f32.mrb[79].mxu0  ;;  %v2110_v18 = vmax.f32 %v1108_v1, 0.0  ;;  %v1112_v13 = vadd.f32 %v1111_v55, %v12735_v44  ;;  %v1113_v4 = vpop.f32.mrb[79].mxu1  ;;  %v2108_v41 = vmax.f32 %v915_v37, 0.0 }
 0x1d7   :  { %v921_v42 = vadd.f32 %v920_v54, %v12724_v6  ;;  %v2111_v7 = vmax.f32 %v1110_v24, 0.0  ;;  %v1114_v34 = vadd.f32 %v1113_v4, %v12740_v25  ;;  %v2109_v16 = vmax.f32 %v917_v12, 0.0 }
 0x1d8   :  { %v2124_v36 = vmax.f32 %v919_v57, 0.0  ;;  %9412 = vmatmul.mubr.msk.bf16.gmra.mrb[184].mxu0 %vm415_vm0, %v12236_v23  ;;  %v2126_v33 = vmax.f32 %v1112_v13, 0.0  ;;  %9428 = vmatmul.mubr.msk.bf16.gmra.mrb[184].mxu1 %vm415_vm0, %v12236_v23 }
 0x1d9   :  { %v2125_v60 = vmax.f32 %v921_v42, 0.0  ;;  %1418 = vmatprep.mubr.bf16.mxu0 %v14571_v21  ;;  %v2127_v43 = vmax.f32 %v1114_v34, 0.0  ;;  %1611 = vmatprep.mubr.bf16.mxu1 %v14571_v21 }
 0x1da   :  { %v12830_v1 = vpack.c.bf16 %v2124_v36, %v2108_v41  ;;  %v12833_v37 = vpack.c.bf16 %v2126_v33, %v2110_v18 }
 0x1db   :  { %v12835_v24 = vpack.c.bf16 %v2125_v60, %v2109_v16  ;;  %v924_v57 = vpop.f32.mrb[80].mxu0  ;;  %v12837_v55 = vpack.c.bf16 %v2127_v43, %v2111_v7  ;;  %v1117_v54 = vpop.f32.mrb[80].mxu1 }
 0x1dc   :  { %14625 = vst [vmem:[#allocation78_spill] sm:$0xff] %v12830_v1  ;;  %14626 = vst [vmem:[#allocation79_spill] sm:$0xff] %v12833_v37  ;;  %v925_v12 = vadd.f32 %v924_v57, %v12717_v9  ;;  %v926_v13 = vpop.f32.mrb[81].mxu0  ;;  %v1118_v42 = vadd.f32 %v1117_v54, %v12735_v44  ;;  %v1119_v36 = vpop.f32.mrb[81].mxu1 }
 0x1dd   :  { %14627 = vst [vmem:[#allocation80_spill] sm:$0xff] %v12835_v24  ;;  %14628 = vst [vmem:[#allocation81_spill] sm:$0xff] %v12837_v55  ;;  %v927_v4 = vadd.f32 %v926_v13, %v12724_v6  ;;  %v928_v41 = vpop.f32.mrb[82].mxu0  ;;  %v1120_v34 = vadd.f32 %v1119_v36, %v12740_v25  ;;  %v1121_v33 = vpop.f32.mrb[82].mxu1 }
 0x1de   :  { %v929_v18 = vadd.f32 %v928_v41, %v12717_v9  ;;  %v930_v60 = vpop.f32.mrb[83].mxu0  ;;  %v2142_v16 = vmax.f32 %v1118_v42, 0.0  ;;  %v1122_v7 = vadd.f32 %v1121_v33, %v12735_v44  ;;  %v1123_v57 = vpop.f32.mrb[83].mxu1  ;;  %v2140_v37 = vmax.f32 %v925_v12, 0.0 }
 0x1df   :  { %v931_v43 = vadd.f32 %v930_v60, %v12724_v6  ;;  %v2143_v55 = vmax.f32 %v1120_v34, 0.0  ;;  %v1124_v54 = vadd.f32 %v1123_v57, %v12740_v25  ;;  %v2141_v13 = vmax.f32 %v927_v4, 0.0 }
 0x1e0   :  { %v2156_v1 = vmax.f32 %v929_v18, 0.0  ;;  %9413 = vmatmul.mubr.msk.bf16.gmra.mrb[188].mxu0 %vm415_vm0, %v12250_v27  ;;  %v2158_v36 = vmax.f32 %v1122_v7, 0.0  ;;  %9429 = vmatmul.mubr.msk.bf16.gmra.mrb[188].mxu1 %vm415_vm0, %v12250_v27 }
 0x1e1   :  { %v2157_v24 = vmax.f32 %v931_v43, 0.0  ;;  %1654 = vmatprep.mubr.bf16.mxu0 %v14571_v21  ;;  %v2159_v41 = vmax.f32 %v1124_v54, 0.0  ;;  %1847 = vmatprep.mubr.bf16.mxu1 %v14571_v21  ;;  %v11015_v54 = vld [vmem:[#allocation7] ss:$16 sps:$4 sm:$0xff]  }
 0x1e2   :  { %v12852_v42 = vpack.c.bf16 %v2156_v1, %v2140_v37  ;;  %v12855_v12 = vpack.c.bf16 %v2158_v36, %v2142_v16  ;;  %v11018_v36 = vld [vmem:[#allocation7 + $0x8] ss:$16 sps:$4 sm:$0xff]  }
 0x1e3   :  { %v12857_v34 = vpack.c.bf16 %v2157_v24, %v2141_v13  ;;  %v934_v18 = vpop.f32.mrb[84].mxu0  ;;  %v12859_v33 = vpack.c.bf16 %v2159_v41, %v2143_v55  ;;  %v1127_v60 = vpop.f32.mrb[84].mxu1 }
 0x1e4   :  { %14629 = vst [vmem:[#allocation82_spill] sm:$0xff] %v12852_v42  ;;  %14630 = vst [vmem:[#allocation83_spill] sm:$0xff] %v12855_v12  ;;  %v935_v4 = vadd.f32 %v934_v18, %v12717_v9  ;;  %v936_v7 = vpop.f32.mrb[85].mxu0  ;;  %v1128_v43 = vadd.f32 %v1127_v60, %v12735_v44  ;;  %v1129_v1 = vpop.f32.mrb[85].mxu1 }
 0x1e5   :  { %14631 = vst [vmem:[#allocation84_spill] sm:$0xff] %v12857_v34  ;;  %14632 = vst [vmem:[#allocation85_spill] sm:$0xff] %v12859_v33  ;;  %v937_v57 = vadd.f32 %v936_v7, %v12724_v6  ;;  %v938_v37 = vpop.f32.mrb[86].mxu0  ;;  %v1130_v42 = vadd.f32 %v1129_v1, %v12740_v25  ;;  %v1131_v24 = vpop.f32.mrb[86].mxu1  ;;  %v11023_v33 = vld [vmem:[#allocation7 + $0x24] ss:$16 sps:$4 sm:$0xff]  }
 0x1e6   :  { %v939_v16 = vadd.f32 %v938_v37, %v12717_v9  ;;  %v940_v13 = vpop.f32.mrb[87].mxu0  ;;  %v2174_v55 = vmax.f32 %v1128_v43, 0.0  ;;  %v1132_v41 = vadd.f32 %v1131_v24, %v12735_v44  ;;  %v1133_v12 = vpop.f32.mrb[87].mxu1  ;;  %v2172_v60 = vmax.f32 %v935_v4, 0.0  ;;  %v11026_v1 = vld [vmem:[#allocation7 + $0x2c] ss:$16 sps:$4 sm:$0xff]  }
 0x1e7   :  { %v941_v18 = vadd.f32 %v940_v13, %v12724_v6  ;;  %v2175_v34 = vmax.f32 %v1130_v42, 0.0  ;;  %v1134_v58 = vadd.f32 %v1133_v12, %v12740_v25  ;;  %v2173_v37 = vmax.f32 %v937_v57, 0.0  ;;  %v11021_v43 = vld [vmem:[#allocation7 + $0x20] ss:$16 sps:$4 sm:$0xff]   ;;  %v11024_v42 = vld [vmem:[#allocation7 + $0x28] ss:$16 sps:$4 sm:$0xff]  }
 0x1e8   :  { %v2188_v7 = vmax.f32 %v939_v16, 0.0  ;;  %9430 = vmatmul.mubr.msk.bf16.vlgmr.msra.gmra.mrb[192].mxu0 %vm415_vm0, %v12024_v26  ;;  %v2190_v19 = vmax.f32 %v1132_v41, 0.0  ;;  %9446 = vmatmul.mubr.msk.bf16.vlgmr.msra.gmra.mrb[192].mxu1 %vm415_vm0, %v12024_v26  ;;  %v11029_v12 = vld [vmem:[#allocation7 + $0x44] ss:$16 sps:$4 sm:$0xff]   ;;  %v11032_v41 = vld [vmem:[#allocation7 + $0x4c] ss:$16 sps:$4 sm:$0xff]  }
 0x1e9   :  { %v2189_v46 = vmax.f32 %v941_v18, 0.0  ;;  %5871 = vmatpush1.bf16.msra.mxu0 %v11015_v54  ;;  %v2191_v13 = vmax.f32 %v1134_v58, 0.0  ;;  %7415 = vmatpush1.bf16.msra.mxu1 %v11018_v36 }
 0x1ea   :  { %v12873_v24 = vpack.c.bf16 %v2188_v7, %v2172_v60  ;;  %1664 = vmatprep.mubr.bf16.mxu0 %v14571_v21  ;;  %v12876_v4 = vpack.c.bf16 %v2190_v19, %v2174_v55  ;;  %1857 = vmatprep.mubr.bf16.mxu1 %v14571_v21 }
 0x1eb   :  { %v12878_v16 = vpack.c.bf16 %v2189_v46, %v2173_v37  ;;  %v944_v57 = vpop.f32.mrb[88].mxu0  ;;  %5872 = vmatprep.subr.bf16.mxu0 %v11023_v33  ;;  %v12881_v26 = vpack.c.bf16 %v2191_v13, %v2175_v34  ;;  %v1137_v18 = vpop.f32.mrb[88].mxu1  ;;  %7416 = vmatprep.subr.bf16.mxu1 %v11026_v1  ;;  %v11027_v34 = vld [vmem:[#allocation7 + $0x40] ss:$16 sps:$4 sm:$0xff]  }
 0x1ec   :  { %14633 = vst [vmem:[#allocation86_spill] sm:$0xff] %v12873_v24  ;;  %14634 = vst [vmem:[#allocation87_spill] sm:$0xff] %v12876_v4  ;;  %v945_v54 = vadd.f32 %v944_v57, %v12717_v9  ;;  %v946_v58 = vpop.f32.mrb[89].mxu0  ;;  %v1138_v36 = vadd.f32 %v1137_v18, %v12735_v44  ;;  %v1139_v19 = vpop.f32.mrb[89].mxu1  ;;  %v11030_v4 = vld [vmem:[#allocation7 + $0x48] ss:$16 sps:$4 sm:$0xff]  }
 0x1ed   :  { %14635 = vst [vmem:[#allocation88_spill] sm:$0xff] %v12881_v26  ;;  %v947_v60 = vadd.f32 %v946_v58, %v12724_v6  ;;  %v948_v55 = vpop.f32.mrb[90].mxu0  ;;  %5873 = vmatpush1.bf16.msra.mxu0 %v11021_v43  ;;  %v1140_v46 = vadd.f32 %v1139_v19, %v12740_v25  ;;  %v1141_v33 = vpop.f32.mrb[90].mxu1  ;;  %7417 = vmatpush1.bf16.msra.mxu1 %v11024_v42  ;;  %v11035_v58 = vld [vmem:[#allocation7 + $0x64] ss:$16 sps:$4 sm:$0xff]  }
 0x1ee   :  { %v949_v7 = vadd.f32 %v948_v55, %v12717_v9  ;;  %v950_v37 = vpop.f32.mrb[91].mxu0  ;;  %5874 = vmatprep.subr.bf16.mxu0 %v11029_v12  ;;  %v2206_v13 = vmax.f32 %v1138_v36, 0.0  ;;  %v1142_v57 = vadd.f32 %v1141_v33, %v12735_v44  ;;  %v1143_v18 = vpop.f32.mrb[91].mxu1  ;;  %7418 = vmatprep.subr.bf16.mxu1 %v11032_v41  ;;  %v2204_v26 = vmax.f32 %v945_v54, 0.0  ;;  %v11038_v42 = vld [vmem:[#allocation7 + $0x6c] ss:$16 sps:$4 sm:$0xff]  }
 0x1ef   :  { %v951_v1 = vadd.f32 %v950_v37, %v12724_v6  ;;  %v2207_v43 = vmax.f32 %v1140_v46, 0.0  ;;  %v1144_v19 = vadd.f32 %v1143_v18, %v12740_v25  ;;  %v2205_v55 = vmax.f32 %v947_v60, 0.0  ;;  %v11033_v54 = vld [vmem:[#allocation7 + $0x60] ss:$16 sps:$4 sm:$0xff]   ;;  %v11036_v60 = vld [vmem:[#allocation7 + $0x68] ss:$16 sps:$4 sm:$0xff]  }
 0x1f0   :  { %v2220_v24 = vmax.f32 %v949_v7, 0.0  ;;  %9431 = vmatmul.mubr.msk.bf16.gmra.mrb[196].mxu0 %vm415_vm0, %v12038_v39  ;;  %v2222_v12 = vmax.f32 %v1142_v57, 0.0  ;;  %9447 = vmatmul.mubr.msk.bf16.gmra.mrb[196].mxu1 %vm415_vm0, %v12038_v39  ;;  %v11041_v57 = vld [vmem:[#allocation7 + $0x84] ss:$16 sps:$4 sm:$0xff]   ;;  %v11044_v18 = vld [vmem:[#allocation7 + $0x8c] ss:$16 sps:$4 sm:$0xff]  }
 0x1f1   :  { %v2221_v36 = vmax.f32 %v951_v1, 0.0  ;;  %1674 = vmatprep.mubr.bf16.mxu0 %v14571_v21  ;;  %v2223_v41 = vmax.f32 %v1144_v19, 0.0  ;;  %1867 = vmatprep.mubr.bf16.mxu1 %v14571_v21 }
 0x1f2   :  { %v12896_v33 = vpack.c.bf16 %v2220_v24, %v2204_v26  ;;  %5875 = vmatpush1.bf16.msra.mxu0 %v11027_v34  ;;  %v12899_v46 = vpack.c.bf16 %v2222_v12, %v2206_v13  ;;  %7419 = vmatpush1.bf16.msra.mxu1 %v11030_v4 }
 0x1f3   :  { %v12901_v7 = vpack.c.bf16 %v2221_v36, %v2205_v55  ;;  %v954_v37 = vpop.f32.mrb[92].mxu0  ;;  %5876 = vmatprep.subr.bf16.mxu0 %v11035_v58  ;;  %v12903_v1 = vpack.c.bf16 %v2223_v41, %v2207_v43  ;;  %v1147_v24 = vpop.f32.mrb[92].mxu1  ;;  %7420 = vmatprep.subr.bf16.mxu1 %v11038_v42  ;;  %v11039_v43 = vld [vmem:[#allocation7 + $0x80] ss:$16 sps:$4 sm:$0xff]  }
 0x1f4   :  { %14636 = vst [vmem:[#allocation89_spill] sm:$0xff] %v12896_v33  ;;  %14637 = vst [vmem:[#allocation90_spill] sm:$0xff] %v12899_v46  ;;  %v955_v39 = vadd.f32 %v954_v37, %v12717_v9  ;;  %v956_v26 = vpop.f32.mrb[93].mxu0  ;;  %v1148_v34 = vadd.f32 %v1147_v24, %v12735_v44  ;;  %v1149_v19 = vpop.f32.mrb[93].mxu1  ;;  %v11042_v24 = vld [vmem:[#allocation7 + $0x88] ss:$16 sps:$4 sm:$0xff]  }
 0x1f5   :  { %14638 = vst [vmem:[#allocation91_spill] sm:$0xff] %v12901_v7  ;;  %14639 = vst [vmem:[#allocation92_spill] sm:$0xff] %v12903_v1  ;;  %v957_v13 = vadd.f32 %v956_v26, %v12724_v6  ;;  %v958_v55 = vpop.f32.mrb[94].mxu0  ;;  %v1150_v12 = vadd.f32 %v1149_v19, %v12740_v25  ;;  %v1151_v58 = vpop.f32.mrb[94].mxu1  ;;  %v11047_v26 = vld [vmem:[#allocation7 + $0xa4] ss:$16 sps:$4 sm:$0xff]  }
 0x1f6   :  { %v959_v4 = vadd.f32 %v958_v55, %v12717_v9  ;;  %v960_v36 = vpop.f32.mrb[95].mxu0  ;;  %5877 = vmatpush1.bf16.msra.mxu0 %v11033_v54  ;;  %v2238_v41 = vmax.f32 %v1148_v34, 0.0  ;;  %v1152_v37 = vadd.f32 %v1151_v58, %v12735_v44  ;;  %v1153_v46 = vpop.f32.mrb[95].mxu1  ;;  %7421 = vmatpush1.bf16.msra.mxu1 %v11036_v60  ;;  %v2236_v1 = vmax.f32 %v955_v39, 0.0  ;;  %v11050_v54 = vld [vmem:[#allocation7 + $0xac] ss:$16 sps:$4 sm:$0xff]  }
 0x1f7   :  { %v961_v42 = vadd.f32 %v960_v36, %v12724_v6  ;;  %5878 = vmatprep.subr.bf16.mxu0 %v11041_v57  ;;  %v2239_v33 = vmax.f32 %v1150_v12, 0.0  ;;  %v1154_v19 = vadd.f32 %v1153_v46, %v12740_v25  ;;  %7422 = vmatprep.subr.bf16.mxu1 %v11044_v18  ;;  %v2237_v34 = vmax.f32 %v957_v13, 0.0  ;;  %v11045_v46 = vld [vmem:[#allocation7 + $0xa0] ss:$16 sps:$4 sm:$0xff]   ;;  %v11048_v13 = vld [vmem:[#allocation7 + $0xa8] ss:$16 sps:$4 sm:$0xff]  }
 0x1f8   :  { %v2252_v7 = vmax.f32 %v959_v4, 0.0  ;;  %9432 = vmatmul.mubr.msk.bf16.gmra.mrb[200].mxu0 %vm415_vm0, %v12068_v50  ;;  %v2254_v55 = vmax.f32 %v1152_v37, 0.0  ;;  %9448 = vmatmul.mubr.msk.bf16.gmra.mrb[200].mxu1 %vm415_vm0, %v12068_v50  ;;  %v11053_v4 = vld [vmem:[#allocation7 + $0xc4] ss:$16 sps:$4 sm:$0xff]   ;;  %v11056_v37 = vld [vmem:[#allocation7 + $0xcc] ss:$16 sps:$4 sm:$0xff]  }
 0x1f9   :  { %v2253_v58 = vmax.f32 %v961_v42, 0.0  ;;  %1684 = vmatprep.mubr.bf16.mxu0 %v14571_v21  ;;  %v2255_v57 = vmax.f32 %v1154_v19, 0.0  ;;  %1877 = vmatprep.mubr.bf16.mxu1 %v14571_v21 }
 0x1fa   :  { %v12918_v60 = vpack.c.bf16 %v2252_v7, %v2236_v1  ;;  %5879 = vmatpush1.bf16.msra.mxu0 %v11039_v43  ;;  %v12921_v39 = vpack.c.bf16 %v2254_v55, %v2238_v41  ;;  %7423 = vmatpush1.bf16.msra.mxu1 %v11042_v24 }
 0x1fb   :  { %v12923_v12 = vpack.c.bf16 %v2253_v58, %v2237_v34  ;;  %v964_v18 = vpop.f32.mrb[96].mxu0  ;;  %5880 = vmatprep.subr.bf16.mxu0 %v11047_v26  ;;  %v12925_v36 = vpack.c.bf16 %v2255_v57, %v2239_v33  ;;  %v1157_v7 = vpop.f32.mrb[96].mxu1  ;;  %7424 = vmatprep.subr.bf16.mxu1 %v11050_v54  ;;  %v11051_v33 = vld [vmem:[#allocation7 + $0xc0] ss:$16 sps:$4 sm:$0xff]  }
 0x1fc   :  { %14640 = vst [vmem:[#allocation93_spill] sm:$0xff] %v12918_v60  ;;  %14641 = vst [vmem:[#allocation94_spill] sm:$0xff] %v12921_v39  ;;  %v965_v50 = vadd.f32 %v964_v18, %v12717_v9  ;;  %v966_v1 = vpop.f32.mrb[97].mxu0  ;;  %v1158_v43 = vadd.f32 %v1157_v7, %v12735_v44  ;;  %v1159_v42 = vpop.f32.mrb[97].mxu1  ;;  %v11054_v7 = vld [vmem:[#allocation7 + $0xc8] ss:$16 sps:$4 sm:$0xff]  }
 0x1fd   :  { %14642 = vst [vmem:[#allocation95_spill] sm:$0xff] %v12925_v36  ;;  %v967_v41 = vadd.f32 %v966_v1, %v12724_v6  ;;  %v968_v19 = vpop.f32.mrb[98].mxu0  ;;  %v1160_v34 = vadd.f32 %v1159_v42, %v12740_v25  ;;  %v1161_v26 = vpop.f32.mrb[98].mxu1  ;;  %v11059_v1 = vld [vmem:[#allocation7 + $0xe4] ss:$16 sps:$4 sm:$0xff]  }
 0x1fe   :  { %v969_v24 = vadd.f32 %v968_v19, %v12717_v9  ;;  %v970_v55 = vpop.f32.mrb[99].mxu0  ;;  %5881 = vmatpush1.bf16.msra.mxu0 %v11045_v46  ;;  %v2270_v58 = vmax.f32 %v1158_v43, 0.0  ;;  %v1162_v57 = vadd.f32 %v1161_v26, %v12735_v44  ;;  %v1163_v18 = vpop.f32.mrb[99].mxu1  ;;  %7425 = vmatpush1.bf16.msra.mxu1 %v11048_v13  ;;  %v2268_v39 = vmax.f32 %v965_v50, 0.0  ;;  %v11062_v46 = vld [vmem:[#allocation7 + $0xec] ss:$16 sps:$4 sm:$0xff]  }
 0x1ff   :  { %v971_v54 = vadd.f32 %v970_v55, %v12724_v6  ;;  %5882 = vmatprep.subr.bf16.mxu0 %v11053_v4  ;;  %v2271_v36 = vmax.f32 %v1160_v34, 0.0  ;;  %v1164_v42 = vadd.f32 %v1163_v18, %v12740_v25  ;;  %7426 = vmatprep.subr.bf16.mxu1 %v11056_v37  ;;  %v2269_v43 = vmax.f32 %v967_v41, 0.0  ;;  %v11057_v50 = vld [vmem:[#allocation7 + $0xe0] ss:$16 sps:$4 sm:$0xff]   ;;  %v11060_v41 = vld [vmem:[#allocation7 + $0xe8] ss:$16 sps:$4 sm:$0xff]  }
 0x200   :  { %v2284_v60 = vmax.f32 %v969_v24, 0.0  ;;  %9433 = vmatmul.mubr.msk.bf16.gmra.mrb[204].mxu0 %vm415_vm0, %v12082_v53  ;;  %v2286_v19 = vmax.f32 %v1162_v57, 0.0  ;;  %9449 = vmatmul.mubr.msk.bf16.gmra.mrb[204].mxu1 %vm415_vm0, %v12082_v53  ;;  %v11065_v55 = vld [vmem:[#allocation7 + $0x104] ss:$16 sps:$4 sm:$0xff]  }
 0x201   :  { %v2285_v26 = vmax.f32 %v971_v54, 0.0  ;;  %1694 = vmatprep.mubr.bf16.mxu0 %v14571_v21  ;;  %v2287_v4 = vmax.f32 %v1164_v42, 0.0  ;;  %1887 = vmatprep.mubr.bf16.mxu1 %v14571_v21  ;;  %v11068_v54 = vld [vmem:[#allocation7 + $0x10c] ss:$16 sps:$4 sm:$0xff]  }
 0x202   :  { %v12940_v13 = vpack.c.bf16 %v2284_v60, %v2268_v39  ;;  %5883 = vmatpush1.bf16.msra.mxu0 %v11051_v33  ;;  %v12943_v34 = vpack.c.bf16 %v2286_v19, %v2270_v58  ;;  %7427 = vmatpush1.bf16.msra.mxu1 %v11054_v7 }
 0x203   :  { %v12945_v24 = vpack.c.bf16 %v2285_v26, %v2269_v43  ;;  %v974_v37 = vpop.f32.mrb[100].mxu0  ;;  %5884 = vmatprep.subr.bf16.mxu0 %v11059_v1  ;;  %v12947_v57 = vpack.c.bf16 %v2287_v4, %v2271_v36  ;;  %v1167_v60 = vpop.f32.mrb[100].mxu1  ;;  %7428 = vmatprep.subr.bf16.mxu1 %v11062_v46  ;;  %v11063_v36 = vld [vmem:[#allocation7 + $0x100] ss:$16 sps:$4 sm:$0xff]  }
 0x204   :  { %14643 = vst [vmem:[#allocation96_spill] sm:$0xff] %v12940_v13  ;;  %14644 = vst [vmem:[#allocation97_spill] sm:$0xff] %v12943_v34  ;;  %v975_v53 = vadd.f32 %v974_v37, %v12717_v9  ;;  %v976_v39 = vpop.f32.mrb[101].mxu0  ;;  %v1168_v33 = vadd.f32 %v1167_v60, %v12735_v44  ;;  %v1169_v18 = vpop.f32.mrb[101].mxu1  ;;  %v11066_v60 = vld [vmem:[#allocation7 + $0x108] ss:$16 sps:$4 sm:$0xff]  }
 0x205   :  { %14645 = vst [vmem:[#allocation98_spill] sm:$0xff] %v12947_v57  ;;  %v977_v58 = vadd.f32 %v976_v39, %v12724_v6  ;;  %v978_v42 = vpop.f32.mrb[102].mxu0  ;;  %v1170_v43 = vadd.f32 %v1169_v18, %v12740_v25  ;;  %v1171_v1 = vpop.f32.mrb[102].mxu1  ;;  %v11071_v39 = vld [vmem:[#allocation7 + $0x124] ss:$16 sps:$4 sm:$0xff]  }
 0x206   :  { %v979_v7 = vadd.f32 %v978_v42, %v12717_v9  ;;  %v980_v19 = vpop.f32.mrb[103].mxu0  ;;  %5885 = vmatpush1.bf16.msra.mxu0 %v11057_v50  ;;  %v2302_v26 = vmax.f32 %v1168_v33, 0.0  ;;  %v1172_v4 = vadd.f32 %v1171_v1, %v12735_v44  ;;  %v1173_v37 = vpop.f32.mrb[103].mxu1  ;;  %7429 = vmatpush1.bf16.msra.mxu1 %v11060_v41  ;;  %v2300_v34 = vmax.f32 %v975_v53, 0.0  ;;  %v11074_v50 = vld [vmem:[#allocation7 + $0x12c] ss:$16 sps:$4 sm:$0xff]  }
 0x207   :  { %v981_v46 = vadd.f32 %v980_v19, %v12724_v6  ;;  %5886 = vmatprep.subr.bf16.mxu0 %v11065_v55  ;;  %v2303_v57 = vmax.f32 %v1170_v43, 0.0  ;;  %v1174_v18 = vadd.f32 %v1173_v37, %v12740_v25  ;;  %7430 = vmatprep.subr.bf16.mxu1 %v11068_v54  ;;  %v2301_v33 = vmax.f32 %v977_v58, 0.0  ;;  %v11069_v53 = vld [vmem:[#allocation7 + $0x120] ss:$16 sps:$4 sm:$0xff]   ;;  %v11072_v58 = vld [vmem:[#allocation7 + $0x128] ss:$16 sps:$4 sm:$0xff]  }
 0x208   :  { %v2316_v13 = vmax.f32 %v979_v7, 0.0  ;;  %9434 = vmatmul.mubr.msk.bf16.gmra.mrb[208].mxu0 %vm415_vm0, %v12096_v56  ;;  %v2318_v42 = vmax.f32 %v1172_v4, 0.0  ;;  %9450 = vmatmul.mubr.msk.bf16.gmra.mrb[208].mxu1 %vm415_vm0, %v12096_v56  ;;  %v11077_v19 = vld [vmem:[#allocation7 + $0x144] ss:$16 sps:$4 sm:$0xff]  }
 0x209   :  { %v2317_v1 = vmax.f32 %v981_v46, 0.0  ;;  %1704 = vmatprep.mubr.bf16.mxu0 %v14571_v21  ;;  %v2319_v55 = vmax.f32 %v1174_v18, 0.0  ;;  %1897 = vmatprep.mubr.bf16.mxu1 %v14571_v21  ;;  %v11080_v46 = vld [vmem:[#allocation7 + $0x14c] ss:$16 sps:$4 sm:$0xff]  }
 0x20a   :  { %v12962_v41 = vpack.c.bf16 %v2316_v13, %v2300_v34  ;;  %5887 = vmatpush1.bf16.msra.mxu0 %v11063_v36  ;;  %v12965_v43 = vpack.c.bf16 %v2318_v42, %v2302_v26  ;;  %7431 = vmatpush1.bf16.msra.mxu1 %v11066_v60 }
 0x20b   :  { %v12967_v7 = vpack.c.bf16 %v2317_v1, %v2301_v33  ;;  %v984_v54 = vpop.f32.mrb[104].mxu0  ;;  %5888 = vmatprep.subr.bf16.mxu0 %v11071_v39  ;;  %v12969_v4 = vpack.c.bf16 %v2319_v55, %v2303_v57  ;;  %v1177_v13 = vpop.f32.mrb[104].mxu1  ;;  %7432 = vmatprep.subr.bf16.mxu1 %v11074_v50  ;;  %v11075_v57 = vld [vmem:[#allocation7 + $0x140] ss:$16 sps:$4 sm:$0xff]  }
 0x20c   :  { %14646 = vst [vmem:[#allocation99_spill] sm:$0xff] %v12962_v41  ;;  %14647 = vst [vmem:[#allocation100_spill] sm:$0xff] %v12965_v43  ;;  %v985_v56 = vadd.f32 %v984_v54, %v12717_v9  ;;  %v986_v34 = vpop.f32.mrb[105].mxu0  ;;  %v1178_v36 = vadd.f32 %v1177_v13, %v12735_v44  ;;  %v1179_v37 = vpop.f32.mrb[105].mxu1  ;;  %v11078_v13 = vld [vmem:[#allocation7 + $0x148] ss:$16 sps:$4 sm:$0xff]  }
 0x20d   :  { %14648 = vst [vmem:[#allocation101_spill] sm:$0xff] %v12969_v4  ;;  %v987_v26 = vadd.f32 %v986_v34, %v12724_v6  ;;  %v988_v18 = vpop.f32.mrb[106].mxu0  ;;  %v1180_v33 = vadd.f32 %v1179_v37, %v12740_v25  ;;  %v1181_v39 = vpop.f32.mrb[106].mxu1  ;;  %v11083_v34 = vld [vmem:[#allocation7 + $0x164] ss:$16 sps:$4 sm:$0xff]  }
 0x20e   :  { %v989_v60 = vadd.f32 %v988_v18, %v12717_v9  ;;  %v990_v42 = vpop.f32.mrb[107].mxu0  ;;  %5889 = vmatpush1.bf16.msra.mxu0 %v11069_v53  ;;  %v2334_v1 = vmax.f32 %v1178_v36, 0.0  ;;  %v1182_v55 = vadd.f32 %v1181_v39, %v12735_v44  ;;  %v1183_v54 = vpop.f32.mrb[107].mxu1  ;;  %7433 = vmatpush1.bf16.msra.mxu1 %v11072_v58  ;;  %v2332_v43 = vmax.f32 %v985_v56, 0.0  ;;  %v11086_v53 = vld [vmem:[#allocation7 + $0x16c] ss:$16 sps:$4 sm:$0xff]  }
 0x20f   :  { %v991_v50 = vadd.f32 %v990_v42, %v12724_v6  ;;  %5890 = vmatprep.subr.bf16.mxu0 %v11077_v19  ;;  %v2335_v4 = vmax.f32 %v1180_v33, 0.0  ;;  %v1184_v37 = vadd.f32 %v1183_v54, %v12740_v25  ;;  %7434 = vmatprep.subr.bf16.mxu1 %v11080_v46  ;;  %v2333_v36 = vmax.f32 %v987_v26, 0.0  ;;  %v11081_v56 = vld [vmem:[#allocation7 + $0x160] ss:$16 sps:$4 sm:$0xff]   ;;  %v11084_v26 = vld [vmem:[#allocation7 + $0x168] ss:$16 sps:$4 sm:$0xff]  }
 0x210   :  { %v2348_v41 = vmax.f32 %v989_v60, 0.0  ;;  %9435 = vmatmul.mubr.msk.bf16.gmra.mrb[212].mxu0 %vm415_vm0, %v12110_v59  ;;  %v2350_v18 = vmax.f32 %v1182_v55, 0.0  ;;  %9451 = vmatmul.mubr.msk.bf16.gmra.mrb[212].mxu1 %vm415_vm0, %v12110_v59  ;;  %v11089_v42 = vld [vmem:[#allocation7 + $0x184] ss:$16 sps:$4 sm:$0xff]  }
 0x211   :  { %v2349_v39 = vmax.f32 %v991_v50, 0.0  ;;  %1714 = vmatprep.mubr.bf16.mxu0 %v14571_v21  ;;  %v2351_v19 = vmax.f32 %v1184_v37, 0.0  ;;  %1907 = vmatprep.mubr.bf16.mxu1 %v14571_v21  ;;  %v11092_v50 = vld [vmem:[#allocation7 + $0x18c] ss:$16 sps:$4 sm:$0xff]  }
 0x212   :  { %v12984_v58 = vpack.c.bf16 %v2348_v41, %v2332_v43  ;;  %5891 = vmatpush1.bf16.msra.mxu0 %v11075_v57  ;;  %v12987_v33 = vpack.c.bf16 %v2350_v18, %v2334_v1  ;;  %7435 = vmatpush1.bf16.msra.mxu1 %v11078_v13 }
 0x213   :  { %v12989_v60 = vpack.c.bf16 %v2349_v39, %v2333_v36  ;;  %v994_v46 = vpop.f32.mrb[108].mxu0  ;;  %5892 = vmatprep.subr.bf16.mxu0 %v11083_v34  ;;  %v12991_v55 = vpack.c.bf16 %v2351_v19, %v2335_v4  ;;  %v1187_v41 = vpop.f32.mrb[108].mxu1  ;;  %7436 = vmatprep.subr.bf16.mxu1 %v11086_v53  ;;  %v11087_v4 = vld [vmem:[#allocation7 + $0x180] ss:$16 sps:$4 sm:$0xff]  }
 0x214   :  { %14649 = vst [vmem:[#allocation102_spill] sm:$0xff] %v12984_v58  ;;  %14650 = vst [vmem:[#allocation103_spill] sm:$0xff] %v12987_v33  ;;  %v995_v59 = vadd.f32 %v994_v46, %v12717_v9  ;;  %v996_v43 = vpop.f32.mrb[109].mxu0  ;;  %v1188_v57 = vadd.f32 %v1187_v41, %v12735_v44  ;;  %v1189_v54 = vpop.f32.mrb[109].mxu1  ;;  %v11090_v41 = vld [vmem:[#allocation7 + $0x188] ss:$16 sps:$4 sm:$0xff]  }
 0x215   :  { %14651 = vst [vmem:[#allocation104_spill] sm:$0xff] %v12991_v55  ;;  %v997_v1 = vadd.f32 %v996_v43, %v12724_v6  ;;  %v998_v37 = vpop.f32.mrb[110].mxu0  ;;  %v1190_v36 = vadd.f32 %v1189_v54, %v12740_v25  ;;  %v1191_v34 = vpop.f32.mrb[110].mxu1  ;;  %v11095_v43 = vld [vmem:[#allocation7 + $0x1a4] ss:$16 sps:$4 sm:$0xff]  }
 0x216   :  { %v999_v13 = vadd.f32 %v998_v37, %v12717_v9  ;;  %v1000_v18 = vpop.f32.mrb[111].mxu0  ;;  %5893 = vmatpush1.bf16.msra.mxu0 %v11081_v56  ;;  %v2366_v39 = vmax.f32 %v1188_v57, 0.0  ;;  %v1192_v19 = vadd.f32 %v1191_v34, %v12735_v44  ;;  %v1193_v46 = vpop.f32.mrb[111].mxu1  ;;  %7437 = vmatpush1.bf16.msra.mxu1 %v11084_v26  ;;  %v2364_v33 = vmax.f32 %v995_v59, 0.0  ;;  %v11098_v56 = vld [vmem:[#allocation7 + $0x1ac] ss:$16 sps:$4 sm:$0xff]  }
 0x217   :  { %v1001_v53 = vadd.f32 %v1000_v18, %v12724_v6  ;;  %5894 = vmatprep.subr.bf16.mxu0 %v11089_v42  ;;  %v2367_v55 = vmax.f32 %v1190_v36, 0.0  ;;  %v1194_v54 = vadd.f32 %v1193_v46, %v12740_v25  ;;  %7438 = vmatprep.subr.bf16.mxu1 %v11092_v50  ;;  %v2365_v57 = vmax.f32 %v997_v1, 0.0  ;;  %v11093_v59 = vld [vmem:[#allocation7 + $0x1a0] ss:$16 sps:$4 sm:$0xff]   ;;  %v11096_v1 = vld [vmem:[#allocation7 + $0x1a8] ss:$16 sps:$4 sm:$0xff]  }
 0x218   :  { %v2380_v58 = vmax.f32 %v999_v13, 0.0  ;;  %9436 = vmatmul.mubr.msk.bf16.gmra.mrb[216].mxu0 %vm415_vm0, %v12124_v62  ;;  %v2382_v37 = vmax.f32 %v1192_v19, 0.0  ;;  %9452 = vmatmul.mubr.msk.bf16.gmra.mrb[216].mxu1 %vm415_vm0, %v12124_v62  ;;  %v11101_v18 = vld [vmem:[#allocation7 + $0x1c4] ss:$16 sps:$4 sm:$0xff]  }
 0x219   :  { %v2381_v34 = vmax.f32 %v1001_v53, 0.0  ;;  %1724 = vmatprep.mubr.bf16.mxu0 %v14571_v21  ;;  %v2383_v42 = vmax.f32 %v1194_v54, 0.0  ;;  %1917 = vmatprep.mubr.bf16.mxu1 %v14571_v21  ;;  %v11104_v53 = vld [vmem:[#allocation7 + $0x1cc] ss:$16 sps:$4 sm:$0xff]  }
 0x21a   :  { %v13006_v26 = vpack.c.bf16 %v2380_v58, %v2364_v33  ;;  %5895 = vmatpush1.bf16.msra.mxu0 %v11087_v4  ;;  %v13009_v36 = vpack.c.bf16 %v2382_v37, %v2366_v39  ;;  %7439 = vmatpush1.bf16.msra.mxu1 %v11090_v41 }
 0x21b   :  { %v13011_v13 = vpack.c.bf16 %v2381_v34, %v2365_v57  ;;  %v1004_v50 = vpop.f32.mrb[112].mxu0  ;;  %5896 = vmatprep.subr.bf16.mxu0 %v11095_v43  ;;  %v13013_v19 = vpack.c.bf16 %v2383_v42, %v2367_v55  ;;  %v1197_v58 = vpop.f32.mrb[112].mxu1  ;;  %7440 = vmatprep.subr.bf16.mxu1 %v11098_v56  ;;  %v11099_v55 = vld [vmem:[#allocation7 + $0x1c0] ss:$16 sps:$4 sm:$0xff]  }
 0x21c   :  { %14652 = vst [vmem:[#allocation105_spill] sm:$0xff] %v13006_v26  ;;  %14653 = vst [vmem:[#allocation106_spill] sm:$0xff] %v13009_v36  ;;  %v1005_v62 = vadd.f32 %v1004_v50, %v12717_v9  ;;  %v1006_v33 = vpop.f32.mrb[113].mxu0  ;;  %v1198_v4 = vadd.f32 %v1197_v58, %v12735_v44  ;;  %v1199_v46 = vpop.f32.mrb[113].mxu1  ;;  %v11102_v58 = vld [vmem:[#allocation7 + $0x1c8] ss:$16 sps:$4 sm:$0xff]  }
 0x21d   :  { %14654 = vst [vmem:[#allocation107_spill] sm:$0xff] %v13013_v19  ;;  %v1007_v39 = vadd.f32 %v1006_v33, %v12724_v6  ;;  %v1008_v54 = vpop.f32.mrb[114].mxu0  ;;  %v1200_v57 = vadd.f32 %v1199_v46, %v12740_v25  ;;  %v1201_v43 = vpop.f32.mrb[114].mxu1  ;;  %v11107_v33 = vld [vmem:[#allocation7 + $0x1e4] ss:$16 sps:$4 sm:$0xff]  }
 0x21e   :  { %v1009_v41 = vadd.f32 %v1008_v54, %v12717_v9  ;;  %v1010_v37 = vpop.f32.mrb[115].mxu0  ;;  %5897 = vmatpush1.bf16.msra.mxu0 %v11093_v59  ;;  %v2398_v34 = vmax.f32 %v1198_v4, 0.0  ;;  %v1202_v42 = vadd.f32 %v1201_v43, %v12735_v44  ;;  %v1203_v50 = vpop.f32.mrb[115].mxu1  ;;  %7441 = vmatpush1.bf16.msra.mxu1 %v11096_v1  ;;  %v2396_v36 = vmax.f32 %v1005_v62, 0.0  ;;  %v11110_v59 = vld [vmem:[#allocation7 + $0x1ec] ss:$16 sps:$4 sm:$0xff]  }
 0x21f   :  { %v1011_v56 = vadd.f32 %v1010_v37, %v12724_v6  ;;  %5898 = vmatprep.subr.bf16.mxu0 %v11101_v18  ;;  %v2399_v19 = vmax.f32 %v1200_v57, 0.0  ;;  %v1204_v46 = vadd.f32 %v1203_v50, %v12740_v25  ;;  %7442 = vmatprep.subr.bf16.mxu1 %v11104_v53  ;;  %v2397_v4 = vmax.f32 %v1007_v39, 0.0  ;;  %v11105_v62 = vld [vmem:[#allocation7 + $0x1e0] ss:$16 sps:$4 sm:$0xff]   ;;  %v11108_v39 = vld [vmem:[#allocation7 + $0x1e8] ss:$16 sps:$4 sm:$0xff]  }
 0x220   :  { %v2412_v26 = vmax.f32 %v1009_v41, 0.0  ;;  %9437 = vmatmul.mubr.msk.bf16.gmra.mrb[220].mxu0 %vm415_vm0, %v12138_v2  ;;  %v2414_v54 = vmax.f32 %v1202_v42, 0.0  ;;  %9453 = vmatmul.mubr.msk.bf16.gmra.mrb[220].mxu1 %vm415_vm0, %v12138_v2  ;;  %v11113_v37 = vld [vmem:[#allocation7 + $0x204] ss:$16 sps:$4 sm:$0xff]  }
 0x221   :  { %v2413_v43 = vmax.f32 %v1011_v56, 0.0  ;;  %1734 = vmatprep.mubr.bf16.mxu0 %v14571_v21  ;;  %v2415_v18 = vmax.f32 %v1204_v46, 0.0  ;;  %1927 = vmatprep.mubr.bf16.mxu1 %v14571_v21  ;;  %v11116_v56 = vld [vmem:[#allocation7 + $0x20c] ss:$16 sps:$4 sm:$0xff]  }
 0x222   :  { %v13028_v1 = vpack.c.bf16 %v2412_v26, %v2396_v36  ;;  %5899 = vmatpush1.bf16.msra.mxu0 %v11099_v55  ;;  %v13031_v57 = vpack.c.bf16 %v2414_v54, %v2398_v34  ;;  %7443 = vmatpush1.bf16.msra.mxu1 %v11102_v58 }
 0x223   :  { %v13033_v41 = vpack.c.bf16 %v2413_v43, %v2397_v4  ;;  %v1014_v53 = vpop.f32.mrb[116].mxu0  ;;  %5900 = vmatprep.subr.bf16.mxu0 %v11107_v33  ;;  %v13035_v42 = vpack.c.bf16 %v2415_v18, %v2399_v19  ;;  %v1207_v26 = vpop.f32.mrb[116].mxu1  ;;  %7444 = vmatprep.subr.bf16.mxu1 %v11110_v59 }
 0x224   :  { %14655 = vst [vmem:[#allocation108_spill] sm:$0xff] %v13031_v57  ;;  %v1015_v2 = vadd.f32 %v1014_v53, %v12717_v9  ;;  %v1016_v36 = vpop.f32.mrb[117].mxu0  ;;  %v1208_v55 = vadd.f32 %v1207_v26, %v12735_v44  ;;  %v1209_v50 = vpop.f32.mrb[117].mxu1 }
 0x225   :  { %v1017_v34 = vadd.f32 %v1016_v36, %v12724_v6  ;;  %v1018_v46 = vpop.f32.mrb[118].mxu0  ;;  %v1210_v4 = vadd.f32 %v1209_v50, %v12740_v25  ;;  %v1211_v33 = vpop.f32.mrb[118].mxu1 }
 0x226   :  { %v1019_v58 = vadd.f32 %v1018_v46, %v12717_v9  ;;  %v1020_v54 = vpop.f32.mrb[119].mxu0  ;;  %5901 = vmatpush1.bf16.msra.mxu0 %v11105_v62  ;;  %v2430_v19 = vmax.f32 %v1208_v55, 0.0  ;;  %v1212_v43 = vadd.f32 %v1211_v33, %v12735_v44  ;;  %v1213_v59 = vpop.f32.mrb[119].mxu1  ;;  %7445 = vmatpush1.bf16.msra.mxu1 %v11108_v39  ;;  %v2428_v53 = vmax.f32 %v1015_v2, 0.0 }
 0x227   :  { %v1021_v18 = vadd.f32 %v1020_v54, %v12724_v6  ;;  %6063 = vmatprep.subr.bf16.mxu0 %v11113_v37  ;;  %v2431_v26 = vmax.f32 %v1210_v4, 0.0  ;;  %v1214_v57 = vadd.f32 %v1213_v59, %v12740_v25  ;;  %7607 = vmatprep.subr.bf16.mxu1 %v11116_v56  ;;  %v2429_v50 = vmax.f32 %v1017_v34, 0.0 }
 0x228   :  { %v2444_v36 = vmax.f32 %v1019_v58, 0.0  ;;  %9438 = vmatmul.mubr.msk.bf16.gmra.mrb[224].mxu0 %vm415_vm0, %v12152_v5  ;;  %v2446_v46 = vmax.f32 %v1212_v43, 0.0  ;;  %9454 = vmatmul.mubr.msk.bf16.gmra.mrb[224].mxu1 %vm415_vm0, %v12152_v5 }
 0x229   :  { %v2445_v62 = vmax.f32 %v1021_v18, 0.0  ;;  %1744 = vmatprep.mubr.bf16.mxu0 %v14571_v21  ;;  %v2447_v39 = vmax.f32 %v1214_v57, 0.0  ;;  %1937 = vmatprep.mubr.bf16.mxu1 %v14571_v21 }
 0x22a   :  { %v13050_v55 = vpack.c.bf16 %v2444_v36, %v2428_v53  ;;  %v13053_v37 = vpack.c.bf16 %v2446_v46, %v2430_v19 }
 0x22b   :  { %v13055_v2 = vpack.c.bf16 %v2445_v62, %v2429_v50  ;;  %v1024_v4 = vpop.f32.mrb[120].mxu0  ;;  %v13057_v58 = vpack.c.bf16 %v2447_v39, %v2431_v26  ;;  %v1217_v34 = vpop.f32.mrb[120].mxu1 }
 0x22c   :  { %14656 = vst [vmem:[#allocation109_spill] sm:$0xff] %v13053_v37  ;;  %v1025_v56 = vadd.f32 %v1024_v4, %v12717_v9  ;;  %v1026_v33 = vpop.f32.mrb[121].mxu0  ;;  %v1218_v5 = vadd.f32 %v1217_v34, %v12735_v44  ;;  %v1219_v43 = vpop.f32.mrb[121].mxu1 }
 0x22d   :  { %14657 = vst [vmem:[#allocation110_spill] sm:$0xff] %v13057_v58  ;;  %v1027_v54 = vadd.f32 %v1026_v33, %v12724_v6  ;;  %v1028_v18 = vpop.f32.mrb[122].mxu0  ;;  %v1220_v57 = vadd.f32 %v1219_v43, %v12740_v25  ;;  %v1221_v59 = vpop.f32.mrb[122].mxu1 }
 0x22e   :  { %v1029_v19 = vadd.f32 %v1028_v18, %v12717_v9  ;;  %v1030_v53 = vpop.f32.mrb[123].mxu0  ;;  %v2462_v36 = vmax.f32 %v1218_v5, 0.0  ;;  %v1222_v26 = vadd.f32 %v1221_v59, %v12735_v44  ;;  %v1223_v46 = vpop.f32.mrb[123].mxu1  ;;  %v2460_v62 = vmax.f32 %v1025_v56, 0.0  ;;  %v172_v59 = vld [vmem:[#allocation5 + $0x8] sm:$0xff] }
 0x22f   :  { %v1031_v50 = vadd.f32 %v1030_v53, %v12724_v6  ;;  %v2463_v39 = vmax.f32 %v1220_v57, 0.0  ;;  %v1224_v34 = vadd.f32 %v1223_v46, %v12740_v25  ;;  %v2461_v33 = vmax.f32 %v1027_v54, 0.0 }
 0x230   :  { %v2476_v4 = vmax.f32 %v1029_v19, 0.0  ;;  %9439 = vmatmul.mubr.msk.bf16.gmra.mrb[228].mxu0 %vm415_vm0, %v12166_v8  ;;  %v2478_v43 = vmax.f32 %v1222_v26, 0.0  ;;  %9455 = vmatmul.mubr.msk.bf16.gmra.mrb[228].mxu1 %vm415_vm0, %v12166_v8 }
 0x231   :  { %v2477_v37 = vmax.f32 %v1031_v50, 0.0  ;;  %1754 = vmatprep.mubr.bf16.mxu0 %v14571_v21  ;;  %v2479_v18 = vmax.f32 %v1224_v34, 0.0  ;;  %1947 = vmatprep.mubr.bf16.mxu1 %v14571_v21 }
 0x232   :  { %v13072_v5 = vpack.c.bf16 %v2476_v4, %v2460_v62  ;;  %v13075_v56 = vpack.c.bf16 %v2478_v43, %v2462_v36  ;;  %v13087_v43 = vrot.slane %v172_v59, %v12344_v47 }
 0x233   :  { %v13077_v57 = vpack.c.bf16 %v2477_v37, %v2461_v33  ;;  %v1034_v19 = vpop.f32.mrb[124].mxu0  ;;  %v13079_v53 = vpack.c.bf16 %v2479_v18, %v2463_v39  ;;  %v1227_v26 = vpop.f32.mrb[124].mxu1 }
 0x234   :  { %14658 = vst [vmem:[#allocation111_spill] sm:$0xff] %v13075_v56  ;;  %v1035_v54 = vadd.f32 %v1034_v19, %v12717_v9  ;;  %v1036_v50 = vpop.f32.mrb[125].mxu0  ;;  %v1228_v8 = vadd.f32 %v1227_v26, %v12735_v44  ;;  %v1229_v62 = vpop.f32.mrb[125].mxu1  ;;  %v13092_v26 = vrot.slane %v172_v59, %v12350_v51 }
 0x235   :  { %14659 = vst [vmem:[#allocation112_spill] sm:$0xff] %v13079_v53  ;;  %v1037_v46 = vadd.f32 %v1036_v50, %v12724_v6  ;;  %v1038_v4 = vpop.f32.mrb[126].mxu0  ;;  %v1230_v34 = vadd.f32 %v1229_v62, %v12740_v25  ;;  %v1231_v37 = vpop.f32.mrb[126].mxu1 }
 0x236   :  { %v1039_v36 = vadd.f32 %v1038_v4, %v12717_v9  ;;  %v1040_v33 = vpop.f32.mrb[127].mxu0  ;;  %v2494_v39 = vmax.f32 %v1228_v8, 0.0  ;;  %v1232_v18 = vadd.f32 %v1231_v37, %v12735_v44  ;;  %v1233_v56 = vpop.f32.mrb[127].mxu1  ;;  %v2492_v50 = vmax.f32 %v1035_v54, 0.0 }
 0x237   :  { %v1041_v19 = vadd.f32 %v1040_v33, %v12724_v6  ;;  %v2495_v53 = vmax.f32 %v1230_v34, 0.0  ;;  %v1234_v62 = vadd.f32 %v1233_v56, %v12740_v25  ;;  %v2493_v9 = vmax.f32 %v1037_v46, 0.0 }
 0x238   :  { %v2508_v58 = vmax.f32 %v1039_v36, 0.0  ;;  %9440 = vmatmul.mubr.msk.bf16.gmra.mrb[232].mxu0 %vm415_vm0, %v12180_v11  ;;  %v2510_v4 = vmax.f32 %v1232_v18, 0.0  ;;  %9456 = vmatmul.mubr.msk.bf16.gmra.mrb[232].mxu1 %vm415_vm0, %v12180_v11  ;;  %v13100_v6 = vrot.slane %v172_v59, %v12347_v49  ;;  %v13106_v8 = vrot.slane %v172_v59, %v12353_v52 }
 0x239   :  { %v2509_v47 = vmax.f32 %v1041_v19, 0.0  ;;  %1764 = vmatprep.mubr.bf16.mxu0 %v14571_v21  ;;  %v2511_v54 = vmax.f32 %v1234_v62, 0.0  ;;  %1957 = vmatprep.mubr.bf16.mxu1 %v14571_v21 }
 0x23a   :  { %v13103_v44 = vpack.c.bf16 %v2508_v58, %v2492_v50  ;;  %v13109_v25 = vpack.c.bf16 %v2510_v4, %v2494_v39 }
 0x23b   :  { %v13111_v56 = vpack.c.bf16 %v2509_v47, %v2493_v9  ;;  %v1270_v46 = vpop.f32.mrb[128].mxu0  ;;  %v13113_v34 = vpack.c.bf16 %v2511_v54, %v2495_v53  ;;  %v1463_v36 = vpop.f32.mrb[128].mxu1 }
 0x23c   :  { %v1271_v11 = vadd.f32 %v1270_v46, %v13087_v43  ;;  %v1272_v37 = vpop.f32.mrb[129].mxu0  ;;  %v1464_v58 = vadd.f32 %v1463_v36, %v13100_v6  ;;  %v1465_v18 = vpop.f32.mrb[129].mxu1 }
 0x23d   :  { %v1273_v33 = vadd.f32 %v1272_v37, %v13092_v26  ;;  %v1274_v59 = vpop.f32.mrb[130].mxu0  ;;  %v1466_v19 = vadd.f32 %v1465_v18, %v13106_v8  ;;  %v1467_v50 = vpop.f32.mrb[130].mxu1 }
 0x23e   :  { %v1275_v39 = vadd.f32 %v1274_v59, %v13087_v43  ;;  %v1276_v47 = vpop.f32.mrb[131].mxu0  ;;  %v2018_v62 = vmax.f32 %v1464_v58, 0.0  ;;  %v1468_v53 = vadd.f32 %v1467_v50, %v13100_v6  ;;  %v1469_v4 = vpop.f32.mrb[131].mxu1  ;;  %v2016_v54 = vmax.f32 %v1271_v11, 0.0 }
 0x23f   :  { %v1277_v9 = vadd.f32 %v1276_v47, %v13092_v26  ;;  %v2019_v46 = vmax.f32 %v1466_v19, 0.0  ;;  %v1470_v36 = vadd.f32 %v1469_v4, %v13106_v8  ;;  %v2017_v37 = vmax.f32 %v1273_v33, 0.0 }
 0x240   :  { %v2032_v52 = vmax.f32 %v1275_v39, 0.0  ;;  %9441 = vmatmul.mubr.msk.bf16.gmra.mrb[236].mxu0 %vm415_vm0, %v12194_v14  ;;  %v2034_v18 = vmax.f32 %v1468_v53, 0.0  ;;  %9457 = vmatmul.mubr.msk.bf16.gmra.mrb[236].mxu1 %vm415_vm0, %v12194_v14 }
 0x241   :  { %v2033_v51 = vmax.f32 %v1277_v9, 0.0  ;;  %1774 = vmatprep.mubr.bf16.mxu0 %v14571_v21  ;;  %v2035_v59 = vmax.f32 %v1470_v36, 0.0  ;;  %1967 = vmatprep.mubr.bf16.mxu1 %v14571_v21 }
 0x242   :  { %v13128_v58 = vpack.c.bf16 %v2032_v52, %v2016_v54  ;;  %v13131_v11 = vpack.c.bf16 %v2034_v18, %v2018_v62 }
 0x243   :  { %v13133_v19 = vpack.c.bf16 %v2033_v51, %v2017_v37  ;;  %v1280_v39 = vpop.f32.mrb[132].mxu0  ;;  %v13135_v50 = vpack.c.bf16 %v2035_v59, %v2019_v46  ;;  %v1473_v47 = vpop.f32.mrb[132].mxu1 }
 0x244   :  { %14660 = vst [vmem:[#allocation113_spill] sm:$0xff] %v13131_v11  ;;  %v1281_v33 = vadd.f32 %v1280_v39, %v13087_v43  ;;  %v1282_v53 = vpop.f32.mrb[133].mxu0  ;;  %v1474_v14 = vadd.f32 %v1473_v47, %v13100_v6  ;;  %v1475_v52 = vpop.f32.mrb[133].mxu1 }
 0x245   :  { %14661 = vst [vmem:[#allocation114_spill] sm:$0xff] %v13135_v50  ;;  %v1283_v9 = vadd.f32 %v1282_v53, %v13092_v26  ;;  %v1284_v4 = vpop.f32.mrb[134].mxu0  ;;  %v1476_v54 = vadd.f32 %v1475_v52, %v13106_v8  ;;  %v1477_v36 = vpop.f32.mrb[134].mxu1 }
 0x246   :  { %v1285_v62 = vadd.f32 %v1284_v4, %v13087_v43  ;;  %v1286_v51 = vpop.f32.mrb[135].mxu0  ;;  %v2050_v37 = vmax.f32 %v1474_v14, 0.0  ;;  %v1478_v46 = vadd.f32 %v1477_v36, %v13100_v6  ;;  %v1479_v59 = vpop.f32.mrb[135].mxu1  ;;  %v2048_v39 = vmax.f32 %v1281_v33, 0.0 }
 0x247   :  { %v1287_v18 = vadd.f32 %v1286_v51, %v13092_v26  ;;  %v2051_v49 = vmax.f32 %v1476_v54, 0.0  ;;  %v1480_v47 = vadd.f32 %v1479_v59, %v13106_v8  ;;  %v2049_v53 = vmax.f32 %v1283_v9, 0.0 }
 0x248   :  { %v2064_v11 = vmax.f32 %v1285_v62, 0.0  ;;  %9442 = vmatmul.mubr.msk.bf16.gmra.mrb[240].mxu0 %vm415_vm0, %v12208_v17  ;;  %v2066_v52 = vmax.f32 %v1478_v46, 0.0  ;;  %9458 = vmatmul.mubr.msk.bf16.gmra.mrb[240].mxu1 %vm415_vm0, %v12208_v17 }
 0x249   :  { %v2065_v50 = vmax.f32 %v1287_v18, 0.0  ;;  %1784 = vmatprep.mubr.bf16.mxu0 %v14571_v21  ;;  %v2067_v4 = vmax.f32 %v1480_v47, 0.0  ;;  %1977 = vmatprep.mubr.bf16.mxu1 %v14571_v21 }
 0x24a   :  { %v13150_v14 = vpack.c.bf16 %v2064_v11, %v2048_v39  ;;  %v13153_v33 = vpack.c.bf16 %v2066_v52, %v2050_v37 }
 0x24b   :  { %v13155_v54 = vpack.c.bf16 %v2065_v50, %v2049_v53  ;;  %v1290_v62 = vpop.f32.mrb[136].mxu0  ;;  %v13157_v36 = vpack.c.bf16 %v2067_v4, %v2051_v49  ;;  %v1483_v51 = vpop.f32.mrb[136].mxu1 }
 0x24c   :  { %14662 = vst [vmem:[#allocation115_spill] sm:$0xff] %v13150_v14  ;;  %14663 = vst [vmem:[#allocation116_spill] sm:$0xff] %v13153_v33  ;;  %v1291_v9 = vadd.f32 %v1290_v62, %v13087_v43  ;;  %v1292_v46 = vpop.f32.mrb[137].mxu0  ;;  %v1484_v17 = vadd.f32 %v1483_v51, %v13100_v6  ;;  %v1485_v11 = vpop.f32.mrb[137].mxu1 }
 0x24d   :  { %14664 = vst [vmem:[#allocation117_spill] sm:$0xff] %v13157_v36  ;;  %v1293_v18 = vadd.f32 %v1292_v46, %v13092_v26  ;;  %v1294_v59 = vpop.f32.mrb[138].mxu0  ;;  %v1486_v39 = vadd.f32 %v1485_v11, %v13106_v8  ;;  %v1487_v47 = vpop.f32.mrb[138].mxu1 }
 0x24e   :  { %v1295_v37 = vadd.f32 %v1294_v59, %v13087_v43  ;;  %v1296_v50 = vpop.f32.mrb[139].mxu0  ;;  %v2082_v53 = vmax.f32 %v1484_v17, 0.0  ;;  %v1488_v49 = vadd.f32 %v1487_v47, %v13100_v6  ;;  %v1489_v4 = vpop.f32.mrb[139].mxu1  ;;  %v2080_v62 = vmax.f32 %v1291_v9, 0.0 }
 0x24f   :  { %v1297_v52 = vadd.f32 %v1296_v50, %v13092_v26  ;;  %v2083_v33 = vmax.f32 %v1486_v39, 0.0  ;;  %v1490_v51 = vadd.f32 %v1489_v4, %v13106_v8  ;;  %v2081_v46 = vmax.f32 %v1293_v18, 0.0 }
 0x250   :  { %v2096_v36 = vmax.f32 %v1295_v37, 0.0  ;;  %9443 = vmatmul.mubr.msk.bf16.gmra.mrb[244].mxu0 %vm415_vm0, %v12222_v20  ;;  %v2098_v11 = vmax.f32 %v1488_v49, 0.0  ;;  %9459 = vmatmul.mubr.msk.bf16.gmra.mrb[244].mxu1 %vm415_vm0, %v12222_v20 }
 0x251   :  { %v2097_v14 = vmax.f32 %v1297_v52, 0.0  ;;  %1794 = vmatprep.mubr.bf16.mxu0 %v14571_v21  ;;  %v2099_v59 = vmax.f32 %v1490_v51, 0.0  ;;  %1987 = vmatprep.mubr.bf16.mxu1 %v14571_v21 }
 0x252   :  { %v13172_v17 = vpack.c.bf16 %v2096_v36, %v2080_v62  ;;  %v13175_v9 = vpack.c.bf16 %v2098_v11, %v2082_v53 }
 0x253   :  { %v13177_v39 = vpack.c.bf16 %v2097_v14, %v2081_v46  ;;  %v1300_v37 = vpop.f32.mrb[140].mxu0  ;;  %v13179_v47 = vpack.c.bf16 %v2099_v59, %v2083_v33  ;;  %v1493_v50 = vpop.f32.mrb[140].mxu1 }
 0x254   :  { %14665 = vst [vmem:[#allocation118_spill] sm:$0xff] %v13172_v17  ;;  %14666 = vst [vmem:[#allocation119_spill] sm:$0xff] %v13175_v9  ;;  %v1301_v18 = vadd.f32 %v1300_v37, %v13087_v43  ;;  %v1302_v49 = vpop.f32.mrb[141].mxu0  ;;  %v1494_v20 = vadd.f32 %v1493_v50, %v13100_v6  ;;  %v1495_v36 = vpop.f32.mrb[141].mxu1 }
 0x255   :  { %14667 = vst [vmem:[#allocation120_spill] sm:$0xff] %v13179_v47  ;;  %v1303_v52 = vadd.f32 %v1302_v49, %v13092_v26  ;;  %v1304_v4 = vpop.f32.mrb[142].mxu0  ;;  %v1496_v62 = vadd.f32 %v1495_v36, %v13106_v8  ;;  %v1497_v51 = vpop.f32.mrb[142].mxu1 }
 0x256   :  { %v1305_v53 = vadd.f32 %v1304_v4, %v13087_v43  ;;  %v1306_v14 = vpop.f32.mrb[143].mxu0  ;;  %v2114_v46 = vmax.f32 %v1494_v20, 0.0  ;;  %v1498_v33 = vadd.f32 %v1497_v51, %v13100_v6  ;;  %v1499_v59 = vpop.f32.mrb[143].mxu1  ;;  %v2112_v37 = vmax.f32 %v1301_v18, 0.0 }
 0x257   :  { %v1307_v11 = vadd.f32 %v1306_v14, %v13092_v26  ;;  %v2115_v9 = vmax.f32 %v1496_v62, 0.0  ;;  %v1500_v50 = vadd.f32 %v1499_v59, %v13106_v8  ;;  %v2113_v49 = vmax.f32 %v1303_v52, 0.0 }
 0x258   :  { %v2128_v47 = vmax.f32 %v1305_v53, 0.0  ;;  %9444 = vmatmul.mubr.msk.bf16.gmra.mrb[248].mxu0 %vm415_vm0, %v12236_v23  ;;  %v2130_v36 = vmax.f32 %v1498_v33, 0.0  ;;  %9460 = vmatmul.mubr.msk.bf16.gmra.mrb[248].mxu1 %vm415_vm0, %v12236_v23 }
 0x259   :  { %v2129_v17 = vmax.f32 %v1307_v11, 0.0  ;;  %1804 = vmatprep.mubr.bf16.mxu0 %v14571_v21  ;;  %v2131_v4 = vmax.f32 %v1500_v50, 0.0  ;;  %1997 = vmatprep.mubr.bf16.mxu1 %v14571_v21 }
 0x25a   :  { %v13194_v20 = vpack.c.bf16 %v2128_v47, %v2112_v37  ;;  %v13197_v18 = vpack.c.bf16 %v2130_v36, %v2114_v46 }
 0x25b   :  { %v13199_v62 = vpack.c.bf16 %v2129_v17, %v2113_v49  ;;  %v1310_v53 = vpop.f32.mrb[144].mxu0  ;;  %v13201_v51 = vpack.c.bf16 %v2131_v4, %v2115_v9  ;;  %v1503_v14 = vpop.f32.mrb[144].mxu1 }
 0x25c   :  { %14668 = vst [vmem:[#allocation121_spill] sm:$0xff] %v13194_v20  ;;  %14669 = vst [vmem:[#allocation122_spill] sm:$0xff] %v13197_v18  ;;  %v1311_v52 = vadd.f32 %v1310_v53, %v13087_v43  ;;  %v1312_v33 = vpop.f32.mrb[145].mxu0  ;;  %v1504_v23 = vadd.f32 %v1503_v14, %v13100_v6  ;;  %v1505_v47 = vpop.f32.mrb[145].mxu1 }
 0x25d   :  { %14670 = vst [vmem:[#allocation123_spill] sm:$0xff] %v13201_v51  ;;  %v1313_v11 = vadd.f32 %v1312_v33, %v13092_v26  ;;  %v1314_v59 = vpop.f32.mrb[146].mxu0  ;;  %v1506_v37 = vadd.f32 %v1505_v47, %v13106_v8  ;;  %v1507_v46 = vpop.f32.mrb[146].mxu1 }
 0x25e   :  { %v1315_v21 = vadd.f32 %v1314_v59, %v13087_v43  ;;  %v1316_v17 = vpop.f32.mrb[147].mxu0  ;;  %v2146_v50 = vmax.f32 %v1504_v23, 0.0  ;;  %v1508_v9 = vadd.f32 %v1507_v46, %v13100_v6  ;;  %v1509_v36 = vpop.f32.mrb[147].mxu1  ;;  %v2144_v4 = vmax.f32 %v1311_v52, 0.0 }
 0x25f   :  { %v1317_v49 = vadd.f32 %v1316_v17, %v13092_v26  ;;  %v2147_v53 = vmax.f32 %v1506_v37, 0.0  ;;  %v1510_v14 = vadd.f32 %v1509_v36, %v13106_v8  ;;  %v2145_v33 = vmax.f32 %v1313_v11, 0.0 }
 0x260   :  { %v2160_v18 = vmax.f32 %v1315_v21, 0.0  ;;  %9445 = vmatmul.mubr.msk.bf16.gmra.mrb[252].mxu0 %vm415_vm0, %v12250_v27  ;;  %v2162_v47 = vmax.f32 %v1508_v9, 0.0  ;;  %9461 = vmatmul.mubr.msk.bf16.gmra.mrb[252].mxu1 %vm415_vm0, %v12250_v27 }
 0x261   :  { %v2161_v51 = vmax.f32 %v1317_v49, 0.0  ;;  %5902 = vmatprep.mubr.bf16.mxu0 %v12391_v38  ;;  %v2163_v59 = vmax.f32 %v1510_v14, 0.0  ;;  %7446 = vmatprep.mubr.bf16.mxu1 %v12391_v38  ;;  %v11111_v14 = vld [vmem:[#allocation7 + $0x200] ss:$16 sps:$4 sm:$0xff]  }
 0x262   :  { %v13216_v23 = vpack.c.bf16 %v2160_v18, %v2144_v4  ;;  %v13219_v52 = vpack.c.bf16 %v2162_v47, %v2146_v50 }
 0x263   :  { %v13221_v37 = vpack.c.bf16 %v2161_v51, %v2145_v33  ;;  %v1320_v21 = vpop.f32.mrb[148].mxu0  ;;  %v13223_v46 = vpack.c.bf16 %v2163_v59, %v2147_v53  ;;  %v1513_v17 = vpop.f32.mrb[148].mxu1 }
 0x264   :  { %14671 = vst [vmem:[#allocation124_spill] sm:$0xff] %v13216_v23  ;;  %14672 = vst [vmem:[#allocation125_spill] sm:$0xff] %v13219_v52  ;;  %v1321_v11 = vadd.f32 %v1320_v21, %v13087_v43  ;;  %v1322_v9 = vpop.f32.mrb[149].mxu0  ;;  %v1514_v27 = vadd.f32 %v1513_v17, %v13100_v6  ;;  %v1515_v18 = vpop.f32.mrb[149].mxu1  ;;  %v11114_v21 = vld [vmem:[#allocation7 + $0x208] ss:$16 sps:$4 sm:$0xff]  }
 0x265   :  { %14673 = vst [vmem:[#allocation126_spill] sm:$0xff] %v13221_v37  ;;  %14674 = vst [vmem:[#allocation127_spill] sm:$0xff] %v13223_v46  ;;  %v1323_v49 = vadd.f32 %v1322_v9, %v13092_v26  ;;  %v1324_v36 = vpop.f32.mrb[150].mxu0  ;;  %v1516_v4 = vadd.f32 %v1515_v18, %v13106_v8  ;;  %v1517_v50 = vpop.f32.mrb[150].mxu1  ;;  %v11119_v52 = vld [vmem:[#allocation7 + $0x224] ss:$16 sps:$4 sm:$0xff]  }
 0x266   :  { %v1325_v38 = vadd.f32 %v1324_v36, %v13087_v43  ;;  %v1326_v51 = vpop.f32.mrb[151].mxu0  ;;  %v2178_v33 = vmax.f32 %v1514_v27, 0.0  ;;  %v1518_v53 = vadd.f32 %v1517_v50, %v13100_v6  ;;  %v1519_v59 = vpop.f32.mrb[151].mxu1  ;;  %v2176_v17 = vmax.f32 %v1321_v11, 0.0  ;;  %v11122_v18 = vld [vmem:[#allocation7 + $0x22c] ss:$16 sps:$4 sm:$0xff]  }
 0x267   :  { %v1327_v47 = vadd.f32 %v1326_v51, %v13092_v26  ;;  %v2179_v46 = vmax.f32 %v1516_v4, 0.0  ;;  %v1520_v23 = vadd.f32 %v1519_v59, %v13106_v8  ;;  %v2177_v36 = vmax.f32 %v1323_v49, 0.0  ;;  %v11117_v11 = vld [vmem:[#allocation7 + $0x220] ss:$16 sps:$4 sm:$0xff]   ;;  %v11120_v49 = vld [vmem:[#allocation7 + $0x228] ss:$16 sps:$4 sm:$0xff]  }
 0x268   :  { %v2192_v9 = vmax.f32 %v1325_v38, 0.0  ;;  %5903 = vmatmul.mubr.bf16.vlgmr.msra.gmra.mrb[0].mxu0 %v12386_v31  ;;  %v2194_v37 = vmax.f32 %v1518_v53, 0.0  ;;  %7447 = vmatmul.mubr.bf16.vlgmr.msra.gmra.mrb[0].mxu1 %v12386_v31  ;;  %v11125_v53 = vld [vmem:[#allocation7 + $0x244] ss:$16 sps:$4 sm:$0xff]  }
 0x269   :  { %v2193_v20 = vmax.f32 %v1327_v47, 0.0  ;;  %5912 = vmatprep.mubr.bf16.mxu0 %v12411_v32  ;;  %v2195_v50 = vmax.f32 %v1520_v23, 0.0  ;;  %6064 = vmatpush1.bf16.msra.mxu0 %v11111_v14  ;;  %v11128_v23 = vld [vmem:[#allocation7 + $0x24c] ss:$16 sps:$4 sm:$0xff]  }
 0x26a   :  { %v13236_v27 = vpack.c.bf16 %v2192_v9, %v2176_v17  ;;  %7456 = vmatprep.mubr.bf16.mxu1 %v12411_v32  ;;  %v13239_v4 = vpack.c.bf16 %v2194_v37, %v2178_v33  ;;  %7608 = vmatpush1.bf16.msra.mxu1 %v11114_v21 }
 0x26b   :  { %v13241_v38 = vpack.c.bf16 %v2193_v20, %v2177_v36  ;;  %v1330_v51 = vpop.f32.mrb[152].mxu0  ;;  %6065 = vmatprep.subr.bf16.mxu0 %v11119_v52  ;;  %v13243_v47 = vpack.c.bf16 %v2195_v50, %v2179_v46  ;;  %v1523_v59 = vpop.f32.mrb[152].mxu1  ;;  %7609 = vmatprep.subr.bf16.mxu1 %v11122_v18  ;;  %v11123_v46 = vld [vmem:[#allocation7 + $0x240] ss:$16 sps:$4 sm:$0xff]  }
 0x26c   :  { %14675 = vst [vmem:[#allocation128_spill] sm:$0xff] %v13236_v27  ;;  %14676 = vst [vmem:[#allocation129_spill] sm:$0xff] %v13239_v4  ;;  %v1331_v31 = vadd.f32 %v1330_v51, %v13087_v43  ;;  %v1332_v17 = vpop.f32.mrb[153].mxu0  ;;  %v1524_v32 = vadd.f32 %v1523_v59, %v13100_v6  ;;  %v1525_v14 = vpop.f32.mrb[153].mxu1  ;;  %v11126_v59 = vld [vmem:[#allocation7 + $0x248] ss:$16 sps:$4 sm:$0xff]  }
 0x26d   :  { %14677 = vst [vmem:[#allocation130_spill] sm:$0xff] %v13241_v38  ;;  %14678 = vst [vmem:[#allocation131_spill] sm:$0xff] %v13243_v47  ;;  %v1333_v37 = vadd.f32 %v1332_v17, %v13092_v26  ;;  %v1334_v20 = vpop.f32.mrb[154].mxu0  ;;  %v1526_v33 = vadd.f32 %v1525_v14, %v13106_v8  ;;  %v1527_v21 = vpop.f32.mrb[154].mxu1  ;;  %6066 = vmatpush1.bf16.msra.mxu0 %v11117_v11  ;;  %v11131_v17 = vld [vmem:[#allocation7 + $0x264] ss:$16 sps:$4 sm:$0xff]  }
 0x26e   :  { %v1335_v52 = vadd.f32 %v1334_v20, %v13087_v43  ;;  %v1336_v9 = vpop.f32.mrb[155].mxu0  ;;  %v2210_v36 = vmax.f32 %v1524_v32, 0.0  ;;  %v1528_v50 = vadd.f32 %v1527_v21, %v13100_v6  ;;  %v1529_v51 = vpop.f32.mrb[155].mxu1  ;;  %7610 = vmatpush1.bf16.msra.mxu1 %v11120_v49  ;;  %6067 = vmatprep.subr.bf16.mxu0 %v11125_v53  ;;  %v2208_v4 = vmax.f32 %v1331_v31, 0.0  ;;  %v11134_v11 = vld [vmem:[#allocation7 + $0x26c] ss:$16 sps:$4 sm:$0xff]  }
 0x26f   :  { %v1337_v18 = vadd.f32 %v1336_v9, %v13092_v26  ;;  %v2211_v47 = vmax.f32 %v1526_v33, 0.0  ;;  %v1530_v14 = vadd.f32 %v1529_v51, %v13106_v8  ;;  %7611 = vmatprep.subr.bf16.mxu1 %v11128_v23  ;;  %v2209_v20 = vmax.f32 %v1333_v37, 0.0  ;;  %v11129_v31 = vld [vmem:[#allocation7 + $0x260] ss:$16 sps:$4 sm:$0xff]   ;;  %v11132_v37 = vld [vmem:[#allocation7 + $0x268] ss:$16 sps:$4 sm:$0xff]  }
 0x270   :  { %v2224_v27 = vmax.f32 %v1335_v52, 0.0  ;;  %5913 = vmatmul.mubr.bf16.gmra.mrb[4].mxu0 %v12409_v28  ;;  %v2226_v32 = vmax.f32 %v1528_v50, 0.0  ;;  %7457 = vmatmul.mubr.bf16.gmra.mrb[4].mxu1 %v12409_v28  ;;  %v11137_v21 = vld [vmem:[#allocation7 + $0x284] ss:$16 sps:$4 sm:$0xff]   ;;  %v11140_v50 = vld [vmem:[#allocation7 + $0x28c] ss:$16 sps:$4 sm:$0xff]  }
 0x271   :  { %v2225_v38 = vmax.f32 %v1337_v18, 0.0  ;;  %5922 = vmatprep.mubr.bf16.mxu0 %v12433_v63  ;;  %v2227_v53 = vmax.f32 %v1530_v14, 0.0  ;;  %7466 = vmatprep.mubr.bf16.mxu1 %v12433_v63 }
 0x272   :  { %v13256_v49 = vpack.c.bf16 %v2224_v27, %v2208_v4  ;;  %6068 = vmatpush1.bf16.msra.mxu0 %v11123_v46  ;;  %v13259_v33 = vpack.c.bf16 %v2226_v32, %v2210_v36  ;;  %7612 = vmatpush1.bf16.msra.mxu1 %v11126_v59 }
 0x273   :  { %v13261_v52 = vpack.c.bf16 %v2225_v38, %v2209_v20  ;;  %v1340_v23 = vpop.f32.mrb[156].mxu0  ;;  %6069 = vmatprep.subr.bf16.mxu0 %v11131_v17  ;;  %v13263_v9 = vpack.c.bf16 %v2227_v53, %v2211_v47  ;;  %v1533_v27 = vpop.f32.mrb[156].mxu1  ;;  %7613 = vmatprep.subr.bf16.mxu1 %v11134_v11  ;;  %v11135_v47 = vld [vmem:[#allocation7 + $0x280] ss:$16 sps:$4 sm:$0xff]   ;;  %v11138_v53 = vld [vmem:[#allocation7 + $0x288] ss:$16 sps:$4 sm:$0xff]  }
 0x274   :  { %14679 = vst [vmem:[#allocation132_spill] sm:$0xff] %v13259_v33  ;;  %v1341_v28 = vadd.f32 %v1340_v23, %v13087_v43  ;;  %v1342_v4 = vpop.f32.mrb[157].mxu0  ;;  %v1534_v63 = vadd.f32 %v1533_v27, %v13100_v6  ;;  %v1535_v36 = vpop.f32.mrb[157].mxu1  ;;  %v11143_v23 = vld [vmem:[#allocation7 + $0x2a4] ss:$16 sps:$4 sm:$0xff]  }
 0x275   :  { %14680 = vst [vmem:[#allocation133_spill] sm:$0xff] %v13263_v9  ;;  %v1343_v46 = vadd.f32 %v1342_v4, %v13092_v26  ;;  %v1344_v38 = vpop.f32.mrb[158].mxu0  ;;  %v1536_v18 = vadd.f32 %v1535_v36, %v13106_v8  ;;  %v1537_v59 = vpop.f32.mrb[158].mxu1 }
 0x276   :  { %v1345_v51 = vadd.f32 %v1344_v38, %v13087_v43  ;;  %v1346_v17 = vpop.f32.mrb[159].mxu0  ;;  %6070 = vmatpush1.bf16.msra.mxu0 %v11129_v31  ;;  %v2242_v14 = vmax.f32 %v1534_v63, 0.0  ;;  %v1538_v20 = vadd.f32 %v1537_v59, %v13100_v6  ;;  %v1539_v32 = vpop.f32.mrb[159].mxu1  ;;  %7614 = vmatpush1.bf16.msra.mxu1 %v11132_v37  ;;  %v2240_v27 = vmax.f32 %v1341_v28, 0.0  ;;  %v11146_v31 = vld [vmem:[#allocation7 + $0x2ac] ss:$16 sps:$4 sm:$0xff]  }
 0x277   :  { %v1347_v11 = vadd.f32 %v1346_v17, %v13092_v26  ;;  %6071 = vmatprep.subr.bf16.mxu0 %v11137_v21  ;;  %v2243_v4 = vmax.f32 %v1536_v18, 0.0  ;;  %v1540_v36 = vadd.f32 %v1539_v32, %v13106_v8  ;;  %7615 = vmatprep.subr.bf16.mxu1 %v11140_v50  ;;  %v2241_v38 = vmax.f32 %v1343_v46, 0.0  ;;  %v11141_v28 = vld [vmem:[#allocation7 + $0x2a0] ss:$16 sps:$4 sm:$0xff]   ;;  %v11144_v46 = vld [vmem:[#allocation7 + $0x2a8] ss:$16 sps:$4 sm:$0xff]  }
 0x278   :  { %v2256_v33 = vmax.f32 %v1345_v51, 0.0  ;;  %5923 = vmatmul.mubr.bf16.gmra.mrb[8].mxu0 %v12431_v30  ;;  %v2258_v63 = vmax.f32 %v1538_v20, 0.0  ;;  %7467 = vmatmul.mubr.bf16.gmra.mrb[8].mxu1 %v12431_v30  ;;  %v11149_v59 = vld [vmem:[#allocation7 + $0x2c4] ss:$16 sps:$4 sm:$0xff]  }
 0x279   :  { %v2257_v9 = vmax.f32 %v1347_v11, 0.0  ;;  %5932 = vmatprep.mubr.bf16.mxu0 %v12455_v15  ;;  %v2259_v21 = vmax.f32 %v1540_v36, 0.0  ;;  %7476 = vmatprep.mubr.bf16.mxu1 %v12455_v15  ;;  %v11152_v11 = vld [vmem:[#allocation7 + $0x2cc] ss:$16 sps:$4 sm:$0xff]  }
 0x27a   :  { %v13276_v37 = vpack.c.bf16 %v2256_v33, %v2240_v27  ;;  %6072 = vmatpush1.bf16.msra.mxu0 %v11135_v47  ;;  %v13279_v18 = vpack.c.bf16 %v2258_v63, %v2242_v14  ;;  %7616 = vmatpush1.bf16.msra.mxu1 %v11138_v53 }
 0x27b   :  { %v13281_v51 = vpack.c.bf16 %v2257_v9, %v2241_v38  ;;  %v1350_v50 = vpop.f32.mrb[160].mxu0  ;;  %6073 = vmatprep.subr.bf16.mxu0 %v11143_v23  ;;  %v13283_v17 = vpack.c.bf16 %v2259_v21, %v2243_v4  ;;  %v1543_v33 = vpop.f32.mrb[160].mxu1  ;;  %7617 = vmatprep.subr.bf16.mxu1 %v11146_v31  ;;  %v11147_v4 = vld [vmem:[#allocation7 + $0x2c0] ss:$16 sps:$4 sm:$0xff]   ;;  %v11150_v21 = vld [vmem:[#allocation7 + $0x2c8] ss:$16 sps:$4 sm:$0xff]  }
 0x27c   :  { %14681 = vst [vmem:[#allocation134_spill] sm:$0xff] %v13279_v18  ;;  %v1351_v30 = vadd.f32 %v1350_v50, %v13087_v43  ;;  %v1352_v20 = vpop.f32.mrb[161].mxu0  ;;  %v1544_v15 = vadd.f32 %v1543_v33, %v13100_v6  ;;  %v1545_v14 = vpop.f32.mrb[161].mxu1  ;;  %v11155_v50 = vld [vmem:[#allocation7 + $0x2e4] ss:$16 sps:$4 sm:$0xff]  }
 0x27d   :  { %14682 = vst [vmem:[#allocation135_spill] sm:$0xff] %v13283_v17  ;;  %v1353_v47 = vadd.f32 %v1352_v20, %v13092_v26  ;;  %v1354_v9 = vpop.f32.mrb[162].mxu0  ;;  %v1546_v32 = vadd.f32 %v1545_v14, %v13106_v8  ;;  %v1547_v23 = vpop.f32.mrb[162].mxu1 }
 0x27e   :  { %v1355_v53 = vadd.f32 %v1354_v9, %v13087_v43  ;;  %v1356_v27 = vpop.f32.mrb[163].mxu0  ;;  %6074 = vmatpush1.bf16.msra.mxu0 %v11141_v28  ;;  %v2274_v36 = vmax.f32 %v1544_v15, 0.0  ;;  %v1548_v38 = vadd.f32 %v1547_v23, %v13100_v6  ;;  %v1549_v63 = vpop.f32.mrb[163].mxu1  ;;  %7618 = vmatpush1.bf16.msra.mxu1 %v11144_v46  ;;  %v2272_v33 = vmax.f32 %v1351_v30, 0.0  ;;  %v11158_v28 = vld [vmem:[#allocation7 + $0x2ec] ss:$16 sps:$4 sm:$0xff]  }
 0x27f   :  { %v1357_v31 = vadd.f32 %v1356_v27, %v13092_v26  ;;  %6075 = vmatprep.subr.bf16.mxu0 %v11149_v59  ;;  %v2275_v20 = vmax.f32 %v1546_v32, 0.0  ;;  %v1550_v14 = vadd.f32 %v1549_v63, %v13106_v8  ;;  %7619 = vmatprep.subr.bf16.mxu1 %v11152_v11  ;;  %v2273_v9 = vmax.f32 %v1353_v47, 0.0  ;;  %v11153_v30 = vld [vmem:[#allocation7 + $0x2e0] ss:$16 sps:$4 sm:$0xff]   ;;  %v11156_v47 = vld [vmem:[#allocation7 + $0x2e8] ss:$16 sps:$4 sm:$0xff]  }
 0x280   :  { %v2288_v18 = vmax.f32 %v1355_v53, 0.0  ;;  %5933 = vmatmul.mubr.bf16.gmra.mrb[12].mxu0 %v12453_v3  ;;  %v2290_v15 = vmax.f32 %v1548_v38, 0.0  ;;  %7477 = vmatmul.mubr.bf16.gmra.mrb[12].mxu1 %v12453_v3  ;;  %v11161_v23 = vld [vmem:[#allocation7 + $0x304] ss:$16 sps:$4 sm:$0xff]  }
 0x281   :  { %v2289_v17 = vmax.f32 %v1357_v31, 0.0  ;;  %5942 = vmatprep.mubr.bf16.mxu0 %v12477_v40  ;;  %v2291_v59 = vmax.f32 %v1550_v14, 0.0  ;;  %7486 = vmatprep.mubr.bf16.mxu1 %v12477_v40  ;;  %v11164_v31 = vld [vmem:[#allocation7 + $0x30c] ss:$16 sps:$4 sm:$0xff]  }
 0x282   :  { %v13296_v46 = vpack.c.bf16 %v2288_v18, %v2272_v33  ;;  %6076 = vmatpush1.bf16.msra.mxu0 %v11147_v4  ;;  %v13299_v32 = vpack.c.bf16 %v2290_v15, %v2274_v36  ;;  %7620 = vmatpush1.bf16.msra.mxu1 %v11150_v21 }
 0x283   :  { %v13301_v53 = vpack.c.bf16 %v2289_v17, %v2273_v9  ;;  %v1360_v11 = vpop.f32.mrb[164].mxu0  ;;  %6077 = vmatprep.subr.bf16.mxu0 %v11155_v50  ;;  %v13303_v27 = vpack.c.bf16 %v2291_v59, %v2275_v20  ;;  %v1553_v18 = vpop.f32.mrb[164].mxu1  ;;  %7621 = vmatprep.subr.bf16.mxu1 %v11158_v28  ;;  %v11159_v20 = vld [vmem:[#allocation7 + $0x300] ss:$16 sps:$4 sm:$0xff]   ;;  %v11162_v59 = vld [vmem:[#allocation7 + $0x308] ss:$16 sps:$4 sm:$0xff]  }
 0x284   :  { %14683 = vst [vmem:[#allocation136_spill] sm:$0xff] %v13299_v32  ;;  %v1361_v3 = vadd.f32 %v1360_v11, %v13087_v43  ;;  %v1362_v38 = vpop.f32.mrb[165].mxu0  ;;  %v1554_v40 = vadd.f32 %v1553_v18, %v13100_v6  ;;  %v1555_v36 = vpop.f32.mrb[165].mxu1  ;;  %v11167_v11 = vld [vmem:[#allocation7 + $0x324] ss:$16 sps:$4 sm:$0xff]  }
 0x285   :  { %14684 = vst [vmem:[#allocation137_spill] sm:$0xff] %v13303_v27  ;;  %v1363_v4 = vadd.f32 %v1362_v38, %v13092_v26  ;;  %v1364_v17 = vpop.f32.mrb[166].mxu0  ;;  %v1556_v63 = vadd.f32 %v1555_v36, %v13106_v8  ;;  %v1557_v50 = vpop.f32.mrb[166].mxu1 }
 0x286   :  { %v1365_v21 = vadd.f32 %v1364_v17, %v13087_v43  ;;  %v1366_v33 = vpop.f32.mrb[167].mxu0  ;;  %6078 = vmatpush1.bf16.msra.mxu0 %v11153_v30  ;;  %v2306_v14 = vmax.f32 %v1554_v40, 0.0  ;;  %v1558_v9 = vadd.f32 %v1557_v50, %v13100_v6  ;;  %v1559_v15 = vpop.f32.mrb[167].mxu1  ;;  %7622 = vmatpush1.bf16.msra.mxu1 %v11156_v47  ;;  %v2304_v18 = vmax.f32 %v1361_v3, 0.0  ;;  %v11170_v30 = vld [vmem:[#allocation7 + $0x32c] ss:$16 sps:$4 sm:$0xff]  }
 0x287   :  { %v1367_v28 = vadd.f32 %v1366_v33, %v13092_v26  ;;  %6079 = vmatprep.subr.bf16.mxu0 %v11161_v23  ;;  %v2307_v38 = vmax.f32 %v1556_v63, 0.0  ;;  %v1560_v36 = vadd.f32 %v1559_v15, %v13106_v8  ;;  %7623 = vmatprep.subr.bf16.mxu1 %v11164_v31  ;;  %v2305_v17 = vmax.f32 %v1363_v4, 0.0  ;;  %v11165_v3 = vld [vmem:[#allocation7 + $0x320] ss:$16 sps:$4 sm:$0xff]   ;;  %v11168_v4 = vld [vmem:[#allocation7 + $0x328] ss:$16 sps:$4 sm:$0xff]  }
 0x288   :  { %v2320_v32 = vmax.f32 %v1365_v21, 0.0  ;;  %5943 = vmatmul.mubr.bf16.gmra.mrb[16].mxu0 %v12475_v22  ;;  %v2322_v40 = vmax.f32 %v1558_v9, 0.0  ;;  %7487 = vmatmul.mubr.bf16.gmra.mrb[16].mxu1 %v12475_v22  ;;  %v11173_v50 = vld [vmem:[#allocation7 + $0x344] ss:$16 sps:$4 sm:$0xff]  }
 0x289   :  { %v2321_v27 = vmax.f32 %v1367_v28, 0.0  ;;  %5952 = vmatprep.mubr.bf16.mxu0 %v12505_v35  ;;  %v2323_v23 = vmax.f32 %v1560_v36, 0.0  ;;  %7496 = vmatprep.mubr.bf16.mxu1 %v12505_v35  ;;  %v11176_v28 = vld [vmem:[#allocation7 + $0x34c] ss:$16 sps:$4 sm:$0xff]  }
 0x28a   :  { %v13316_v47 = vpack.c.bf16 %v2320_v32, %v2304_v18  ;;  %6080 = vmatpush1.bf16.msra.mxu0 %v11159_v20  ;;  %v13319_v63 = vpack.c.bf16 %v2322_v40, %v2306_v14  ;;  %7624 = vmatpush1.bf16.msra.mxu1 %v11162_v59 }
 0x28b   :  { %v13321_v21 = vpack.c.bf16 %v2321_v27, %v2305_v17  ;;  %v1370_v31 = vpop.f32.mrb[168].mxu0  ;;  %6081 = vmatprep.subr.bf16.mxu0 %v11167_v11  ;;  %v13323_v33 = vpack.c.bf16 %v2323_v23, %v2307_v38  ;;  %v1563_v32 = vpop.f32.mrb[168].mxu1  ;;  %7625 = vmatprep.subr.bf16.mxu1 %v11170_v30  ;;  %v11171_v38 = vld [vmem:[#allocation7 + $0x340] ss:$16 sps:$4 sm:$0xff]   ;;  %v11174_v23 = vld [vmem:[#allocation7 + $0x348] ss:$16 sps:$4 sm:$0xff]  }
 0x28c   :  { %14685 = vst [vmem:[#allocation138_spill] sm:$0xff] %v13319_v63  ;;  %v1371_v22 = vadd.f32 %v1370_v31, %v13087_v43  ;;  %v1372_v9 = vpop.f32.mrb[169].mxu0  ;;  %v1564_v35 = vadd.f32 %v1563_v32, %v13100_v6  ;;  %v1565_v14 = vpop.f32.mrb[169].mxu1  ;;  %v11179_v31 = vld [vmem:[#allocation7 + $0x364] ss:$16 sps:$4 sm:$0xff]  }
 0x28d   :  { %14686 = vst [vmem:[#allocation139_spill] sm:$0xff] %v13323_v33  ;;  %v1373_v20 = vadd.f32 %v1372_v9, %v13092_v26  ;;  %v1374_v27 = vpop.f32.mrb[170].mxu0  ;;  %v1566_v15 = vadd.f32 %v1565_v14, %v13106_v8  ;;  %v1567_v11 = vpop.f32.mrb[170].mxu1 }
 0x28e   :  { %v1375_v59 = vadd.f32 %v1374_v27, %v13087_v43  ;;  %v1376_v18 = vpop.f32.mrb[171].mxu0  ;;  %6082 = vmatpush1.bf16.msra.mxu0 %v11165_v3  ;;  %v2338_v36 = vmax.f32 %v1564_v35, 0.0  ;;  %v1568_v17 = vadd.f32 %v1567_v11, %v13100_v6  ;;  %v1569_v40 = vpop.f32.mrb[171].mxu1  ;;  %7626 = vmatpush1.bf16.msra.mxu1 %v11168_v4  ;;  %v2336_v32 = vmax.f32 %v1371_v22, 0.0  ;;  %v11182_v3 = vld [vmem:[#allocation7 + $0x36c] ss:$16 sps:$4 sm:$0xff]  }
 0x28f   :  { %v1377_v30 = vadd.f32 %v1376_v18, %v13092_v26  ;;  %6083 = vmatprep.subr.bf16.mxu0 %v11173_v50  ;;  %v2339_v9 = vmax.f32 %v1566_v15, 0.0  ;;  %v1570_v14 = vadd.f32 %v1569_v40, %v13106_v8  ;;  %7627 = vmatprep.subr.bf16.mxu1 %v11176_v28  ;;  %v2337_v27 = vmax.f32 %v1373_v20, 0.0  ;;  %v11177_v22 = vld [vmem:[#allocation7 + $0x360] ss:$16 sps:$4 sm:$0xff]   ;;  %v11180_v20 = vld [vmem:[#allocation7 + $0x368] ss:$16 sps:$4 sm:$0xff]  }
 0x290   :  { %v2352_v63 = vmax.f32 %v1375_v59, 0.0  ;;  %5953 = vmatmul.mubr.bf16.gmra.mrb[20].mxu0 %v12502_v10  ;;  %v2354_v35 = vmax.f32 %v1568_v17, 0.0  ;;  %7497 = vmatmul.mubr.bf16.gmra.mrb[20].mxu1 %v12502_v10  ;;  %v11185_v11 = vld [vmem:[#allocation7 + $0x384] ss:$16 sps:$4 sm:$0xff]  }
 0x291   :  { %v2353_v33 = vmax.f32 %v1377_v30, 0.0  ;;  %5962 = vmatprep.mubr.bf16.mxu0 %v12527_v48  ;;  %v2355_v50 = vmax.f32 %v1570_v14, 0.0  ;;  %7506 = vmatprep.mubr.bf16.mxu1 %v12527_v48  ;;  %v11188_v30 = vld [vmem:[#allocation7 + $0x38c] ss:$16 sps:$4 sm:$0xff]  }
 0x292   :  { %v13336_v4 = vpack.c.bf16 %v2352_v63, %v2336_v32  ;;  %6084 = vmatpush1.bf16.msra.mxu0 %v11171_v38  ;;  %v13339_v15 = vpack.c.bf16 %v2354_v35, %v2338_v36  ;;  %7628 = vmatpush1.bf16.msra.mxu1 %v11174_v23 }
 0x293   :  { %v13341_v59 = vpack.c.bf16 %v2353_v33, %v2337_v27  ;;  %v1380_v28 = vpop.f32.mrb[172].mxu0  ;;  %6085 = vmatprep.subr.bf16.mxu0 %v11179_v31  ;;  %v13343_v18 = vpack.c.bf16 %v2355_v50, %v2339_v9  ;;  %v1573_v63 = vpop.f32.mrb[172].mxu1  ;;  %7629 = vmatprep.subr.bf16.mxu1 %v11182_v3  ;;  %v11183_v9 = vld [vmem:[#allocation7 + $0x380] ss:$16 sps:$4 sm:$0xff]   ;;  %v11186_v50 = vld [vmem:[#allocation7 + $0x388] ss:$16 sps:$4 sm:$0xff]  }
 0x294   :  { %14687 = vst [vmem:[#allocation140_spill] sm:$0xff] %v13339_v15  ;;  %v1381_v10 = vadd.f32 %v1380_v28, %v13087_v43  ;;  %v1382_v17 = vpop.f32.mrb[173].mxu0  ;;  %v1574_v48 = vadd.f32 %v1573_v63, %v13100_v6  ;;  %v1575_v36 = vpop.f32.mrb[173].mxu1  ;;  %v11191_v28 = vld [vmem:[#allocation7 + $0x3a4] ss:$16 sps:$4 sm:$0xff]  }
 0x295   :  { %14688 = vst [vmem:[#allocation141_spill] sm:$0xff] %v13343_v18  ;;  %v1383_v38 = vadd.f32 %v1382_v17, %v13092_v26  ;;  %v1384_v33 = vpop.f32.mrb[174].mxu0  ;;  %v1576_v40 = vadd.f32 %v1575_v36, %v13106_v8  ;;  %v1577_v31 = vpop.f32.mrb[174].mxu1 }
 0x296   :  { %v1385_v23 = vadd.f32 %v1384_v33, %v13087_v43  ;;  %v1386_v32 = vpop.f32.mrb[175].mxu0  ;;  %6086 = vmatpush1.bf16.msra.mxu0 %v11177_v22  ;;  %v2370_v14 = vmax.f32 %v1574_v48, 0.0  ;;  %v1578_v27 = vadd.f32 %v1577_v31, %v13100_v6  ;;  %v1579_v35 = vpop.f32.mrb[175].mxu1  ;;  %7630 = vmatpush1.bf16.msra.mxu1 %v11180_v20  ;;  %v2368_v63 = vmax.f32 %v1381_v10, 0.0  ;;  %v11194_v22 = vld [vmem:[#allocation7 + $0x3ac] ss:$16 sps:$4 sm:$0xff]  }
 0x297   :  { %v1387_v3 = vadd.f32 %v1386_v32, %v13092_v26  ;;  %6087 = vmatprep.subr.bf16.mxu0 %v11185_v11  ;;  %v2371_v17 = vmax.f32 %v1576_v40, 0.0  ;;  %v1580_v36 = vadd.f32 %v1579_v35, %v13106_v8  ;;  %7631 = vmatprep.subr.bf16.mxu1 %v11188_v30  ;;  %v2369_v33 = vmax.f32 %v1383_v38, 0.0  ;;  %v11189_v10 = vld [vmem:[#allocation7 + $0x3a0] ss:$16 sps:$4 sm:$0xff]   ;;  %v11192_v38 = vld [vmem:[#allocation7 + $0x3a8] ss:$16 sps:$4 sm:$0xff]  }
 0x298   :  { %v2384_v15 = vmax.f32 %v1385_v23, 0.0  ;;  %5963 = vmatmul.mubr.bf16.gmra.mrb[24].mxu0 %v12525_v61  ;;  %v2386_v48 = vmax.f32 %v1578_v27, 0.0  ;;  %7507 = vmatmul.mubr.bf16.gmra.mrb[24].mxu1 %v12525_v61  ;;  %v11197_v31 = vld [vmem:[#allocation7 + $0x3c4] ss:$16 sps:$4 sm:$0xff]  }
 0x299   :  { %v2385_v18 = vmax.f32 %v1387_v3, 0.0  ;;  %5972 = vmatprep.mubr.bf16.mxu0 %v12549_v29  ;;  %v2387_v11 = vmax.f32 %v1580_v36, 0.0  ;;  %7516 = vmatprep.mubr.bf16.mxu1 %v12549_v29  ;;  %v11200_v3 = vld [vmem:[#allocation7 + $0x3cc] ss:$16 sps:$4 sm:$0xff]  }
 0x29a   :  { %v13356_v20 = vpack.c.bf16 %v2384_v15, %v2368_v63  ;;  %6088 = vmatpush1.bf16.msra.mxu0 %v11183_v9  ;;  %v13359_v40 = vpack.c.bf16 %v2386_v48, %v2370_v14  ;;  %7632 = vmatpush1.bf16.msra.mxu1 %v11186_v50 }
 0x29b   :  { %v13361_v23 = vpack.c.bf16 %v2385_v18, %v2369_v33  ;;  %v1390_v30 = vpop.f32.mrb[176].mxu0  ;;  %6089 = vmatprep.subr.bf16.mxu0 %v11191_v28  ;;  %v13363_v32 = vpack.c.bf16 %v2387_v11, %v2371_v17  ;;  %v1583_v15 = vpop.f32.mrb[176].mxu1  ;;  %7633 = vmatprep.subr.bf16.mxu1 %v11194_v22  ;;  %v11195_v17 = vld [vmem:[#allocation7 + $0x3c0] ss:$16 sps:$4 sm:$0xff]   ;;  %v11198_v11 = vld [vmem:[#allocation7 + $0x3c8] ss:$16 sps:$4 sm:$0xff]  }
 0x29c   :  { %14689 = vst [vmem:[#allocation142_spill] sm:$0xff] %v13359_v40  ;;  %v1391_v61 = vadd.f32 %v1390_v30, %v13087_v43  ;;  %v1392_v27 = vpop.f32.mrb[177].mxu0  ;;  %v1584_v29 = vadd.f32 %v1583_v15, %v13100_v6  ;;  %v1585_v14 = vpop.f32.mrb[177].mxu1  ;;  %v11203_v30 = vld [vmem:[#allocation7 + $0x3e4] ss:$16 sps:$4 sm:$0xff]  }
 0x29d   :  { %14690 = vst [vmem:[#allocation143_spill] sm:$0xff] %v13363_v32  ;;  %v1393_v9 = vadd.f32 %v1392_v27, %v13092_v26  ;;  %v1394_v18 = vpop.f32.mrb[178].mxu0  ;;  %v1586_v35 = vadd.f32 %v1585_v14, %v13106_v8  ;;  %v1587_v28 = vpop.f32.mrb[178].mxu1 }
 0x29e   :  { %v1395_v50 = vadd.f32 %v1394_v18, %v13087_v43  ;;  %v1396_v63 = vpop.f32.mrb[179].mxu0  ;;  %6090 = vmatpush1.bf16.msra.mxu0 %v11189_v10  ;;  %v2402_v36 = vmax.f32 %v1584_v29, 0.0  ;;  %v1588_v33 = vadd.f32 %v1587_v28, %v13100_v6  ;;  %v1589_v48 = vpop.f32.mrb[179].mxu1  ;;  %7634 = vmatpush1.bf16.msra.mxu1 %v11192_v38  ;;  %v2400_v15 = vmax.f32 %v1391_v61, 0.0  ;;  %v11206_v10 = vld [vmem:[#allocation7 + $0x3ec] ss:$16 sps:$4 sm:$0xff]  }
 0x29f   :  { %v1397_v22 = vadd.f32 %v1396_v63, %v13092_v26  ;;  %6091 = vmatprep.subr.bf16.mxu0 %v11197_v31  ;;  %v2403_v27 = vmax.f32 %v1586_v35, 0.0  ;;  %v1590_v14 = vadd.f32 %v1589_v48, %v13106_v8  ;;  %7635 = vmatprep.subr.bf16.mxu1 %v11200_v3  ;;  %v2401_v18 = vmax.f32 %v1393_v9, 0.0  ;;  %v11201_v61 = vld [vmem:[#allocation7 + $0x3e0] ss:$16 sps:$4 sm:$0xff]   ;;  %v11204_v9 = vld [vmem:[#allocation7 + $0x3e8] ss:$16 sps:$4 sm:$0xff]  }
 0x2a0   :  { %v2416_v40 = vmax.f32 %v1395_v50, 0.0  ;;  %5973 = vmatmul.mubr.bf16.gmra.mrb[28].mxu0 %v12547_v45  ;;  %v2418_v29 = vmax.f32 %v1588_v33, 0.0  ;;  %7517 = vmatmul.mubr.bf16.gmra.mrb[28].mxu1 %v12547_v45  ;;  %v11209_v28 = vld [vmem:[#allocation7 + $0x404] ss:$16 sps:$4 sm:$0xff]  }
 0x2a1   :  { %v2417_v32 = vmax.f32 %v1397_v22, 0.0  ;;  %5982 = vmatprep.mubr.bf16.mxu0 %v12571_v0  ;;  %v2419_v31 = vmax.f32 %v1590_v14, 0.0  ;;  %7526 = vmatprep.mubr.bf16.mxu1 %v12571_v0  ;;  %v11212_v22 = vld [vmem:[#allocation7 + $0x40c] ss:$16 sps:$4 sm:$0xff]  }
 0x2a2   :  { %v13376_v38 = vpack.c.bf16 %v2416_v40, %v2400_v15  ;;  %6092 = vmatpush1.bf16.msra.mxu0 %v11195_v17  ;;  %v13379_v35 = vpack.c.bf16 %v2418_v29, %v2402_v36  ;;  %7636 = vmatpush1.bf16.msra.mxu1 %v11198_v11 }
 0x2a3   :  { %v13381_v50 = vpack.c.bf16 %v2417_v32, %v2401_v18  ;;  %v1400_v3 = vpop.f32.mrb[180].mxu0  ;;  %6093 = vmatprep.subr.bf16.mxu0 %v11203_v30  ;;  %v13383_v63 = vpack.c.bf16 %v2419_v31, %v2403_v27  ;;  %v1593_v40 = vpop.f32.mrb[180].mxu1  ;;  %7637 = vmatprep.subr.bf16.mxu1 %v11206_v10 }
 0x2a4   :  { %14691 = vst [vmem:[#allocation144_spill] sm:$0xff] %v13376_v38  ;;  %14692 = vst [vmem:[#allocation145_spill] sm:$0xff] %v13379_v35  ;;  %v1401_v45 = vadd.f32 %v1400_v3, %v13087_v43  ;;  %v1402_v33 = vpop.f32.mrb[181].mxu0  ;;  %v1594_v0 = vadd.f32 %v1593_v40, %v13100_v6  ;;  %v1595_v36 = vpop.f32.mrb[181].mxu1 }
 0x2a5   :  { %14693 = vst [vmem:[#allocation146_spill] sm:$0xff] %v13383_v63  ;;  %v1403_v17 = vadd.f32 %v1402_v33, %v13092_v26  ;;  %v1404_v32 = vpop.f32.mrb[182].mxu0  ;;  %v1596_v48 = vadd.f32 %v1595_v36, %v13106_v8  ;;  %v1597_v30 = vpop.f32.mrb[182].mxu1  ;;  %v14694_v33 = vld [vmem:[#allocation35_spill] sm:$0xff] }
 0x2a6   :  { %v1405_v11 = vadd.f32 %v1404_v32, %v13087_v43  ;;  %v1406_v15 = vpop.f32.mrb[183].mxu0  ;;  %6094 = vmatpush1.bf16.msra.mxu0 %v11201_v61  ;;  %v2434_v27 = vmax.f32 %v1594_v0, 0.0  ;;  %v1598_v14 = vadd.f32 %v1597_v30, %v13100_v6  ;;  %v1599_v10 = vpop.f32.mrb[183].mxu1  ;;  %7638 = vmatpush1.bf16.msra.mxu1 %v11204_v9  ;;  %v2432_v29 = vmax.f32 %v1401_v45, 0.0  ;;  %v14695_v61 = vld [vmem:[#allocation39_spill] sm:$0xff] }
 0x2a7   :  { %v1407_v18 = vadd.f32 %v1406_v15, %v13092_v26  ;;  %6256 = vmatprep.subr.bf16.mxu0 %v11209_v28  ;;  %v2435_v31 = vmax.f32 %v1596_v48, 0.0  ;;  %v1600_v40 = vadd.f32 %v1599_v10, %v13106_v8  ;;  %7800 = vmatprep.subr.bf16.mxu1 %v11212_v22  ;;  %v2433_v36 = vmax.f32 %v1403_v17, 0.0 }
 0x2a8   :  { %v2448_v3 = vmax.f32 %v1405_v11, 0.0  ;;  %5983 = vmatmul.mubr.bf16.gmra.mrb[32].mxu0 %v14694_v33  ;;  %v2450_v32 = vmax.f32 %v1598_v14, 0.0  ;;  %7527 = vmatmul.mubr.bf16.gmra.mrb[32].mxu1 %v14694_v33 }
 0x2a9   :  { %v2449_v35 = vmax.f32 %v1407_v18, 0.0  ;;  %5992 = vmatprep.mubr.bf16.mxu0 %v14695_v61  ;;  %v2451_v30 = vmax.f32 %v1600_v40, 0.0  ;;  %7536 = vmatprep.mubr.bf16.mxu1 %v14695_v61 }
 0x2aa   :  { %v13396_v0 = vpack.c.bf16 %v2448_v3, %v2432_v29  ;;  %v13399_v9 = vpack.c.bf16 %v2450_v32, %v2434_v27 }
 0x2ab   :  { %v13401_v28 = vpack.c.bf16 %v2449_v35, %v2433_v36  ;;  %v1410_v45 = vpop.f32.mrb[184].mxu0  ;;  %v13403_v48 = vpack.c.bf16 %v2451_v30, %v2435_v31  ;;  %v1603_v17 = vpop.f32.mrb[184].mxu1 }
 0x2ac   :  { %14696 = vst [vmem:[#allocation35_spill] sm:$0xff] %v13396_v0  ;;  %14697 = vst [vmem:[#allocation39_spill] sm:$0xff] %v13399_v9  ;;  %v1411_v22 = vadd.f32 %v1410_v45, %v13087_v43  ;;  %v1412_v11 = vpop.f32.mrb[185].mxu0  ;;  %v1604_v15 = vadd.f32 %v1603_v17, %v13100_v6  ;;  %v1605_v18 = vpop.f32.mrb[185].mxu1  ;;  %v14700_v17 = vld [vmem:[#allocation38_spill] sm:$0xff] }
 0x2ad   :  { %14698 = vst [vmem:[#allocation147_spill] sm:$0xff] %v13401_v28  ;;  %14699 = vst [vmem:[#allocation148_spill] sm:$0xff] %v13403_v48  ;;  %v1413_v14 = vadd.f32 %v1412_v11, %v13092_v26  ;;  %v1414_v10 = vpop.f32.mrb[186].mxu0  ;;  %v1606_v29 = vadd.f32 %v1605_v18, %v13106_v8  ;;  %v1607_v3 = vpop.f32.mrb[186].mxu1 }
 0x2ae   :  { %v1415_v27 = vadd.f32 %v1414_v10, %v13087_v43  ;;  %v1416_v35 = vpop.f32.mrb[187].mxu0  ;;  %v2466_v40 = vmax.f32 %v1604_v15, 0.0  ;;  %v1608_v31 = vadd.f32 %v1607_v3, %v13100_v6  ;;  %v1609_v36 = vpop.f32.mrb[187].mxu1  ;;  %v2464_v32 = vmax.f32 %v1411_v22, 0.0  ;;  %v14701_v10 = vld [vmem:[#allocation43_spill] sm:$0xff] }
 0x2af   :  { %v1417_v33 = vadd.f32 %v1416_v35, %v13092_v26  ;;  %v2467_v61 = vmax.f32 %v1606_v29, 0.0  ;;  %v1610_v45 = vadd.f32 %v1609_v36, %v13106_v8  ;;  %v2465_v11 = vmax.f32 %v1413_v14, 0.0 }
 0x2b0   :  { %v2480_v30 = vmax.f32 %v1415_v27, 0.0  ;;  %5993 = vmatmul.mubr.bf16.gmra.mrb[36].mxu0 %v14700_v17  ;;  %v2482_v9 = vmax.f32 %v1608_v31, 0.0  ;;  %7537 = vmatmul.mubr.bf16.gmra.mrb[36].mxu1 %v14700_v17 }
 0x2b1   :  { %v2481_v18 = vmax.f32 %v1417_v33, 0.0  ;;  %6002 = vmatprep.mubr.bf16.mxu0 %v14701_v10  ;;  %v2483_v3 = vmax.f32 %v1610_v45, 0.0  ;;  %7546 = vmatprep.mubr.bf16.mxu1 %v14701_v10  ;;  %v14706_v10 = vld [vmem:[#allocation14_spill] sm:$0xff] }
 0x2b2   :  { %v13416_v15 = vpack.c.bf16 %v2480_v30, %v2464_v32  ;;  %v13419_v35 = vpack.c.bf16 %v2482_v9, %v2466_v40 }
 0x2b3   :  { %v13421_v22 = vpack.c.bf16 %v2481_v18, %v2465_v11  ;;  %v1420_v29 = vpop.f32.mrb[188].mxu0  ;;  %v13423_v27 = vpack.c.bf16 %v2483_v3, %v2467_v61  ;;  %v1613_v31 = vpop.f32.mrb[188].mxu1  ;;  %v11784_v18 = vld [vmem:[#allocation5 + $0x8] sm:$0xff]  ;;  %v14707_v61 = vsub.s32 4, %v14706_v10 }
 0x2b4   :  { %14702 = vst [vmem:[#allocation38_spill] sm:$0xff] %v13416_v15  ;;  %14703 = vst [vmem:[#allocation43_spill] sm:$0xff] %v13419_v35  ;;  %v1421_v14 = vadd.f32 %v1420_v29, %v13087_v43  ;;  %v1422_v33 = vpop.f32.mrb[189].mxu0  ;;  %v1614_v36 = vadd.f32 %v1613_v31, %v13100_v6  ;;  %v1615_v32 = vpop.f32.mrb[189].mxu1  ;;  %v14709_v15 = vld [vmem:[#allocation42_spill] sm:$0xff] }
 0x2b5   :  { %14704 = vst [vmem:[#allocation149_spill] sm:$0xff] %v13421_v22  ;;  %14705 = vst [vmem:[#allocation150_spill] sm:$0xff] %v13423_v27  ;;  %v1423_v17 = vadd.f32 %v1422_v33, %v13092_v26  ;;  %v1424_v30 = vpop.f32.mrb[190].mxu0  ;;  %v1616_v45 = vadd.f32 %v1615_v32, %v13106_v8  ;;  %v1617_v40 = vpop.f32.mrb[190].mxu1  ;;  %v13432_v3 = vrot.slane %v11784_v18, %v14707_v61  ;;  %v14708_v33 = vsub.s32 5, %v14706_v10 }
 0x2b6   :  { %v1425_v9 = vadd.f32 %v1424_v30, %v13087_v43  ;;  %v1426_v11 = vpop.f32.mrb[191].mxu0  ;;  %v2498_v29 = vmax.f32 %v1614_v36, 0.0  ;;  %v1618_v35 = vadd.f32 %v1617_v40, %v13100_v6  ;;  %v1619_v27 = vpop.f32.mrb[191].mxu1  ;;  %v2496_v32 = vmax.f32 %v1421_v14, 0.0  ;;  %v14710_v6 = vld [vmem:[#allocation47_spill] sm:$0xff] }
 0x2b7   :  { %v1427_v31 = vadd.f32 %v1426_v11, %v13092_v26  ;;  %v13438_v48 = vrot.slane %v11784_v18, %v14708_v33  ;;  %v2499_v63 = vmax.f32 %v1616_v45, 0.0  ;;  %v1620_v30 = vadd.f32 %v1619_v27, %v13106_v8 }
 0x2b8   :  { %v2512_v43 = vmax.f32 %v1425_v9, 0.0  ;;  %6003 = vmatmul.mubr.bf16.gmra.mrb[40].mxu0 %v14709_v15  ;;  %v2497_v22 = vmax.f32 %v1423_v17, 0.0  ;;  %v2514_v61 = vmax.f32 %v1618_v35, 0.0  ;;  %7547 = vmatmul.mubr.bf16.gmra.mrb[40].mxu1 %v14709_v15  ;;  %v14711_v26 = vsub.s32 6, %v14706_v10 }
 0x2b9   :  { %v2513_v0 = vmax.f32 %v1427_v31, 0.0  ;;  %6012 = vmatprep.mubr.bf16.mxu0 %v14710_v6  ;;  %v2515_v14 = vmax.f32 %v1620_v30, 0.0  ;;  %7556 = vmatprep.mubr.bf16.mxu1 %v14710_v6  ;;  %v14713_v8 = vsub.s32 7, %v14706_v10 }
 0x2ba   :  { %v13446_v36 = vrot.slane %v11784_v18, %v14711_v26  ;;  %v13448_v40 = vpack.c.bf16 %v2512_v43, %v2496_v32  ;;  %v13455_v17 = vpack.c.bf16 %v2514_v61, %v2498_v29 }
 0x2bb   :  { %v13453_v27 = vrot.slane %v11784_v18, %v14713_v8  ;;  %v13457_v35 = vpack.c.bf16 %v2513_v0, %v2497_v22  ;;  %v1656_v15 = vpop.f32.mrb[192].mxu0  ;;  %v13459_v45 = vpack.c.bf16 %v2515_v14, %v2499_v63  ;;  %v1849_v11 = vpop.f32.mrb[192].mxu1 }
 0x2bc   :  { %14712 = vst [vmem:[#allocation42_spill] sm:$0xff] %v13448_v40  ;;  %14714 = vst [vmem:[#allocation47_spill] sm:$0xff] %v13455_v17  ;;  %v1657_v9 = vadd.f32 %v1656_v15, %v13432_v3  ;;  %v1658_v31 = vpop.f32.mrb[193].mxu0  ;;  %v1850_v33 = vadd.f32 %v1849_v11, %v13446_v36  ;;  %v1851_v43 = vpop.f32.mrb[193].mxu1 }
 0x2bd   :  { %14715 = vst [vmem:[#allocation151_spill] sm:$0xff] %v13457_v35  ;;  %14716 = vst [vmem:[#allocation152_spill] sm:$0xff] %v13459_v45  ;;  %v1659_v32 = vadd.f32 %v1658_v31, %v13438_v48  ;;  %v1660_v30 = vpop.f32.mrb[194].mxu0  ;;  %v1852_v18 = vadd.f32 %v1851_v43, %v13453_v27  ;;  %v1853_v61 = vpop.f32.mrb[194].mxu1  ;;  %v14717_v31 = vld [vmem:[#allocation46_spill] sm:$0xff]  ;;  %v14747_v45 = vld [vmem:[#allocation19_spill] sm:$0xff] }
 0x2be   :  { %v1661_v29 = vadd.f32 %v1660_v30, %v13432_v3  ;;  %v1662_v0 = vpop.f32.mrb[195].mxu0  ;;  %v2022_v22 = vmax.f32 %v1850_v33, 0.0  ;;  %v1854_v63 = vadd.f32 %v1853_v61, %v13446_v36  ;;  %v1855_v26 = vpop.f32.mrb[195].mxu1  ;;  %v2020_v14 = vmax.f32 %v1657_v9, 0.0  ;;  %v14718_v30 = vld [vmem:[#allocation51_spill] sm:$0xff] }
 0x2bf   :  { %v1663_v6 = vadd.f32 %v1662_v0, %v13438_v48  ;;  %v2023_v8 = vmax.f32 %v1852_v18, 0.0  ;;  %v1856_v11 = vadd.f32 %v1855_v26, %v13453_v27  ;;  %v2021_v10 = vmax.f32 %v1659_v32, 0.0 }
 0x2c0   :  { %v2036_v15 = vmax.f32 %v1661_v29, 0.0  ;;  %6013 = vmatmul.mubr.bf16.gmra.mrb[44].mxu0 %v14717_v31  ;;  %v2038_v17 = vmax.f32 %v1854_v63, 0.0  ;;  %7557 = vmatmul.mubr.bf16.gmra.mrb[44].mxu1 %v14717_v31 }
 0x2c1   :  { %v2037_v43 = vmax.f32 %v1663_v6, 0.0  ;;  %6022 = vmatprep.mubr.bf16.mxu0 %v14718_v30  ;;  %v2039_v61 = vmax.f32 %v1856_v11, 0.0  ;;  %7566 = vmatprep.mubr.bf16.mxu1 %v14718_v30 }
 0x2c2   :  { %v13472_v33 = vpack.c.bf16 %v2036_v15, %v2020_v14  ;;  %v13475_v0 = vpack.c.bf16 %v2038_v17, %v2022_v22 }
 0x2c3   :  { %v13477_v9 = vpack.c.bf16 %v2037_v43, %v2021_v10  ;;  %v1666_v18 = vpop.f32.mrb[196].mxu0  ;;  %v13479_v29 = vpack.c.bf16 %v2039_v61, %v2023_v8  ;;  %v1859_v63 = vpop.f32.mrb[196].mxu1 }
 0x2c4   :  { %14719 = vst [vmem:[#allocation46_spill] sm:$0xff] %v13472_v33  ;;  %14720 = vst [vmem:[#allocation51_spill] sm:$0xff] %v13475_v0  ;;  %v1667_v32 = vadd.f32 %v1666_v18, %v13432_v3  ;;  %v1668_v6 = vpop.f32.mrb[197].mxu0  ;;  %v1860_v26 = vadd.f32 %v1859_v63, %v13446_v36  ;;  %v1861_v14 = vpop.f32.mrb[197].mxu1 }
 0x2c5   :  { %14721 = vst [vmem:[#allocation153_spill] sm:$0xff] %v13477_v9  ;;  %14722 = vst [vmem:[#allocation154_spill] sm:$0xff] %v13479_v29  ;;  %v1669_v31 = vadd.f32 %v1668_v6, %v13438_v48  ;;  %v1670_v15 = vpop.f32.mrb[198].mxu0  ;;  %v1862_v11 = vadd.f32 %v1861_v14, %v13453_v27  ;;  %v1863_v22 = vpop.f32.mrb[198].mxu1  ;;  %v14723_v6 = vld [vmem:[#allocation50_spill] sm:$0xff] }
 0x2c6   :  { %v1671_v17 = vadd.f32 %v1670_v15, %v13432_v3  ;;  %v1672_v10 = vpop.f32.mrb[199].mxu0  ;;  %v2054_v43 = vmax.f32 %v1860_v26, 0.0  ;;  %v1864_v8 = vadd.f32 %v1863_v22, %v13446_v36  ;;  %v1865_v61 = vpop.f32.mrb[199].mxu1  ;;  %v2052_v18 = vmax.f32 %v1667_v32, 0.0  ;;  %v14724_v15 = vld [vmem:[#allocation55_spill] sm:$0xff] }
 0x2c7   :  { %v1673_v30 = vadd.f32 %v1672_v10, %v13438_v48  ;;  %v2055_v0 = vmax.f32 %v1862_v11, 0.0  ;;  %v1866_v63 = vadd.f32 %v1865_v61, %v13453_v27  ;;  %v2053_v33 = vmax.f32 %v1669_v31, 0.0 }
 0x2c8   :  { %v2068_v29 = vmax.f32 %v1671_v17, 0.0  ;;  %6023 = vmatmul.mubr.bf16.gmra.mrb[48].mxu0 %v14723_v6  ;;  %v2070_v9 = vmax.f32 %v1864_v8, 0.0  ;;  %7567 = vmatmul.mubr.bf16.gmra.mrb[48].mxu1 %v14723_v6 }
 0x2c9   :  { %v2069_v14 = vmax.f32 %v1673_v30, 0.0  ;;  %6032 = vmatprep.mubr.bf16.mxu0 %v14724_v15  ;;  %v2071_v22 = vmax.f32 %v1866_v63, 0.0  ;;  %7576 = vmatprep.mubr.bf16.mxu1 %v14724_v15 }
 0x2ca   :  { %v13492_v26 = vpack.c.bf16 %v2068_v29, %v2052_v18  ;;  %v13495_v10 = vpack.c.bf16 %v2070_v9, %v2054_v43 }
 0x2cb   :  { %v13497_v32 = vpack.c.bf16 %v2069_v14, %v2053_v33  ;;  %v1676_v11 = vpop.f32.mrb[200].mxu0  ;;  %v13499_v17 = vpack.c.bf16 %v2071_v22, %v2055_v0  ;;  %v1869_v8 = vpop.f32.mrb[200].mxu1 }
 0x2cc   :  { %14725 = vst [vmem:[#allocation50_spill] sm:$0xff] %v13492_v26  ;;  %14726 = vst [vmem:[#allocation55_spill] sm:$0xff] %v13495_v10  ;;  %v1677_v31 = vadd.f32 %v1676_v11, %v13432_v3  ;;  %v1678_v30 = vpop.f32.mrb[201].mxu0  ;;  %v1870_v61 = vadd.f32 %v1869_v8, %v13446_v36  ;;  %v1871_v29 = vpop.f32.mrb[201].mxu1 }
 0x2cd   :  { %14727 = vst [vmem:[#allocation155_spill] sm:$0xff] %v13497_v32  ;;  %14728 = vst [vmem:[#allocation156_spill] sm:$0xff] %v13499_v17  ;;  %v1679_v6 = vadd.f32 %v1678_v30, %v13438_v48  ;;  %v1680_v18 = vpop.f32.mrb[202].mxu0  ;;  %v1872_v63 = vadd.f32 %v1871_v29, %v13453_v27  ;;  %v1873_v43 = vpop.f32.mrb[202].mxu1  ;;  %v14729_v30 = vld [vmem:[#allocation54_spill] sm:$0xff] }
 0x2ce   :  { %v1681_v9 = vadd.f32 %v1680_v18, %v13432_v3  ;;  %v1682_v33 = vpop.f32.mrb[203].mxu0  ;;  %v2086_v14 = vmax.f32 %v1870_v61, 0.0  ;;  %v1874_v0 = vadd.f32 %v1873_v43, %v13446_v36  ;;  %v1875_v22 = vpop.f32.mrb[203].mxu1  ;;  %v2084_v11 = vmax.f32 %v1677_v31, 0.0  ;;  %v14730_v18 = vld [vmem:[#allocation59_spill] sm:$0xff] }
 0x2cf   :  { %v1683_v15 = vadd.f32 %v1682_v33, %v13438_v48  ;;  %v2087_v10 = vmax.f32 %v1872_v63, 0.0  ;;  %v1876_v8 = vadd.f32 %v1875_v22, %v13453_v27  ;;  %v2085_v26 = vmax.f32 %v1679_v6, 0.0 }
 0x2d0   :  { %v2100_v17 = vmax.f32 %v1681_v9, 0.0  ;;  %6033 = vmatmul.mubr.bf16.gmra.mrb[52].mxu0 %v14729_v30  ;;  %v2102_v32 = vmax.f32 %v1874_v0, 0.0  ;;  %7577 = vmatmul.mubr.bf16.gmra.mrb[52].mxu1 %v14729_v30 }
 0x2d1   :  { %v2101_v29 = vmax.f32 %v1683_v15, 0.0  ;;  %6042 = vmatprep.mubr.bf16.mxu0 %v14730_v18  ;;  %v2103_v43 = vmax.f32 %v1876_v8, 0.0  ;;  %7586 = vmatprep.mubr.bf16.mxu1 %v14730_v18 }
 0x2d2   :  { %v13512_v61 = vpack.c.bf16 %v2100_v17, %v2084_v11  ;;  %v13515_v33 = vpack.c.bf16 %v2102_v32, %v2086_v14 }
 0x2d3   :  { %v13517_v31 = vpack.c.bf16 %v2101_v29, %v2085_v26  ;;  %v1686_v63 = vpop.f32.mrb[204].mxu0  ;;  %v13519_v9 = vpack.c.bf16 %v2103_v43, %v2087_v10  ;;  %v1879_v0 = vpop.f32.mrb[204].mxu1 }
 0x2d4   :  { %14731 = vst [vmem:[#allocation54_spill] sm:$0xff] %v13512_v61  ;;  %14732 = vst [vmem:[#allocation59_spill] sm:$0xff] %v13515_v33  ;;  %v1687_v6 = vadd.f32 %v1686_v63, %v13432_v3  ;;  %v1688_v15 = vpop.f32.mrb[205].mxu0  ;;  %v1880_v22 = vadd.f32 %v1879_v0, %v13446_v36  ;;  %v1881_v17 = vpop.f32.mrb[205].mxu1 }
 0x2d5   :  { %14733 = vst [vmem:[#allocation157_spill] sm:$0xff] %v13517_v31  ;;  %14734 = vst [vmem:[#allocation158_spill] sm:$0xff] %v13519_v9  ;;  %v1689_v30 = vadd.f32 %v1688_v15, %v13438_v48  ;;  %v1690_v11 = vpop.f32.mrb[206].mxu0  ;;  %v1882_v8 = vadd.f32 %v1881_v17, %v13453_v27  ;;  %v1883_v14 = vpop.f32.mrb[206].mxu1  ;;  %v14735_v15 = vld [vmem:[#allocation58_spill] sm:$0xff] }
 0x2d6   :  { %v1691_v32 = vadd.f32 %v1690_v11, %v13432_v3  ;;  %v1692_v26 = vpop.f32.mrb[207].mxu0  ;;  %v2118_v29 = vmax.f32 %v1880_v22, 0.0  ;;  %v1884_v10 = vadd.f32 %v1883_v14, %v13446_v36  ;;  %v1885_v43 = vpop.f32.mrb[207].mxu1  ;;  %v2116_v63 = vmax.f32 %v1687_v6, 0.0  ;;  %v14736_v11 = vld [vmem:[#allocation63_spill] sm:$0xff] }
 0x2d7   :  { %v1693_v18 = vadd.f32 %v1692_v26, %v13438_v48  ;;  %v2119_v33 = vmax.f32 %v1882_v8, 0.0  ;;  %v1886_v0 = vadd.f32 %v1885_v43, %v13453_v27  ;;  %v2117_v61 = vmax.f32 %v1689_v30, 0.0 }
 0x2d8   :  { %v2132_v9 = vmax.f32 %v1691_v32, 0.0  ;;  %6043 = vmatmul.mubr.bf16.gmra.mrb[56].mxu0 %v14735_v15  ;;  %v2134_v31 = vmax.f32 %v1884_v10, 0.0  ;;  %7587 = vmatmul.mubr.bf16.gmra.mrb[56].mxu1 %v14735_v15 }
 0x2d9   :  { %v2133_v17 = vmax.f32 %v1693_v18, 0.0  ;;  %6052 = vmatprep.mubr.bf16.mxu0 %v14736_v11  ;;  %v2135_v14 = vmax.f32 %v1886_v0, 0.0  ;;  %7596 = vmatprep.mubr.bf16.mxu1 %v14736_v11 }
 0x2da   :  { %v13532_v22 = vpack.c.bf16 %v2132_v9, %v2116_v63  ;;  %v13535_v26 = vpack.c.bf16 %v2134_v31, %v2118_v29 }
 0x2db   :  { %v13537_v6 = vpack.c.bf16 %v2133_v17, %v2117_v61  ;;  %v1696_v8 = vpop.f32.mrb[208].mxu0  ;;  %v13539_v32 = vpack.c.bf16 %v2135_v14, %v2119_v33  ;;  %v1889_v10 = vpop.f32.mrb[208].mxu1 }
 0x2dc   :  { %14737 = vst [vmem:[#allocation58_spill] sm:$0xff] %v13532_v22  ;;  %14738 = vst [vmem:[#allocation63_spill] sm:$0xff] %v13535_v26  ;;  %v1697_v30 = vadd.f32 %v1696_v8, %v13432_v3  ;;  %v1698_v18 = vpop.f32.mrb[209].mxu0  ;;  %v1890_v43 = vadd.f32 %v1889_v10, %v13446_v36  ;;  %v1891_v9 = vpop.f32.mrb[209].mxu1 }
 0x2dd   :  { %14739 = vst [vmem:[#allocation159_spill] sm:$0xff] %v13537_v6  ;;  %14740 = vst [vmem:[#allocation160_spill] sm:$0xff] %v13539_v32  ;;  %v1699_v15 = vadd.f32 %v1698_v18, %v13438_v48  ;;  %v1700_v63 = vpop.f32.mrb[210].mxu0  ;;  %v1892_v0 = vadd.f32 %v1891_v9, %v13453_v27  ;;  %v1893_v29 = vpop.f32.mrb[210].mxu1  ;;  %v14741_v18 = vld [vmem:[#allocation62_spill] sm:$0xff] }
 0x2de   :  { %v1701_v31 = vadd.f32 %v1700_v63, %v13432_v3  ;;  %v1702_v61 = vpop.f32.mrb[211].mxu0  ;;  %v2150_v17 = vmax.f32 %v1890_v43, 0.0  ;;  %v1894_v33 = vadd.f32 %v1893_v29, %v13446_v36  ;;  %v1895_v14 = vpop.f32.mrb[211].mxu1  ;;  %v2148_v8 = vmax.f32 %v1697_v30, 0.0  ;;  %v14742_v63 = vld [vmem:[#allocation20_spill] sm:$0xff] }
 0x2df   :  { %v1703_v11 = vadd.f32 %v1702_v61, %v13438_v48  ;;  %v2151_v26 = vmax.f32 %v1892_v0, 0.0  ;;  %v1896_v10 = vadd.f32 %v1895_v14, %v13453_v27  ;;  %v2149_v22 = vmax.f32 %v1699_v15, 0.0 }
 0x2e0   :  { %v2164_v32 = vmax.f32 %v1701_v31, 0.0  ;;  %6053 = vmatmul.mubr.bf16.gmra.mrb[60].mxu0 %v14741_v18  ;;  %v2166_v6 = vmax.f32 %v1894_v33, 0.0  ;;  %7597 = vmatmul.mubr.bf16.gmra.mrb[60].mxu1 %v14741_v18 }
 0x2e1   :  { %v2165_v9 = vmax.f32 %v1703_v11, 0.0  ;;  %6095 = vmatprep.mubr.bf16.mxu0 %v14742_v63  ;;  %v2167_v29 = vmax.f32 %v1896_v10, 0.0  ;;  %7639 = vmatprep.mubr.bf16.mxu1 %v14742_v63 }
 0x2e2   :  { %v13552_v43 = vpack.c.bf16 %v2164_v32, %v2148_v8  ;;  %v13555_v61 = vpack.c.bf16 %v2166_v6, %v2150_v17 }
 0x2e3   :  { %v13557_v30 = vpack.c.bf16 %v2165_v9, %v2149_v22  ;;  %v1706_v0 = vpop.f32.mrb[212].mxu0  ;;  %v13559_v31 = vpack.c.bf16 %v2167_v29, %v2151_v26  ;;  %v1899_v33 = vpop.f32.mrb[212].mxu1  ;;  %v11207_v9 = vld [vmem:[#allocation7 + $0x400] ss:$16 sps:$4 sm:$0xff]  }
 0x2e4   :  { %14743 = vst [vmem:[#allocation62_spill] sm:$0xff] %v13552_v43  ;;  %14744 = vst [vmem:[#allocation20_spill] sm:$0xff] %v13555_v61  ;;  %v1707_v15 = vadd.f32 %v1706_v0, %v13432_v3  ;;  %v1708_v11 = vpop.f32.mrb[213].mxu0  ;;  %v1900_v14 = vadd.f32 %v1899_v33, %v13446_v36  ;;  %v1901_v32 = vpop.f32.mrb[213].mxu1  ;;  %v11210_v61 = vld [vmem:[#allocation7 + $0x408] ss:$16 sps:$4 sm:$0xff]  }
 0x2e5   :  { %14745 = vst [vmem:[#allocation161_spill] sm:$0xff] %v13557_v30  ;;  %14746 = vst [vmem:[#allocation162_spill] sm:$0xff] %v13559_v31  ;;  %v1709_v18 = vadd.f32 %v1708_v11, %v13438_v48  ;;  %v1710_v8 = vpop.f32.mrb[214].mxu0  ;;  %v1902_v10 = vadd.f32 %v1901_v32, %v13453_v27  ;;  %v1903_v17 = vpop.f32.mrb[214].mxu1  ;;  %v11215_v31 = vld [vmem:[#allocation7 + $0x424] ss:$16 sps:$4 sm:$0xff]  }
 0x2e6   :  { %v1711_v6 = vadd.f32 %v1710_v8, %v13432_v3  ;;  %v1712_v22 = vpop.f32.mrb[215].mxu0  ;;  %v2182_v63 = vmax.f32 %v1900_v14, 0.0  ;;  %v1904_v26 = vadd.f32 %v1903_v17, %v13446_v36  ;;  %v1905_v0 = vpop.f32.mrb[215].mxu1  ;;  %v2180_v33 = vmax.f32 %v1707_v15, 0.0  ;;  %v11218_v32 = vld [vmem:[#allocation7 + $0x42c] ss:$16 sps:$4 sm:$0xff]  }
 0x2e7   :  { %v1713_v29 = vadd.f32 %v1712_v22, %v13438_v48  ;;  %v2183_v43 = vmax.f32 %v1902_v10, 0.0  ;;  %v1906_v30 = vadd.f32 %v1905_v0, %v13453_v27  ;;  %v2181_v8 = vmax.f32 %v1709_v18, 0.0  ;;  %v14748_v14 = vld [vmem:[#allocation22_spill] sm:$0xff]  ;;  %v11213_v15 = vld [vmem:[#allocation7 + $0x420] ss:$16 sps:$4 sm:$0xff]  }
 0x2e8   :  { %v2196_v11 = vmax.f32 %v1711_v6, 0.0  ;;  %6096 = vmatmul.mubr.bf16.vlgmr.msra.gmra.mrb[0].mxu0 %v14747_v45  ;;  %v2198_v40 = vmax.f32 %v1904_v26, 0.0  ;;  %7640 = vmatmul.mubr.bf16.vlgmr.msra.gmra.mrb[0].mxu1 %v14747_v45  ;;  %v11216_v18 = vld [vmem:[#allocation7 + $0x428] ss:$16 sps:$4 sm:$0xff]   ;;  %v11221_v26 = vld [vmem:[#allocation7 + $0x444] ss:$16 sps:$4 sm:$0xff]  }
 0x2e9   :  { %v2197_v35 = vmax.f32 %v1713_v29, 0.0  ;;  %6105 = vmatprep.mubr.bf16.mxu0 %v14748_v14  ;;  %v2199_v22 = vmax.f32 %v1906_v30, 0.0  ;;  %6257 = vmatpush1.bf16.msra.mxu0 %v11207_v9  ;;  %v11224_v30 = vld [vmem:[#allocation7 + $0x44c] ss:$16 sps:$4 sm:$0xff]  }
 0x2ea   :  { %v13572_v17 = vpack.c.bf16 %v2196_v11, %v2180_v33  ;;  %7649 = vmatprep.mubr.bf16.mxu1 %v14748_v14  ;;  %v13575_v10 = vpack.c.bf16 %v2198_v40, %v2182_v63  ;;  %7801 = vmatpush1.bf16.msra.mxu1 %v11210_v61 }
 0x2eb   :  { %v13577_v6 = vpack.c.bf16 %v2197_v35, %v2181_v8  ;;  %v1716_v0 = vpop.f32.mrb[216].mxu0  ;;  %6258 = vmatprep.subr.bf16.mxu0 %v11215_v31  ;;  %v13579_v29 = vpack.c.bf16 %v2199_v22, %v2183_v43  ;;  %v1909_v33 = vpop.f32.mrb[216].mxu1  ;;  %7802 = vmatprep.subr.bf16.mxu1 %v11218_v32  ;;  %v11219_v43 = vld [vmem:[#allocation7 + $0x440] ss:$16 sps:$4 sm:$0xff]  }
 0x2ec   :  { %14749 = vst [vmem:[#allocation19_spill] sm:$0xff] %v13572_v17  ;;  %14750 = vst [vmem:[#allocation22_spill] sm:$0xff] %v13575_v10  ;;  %v1717_v45 = vadd.f32 %v1716_v0, %v13432_v3  ;;  %v1718_v11 = vpop.f32.mrb[217].mxu0  ;;  %v1910_v9 = vadd.f32 %v1909_v33, %v13446_v36  ;;  %v1911_v63 = vpop.f32.mrb[217].mxu1  ;;  %v11222_v33 = vld [vmem:[#allocation7 + $0x448] ss:$16 sps:$4 sm:$0xff]  }
 0x2ed   :  { %14751 = vst [vmem:[#allocation163_spill] sm:$0xff] %v13577_v6  ;;  %14752 = vst [vmem:[#allocation164_spill] sm:$0xff] %v13579_v29  ;;  %v1719_v40 = vadd.f32 %v1718_v11, %v13438_v48  ;;  %v1720_v35 = vpop.f32.mrb[218].mxu0  ;;  %v1912_v8 = vadd.f32 %v1911_v63, %v13453_v27  ;;  %v1913_v31 = vpop.f32.mrb[218].mxu1  ;;  %6259 = vmatpush1.bf16.msra.mxu0 %v11213_v15  ;;  %v11227_v11 = vld [vmem:[#allocation7 + $0x464] ss:$16 sps:$4 sm:$0xff]  }
 0x2ee   :  { %v1721_v61 = vadd.f32 %v1720_v35, %v13432_v3  ;;  %v1722_v14 = vpop.f32.mrb[219].mxu0  ;;  %v2214_v22 = vmax.f32 %v1910_v9, 0.0  ;;  %v1914_v0 = vadd.f32 %v1913_v31, %v13446_v36  ;;  %v1915_v10 = vpop.f32.mrb[219].mxu1  ;;  %7803 = vmatpush1.bf16.msra.mxu1 %v11216_v18  ;;  %6260 = vmatprep.subr.bf16.mxu0 %v11221_v26  ;;  %v2212_v29 = vmax.f32 %v1717_v45, 0.0  ;;  %v14753_v35 = vld [vmem:[#allocation21_spill] sm:$0xff]  ;;  %v14754_v31 = vld [vmem:[#allocation24_spill] sm:$0xff] }
 0x2ef   :  { %v1723_v32 = vadd.f32 %v1722_v14, %v13438_v48  ;;  %v2215_v17 = vmax.f32 %v1912_v8, 0.0  ;;  %v1916_v63 = vadd.f32 %v1915_v10, %v13453_v27  ;;  %7804 = vmatprep.subr.bf16.mxu1 %v11224_v30  ;;  %v11230_v15 = vld [vmem:[#allocation7 + $0x46c] ss:$16 sps:$4 sm:$0xff]   ;;  %v2213_v28 = vmax.f32 %v1719_v40, 0.0  ;;  %v11225_v45 = vld [vmem:[#allocation7 + $0x460] ss:$16 sps:$4 sm:$0xff]  }
 0x2f0   :  { %v2228_v6 = vmax.f32 %v1721_v61, 0.0  ;;  %6106 = vmatmul.mubr.bf16.gmra.mrb[4].mxu0 %v14753_v35  ;;  %v2230_v9 = vmax.f32 %v1914_v0, 0.0  ;;  %7650 = vmatmul.mubr.bf16.gmra.mrb[4].mxu1 %v14753_v35  ;;  %v11228_v40 = vld [vmem:[#allocation7 + $0x468] ss:$16 sps:$4 sm:$0xff]   ;;  %v11233_v61 = vld [vmem:[#allocation7 + $0x484] ss:$16 sps:$4 sm:$0xff]  }
 0x2f1   :  { %v2229_v38 = vmax.f32 %v1723_v32, 0.0  ;;  %6115 = vmatprep.mubr.bf16.mxu0 %v14754_v31  ;;  %v2231_v26 = vmax.f32 %v1916_v63, 0.0  ;;  %7659 = vmatprep.mubr.bf16.mxu1 %v14754_v31  ;;  %v11236_v32 = vld [vmem:[#allocation7 + $0x48c] ss:$16 sps:$4 sm:$0xff]  }
 0x2f2   :  { %v13592_v18 = vpack.c.bf16 %v2228_v6, %v2212_v29  ;;  %6261 = vmatpush1.bf16.msra.mxu0 %v11219_v43  ;;  %v13595_v8 = vpack.c.bf16 %v2230_v9, %v2214_v22  ;;  %7805 = vmatpush1.bf16.msra.mxu1 %v11222_v33 }
 0x2f3   :  { %v13597_v10 = vpack.c.bf16 %v2229_v38, %v2213_v28  ;;  %v1726_v30 = vpop.f32.mrb[220].mxu0  ;;  %6262 = vmatprep.subr.bf16.mxu0 %v11227_v11  ;;  %v13599_v14 = vpack.c.bf16 %v2231_v26, %v2215_v17  ;;  %v1919_v6 = vpop.f32.mrb[220].mxu1  ;;  %7806 = vmatprep.subr.bf16.mxu1 %v11230_v15  ;;  %v11231_v17 = vld [vmem:[#allocation7 + $0x480] ss:$16 sps:$4 sm:$0xff]  }
 0x2f4   :  { %14755 = vst [vmem:[#allocation21_spill] sm:$0xff] %v13592_v18  ;;  %14756 = vst [vmem:[#allocation24_spill] sm:$0xff] %v13595_v8  ;;  %v1727_v0 = vadd.f32 %v1726_v30, %v13432_v3  ;;  %v1728_v29 = vpop.f32.mrb[221].mxu0  ;;  %v1920_v43 = vadd.f32 %v1919_v6, %v13446_v36  ;;  %v1921_v63 = vpop.f32.mrb[221].mxu1  ;;  %v11234_v30 = vld [vmem:[#allocation7 + $0x488] ss:$16 sps:$4 sm:$0xff]  }
 0x2f5   :  { %14757 = vst [vmem:[#allocation165_spill] sm:$0xff] %v13597_v10  ;;  %14758 = vst [vmem:[#allocation166_spill] sm:$0xff] %v13599_v14  ;;  %v1729_v22 = vadd.f32 %v1728_v29, %v13438_v48  ;;  %v1730_v38 = vpop.f32.mrb[222].mxu0  ;;  %v1922_v28 = vadd.f32 %v1921_v63, %v13453_v27  ;;  %v1923_v11 = vpop.f32.mrb[222].mxu1  ;;  %v11239_v6 = vld [vmem:[#allocation7 + $0x4a4] ss:$16 sps:$4 sm:$0xff]  }
 0x2f6   :  { %v1731_v33 = vadd.f32 %v1730_v38, %v13432_v3  ;;  %v1732_v35 = vpop.f32.mrb[223].mxu0  ;;  %6263 = vmatpush1.bf16.msra.mxu0 %v11225_v45  ;;  %v2246_v9 = vmax.f32 %v1920_v43, 0.0  ;;  %v1924_v31 = vadd.f32 %v1923_v11, %v13446_v36  ;;  %v1925_v26 = vpop.f32.mrb[223].mxu1  ;;  %7807 = vmatpush1.bf16.msra.mxu1 %v11228_v40  ;;  %v2244_v29 = vmax.f32 %v1727_v0, 0.0  ;;  %v14759_v38 = vld [vmem:[#allocation23_spill] sm:$0xff]  ;;  %v14760_v11 = vld [vmem:[#allocation26_spill] sm:$0xff] }
 0x2f7   :  { %v1733_v15 = vadd.f32 %v1732_v35, %v13438_v48  ;;  %6264 = vmatprep.subr.bf16.mxu0 %v11233_v61  ;;  %v2247_v8 = vmax.f32 %v1922_v28, 0.0  ;;  %v1926_v63 = vadd.f32 %v1925_v26, %v13453_v27  ;;  %7808 = vmatprep.subr.bf16.mxu1 %v11236_v32  ;;  %v11242_v45 = vld [vmem:[#allocation7 + $0x4ac] ss:$16 sps:$4 sm:$0xff]   ;;  %v2245_v18 = vmax.f32 %v1729_v22, 0.0  ;;  %v11237_v0 = vld [vmem:[#allocation7 + $0x4a0] ss:$16 sps:$4 sm:$0xff]  }
 0x2f8   :  { %v2260_v14 = vmax.f32 %v1731_v33, 0.0  ;;  %6116 = vmatmul.mubr.bf16.gmra.mrb[8].mxu0 %v14759_v38  ;;  %v2262_v43 = vmax.f32 %v1924_v31, 0.0  ;;  %7660 = vmatmul.mubr.bf16.gmra.mrb[8].mxu1 %v14759_v38  ;;  %v11240_v22 = vld [vmem:[#allocation7 + $0x4a8] ss:$16 sps:$4 sm:$0xff]   ;;  %v11245_v35 = vld [vmem:[#allocation7 + $0x4c4] ss:$16 sps:$4 sm:$0xff]  }
 0x2f9   :  { %v2261_v10 = vmax.f32 %v1733_v15, 0.0  ;;  %6125 = vmatprep.mubr.bf16.mxu0 %v14760_v11  ;;  %v2263_v61 = vmax.f32 %v1926_v63, 0.0  ;;  %7669 = vmatprep.mubr.bf16.mxu1 %v14760_v11 }
 0x2fa   :  { %v13612_v40 = vpack.c.bf16 %v2260_v14, %v2244_v29  ;;  %6265 = vmatpush1.bf16.msra.mxu0 %v11231_v17  ;;  %v13615_v28 = vpack.c.bf16 %v2262_v43, %v2246_v9  ;;  %7809 = vmatpush1.bf16.msra.mxu1 %v11234_v30  ;;  %v11248_v29 = vld [vmem:[#allocation7 + $0x4cc] ss:$16 sps:$4 sm:$0xff]  }
 0x2fb   :  { %v13617_v33 = vpack.c.bf16 %v2261_v10, %v2245_v18  ;;  %v1736_v32 = vpop.f32.mrb[224].mxu0  ;;  %6266 = vmatprep.subr.bf16.mxu0 %v11239_v6  ;;  %v13619_v31 = vpack.c.bf16 %v2263_v61, %v2247_v8  ;;  %v1929_v14 = vpop.f32.mrb[224].mxu1  ;;  %7810 = vmatprep.subr.bf16.mxu1 %v11242_v45  ;;  %v11243_v8 = vld [vmem:[#allocation7 + $0x4c0] ss:$16 sps:$4 sm:$0xff]  }
 0x2fc   :  { %14761 = vst [vmem:[#allocation23_spill] sm:$0xff] %v13612_v40  ;;  %14762 = vst [vmem:[#allocation26_spill] sm:$0xff] %v13615_v28  ;;  %v1737_v15 = vadd.f32 %v1736_v32, %v13432_v3  ;;  %v1738_v26 = vpop.f32.mrb[225].mxu0  ;;  %v1930_v17 = vadd.f32 %v1929_v14, %v13446_v36  ;;  %v1931_v63 = vpop.f32.mrb[225].mxu1  ;;  %v11246_v32 = vld [vmem:[#allocation7 + $0x4c8] ss:$16 sps:$4 sm:$0xff]  }
 0x2fd   :  { %14763 = vst [vmem:[#allocation167_spill] sm:$0xff] %v13617_v33  ;;  %14764 = vst [vmem:[#allocation168_spill] sm:$0xff] %v13619_v31  ;;  %v1739_v9 = vadd.f32 %v1738_v26, %v13438_v48  ;;  %v1740_v18 = vpop.f32.mrb[226].mxu0  ;;  %v1932_v10 = vadd.f32 %v1931_v63, %v13453_v27  ;;  %v1933_v6 = vpop.f32.mrb[226].mxu1  ;;  %v11251_v14 = vld [vmem:[#allocation7 + $0x4e4] ss:$16 sps:$4 sm:$0xff]  }
 0x2fe   :  { %v1741_v30 = vadd.f32 %v1740_v18, %v13432_v3  ;;  %v1742_v38 = vpop.f32.mrb[227].mxu0  ;;  %6267 = vmatpush1.bf16.msra.mxu0 %v11237_v0  ;;  %v2278_v43 = vmax.f32 %v1930_v17, 0.0  ;;  %v1934_v11 = vadd.f32 %v1933_v6, %v13446_v36  ;;  %v1935_v61 = vpop.f32.mrb[227].mxu1  ;;  %7811 = vmatpush1.bf16.msra.mxu1 %v11240_v22  ;;  %v2276_v26 = vmax.f32 %v1737_v15, 0.0  ;;  %v14765_v18 = vld [vmem:[#allocation25_spill] sm:$0xff]  ;;  %v14766_v6 = vld [vmem:[#allocation28_spill] sm:$0xff] }
 0x2ff   :  { %v1743_v45 = vadd.f32 %v1742_v38, %v13438_v48  ;;  %6268 = vmatprep.subr.bf16.mxu0 %v11245_v35  ;;  %v2279_v28 = vmax.f32 %v1932_v10, 0.0  ;;  %v1936_v63 = vadd.f32 %v1935_v61, %v13453_v27  ;;  %7812 = vmatprep.subr.bf16.mxu1 %v11248_v29  ;;  %v11254_v0 = vld [vmem:[#allocation7 + $0x4ec] ss:$16 sps:$4 sm:$0xff]   ;;  %v2277_v40 = vmax.f32 %v1739_v9, 0.0  ;;  %v11249_v15 = vld [vmem:[#allocation7 + $0x4e0] ss:$16 sps:$4 sm:$0xff]  }
 0x300   :  { %v2292_v31 = vmax.f32 %v1741_v30, 0.0  ;;  %6126 = vmatmul.mubr.bf16.gmra.mrb[12].mxu0 %v14765_v18  ;;  %v2294_v17 = vmax.f32 %v1934_v11, 0.0  ;;  %7670 = vmatmul.mubr.bf16.gmra.mrb[12].mxu1 %v14765_v18  ;;  %v11252_v9 = vld [vmem:[#allocation7 + $0x4e8] ss:$16 sps:$4 sm:$0xff]   ;;  %v11257_v38 = vld [vmem:[#allocation7 + $0x504] ss:$16 sps:$4 sm:$0xff]  }
 0x301   :  { %v2293_v33 = vmax.f32 %v1743_v45, 0.0  ;;  %6135 = vmatprep.mubr.bf16.mxu0 %v14766_v6  ;;  %v2295_v35 = vmax.f32 %v1936_v63, 0.0  ;;  %7679 = vmatprep.mubr.bf16.mxu1 %v14766_v6 }
 0x302   :  { %v13632_v22 = vpack.c.bf16 %v2292_v31, %v2276_v26  ;;  %6269 = vmatpush1.bf16.msra.mxu0 %v11243_v8  ;;  %v13635_v10 = vpack.c.bf16 %v2294_v17, %v2278_v43  ;;  %7813 = vmatpush1.bf16.msra.mxu1 %v11246_v32  ;;  %v11260_v26 = vld [vmem:[#allocation7 + $0x50c] ss:$16 sps:$4 sm:$0xff]  }
 0x303   :  { %v13637_v30 = vpack.c.bf16 %v2293_v33, %v2277_v40  ;;  %v1746_v29 = vpop.f32.mrb[228].mxu0  ;;  %6270 = vmatprep.subr.bf16.mxu0 %v11251_v14  ;;  %v13639_v11 = vpack.c.bf16 %v2295_v35, %v2279_v28  ;;  %v1939_v31 = vpop.f32.mrb[228].mxu1  ;;  %7814 = vmatprep.subr.bf16.mxu1 %v11254_v0  ;;  %v11255_v28 = vld [vmem:[#allocation7 + $0x500] ss:$16 sps:$4 sm:$0xff]  }
 0x304   :  { %14767 = vst [vmem:[#allocation25_spill] sm:$0xff] %v13632_v22  ;;  %14768 = vst [vmem:[#allocation28_spill] sm:$0xff] %v13635_v10  ;;  %v1747_v45 = vadd.f32 %v1746_v29, %v13432_v3  ;;  %v1748_v61 = vpop.f32.mrb[229].mxu0  ;;  %v1940_v8 = vadd.f32 %v1939_v31, %v13446_v36  ;;  %v1941_v63 = vpop.f32.mrb[229].mxu1  ;;  %v11258_v29 = vld [vmem:[#allocation7 + $0x508] ss:$16 sps:$4 sm:$0xff]  }
 0x305   :  { %14769 = vst [vmem:[#allocation169_spill] sm:$0xff] %v13637_v30  ;;  %14770 = vst [vmem:[#allocation170_spill] sm:$0xff] %v13639_v11  ;;  %v1749_v43 = vadd.f32 %v1748_v61, %v13438_v48  ;;  %v1750_v40 = vpop.f32.mrb[230].mxu0  ;;  %v1942_v33 = vadd.f32 %v1941_v63, %v13453_v27  ;;  %v1943_v14 = vpop.f32.mrb[230].mxu1  ;;  %v11263_v31 = vld [vmem:[#allocation7 + $0x524] ss:$16 sps:$4 sm:$0xff]  }
 0x306   :  { %v1751_v32 = vadd.f32 %v1750_v40, %v13432_v3  ;;  %v1752_v18 = vpop.f32.mrb[231].mxu0  ;;  %6271 = vmatpush1.bf16.msra.mxu0 %v11249_v15  ;;  %v2310_v17 = vmax.f32 %v1940_v8, 0.0  ;;  %v1944_v6 = vadd.f32 %v1943_v14, %v13446_v36  ;;  %v1945_v35 = vpop.f32.mrb[231].mxu1  ;;  %7815 = vmatpush1.bf16.msra.mxu1 %v11252_v9  ;;  %v2308_v61 = vmax.f32 %v1747_v45, 0.0  ;;  %v14771_v40 = vld [vmem:[#allocation27_spill] sm:$0xff]  ;;  %v14772_v14 = vld [vmem:[#allocation30_spill] sm:$0xff] }
 0x307   :  { %v1753_v0 = vadd.f32 %v1752_v18, %v13438_v48  ;;  %6272 = vmatprep.subr.bf16.mxu0 %v11257_v38  ;;  %v2311_v10 = vmax.f32 %v1942_v33, 0.0  ;;  %v1946_v63 = vadd.f32 %v1945_v35, %v13453_v27  ;;  %7816 = vmatprep.subr.bf16.mxu1 %v11260_v26  ;;  %v11266_v15 = vld [vmem:[#allocation7 + $0x52c] ss:$16 sps:$4 sm:$0xff]   ;;  %v2309_v22 = vmax.f32 %v1749_v43, 0.0  ;;  %v11261_v45 = vld [vmem:[#allocation7 + $0x520] ss:$16 sps:$4 sm:$0xff]  }
 0x308   :  { %v2324_v11 = vmax.f32 %v1751_v32, 0.0  ;;  %6136 = vmatmul.mubr.bf16.gmra.mrb[16].mxu0 %v14771_v40  ;;  %v2326_v8 = vmax.f32 %v1944_v6, 0.0  ;;  %7680 = vmatmul.mubr.bf16.gmra.mrb[16].mxu1 %v14771_v40  ;;  %v11264_v43 = vld [vmem:[#allocation7 + $0x528] ss:$16 sps:$4 sm:$0xff]   ;;  %v11269_v18 = vld [vmem:[#allocation7 + $0x544] ss:$16 sps:$4 sm:$0xff]  }
 0x309   :  { %v2325_v30 = vmax.f32 %v1753_v0, 0.0  ;;  %6145 = vmatprep.mubr.bf16.mxu0 %v14772_v14  ;;  %v2327_v38 = vmax.f32 %v1946_v63, 0.0  ;;  %7689 = vmatprep.mubr.bf16.mxu1 %v14772_v14 }
 0x30a   :  { %v13652_v9 = vpack.c.bf16 %v2324_v11, %v2308_v61  ;;  %6273 = vmatpush1.bf16.msra.mxu0 %v11255_v28  ;;  %v13655_v33 = vpack.c.bf16 %v2326_v8, %v2310_v17  ;;  %7817 = vmatpush1.bf16.msra.mxu1 %v11258_v29  ;;  %v11272_v61 = vld [vmem:[#allocation7 + $0x54c] ss:$16 sps:$4 sm:$0xff]  }
 0x30b   :  { %v13657_v32 = vpack.c.bf16 %v2325_v30, %v2309_v22  ;;  %v1756_v26 = vpop.f32.mrb[232].mxu0  ;;  %6274 = vmatprep.subr.bf16.mxu0 %v11263_v31  ;;  %v13659_v6 = vpack.c.bf16 %v2327_v38, %v2311_v10  ;;  %v1949_v11 = vpop.f32.mrb[232].mxu1  ;;  %7818 = vmatprep.subr.bf16.mxu1 %v11266_v15  ;;  %v11267_v10 = vld [vmem:[#allocation7 + $0x540] ss:$16 sps:$4 sm:$0xff]  }
 0x30c   :  { %14773 = vst [vmem:[#allocation27_spill] sm:$0xff] %v13652_v9  ;;  %14774 = vst [vmem:[#allocation30_spill] sm:$0xff] %v13655_v33  ;;  %v1757_v0 = vadd.f32 %v1756_v26, %v13432_v3  ;;  %v1758_v35 = vpop.f32.mrb[233].mxu0  ;;  %v1950_v28 = vadd.f32 %v1949_v11, %v13446_v36  ;;  %v1951_v63 = vpop.f32.mrb[233].mxu1  ;;  %v11270_v26 = vld [vmem:[#allocation7 + $0x548] ss:$16 sps:$4 sm:$0xff]  }
 0x30d   :  { %14775 = vst [vmem:[#allocation171_spill] sm:$0xff] %v13657_v32  ;;  %14776 = vst [vmem:[#allocation172_spill] sm:$0xff] %v13659_v6  ;;  %v1759_v17 = vadd.f32 %v1758_v35, %v13438_v48  ;;  %v1760_v22 = vpop.f32.mrb[234].mxu0  ;;  %v1952_v30 = vadd.f32 %v1951_v63, %v13453_v27  ;;  %v1953_v31 = vpop.f32.mrb[234].mxu1  ;;  %v11275_v11 = vld [vmem:[#allocation7 + $0x564] ss:$16 sps:$4 sm:$0xff]  }
 0x30e   :  { %v1761_v29 = vadd.f32 %v1760_v22, %v13432_v3  ;;  %v1762_v40 = vpop.f32.mrb[235].mxu0  ;;  %6275 = vmatpush1.bf16.msra.mxu0 %v11261_v45  ;;  %v2342_v8 = vmax.f32 %v1950_v28, 0.0  ;;  %v1954_v14 = vadd.f32 %v1953_v31, %v13446_v36  ;;  %v1955_v38 = vpop.f32.mrb[235].mxu1  ;;  %7819 = vmatpush1.bf16.msra.mxu1 %v11264_v43  ;;  %v2340_v35 = vmax.f32 %v1757_v0, 0.0  ;;  %v14777_v22 = vld [vmem:[#allocation29_spill] sm:$0xff]  ;;  %v14778_v31 = vld [vmem:[#allocation32_spill] sm:$0xff] }
 0x30f   :  { %v1763_v15 = vadd.f32 %v1762_v40, %v13438_v48  ;;  %6276 = vmatprep.subr.bf16.mxu0 %v11269_v18  ;;  %v2343_v33 = vmax.f32 %v1952_v30, 0.0  ;;  %v1956_v63 = vadd.f32 %v1955_v38, %v13453_v27  ;;  %7820 = vmatprep.subr.bf16.mxu1 %v11272_v61  ;;  %v11278_v45 = vld [vmem:[#allocation7 + $0x56c] ss:$16 sps:$4 sm:$0xff]   ;;  %v2341_v9 = vmax.f32 %v1759_v17, 0.0  ;;  %v11273_v0 = vld [vmem:[#allocation7 + $0x560] ss:$16 sps:$4 sm:$0xff]  }
 0x310   :  { %v2356_v6 = vmax.f32 %v1761_v29, 0.0  ;;  %6146 = vmatmul.mubr.bf16.gmra.mrb[20].mxu0 %v14777_v22  ;;  %v2358_v28 = vmax.f32 %v1954_v14, 0.0  ;;  %7690 = vmatmul.mubr.bf16.gmra.mrb[20].mxu1 %v14777_v22  ;;  %v11276_v17 = vld [vmem:[#allocation7 + $0x568] ss:$16 sps:$4 sm:$0xff]   ;;  %v11281_v40 = vld [vmem:[#allocation7 + $0x584] ss:$16 sps:$4 sm:$0xff]  }
 0x311   :  { %v2357_v32 = vmax.f32 %v1763_v15, 0.0  ;;  %6155 = vmatprep.mubr.bf16.mxu0 %v14778_v31  ;;  %v2359_v18 = vmax.f32 %v1956_v63, 0.0  ;;  %7699 = vmatprep.mubr.bf16.mxu1 %v14778_v31 }
 0x312   :  { %v13672_v43 = vpack.c.bf16 %v2356_v6, %v2340_v35  ;;  %6277 = vmatpush1.bf16.msra.mxu0 %v11267_v10  ;;  %v13675_v30 = vpack.c.bf16 %v2358_v28, %v2342_v8  ;;  %7821 = vmatpush1.bf16.msra.mxu1 %v11270_v26  ;;  %v11284_v35 = vld [vmem:[#allocation7 + $0x58c] ss:$16 sps:$4 sm:$0xff]  }
 0x313   :  { %v13677_v29 = vpack.c.bf16 %v2357_v32, %v2341_v9  ;;  %v1766_v61 = vpop.f32.mrb[236].mxu0  ;;  %6278 = vmatprep.subr.bf16.mxu0 %v11275_v11  ;;  %v13679_v14 = vpack.c.bf16 %v2359_v18, %v2343_v33  ;;  %v1959_v6 = vpop.f32.mrb[236].mxu1  ;;  %7822 = vmatprep.subr.bf16.mxu1 %v11278_v45  ;;  %v11279_v33 = vld [vmem:[#allocation7 + $0x580] ss:$16 sps:$4 sm:$0xff]  }
 0x314   :  { %14779 = vst [vmem:[#allocation29_spill] sm:$0xff] %v13672_v43  ;;  %14780 = vst [vmem:[#allocation32_spill] sm:$0xff] %v13675_v30  ;;  %v1767_v15 = vadd.f32 %v1766_v61, %v13432_v3  ;;  %v1768_v38 = vpop.f32.mrb[237].mxu0  ;;  %v1960_v10 = vadd.f32 %v1959_v6, %v13446_v36  ;;  %v1961_v63 = vpop.f32.mrb[237].mxu1  ;;  %v11282_v61 = vld [vmem:[#allocation7 + $0x588] ss:$16 sps:$4 sm:$0xff]  }
 0x315   :  { %14781 = vst [vmem:[#allocation173_spill] sm:$0xff] %v13677_v29  ;;  %14782 = vst [vmem:[#allocation174_spill] sm:$0xff] %v13679_v14  ;;  %v1769_v8 = vadd.f32 %v1768_v38, %v13438_v48  ;;  %v1770_v9 = vpop.f32.mrb[238].mxu0  ;;  %v1962_v32 = vadd.f32 %v1961_v63, %v13453_v27  ;;  %v1963_v11 = vpop.f32.mrb[238].mxu1  ;;  %v11287_v6 = vld [vmem:[#allocation7 + $0x5a4] ss:$16 sps:$4 sm:$0xff]  }
 0x316   :  { %v1771_v26 = vadd.f32 %v1770_v9, %v13432_v3  ;;  %v1772_v22 = vpop.f32.mrb[239].mxu0  ;;  %6279 = vmatpush1.bf16.msra.mxu0 %v11273_v0  ;;  %v2374_v28 = vmax.f32 %v1960_v10, 0.0  ;;  %v1964_v31 = vadd.f32 %v1963_v11, %v13446_v36  ;;  %v1965_v18 = vpop.f32.mrb[239].mxu1  ;;  %7823 = vmatpush1.bf16.msra.mxu1 %v11276_v17  ;;  %v2372_v38 = vmax.f32 %v1767_v15, 0.0  ;;  %v14783_v9 = vld [vmem:[#allocation31_spill] sm:$0xff]  ;;  %v14784_v11 = vld [vmem:[#allocation34_spill] sm:$0xff] }
 0x317   :  { %v1773_v45 = vadd.f32 %v1772_v22, %v13438_v48  ;;  %6280 = vmatprep.subr.bf16.mxu0 %v11281_v40  ;;  %v2375_v30 = vmax.f32 %v1962_v32, 0.0  ;;  %v1966_v63 = vadd.f32 %v1965_v18, %v13453_v27  ;;  %7824 = vmatprep.subr.bf16.mxu1 %v11284_v35  ;;  %v11290_v0 = vld [vmem:[#allocation7 + $0x5ac] ss:$16 sps:$4 sm:$0xff]   ;;  %v2373_v43 = vmax.f32 %v1769_v8, 0.0  ;;  %v11285_v15 = vld [vmem:[#allocation7 + $0x5a0] ss:$16 sps:$4 sm:$0xff]  }
 0x318   :  { %v2388_v14 = vmax.f32 %v1771_v26, 0.0  ;;  %6156 = vmatmul.mubr.bf16.gmra.mrb[24].mxu0 %v14783_v9  ;;  %v2390_v10 = vmax.f32 %v1964_v31, 0.0  ;;  %7700 = vmatmul.mubr.bf16.gmra.mrb[24].mxu1 %v14783_v9  ;;  %v11288_v8 = vld [vmem:[#allocation7 + $0x5a8] ss:$16 sps:$4 sm:$0xff]   ;;  %v11293_v22 = vld [vmem:[#allocation7 + $0x5c4] ss:$16 sps:$4 sm:$0xff]  }
 0x319   :  { %v2389_v29 = vmax.f32 %v1773_v45, 0.0  ;;  %6165 = vmatprep.mubr.bf16.mxu0 %v14784_v11  ;;  %v2391_v40 = vmax.f32 %v1966_v63, 0.0  ;;  %7709 = vmatprep.mubr.bf16.mxu1 %v14784_v11 }
 0x31a   :  { %v13692_v17 = vpack.c.bf16 %v2388_v14, %v2372_v38  ;;  %6281 = vmatpush1.bf16.msra.mxu0 %v11279_v33  ;;  %v13695_v32 = vpack.c.bf16 %v2390_v10, %v2374_v28  ;;  %7825 = vmatpush1.bf16.msra.mxu1 %v11282_v61  ;;  %v11296_v38 = vld [vmem:[#allocation7 + $0x5cc] ss:$16 sps:$4 sm:$0xff]  }
 0x31b   :  { %v13697_v26 = vpack.c.bf16 %v2389_v29, %v2373_v43  ;;  %v1776_v35 = vpop.f32.mrb[240].mxu0  ;;  %6282 = vmatprep.subr.bf16.mxu0 %v11287_v6  ;;  %v13699_v31 = vpack.c.bf16 %v2391_v40, %v2375_v30  ;;  %v1969_v14 = vpop.f32.mrb[240].mxu1  ;;  %7826 = vmatprep.subr.bf16.mxu1 %v11290_v0  ;;  %v11291_v30 = vld [vmem:[#allocation7 + $0x5c0] ss:$16 sps:$4 sm:$0xff]  }
 0x31c   :  { %14785 = vst [vmem:[#allocation31_spill] sm:$0xff] %v13692_v17  ;;  %14786 = vst [vmem:[#allocation34_spill] sm:$0xff] %v13695_v32  ;;  %v1777_v45 = vadd.f32 %v1776_v35, %v13432_v3  ;;  %v1778_v18 = vpop.f32.mrb[241].mxu0  ;;  %v1970_v33 = vadd.f32 %v1969_v14, %v13446_v36  ;;  %v1971_v63 = vpop.f32.mrb[241].mxu1  ;;  %v11294_v35 = vld [vmem:[#allocation7 + $0x5c8] ss:$16 sps:$4 sm:$0xff]  }
 0x31d   :  { %14787 = vst [vmem:[#allocation175_spill] sm:$0xff] %v13697_v26  ;;  %14788 = vst [vmem:[#allocation176_spill] sm:$0xff] %v13699_v31  ;;  %v1779_v28 = vadd.f32 %v1778_v18, %v13438_v48  ;;  %v1780_v43 = vpop.f32.mrb[242].mxu0  ;;  %v1972_v29 = vadd.f32 %v1971_v63, %v13453_v27  ;;  %v1973_v6 = vpop.f32.mrb[242].mxu1  ;;  %v11299_v14 = vld [vmem:[#allocation7 + $0x5e4] ss:$16 sps:$4 sm:$0xff]  }
 0x31e   :  { %v1781_v61 = vadd.f32 %v1780_v43, %v13432_v3  ;;  %v1782_v9 = vpop.f32.mrb[243].mxu0  ;;  %6283 = vmatpush1.bf16.msra.mxu0 %v11285_v15  ;;  %v2406_v10 = vmax.f32 %v1970_v33, 0.0  ;;  %v1974_v11 = vadd.f32 %v1973_v6, %v13446_v36  ;;  %v1975_v40 = vpop.f32.mrb[243].mxu1  ;;  %7827 = vmatpush1.bf16.msra.mxu1 %v11288_v8  ;;  %v2404_v18 = vmax.f32 %v1777_v45, 0.0  ;;  %v14789_v43 = vld [vmem:[#allocation33_spill] sm:$0xff] }
 0x31f   :  { %v1783_v0 = vadd.f32 %v1782_v9, %v13438_v48  ;;  %6284 = vmatprep.subr.bf16.mxu0 %v11293_v22  ;;  %v2407_v32 = vmax.f32 %v1972_v29, 0.0  ;;  %v1976_v63 = vadd.f32 %v1975_v40, %v13453_v27  ;;  %7828 = vmatprep.subr.bf16.mxu1 %v11296_v38  ;;  %v11302_v15 = vld [vmem:[#allocation7 + $0x5ec] ss:$16 sps:$4 sm:$0xff]   ;;  %v2405_v17 = vmax.f32 %v1779_v28, 0.0  ;;  %v14790_v6 = vld [vmem:[#allocation37_spill] sm:$0xff] }
 0x320   :  { %v2420_v31 = vmax.f32 %v1781_v61, 0.0  ;;  %6166 = vmatmul.mubr.bf16.gmra.mrb[28].mxu0 %v14789_v43  ;;  %v2422_v33 = vmax.f32 %v1974_v11, 0.0  ;;  %7710 = vmatmul.mubr.bf16.gmra.mrb[28].mxu1 %v14789_v43  ;;  %v11297_v45 = vld [vmem:[#allocation7 + $0x5e0] ss:$16 sps:$4 sm:$0xff]   ;;  %v11300_v28 = vld [vmem:[#allocation7 + $0x5e8] ss:$16 sps:$4 sm:$0xff]  }
 0x321   :  { %v2421_v26 = vmax.f32 %v1783_v0, 0.0  ;;  %6175 = vmatprep.mubr.bf16.mxu0 %v14790_v6  ;;  %v2423_v22 = vmax.f32 %v1976_v63, 0.0  ;;  %7719 = vmatprep.mubr.bf16.mxu1 %v14790_v6  ;;  %v11305_v9 = vld [vmem:[#allocation7 + $0x604] ss:$16 sps:$4 sm:$0xff]  }
 0x322   :  { %v13712_v8 = vpack.c.bf16 %v2420_v31, %v2404_v18  ;;  %6285 = vmatpush1.bf16.msra.mxu0 %v11291_v30  ;;  %v13715_v29 = vpack.c.bf16 %v2422_v33, %v2406_v10  ;;  %7829 = vmatpush1.bf16.msra.mxu1 %v11294_v35  ;;  %v11308_v18 = vld [vmem:[#allocation7 + $0x60c] ss:$16 sps:$4 sm:$0xff]  }
 0x323   :  { %v13717_v61 = vpack.c.bf16 %v2421_v26, %v2405_v17  ;;  %v1786_v38 = vpop.f32.mrb[244].mxu0  ;;  %6286 = vmatprep.subr.bf16.mxu0 %v11299_v14  ;;  %v13719_v11 = vpack.c.bf16 %v2423_v22, %v2407_v32  ;;  %v1979_v31 = vpop.f32.mrb[244].mxu1  ;;  %7830 = vmatprep.subr.bf16.mxu1 %v11302_v15 }
 0x324   :  { %14791 = vst [vmem:[#allocation33_spill] sm:$0xff] %v13715_v29  ;;  %v1787_v0 = vadd.f32 %v1786_v38, %v13432_v3  ;;  %v1788_v40 = vpop.f32.mrb[245].mxu0  ;;  %v1980_v30 = vadd.f32 %v1979_v31, %v13446_v36  ;;  %v1981_v63 = vpop.f32.mrb[245].mxu1  ;;  %v14793_v29 = vld [vmem:[#allocation36_spill] sm:$0xff] }
 0x325   :  { %14792 = vst [vmem:[#allocation37_spill] sm:$0xff] %v13719_v11  ;;  %v1789_v10 = vadd.f32 %v1788_v40, %v13438_v48  ;;  %v1790_v17 = vpop.f32.mrb[246].mxu0  ;;  %v1982_v26 = vadd.f32 %v1981_v63, %v13453_v27  ;;  %v1983_v14 = vpop.f32.mrb[246].mxu1 }
 0x326   :  { %v1791_v35 = vadd.f32 %v1790_v17, %v13432_v3  ;;  %v1792_v43 = vpop.f32.mrb[247].mxu0  ;;  %6287 = vmatpush1.bf16.msra.mxu0 %v11297_v45  ;;  %v2438_v32 = vmax.f32 %v1980_v30, 0.0  ;;  %v1984_v33 = vadd.f32 %v1983_v14, %v13446_v36  ;;  %v1985_v15 = vpop.f32.mrb[247].mxu1  ;;  %7831 = vmatpush1.bf16.msra.mxu1 %v11300_v28  ;;  %v2436_v22 = vmax.f32 %v1787_v0, 0.0  ;;  %v14794_v45 = vld [vmem:[#allocation41_spill] sm:$0xff] }
 0x327   :  { %v1793_v6 = vadd.f32 %v1792_v43, %v13438_v48  ;;  %6449 = vmatprep.subr.bf16.mxu0 %v11305_v9  ;;  %v2439_v38 = vmax.f32 %v1982_v26, 0.0  ;;  %v1986_v40 = vadd.f32 %v1985_v15, %v13453_v27  ;;  %7993 = vmatprep.subr.bf16.mxu1 %v11308_v18  ;;  %v2437_v63 = vmax.f32 %v1789_v10, 0.0 }
 0x328   :  { %v2452_v31 = vmax.f32 %v1791_v35, 0.0  ;;  %6176 = vmatmul.mubr.bf16.gmra.mrb[32].mxu0 %v14793_v29  ;;  %v2454_v17 = vmax.f32 %v1984_v33, 0.0  ;;  %7720 = vmatmul.mubr.bf16.gmra.mrb[32].mxu1 %v14793_v29 }
 0x329   :  { %v2453_v11 = vmax.f32 %v1793_v6, 0.0  ;;  %6185 = vmatprep.mubr.bf16.mxu0 %v14794_v45  ;;  %v2455_v14 = vmax.f32 %v1986_v40, 0.0  ;;  %7729 = vmatprep.mubr.bf16.mxu1 %v14794_v45 }
 0x32a   :  { %v13732_v30 = vpack.c.bf16 %v2452_v31, %v2436_v22  ;;  %v13735_v28 = vpack.c.bf16 %v2454_v17, %v2438_v32 }
 0x32b   :  { %v13737_v9 = vpack.c.bf16 %v2453_v11, %v2437_v63  ;;  %v1796_v0 = vpop.f32.mrb[248].mxu0  ;;  %v13739_v26 = vpack.c.bf16 %v2455_v14, %v2439_v38  ;;  %v1989_v10 = vpop.f32.mrb[248].mxu1 }
 0x32c   :  { %14795 = vst [vmem:[#allocation36_spill] sm:$0xff] %v13735_v28  ;;  %v1797_v18 = vadd.f32 %v1796_v0, %v13432_v3  ;;  %v1798_v35 = vpop.f32.mrb[249].mxu0  ;;  %v1990_v29 = vadd.f32 %v1989_v10, %v13446_v36  ;;  %v1991_v33 = vpop.f32.mrb[249].mxu1  ;;  %v14797_v10 = vld [vmem:[#allocation40_spill] sm:$0xff] }
 0x32d   :  { %14796 = vst [vmem:[#allocation41_spill] sm:$0xff] %v13739_v26  ;;  %v1799_v43 = vadd.f32 %v1798_v35, %v13438_v48  ;;  %v1800_v6 = vpop.f32.mrb[250].mxu0  ;;  %v1992_v15 = vadd.f32 %v1991_v33, %v13453_v27  ;;  %v1993_v22 = vpop.f32.mrb[250].mxu1 }
 0x32e   :  { %v1801_v32 = vadd.f32 %v1800_v6, %v13432_v3  ;;  %v1802_v11 = vpop.f32.mrb[251].mxu0  ;;  %v2470_v31 = vmax.f32 %v1990_v29, 0.0  ;;  %v1994_v38 = vadd.f32 %v1993_v22, %v13446_v36  ;;  %v1995_v63 = vpop.f32.mrb[251].mxu1  ;;  %v2468_v17 = vmax.f32 %v1797_v18, 0.0  ;;  %v14798_v6 = vld [vmem:[#allocation45_spill] sm:$0xff] }
 0x32f   :  { %v1803_v40 = vadd.f32 %v1802_v11, %v13438_v48  ;;  %v2471_v45 = vmax.f32 %v1992_v15, 0.0  ;;  %v1996_v0 = vadd.f32 %v1995_v63, %v13453_v27  ;;  %v2469_v35 = vmax.f32 %v1799_v43, 0.0 }
 0x330   :  { %v2484_v14 = vmax.f32 %v1801_v32, 0.0  ;;  %6186 = vmatmul.mubr.bf16.gmra.mrb[36].mxu0 %v14797_v10  ;;  %v2486_v28 = vmax.f32 %v1994_v38, 0.0  ;;  %7730 = vmatmul.mubr.bf16.gmra.mrb[36].mxu1 %v14797_v10 }
 0x331   :  { %v2485_v33 = vmax.f32 %v1803_v40, 0.0  ;;  %6195 = vmatprep.mubr.bf16.mxu0 %v14798_v6  ;;  %v2487_v22 = vmax.f32 %v1996_v0, 0.0  ;;  %7739 = vmatprep.mubr.bf16.mxu1 %v14798_v6 }
 0x332   :  { %v13752_v29 = vpack.c.bf16 %v2484_v14, %v2468_v17  ;;  %v13755_v11 = vpack.c.bf16 %v2486_v28, %v2470_v31 }
 0x333   :  { %v13757_v18 = vpack.c.bf16 %v2485_v33, %v2469_v35  ;;  %v1806_v15 = vpop.f32.mrb[252].mxu0  ;;  %v13759_v32 = vpack.c.bf16 %v2487_v22, %v2471_v45  ;;  %v1999_v38 = vpop.f32.mrb[252].mxu1 }
 0x334   :  { %14799 = vst [vmem:[#allocation40_spill] sm:$0xff] %v13752_v29  ;;  %14800 = vst [vmem:[#allocation45_spill] sm:$0xff] %v13755_v11  ;;  %v1807_v43 = vadd.f32 %v1806_v15, %v13432_v3  ;;  %v1808_v40 = vpop.f32.mrb[253].mxu0  ;;  %v2000_v63 = vadd.f32 %v1999_v38, %v13446_v36  ;;  %v2001_v17 = vpop.f32.mrb[253].mxu1 }
 0x335   :  { %14801 = vst [vmem:[#allocation177_spill] sm:$0xff] %v13759_v32  ;;  %v1809_v10 = vadd.f32 %v1808_v40, %v13438_v48  ;;  %v1810_v14 = vpop.f32.mrb[254].mxu0  ;;  %v2002_v0 = vadd.f32 %v2001_v17, %v13453_v27  ;;  %v2003_v31 = vpop.f32.mrb[254].mxu1  ;;  %v14802_v40 = vld [vmem:[#allocation44_spill] sm:$0xff] }
 0x336   :  { %v1811_v28 = vadd.f32 %v1810_v14, %v13432_v3  ;;  %v1812_v35 = vpop.f32.mrb[255].mxu0  ;;  %v2502_v33 = vmax.f32 %v2000_v63, 0.0  ;;  %v2004_v45 = vadd.f32 %v2003_v31, %v13446_v36  ;;  %v2005_v22 = vpop.f32.mrb[255].mxu1  ;;  %v2500_v15 = vmax.f32 %v1807_v43, 0.0  ;;  %v14803_v3 = vld [vmem:[#allocation49_spill] sm:$0xff]  ;;  %v14812_v31 = vld [vmem:[#allocation64_spill] sm:$0xff] }
 0x337   :  { %v1813_v6 = vadd.f32 %v1812_v35, %v13438_v48  ;;  %v2503_v11 = vmax.f32 %v2002_v0, 0.0  ;;  %v2006_v38 = vadd.f32 %v2005_v22, %v13453_v27  ;;  %v2501_v26 = vmax.f32 %v1809_v10, 0.0  ;;  %v14804_v27 = vld [vmem:[#allocation48_spill] sm:$0xff]  ;;  %v14805_v10 = vld [vmem:[#allocation53_spill] sm:$0xff]  ;;  %v14814_v22 = vld [vmem:[#allocation66_spill] sm:$0xff] }
 0x338   :  { %v2516_v32 = vmax.f32 %v1811_v28, 0.0  ;;  %6196 = vmatmul.mubr.bf16.gmra.mrb[40].mxu0 %v14802_v40  ;;  %v2518_v29 = vmax.f32 %v2004_v45, 0.0  ;;  %7740 = vmatmul.mubr.bf16.gmra.mrb[40].mxu1 %v14802_v40  ;;  %v14806_v0 = vld [vmem:[#allocation52_spill] sm:$0xff]  ;;  %v14811_v28 = vld [vmem:[#allocation65_spill] sm:$0xff] }
 0x339   :  { %v2517_v17 = vmax.f32 %v1813_v6, 0.0  ;;  %6205 = vmatprep.mubr.bf16.mxu0 %v14803_v3  ;;  %v2519_v36 = vmax.f32 %v2006_v38, 0.0  ;;  %7749 = vmatprep.mubr.bf16.mxu1 %v14803_v3  ;;  %v14813_v35 = vld [vmem:[#allocation68_spill] sm:$0xff]  ;;  %v11311_v6 = vld [vmem:[#allocation7 + $0x624] ss:$16 sps:$4 sm:$0xff]  }
 0x33a   :  { %v13772_v63 = vpack.c.bf16 %v2516_v32, %v2500_v15  ;;  %v13775_v48 = vpack.c.bf16 %v2518_v29, %v2502_v33  ;;  %v14807_v32 = vld [vmem:[#allocation57_spill] sm:$0xff]  ;;  %v11306_v45 = vld [vmem:[#allocation7 + $0x608] ss:$16 sps:$4 sm:$0xff]   ;;  %v11314_v15 = vld [vmem:[#allocation7 + $0x62c] ss:$16 sps:$4 sm:$0xff]  }
 0x33b   :  { %v13777_v43 = vpack.c.bf16 %v2517_v17, %v2501_v26  ;;  %v13779_v14 = vpack.c.bf16 %v2519_v36, %v2503_v11  ;;  %v14808_v26 = vld [vmem:[#allocation56_spill] sm:$0xff]  ;;  %v14809_v29 = vld [vmem:[#allocation61_spill] sm:$0xff] }
 0x33c   :  { %v14810_v11 = vld [vmem:[#allocation60_spill] sm:$0xff]  ;;  %v11303_v33 = vld [vmem:[#allocation7 + $0x600] ss:$16 sps:$4 sm:$0xff]   ;;  %v11317_v3 = vld [vmem:[#allocation7 + $0x644] ss:$16 sps:$4 sm:$0xff]  }
 0x33d   :  { %v14815_v38 = vld [vmem:[#allocation72_spill] sm:$0xff]  ;;  %v11309_v40 = vld [vmem:[#allocation7 + $0x620] ss:$16 sps:$4 sm:$0xff]  }
 0x33e   :  { %v11312_v17 = vld [vmem:[#allocation7 + $0x628] ss:$16 sps:$4 sm:$0xff]   ;;  %v11320_v36 = vld [vmem:[#allocation7 + $0x64c] ss:$16 sps:$4 sm:$0xff]  }
 0x340   :  { %6206 = vmatmul.mubr.bf16.gmra.mrb[44].mxu0 %v14804_v27  ;;  %7750 = vmatmul.mubr.bf16.gmra.mrb[44].mxu1 %v14804_v27  ;;  %v11315_v27 = vld [vmem:[#allocation7 + $0x640] ss:$16 sps:$4 sm:$0xff]  }
 0x341   :  { %6215 = vmatprep.mubr.bf16.mxu0 %v14805_v10  ;;  %7759 = vmatprep.mubr.bf16.mxu1 %v14805_v10  ;;  %v11318_v10 = vld [vmem:[#allocation7 + $0x648] ss:$16 sps:$4 sm:$0xff]  }
 0x348   :  { %6216 = vmatmul.mubr.bf16.gmra.mrb[48].mxu0 %v14806_v0  ;;  %7760 = vmatmul.mubr.bf16.gmra.mrb[48].mxu1 %v14806_v0  ;;  %v11323_v0 = vld [vmem:[#allocation7 + $0x664] ss:$16 sps:$4 sm:$0xff]  }
 0x349   :  { %6225 = vmatprep.mubr.bf16.mxu0 %v14807_v32  ;;  %7769 = vmatprep.mubr.bf16.mxu1 %v14807_v32  ;;  %v14816_v32 = vld [vmem:[#allocation70_spill] sm:$0xff] }
 0x350   :  { %6226 = vmatmul.mubr.bf16.gmra.mrb[52].mxu0 %v14808_v26  ;;  %7770 = vmatmul.mubr.bf16.gmra.mrb[52].mxu1 %v14808_v26  ;;  %v11326_v26 = vld [vmem:[#allocation7 + $0x66c] ss:$16 sps:$4 sm:$0xff]  }
 0x351   :  { %6235 = vmatprep.mubr.bf16.mxu0 %v14809_v29  ;;  %7779 = vmatprep.mubr.bf16.mxu1 %v14809_v29  ;;  %v14817_v29 = vld [vmem:[#allocation76_spill] sm:$0xff] }
 0x358   :  { %6236 = vmatmul.mubr.bf16.gmra.mrb[56].mxu0 %v14810_v11  ;;  %7780 = vmatmul.mubr.bf16.gmra.mrb[56].mxu1 %v14810_v11  ;;  %v11321_v11 = vld [vmem:[#allocation7 + $0x660] ss:$16 sps:$4 sm:$0xff]  }
 0x359   :  { %6245 = vmatprep.mubr.bf16.mxu0 %v14811_v28  ;;  %7789 = vmatprep.mubr.bf16.mxu1 %v14811_v28  ;;  %v11324_v28 = vld [vmem:[#allocation7 + $0x668] ss:$16 sps:$4 sm:$0xff]  }
 0x360   :  { %6246 = vmatmul.mubr.bf16.gmra.mrb[60].mxu0 %v14812_v31  ;;  %7790 = vmatmul.mubr.bf16.gmra.mrb[60].mxu1 %v14812_v31  ;;  %v11329_v31 = vld [vmem:[#allocation7 + $0x684] ss:$16 sps:$4 sm:$0xff]  }
 0x361   :  { %6288 = vmatprep.mubr.bf16.mxu0 %v14813_v35  ;;  %7832 = vmatprep.mubr.bf16.mxu1 %v14813_v35  ;;  %v11332_v35 = vld [vmem:[#allocation7 + $0x68c] ss:$16 sps:$4 sm:$0xff]  }
 0x368   :  { %6289 = vmatmul.mubr.bf16.vlgmr.msra.gmra.mrb[0].mxu0 %v14814_v22  ;;  %7833 = vmatmul.mubr.bf16.vlgmr.msra.gmra.mrb[0].mxu1 %v14814_v22  ;;  %v14818_v22 = vld [vmem:[#allocation74_spill] sm:$0xff] }
 0x369   :  { %6298 = vmatprep.mubr.bf16.mxu0 %v14815_v38  ;;  %6450 = vmatpush1.bf16.msra.mxu0 %v11303_v33  ;;  %v11327_v33 = vld [vmem:[#allocation7 + $0x680] ss:$16 sps:$4 sm:$0xff]  }
 0x36a   :  { %7842 = vmatprep.mubr.bf16.mxu1 %v14815_v38  ;;  %7994 = vmatpush1.bf16.msra.mxu1 %v11306_v45  ;;  %v11330_v45 = vld [vmem:[#allocation7 + $0x688] ss:$16 sps:$4 sm:$0xff]  }
 0x36b   :  { %6451 = vmatprep.subr.bf16.mxu0 %v11311_v6  ;;  %7995 = vmatprep.subr.bf16.mxu1 %v11314_v15  ;;  %v11335_v6 = vld [vmem:[#allocation7 + $0x6a4] ss:$16 sps:$4 sm:$0xff]   ;;  %v11338_v15 = vld [vmem:[#allocation7 + $0x6ac] ss:$16 sps:$4 sm:$0xff]  }
 0x36c   :  { %v14819_v38 = vld [vmem:[#allocation80_spill] sm:$0xff] }
 0x36d   :  { %6452 = vmatpush1.bf16.msra.mxu0 %v11309_v40  ;;  %v11333_v40 = vld [vmem:[#allocation7 + $0x6a0] ss:$16 sps:$4 sm:$0xff]  }
 0x36e   :  { %7996 = vmatpush1.bf16.msra.mxu1 %v11312_v17  ;;  %6453 = vmatprep.subr.bf16.mxu0 %v11317_v3  ;;  %v11336_v17 = vld [vmem:[#allocation7 + $0x6a8] ss:$16 sps:$4 sm:$0xff]   ;;  %v11341_v3 = vld [vmem:[#allocation7 + $0x6c4] ss:$16 sps:$4 sm:$0xff]  }
 0x36f   :  { %7997 = vmatprep.subr.bf16.mxu1 %v11320_v36  ;;  %v11344_v36 = vld [vmem:[#allocation7 + $0x6cc] ss:$16 sps:$4 sm:$0xff]  }
 0x370   :  { %6299 = vmatmul.mubr.bf16.gmra.mrb[4].mxu0 %v14816_v32  ;;  %7843 = vmatmul.mubr.bf16.gmra.mrb[4].mxu1 %v14816_v32  ;;  %v14820_v32 = vld [vmem:[#allocation78_spill] sm:$0xff] }
 0x371   :  { %6308 = vmatprep.mubr.bf16.mxu0 %v14817_v29  ;;  %7852 = vmatprep.mubr.bf16.mxu1 %v14817_v29  ;;  %v14821_v29 = vld [vmem:[#allocation84_spill] sm:$0xff] }
 0x372   :  { %6454 = vmatpush1.bf16.msra.mxu0 %v11315_v27  ;;  %7998 = vmatpush1.bf16.msra.mxu1 %v11318_v10  ;;  %v11339_v27 = vld [vmem:[#allocation7 + $0x6c0] ss:$16 sps:$4 sm:$0xff]   ;;  %v11342_v10 = vld [vmem:[#allocation7 + $0x6c8] ss:$16 sps:$4 sm:$0xff]  }
 0x373   :  { %6455 = vmatprep.subr.bf16.mxu0 %v11323_v0  ;;  %7999 = vmatprep.subr.bf16.mxu1 %v11326_v26  ;;  %v11347_v0 = vld [vmem:[#allocation7 + $0x6e4] ss:$16 sps:$4 sm:$0xff]   ;;  %v11350_v26 = vld [vmem:[#allocation7 + $0x6ec] ss:$16 sps:$4 sm:$0xff]  }
 0x376   :  { %6456 = vmatpush1.bf16.msra.mxu0 %v11321_v11  ;;  %8000 = vmatpush1.bf16.msra.mxu1 %v11324_v28  ;;  %v11345_v11 = vld [vmem:[#allocation7 + $0x6e0] ss:$16 sps:$4 sm:$0xff]   ;;  %v11348_v28 = vld [vmem:[#allocation7 + $0x6e8] ss:$16 sps:$4 sm:$0xff]  }
 0x377   :  { %6457 = vmatprep.subr.bf16.mxu0 %v11329_v31  ;;  %8001 = vmatprep.subr.bf16.mxu1 %v11332_v35  ;;  %v11353_v31 = vld [vmem:[#allocation7 + $0x704] ss:$16 sps:$4 sm:$0xff]   ;;  %v11356_v35 = vld [vmem:[#allocation7 + $0x70c] ss:$16 sps:$4 sm:$0xff]  }
 0x378   :  { %6309 = vmatmul.mubr.bf16.gmra.mrb[8].mxu0 %v14818_v22  ;;  %7853 = vmatmul.mubr.bf16.gmra.mrb[8].mxu1 %v14818_v22  ;;  %v14822_v22 = vld [vmem:[#allocation82_spill] sm:$0xff] }
 0x379   :  { %6318 = vmatprep.mubr.bf16.mxu0 %v14819_v38  ;;  %7862 = vmatprep.mubr.bf16.mxu1 %v14819_v38  ;;  %v11357_v38 = vld [vmem:[#allocation7 + $0x720] ss:$16 sps:$4 sm:$0xff]  }
 0x37a   :  { %6458 = vmatpush1.bf16.msra.mxu0 %v11327_v33  ;;  %8002 = vmatpush1.bf16.msra.mxu1 %v11330_v45  ;;  %v11351_v33 = vld [vmem:[#allocation7 + $0x700] ss:$16 sps:$4 sm:$0xff]   ;;  %v11354_v45 = vld [vmem:[#allocation7 + $0x708] ss:$16 sps:$4 sm:$0xff]  }
 0x37b   :  { %6459 = vmatprep.subr.bf16.mxu0 %v11335_v6  ;;  %8003 = vmatprep.subr.bf16.mxu1 %v11338_v15  ;;  %v11359_v6 = vld [vmem:[#allocation7 + $0x724] ss:$16 sps:$4 sm:$0xff]   ;;  %v11362_v15 = vld [vmem:[#allocation7 + $0x72c] ss:$16 sps:$4 sm:$0xff]  }
 0x37e   :  { %6460 = vmatpush1.bf16.msra.mxu0 %v11333_v40  ;;  %8004 = vmatpush1.bf16.msra.mxu1 %v11336_v17  ;;  %v11360_v40 = vld [vmem:[#allocation7 + $0x728] ss:$16 sps:$4 sm:$0xff]   ;;  %v11365_v17 = vld [vmem:[#allocation7 + $0x744] ss:$16 sps:$4 sm:$0xff]  }
 0x37f   :  { %6461 = vmatprep.subr.bf16.mxu0 %v11341_v3  ;;  %8005 = vmatprep.subr.bf16.mxu1 %v11344_v36  ;;  %v11368_v3 = vld [vmem:[#allocation7 + $0x74c] ss:$16 sps:$4 sm:$0xff]   ;;  %v11363_v36 = vld [vmem:[#allocation7 + $0x740] ss:$16 sps:$4 sm:$0xff]  }
 0x380   :  { %6319 = vmatmul.mubr.bf16.gmra.mrb[12].mxu0 %v14820_v32  ;;  %7863 = vmatmul.mubr.bf16.gmra.mrb[12].mxu1 %v14820_v32  ;;  %v11374_v32 = vld [vmem:[#allocation7 + $0x76c] ss:$16 sps:$4 sm:$0xff]  }
 0x381   :  { %6328 = vmatprep.mubr.bf16.mxu0 %v14821_v29  ;;  %7872 = vmatprep.mubr.bf16.mxu1 %v14821_v29  ;;  %v11372_v29 = vld [vmem:[#allocation7 + $0x768] ss:$16 sps:$4 sm:$0xff]  }
 0x382   :  { %6462 = vmatpush1.bf16.msra.mxu0 %v11339_v27  ;;  %8006 = vmatpush1.bf16.msra.mxu1 %v11342_v10  ;;  %v11366_v27 = vld [vmem:[#allocation7 + $0x748] ss:$16 sps:$4 sm:$0xff]   ;;  %v11371_v10 = vld [vmem:[#allocation7 + $0x764] ss:$16 sps:$4 sm:$0xff]  }
 0x383   :  { %6463 = vmatprep.subr.bf16.mxu0 %v11347_v0  ;;  %8007 = vmatprep.subr.bf16.mxu1 %v11350_v26  ;;  %v14823_v0 = vld [vmem:[#allocation86_spill] sm:$0xff]  ;;  %v11369_v26 = vld [vmem:[#allocation7 + $0x760] ss:$16 sps:$4 sm:$0xff]  }
 0x386   :  { %6464 = vmatpush1.bf16.msra.mxu0 %v11345_v11  ;;  %8008 = vmatpush1.bf16.msra.mxu1 %v11348_v28  ;;  %v11377_v11 = vld [vmem:[#allocation7 + $0x784] ss:$16 sps:$4 sm:$0xff]   ;;  %v11380_v28 = vld [vmem:[#allocation7 + $0x78c] ss:$16 sps:$4 sm:$0xff]  }
 0x387   :  { %6465 = vmatprep.subr.bf16.mxu0 %v11353_v31  ;;  %8009 = vmatprep.subr.bf16.mxu1 %v11356_v35  ;;  %v11375_v31 = vld [vmem:[#allocation7 + $0x780] ss:$16 sps:$4 sm:$0xff]   ;;  %v11378_v35 = vld [vmem:[#allocation7 + $0x788] ss:$16 sps:$4 sm:$0xff]  }
 0x388   :  { %6329 = vmatmul.mubr.bf16.gmra.mrb[16].mxu0 %v14822_v22  ;;  %7873 = vmatmul.mubr.bf16.gmra.mrb[16].mxu1 %v14822_v22  ;;  %v11381_v22 = vld [vmem:[#allocation7 + $0x7a0] ss:$16 sps:$4 sm:$0xff]  }
 0x389   :  { %6338 = vmatprep.mubr.bf16.mxu0 %v12878_v16  ;;  %7882 = vmatprep.mubr.bf16.mxu1 %v12878_v16  ;;  %v14824_v16 = vld [vmem:[#allocation91_spill] sm:$0xff] }
 0x38a   :  { %6466 = vmatpush1.bf16.msra.mxu0 %v11351_v33  ;;  %8010 = vmatpush1.bf16.msra.mxu1 %v11354_v45  ;;  %v11383_v33 = vld [vmem:[#allocation7 + $0x7a4] ss:$16 sps:$4 sm:$0xff]  }
 0x38b   :  { %6467 = vmatprep.subr.bf16.mxu0 %v11359_v6  ;;  %8011 = vmatprep.subr.bf16.mxu1 %v11362_v15  ;;  %v14825_v45 = vld [vmem:[#allocation89_spill] sm:$0xff]  ;;  %v11386_v6 = vld [vmem:[#allocation7 + $0x7ac] ss:$16 sps:$4 sm:$0xff]   ;;  %v11384_v15 = vld [vmem:[#allocation7 + $0x7a8] ss:$16 sps:$4 sm:$0xff]  }
 0x38e   :  { %6468 = vmatpush1.bf16.msra.mxu0 %v11357_v38  ;;  %8012 = vmatpush1.bf16.msra.mxu1 %v11360_v40  ;;  %v11389_v38 = vld [vmem:[#allocation7 + $0x7c4] ss:$16 sps:$4 sm:$0xff]   ;;  %v11392_v40 = vld [vmem:[#allocation7 + $0x7cc] ss:$16 sps:$4 sm:$0xff]  }
 0x38f   :  { %6469 = vmatprep.subr.bf16.mxu0 %v11365_v17  ;;  %8013 = vmatprep.subr.bf16.mxu1 %v11368_v3  ;;  %v11387_v17 = vld [vmem:[#allocation7 + $0x7c0] ss:$16 sps:$4 sm:$0xff]   ;;  %v11390_v3 = vld [vmem:[#allocation7 + $0x7c8] ss:$16 sps:$4 sm:$0xff]  }
 0x390   :  { %6339 = vmatmul.mubr.bf16.gmra.mrb[20].mxu0 %v14823_v0  ;;  %7883 = vmatmul.mubr.bf16.gmra.mrb[20].mxu1 %v14823_v0  ;;  %v11396_v0 = vld [vmem:[#allocation7 + $0x7e8] ss:$16 sps:$4 sm:$0xff]  }
 0x391   :  { %6348 = vmatprep.mubr.bf16.mxu0 %v14824_v16  ;;  %7892 = vmatprep.mubr.bf16.mxu1 %v14824_v16  ;;  %v11404_v16 = vld [vmem:[#allocation7 + $0x80c] ss:$16 sps:$4 sm:$0xff]  }
 0x392   :  { %6470 = vmatpush1.bf16.msra.mxu0 %v11363_v36  ;;  %8014 = vmatpush1.bf16.msra.mxu1 %v11366_v27  ;;  %v11395_v36 = vld [vmem:[#allocation7 + $0x7e4] ss:$16 sps:$4 sm:$0xff]  }
 0x393   :  { %6471 = vmatprep.subr.bf16.mxu0 %v11371_v10  ;;  %8015 = vmatprep.subr.bf16.mxu1 %v11374_v32  ;;  %v14826_v27 = vld [vmem:[#allocation93_spill] sm:$0xff]  ;;  %v11398_v10 = vld [vmem:[#allocation7 + $0x7ec] ss:$16 sps:$4 sm:$0xff]  }
 0x394   :  { %v11401_v32 = vld [vmem:[#allocation7 + $0x804] ss:$16 sps:$4 sm:$0xff]  }
 0x396   :  { %6472 = vmatpush1.bf16.msra.mxu0 %v11369_v26  ;;  %8016 = vmatpush1.bf16.msra.mxu1 %v11372_v29  ;;  %v14827_v26 = vld [vmem:[#allocation96_spill] sm:$0xff]  ;;  %v14829_v29 = vld [vmem:[#allocation102_spill] sm:$0xff] }
 0x397   :  { %6473 = vmatprep.subr.bf16.mxu0 %v11377_v11  ;;  %8017 = vmatprep.subr.bf16.mxu1 %v11380_v28  ;;  %v14830_v11 = vld [vmem:[#allocation105_spill] sm:$0xff] }
 0x398   :  { %6349 = vmatmul.mubr.bf16.gmra.mrb[24].mxu0 %v14825_v45  ;;  %7893 = vmatmul.mubr.bf16.gmra.mrb[24].mxu1 %v14825_v45  ;;  %v11411_v28 = vld [vmem:[#allocation7 + $0x840] ss:$16 sps:$4 sm:$0xff]   ;;  %v11422_v45 = vld [vmem:[#allocation7 + $0x86c] ss:$16 sps:$4 sm:$0xff]  }
 0x399   :  { %6358 = vmatprep.mubr.bf16.mxu0 %v12923_v12  ;;  %7902 = vmatprep.mubr.bf16.mxu1 %v12923_v12  ;;  %v11393_v12 = vld [vmem:[#allocation7 + $0x7e0] ss:$16 sps:$4 sm:$0xff]  }
 0x39a   :  { %6474 = vmatpush1.bf16.msra.mxu0 %v11375_v31  ;;  %8018 = vmatpush1.bf16.msra.mxu1 %v11378_v35  ;;  %v11414_v31 = vld [vmem:[#allocation7 + $0x848] ss:$16 sps:$4 sm:$0xff]   ;;  %v11419_v35 = vld [vmem:[#allocation7 + $0x864] ss:$16 sps:$4 sm:$0xff]  }
 0x39b   :  { %6475 = vmatprep.subr.bf16.mxu0 %v11383_v33  ;;  %8019 = vmatprep.subr.bf16.mxu1 %v11386_v6  ;;  %v14834_v33 = vld [vmem:[#allocation71_spill] sm:$0xff]  ;;  %v14835_v6 = vld [vmem:[#allocation77_spill] sm:$0xff] }
 0x39e   :  { %6476 = vmatpush1.bf16.msra.mxu0 %v11381_v22  ;;  %8020 = vmatpush1.bf16.msra.mxu1 %v11384_v15  ;;  %v11417_v22 = vld [vmem:[#allocation7 + $0x860] ss:$16 sps:$4 sm:$0xff]   ;;  %v11420_v15 = vld [vmem:[#allocation7 + $0x868] ss:$16 sps:$4 sm:$0xff]  }
 0x39f   :  { %6477 = vmatprep.subr.bf16.mxu0 %v11389_v38  ;;  %8021 = vmatprep.subr.bf16.mxu1 %v11392_v40  ;;  %v11425_v38 = vld [vmem:[#allocation7 + $0x884] ss:$16 sps:$4 sm:$0xff]   ;;  %v11428_v40 = vld [vmem:[#allocation7 + $0x88c] ss:$16 sps:$4 sm:$0xff]  }
 0x3a0   :  { %6359 = vmatmul.mubr.bf16.gmra.mrb[28].mxu0 %v14826_v27  ;;  %7903 = vmatmul.mubr.bf16.gmra.mrb[28].mxu1 %v14826_v27  ;;  %v14836_v27 = vld [vmem:[#allocation75_spill] sm:$0xff] }
 0x3a1   :  { %6368 = vmatprep.mubr.bf16.mxu0 %v12945_v24  ;;  %7912 = vmatprep.mubr.bf16.mxu1 %v12945_v24  ;;  %v14828_v24 = vld [vmem:[#allocation99_spill] sm:$0xff] }
 0x3a2   :  { %6478 = vmatpush1.bf16.msra.mxu0 %v11387_v17  ;;  %8022 = vmatpush1.bf16.msra.mxu1 %v11390_v3  ;;  %v11423_v17 = vld [vmem:[#allocation7 + $0x880] ss:$16 sps:$4 sm:$0xff]   ;;  %v11426_v3 = vld [vmem:[#allocation7 + $0x888] ss:$16 sps:$4 sm:$0xff]  }
 0x3a3   :  { %6479 = vmatprep.subr.bf16.mxu0 %v11395_v36  ;;  %8023 = vmatprep.subr.bf16.mxu1 %v11398_v10  ;;  %v11431_v36 = vld [vmem:[#allocation7 + $0x8a4] ss:$16 sps:$4 sm:$0xff]   ;;  %v11434_v10 = vld [vmem:[#allocation7 + $0x8ac] ss:$16 sps:$4 sm:$0xff]  }
 0x3a6   :  { %6480 = vmatpush1.bf16.msra.mxu0 %v11393_v12  ;;  %8024 = vmatpush1.bf16.msra.mxu1 %v11396_v0  ;;  %v14837_v12 = vld [vmem:[#allocation81_spill] sm:$0xff] }
 0x3a7   :  { %6642 = vmatprep.subr.bf16.mxu0 %v11401_v32  ;;  %8186 = vmatprep.subr.bf16.mxu1 %v11404_v16  ;;  %v11429_v0 = vld [vmem:[#allocation7 + $0x8a0] ss:$16 sps:$4 sm:$0xff]   ;;  %v11432_v32 = vld [vmem:[#allocation7 + $0x8a8] ss:$16 sps:$4 sm:$0xff]   ;;  %v11437_v16 = vld [vmem:[#allocation7 + $0x8c4] ss:$16 sps:$4 sm:$0xff]  }
 0x3a8   :  { %6369 = vmatmul.mubr.bf16.gmra.mrb[32].mxu0 %v14827_v26  ;;  %7913 = vmatmul.mubr.bf16.gmra.mrb[32].mxu1 %v14827_v26  ;;  %v11440_v26 = vld [vmem:[#allocation7 + $0x8cc] ss:$16 sps:$4 sm:$0xff]  }
 0x3a9   :  { %6378 = vmatprep.mubr.bf16.mxu0 %v12967_v7  ;;  %7922 = vmatprep.mubr.bf16.mxu1 %v12967_v7  ;;  %v14831_v7 = vld [vmem:[#allocation69_spill] sm:$0xff] }
 0x3b0   :  { %6379 = vmatmul.mubr.bf16.gmra.mrb[36].mxu0 %v14828_v24  ;;  %7923 = vmatmul.mubr.bf16.gmra.mrb[36].mxu1 %v14828_v24  ;;  %v11435_v24 = vld [vmem:[#allocation7 + $0x8c0] ss:$16 sps:$4 sm:$0xff]  }
 0x3b1   :  { %6388 = vmatprep.mubr.bf16.mxu0 %v12989_v60  ;;  %7932 = vmatprep.mubr.bf16.mxu1 %v12989_v60  ;;  %v11399_v60 = vld [vmem:[#allocation7 + $0x800] ss:$16 sps:$4 sm:$0xff]  }
 0x3b8   :  { %6389 = vmatmul.mubr.bf16.gmra.mrb[40].mxu0 %v14829_v29  ;;  %7933 = vmatmul.mubr.bf16.gmra.mrb[40].mxu1 %v14829_v29  ;;  %v11438_v29 = vld [vmem:[#allocation7 + $0x8c8] ss:$16 sps:$4 sm:$0xff]  }
 0x3b9   :  { %6398 = vmatprep.mubr.bf16.mxu0 %v13011_v13  ;;  %7942 = vmatprep.mubr.bf16.mxu1 %v13011_v13  ;;  %v11402_v13 = vld [vmem:[#allocation7 + $0x808] ss:$16 sps:$4 sm:$0xff]  }
 0x3c0   :  { %6399 = vmatmul.mubr.bf16.gmra.mrb[44].mxu0 %v14830_v11  ;;  %7943 = vmatmul.mubr.bf16.gmra.mrb[44].mxu1 %v14830_v11  ;;  %v11443_v11 = vld [vmem:[#allocation7 + $0x8e4] ss:$16 sps:$4 sm:$0xff]  }
 0x3c1   :  { %6408 = vmatprep.mubr.bf16.mxu0 %v13033_v41  ;;  %7952 = vmatprep.mubr.bf16.mxu1 %v13033_v41  ;;  %v14832_v41 = vld [vmem:[#allocation67_spill] sm:$0xff] }
 0x3c8   :  { %6409 = vmatmul.mubr.bf16.gmra.mrb[48].mxu0 %v13028_v1  ;;  %7953 = vmatmul.mubr.bf16.gmra.mrb[48].mxu1 %v13028_v1  ;;  %v11407_v1 = vld [vmem:[#allocation7 + $0x824] ss:$16 sps:$4 sm:$0xff]  }
 0x3c9   :  { %6418 = vmatprep.mubr.bf16.mxu0 %v13055_v2  ;;  %7962 = vmatprep.mubr.bf16.mxu1 %v13055_v2  ;;  %v14833_v2 = vld [vmem:[#allocation73_spill] sm:$0xff] }
 0x3d0   :  { %6419 = vmatmul.mubr.bf16.gmra.mrb[52].mxu0 %v13050_v55  ;;  %7963 = vmatmul.mubr.bf16.gmra.mrb[52].mxu1 %v13050_v55  ;;  %v11410_v55 = vld [vmem:[#allocation7 + $0x82c] ss:$16 sps:$4 sm:$0xff]  }
 0x3d1   :  { %6428 = vmatprep.mubr.bf16.mxu0 %v13077_v57  ;;  %7972 = vmatprep.mubr.bf16.mxu1 %v13077_v57  ;;  %v11408_v57 = vld [vmem:[#allocation7 + $0x828] ss:$16 sps:$4 sm:$0xff]  }
 0x3d8   :  { %6429 = vmatmul.mubr.bf16.gmra.mrb[56].mxu0 %v13072_v5  ;;  %7973 = vmatmul.mubr.bf16.gmra.mrb[56].mxu1 %v13072_v5  ;;  %v11405_v5 = vld [vmem:[#allocation7 + $0x820] ss:$16 sps:$4 sm:$0xff]  }
 0x3d9   :  { %6438 = vmatprep.mubr.bf16.mxu0 %v13111_v56  ;;  %7982 = vmatprep.mubr.bf16.mxu1 %v13111_v56  ;;  %v11416_v56 = vld [vmem:[#allocation7 + $0x84c] ss:$16 sps:$4 sm:$0xff]  }
 0x3e0   :  { %6439 = vmatmul.mubr.bf16.gmra.mrb[60].mxu0 %v13103_v44  ;;  %7983 = vmatmul.mubr.bf16.gmra.mrb[60].mxu1 %v13103_v44  ;;  %v11413_v44 = vld [vmem:[#allocation7 + $0x844] ss:$16 sps:$4 sm:$0xff]  }
 0x3e1   :  { %6481 = vmatprep.mubr.bf16.mxu0 %v14831_v7  ;;  %8025 = vmatprep.mubr.bf16.mxu1 %v14831_v7  ;;  %v14838_v7 = vld [vmem:[#allocation79_spill] sm:$0xff] }
 0x3e8   :  { %6482 = vmatmul.mubr.bf16.vlgmr.msra.gmra.mrb[0].mxu0 %v14832_v41  ;;  %8026 = vmatmul.mubr.bf16.vlgmr.msra.gmra.mrb[0].mxu1 %v14832_v41  ;;  %v11444_v41 = vld [vmem:[#allocation7 + $0x8e8] ss:$16 sps:$4 sm:$0xff]  }
 0x3e9   :  { %6491 = vmatprep.mubr.bf16.mxu0 %v14833_v2  ;;  %6643 = vmatpush1.bf16.msra.mxu0 %v11399_v60  ;;  %v11446_v60 = vld [vmem:[#allocation7 + $0x8ec] ss:$16 sps:$4 sm:$0xff]  }
 0x3ea   :  { %8035 = vmatprep.mubr.bf16.mxu1 %v14833_v2  ;;  %8187 = vmatpush1.bf16.msra.mxu1 %v11402_v13  ;;  %v14839_v13 = vld [vmem:[#allocation85_spill] sm:$0xff]  ;;  %v11452_v2 = vld [vmem:[#allocation7 + $0x90c] ss:$16 sps:$4 sm:$0xff]  }
 0x3eb   :  { %6644 = vmatprep.subr.bf16.mxu0 %v11407_v1  ;;  %8188 = vmatprep.subr.bf16.mxu1 %v11410_v55  ;;  %v11441_v1 = vld [vmem:[#allocation7 + $0x8e0] ss:$16 sps:$4 sm:$0xff]   ;;  %v11449_v55 = vld [vmem:[#allocation7 + $0x904] ss:$16 sps:$4 sm:$0xff]  }
 0x3ed   :  { %6645 = vmatpush1.bf16.msra.mxu0 %v11405_v5  ;;  %v11447_v5 = vld [vmem:[#allocation7 + $0x900] ss:$16 sps:$4 sm:$0xff]  }
 0x3ee   :  { %8189 = vmatpush1.bf16.msra.mxu1 %v11408_v57  ;;  %6646 = vmatprep.subr.bf16.mxu0 %v11413_v44  ;;  %v11450_v57 = vld [vmem:[#allocation7 + $0x908] ss:$16 sps:$4 sm:$0xff]   ;;  %v11455_v44 = vld [vmem:[#allocation7 + $0x924] ss:$16 sps:$4 sm:$0xff]  }
 0x3ef   :  { %8190 = vmatprep.subr.bf16.mxu1 %v11416_v56  ;;  %v14840_v56 = vld [vmem:[#allocation83_spill] sm:$0xff] }
 0x3f0   :  { %6492 = vmatmul.mubr.bf16.gmra.mrb[4].mxu0 %v14834_v33  ;;  %8036 = vmatmul.mubr.bf16.gmra.mrb[4].mxu1 %v14834_v33  ;;  %v11456_v33 = vld [vmem:[#allocation7 + $0x928] ss:$16 sps:$4 sm:$0xff]  }
 0x3f1   :  { %6501 = vmatprep.mubr.bf16.mxu0 %v14835_v6  ;;  %8045 = vmatprep.mubr.bf16.mxu1 %v14835_v6  ;;  %v11464_v6 = vld [vmem:[#allocation7 + $0x94c] ss:$16 sps:$4 sm:$0xff]  }
 0x3f2   :  { %6647 = vmatpush1.bf16.msra.mxu0 %v11411_v28  ;;  %8191 = vmatpush1.bf16.msra.mxu1 %v11414_v31  ;;  %v11458_v28 = vld [vmem:[#allocation7 + $0x92c] ss:$16 sps:$4 sm:$0xff]  }
 0x3f3   :  { %6648 = vmatprep.subr.bf16.mxu0 %v11419_v35  ;;  %8192 = vmatprep.subr.bf16.mxu1 %v11422_v45  ;;  %v14841_v31 = vld [vmem:[#allocation88_spill] sm:$0xff]  ;;  %v11453_v35 = vld [vmem:[#allocation7 + $0x920] ss:$16 sps:$4 sm:$0xff]   ;;  %v11461_v45 = vld [vmem:[#allocation7 + $0x944] ss:$16 sps:$4 sm:$0xff]  }
 0x3f6   :  { %6649 = vmatpush1.bf16.msra.mxu0 %v11417_v22  ;;  %8193 = vmatpush1.bf16.msra.mxu1 %v11420_v15  ;;  %v11459_v22 = vld [vmem:[#allocation7 + $0x940] ss:$16 sps:$4 sm:$0xff]   ;;  %v11462_v15 = vld [vmem:[#allocation7 + $0x948] ss:$16 sps:$4 sm:$0xff]  }
 0x3f7   :  { %6650 = vmatprep.subr.bf16.mxu0 %v11425_v38  ;;  %8194 = vmatprep.subr.bf16.mxu1 %v11428_v40  ;;  %v11467_v38 = vld [vmem:[#allocation7 + $0x964] ss:$16 sps:$4 sm:$0xff]  }
 0x3f8   :  { %6502 = vmatmul.mubr.bf16.gmra.mrb[8].mxu0 %v14836_v27  ;;  %8046 = vmatmul.mubr.bf16.gmra.mrb[8].mxu1 %v14836_v27  ;;  %v14842_v40 = vld [vmem:[#allocation87_spill] sm:$0xff]  ;;  %v11468_v27 = vld [vmem:[#allocation7 + $0x968] ss:$16 sps:$4 sm:$0xff]  }
 0x3f9   :  { %6511 = vmatprep.mubr.bf16.mxu0 %v14837_v12  ;;  %8055 = vmatprep.mubr.bf16.mxu1 %v14837_v12  ;;  %v11476_v12 = vld [vmem:[#allocation7 + $0x98c] ss:$16 sps:$4 sm:$0xff]  }
 0x3fa   :  { %6651 = vmatpush1.bf16.msra.mxu0 %v11423_v17  ;;  %8195 = vmatpush1.bf16.msra.mxu1 %v11426_v3  ;;  %v11470_v17 = vld [vmem:[#allocation7 + $0x96c] ss:$16 sps:$4 sm:$0xff]  }
 0x3fb   :  { %6652 = vmatprep.subr.bf16.mxu0 %v11431_v36  ;;  %8196 = vmatprep.subr.bf16.mxu1 %v11434_v10  ;;  %v14843_v3 = vld [vmem:[#allocation92_spill] sm:$0xff]  ;;  %v11465_v36 = vld [vmem:[#allocation7 + $0x960] ss:$16 sps:$4 sm:$0xff]   ;;  %v11473_v10 = vld [vmem:[#allocation7 + $0x984] ss:$16 sps:$4 sm:$0xff]  }
 0x3fe   :  { %6653 = vmatpush1.bf16.msra.mxu0 %v11429_v0  ;;  %8197 = vmatpush1.bf16.msra.mxu1 %v11432_v32  ;;  %v11471_v0 = vld [vmem:[#allocation7 + $0x980] ss:$16 sps:$4 sm:$0xff]   ;;  %v11474_v32 = vld [vmem:[#allocation7 + $0x988] ss:$16 sps:$4 sm:$0xff]  }
 0x3ff   :  { %6654 = vmatprep.subr.bf16.mxu0 %v11437_v16  ;;  %8198 = vmatprep.subr.bf16.mxu1 %v11440_v26  ;;  %v11479_v16 = vld [vmem:[#allocation7 + $0x9a4] ss:$16 sps:$4 sm:$0xff]   ;;  %v14844_v26 = vld [vmem:[#allocation90_spill] sm:$0xff] }
 0x400   :  { %6512 = vmatmul.mubr.bf16.gmra.mrb[12].mxu0 %v14838_v7  ;;  %8056 = vmatmul.mubr.bf16.gmra.mrb[12].mxu1 %v14838_v7  ;;  %v11480_v7 = vld [vmem:[#allocation7 + $0x9a8] ss:$16 sps:$4 sm:$0xff]  }
 0x401   :  { %6521 = vmatprep.mubr.bf16.mxu0 %v14839_v13  ;;  %8065 = vmatprep.mubr.bf16.mxu1 %v14839_v13  ;;  %v11488_v13 = vld [vmem:[#allocation7 + $0x9cc] ss:$16 sps:$4 sm:$0xff]  }
 0x402   :  { %6655 = vmatpush1.bf16.msra.mxu0 %v11435_v24  ;;  %8199 = vmatpush1.bf16.msra.mxu1 %v11438_v29  ;;  %v11482_v24 = vld [vmem:[#allocation7 + $0x9ac] ss:$16 sps:$4 sm:$0xff]   ;;  %v14845_v29 = vld [vmem:[#allocation95_spill] sm:$0xff] }
 0x403   :  { %6656 = vmatprep.subr.bf16.mxu0 %v11443_v11  ;;  %8200 = vmatprep.subr.bf16.mxu1 %v11446_v60  ;;  %v11477_v11 = vld [vmem:[#allocation7 + $0x9a0] ss:$16 sps:$4 sm:$0xff]   ;;  %v11485_v60 = vld [vmem:[#allocation7 + $0x9c4] ss:$16 sps:$4 sm:$0xff]  }
 0x406   :  { %6657 = vmatpush1.bf16.msra.mxu0 %v11441_v1  ;;  %8201 = vmatpush1.bf16.msra.mxu1 %v11444_v41  ;;  %v11483_v1 = vld [vmem:[#allocation7 + $0x9c0] ss:$16 sps:$4 sm:$0xff]   ;;  %v11486_v41 = vld [vmem:[#allocation7 + $0x9c8] ss:$16 sps:$4 sm:$0xff]  }
 0x407   :  { %6658 = vmatprep.subr.bf16.mxu0 %v11449_v55  ;;  %8202 = vmatprep.subr.bf16.mxu1 %v11452_v2  ;;  %v11491_v55 = vld [vmem:[#allocation7 + $0x9e4] ss:$16 sps:$4 sm:$0xff]   ;;  %v14846_v2 = vld [vmem:[#allocation94_spill] sm:$0xff] }
 0x408   :  { %6522 = vmatmul.mubr.bf16.gmra.mrb[16].mxu0 %v14840_v56  ;;  %8066 = vmatmul.mubr.bf16.gmra.mrb[16].mxu1 %v14840_v56  ;;  %v11492_v56 = vld [vmem:[#allocation7 + $0x9e8] ss:$16 sps:$4 sm:$0xff]  }
 0x409   :  { %6531 = vmatprep.mubr.bf16.mxu0 %v14841_v31  ;;  %8075 = vmatprep.mubr.bf16.mxu1 %v14841_v31  ;;  %v11500_v31 = vld [vmem:[#allocation7 + $0xa0c] ss:$16 sps:$4 sm:$0xff]  }
 0x40a   :  { %6659 = vmatpush1.bf16.msra.mxu0 %v11447_v5  ;;  %8203 = vmatpush1.bf16.msra.mxu1 %v11450_v57  ;;  %v11494_v5 = vld [vmem:[#allocation7 + $0x9ec] ss:$16 sps:$4 sm:$0xff]  }
 0x40b   :  { %6660 = vmatprep.subr.bf16.mxu0 %v11455_v44  ;;  %8204 = vmatprep.subr.bf16.mxu1 %v11458_v28  ;;  %v14847_v57 = vld [vmem:[#allocation98_spill] sm:$0xff]  ;;  %v11489_v44 = vld [vmem:[#allocation7 + $0x9e0] ss:$16 sps:$4 sm:$0xff]   ;;  %v11497_v28 = vld [vmem:[#allocation7 + $0xa04] ss:$16 sps:$4 sm:$0xff]  }
 0x40e   :  { %6661 = vmatpush1.bf16.msra.mxu0 %v11453_v35  ;;  %8205 = vmatpush1.bf16.msra.mxu1 %v11456_v33  ;;  %v14848_v35 = vld [vmem:[#allocation97_spill] sm:$0xff] }
 0x40f   :  { %6662 = vmatprep.subr.bf16.mxu0 %v11461_v45  ;;  %8206 = vmatprep.subr.bf16.mxu1 %v11464_v6  ;;  %v14849_v33 = vld [vmem:[#allocation101_spill] sm:$0xff]  ;;  %v14850_v45 = vld [vmem:[#allocation100_spill] sm:$0xff] }
 0x410   :  { %6532 = vmatmul.mubr.bf16.gmra.mrb[20].mxu0 %v14842_v40  ;;  %8076 = vmatmul.mubr.bf16.gmra.mrb[20].mxu1 %v14842_v40  ;;  %v14851_v6 = vld [vmem:[#allocation104_spill] sm:$0xff] }
 0x411   :  { %6541 = vmatprep.mubr.bf16.mxu0 %v14843_v3  ;;  %8085 = vmatprep.mubr.bf16.mxu1 %v14843_v3  ;;  %v14855_v40 = vld [vmem:[#allocation108_spill] sm:$0xff]  ;;  %v14857_v3 = vld [vmem:[#allocation109_spill] sm:$0xff] }
 0x412   :  { %6663 = vmatpush1.bf16.msra.mxu0 %v11459_v22  ;;  %8207 = vmatpush1.bf16.msra.mxu1 %v11462_v15  ;;  %v14852_v22 = vld [vmem:[#allocation103_spill] sm:$0xff] }
 0x413   :  { %6664 = vmatprep.subr.bf16.mxu0 %v11467_v38  ;;  %8208 = vmatprep.subr.bf16.mxu1 %v11470_v17  ;;  %v14853_v15 = vld [vmem:[#allocation107_spill] sm:$0xff]  ;;  %v14854_v38 = vld [vmem:[#allocation106_spill] sm:$0xff] }
 0x414   :  { %v14856_v17 = vld [vmem:[#allocation110_spill] sm:$0xff] }
 0x416   :  { %6665 = vmatpush1.bf16.msra.mxu0 %v11465_v36  ;;  %8209 = vmatpush1.bf16.msra.mxu1 %v11468_v27  ;;  %v14858_v36 = vld [vmem:[#allocation112_spill] sm:$0xff]  ;;  %v14859_v27 = vld [vmem:[#allocation111_spill] sm:$0xff] }
 0x417   :  { %6666 = vmatprep.subr.bf16.mxu0 %v11473_v10  ;;  %8210 = vmatprep.subr.bf16.mxu1 %v11476_v12  ;;  %v11498_v10 = vld [vmem:[#allocation7 + $0xa08] ss:$16 sps:$4 sm:$0xff]   ;;  %v11503_v12 = vld [vmem:[#allocation7 + $0xa24] ss:$16 sps:$4 sm:$0xff]  }
 0x418   :  { %6542 = vmatmul.mubr.bf16.gmra.mrb[24].mxu0 %v14844_v26  ;;  %8086 = vmatmul.mubr.bf16.gmra.mrb[24].mxu1 %v14844_v26  ;;  %v11510_v26 = vld [vmem:[#allocation7 + $0xa48] ss:$16 sps:$4 sm:$0xff]  }
 0x419   :  { %6551 = vmatprep.mubr.bf16.mxu0 %v14845_v29  ;;  %8095 = vmatprep.mubr.bf16.mxu1 %v14845_v29  ;;  %v14860_v29 = vld [vmem:[#allocation115_spill] sm:$0xff] }
 0x41a   :  { %6667 = vmatpush1.bf16.msra.mxu0 %v11471_v0  ;;  %8211 = vmatpush1.bf16.msra.mxu1 %v11474_v32  ;;  %v11506_v0 = vld [vmem:[#allocation7 + $0xa2c] ss:$16 sps:$4 sm:$0xff]   ;;  %v11509_v32 = vld [vmem:[#allocation7 + $0xa44] ss:$16 sps:$4 sm:$0xff]  }
 0x41b   :  { %6668 = vmatprep.subr.bf16.mxu0 %v11479_v16  ;;  %8212 = vmatprep.subr.bf16.mxu1 %v11482_v24  ;;  %v11507_v16 = vld [vmem:[#allocation7 + $0xa40] ss:$16 sps:$4 sm:$0xff]   ;;  %v11515_v24 = vld [vmem:[#allocation7 + $0xa64] ss:$16 sps:$4 sm:$0xff]  }
 0x41e   :  { %6669 = vmatpush1.bf16.msra.mxu0 %v11477_v11  ;;  %8213 = vmatpush1.bf16.msra.mxu1 %v11480_v7  ;;  %v11516_v11 = vld [vmem:[#allocation7 + $0xa68] ss:$16 sps:$4 sm:$0xff]   ;;  %v11521_v7 = vld [vmem:[#allocation7 + $0xa84] ss:$16 sps:$4 sm:$0xff]  }
 0x41f   :  { %6670 = vmatprep.subr.bf16.mxu0 %v11485_v60  ;;  %8214 = vmatprep.subr.bf16.mxu1 %v11488_v13  ;;  %v11524_v60 = vld [vmem:[#allocation7 + $0xa8c] ss:$16 sps:$4 sm:$0xff]   ;;  %v11519_v13 = vld [vmem:[#allocation7 + $0xa80] ss:$16 sps:$4 sm:$0xff]  }
 0x420   :  { %6552 = vmatmul.mubr.bf16.gmra.mrb[28].mxu0 %v14846_v2  ;;  %8096 = vmatmul.mubr.bf16.gmra.mrb[28].mxu1 %v14846_v2  ;;  %v11530_v2 = vld [vmem:[#allocation7 + $0xaac] ss:$16 sps:$4 sm:$0xff]  }
 0x421   :  { %6561 = vmatprep.mubr.bf16.mxu0 %v14847_v57  ;;  %8105 = vmatprep.mubr.bf16.mxu1 %v14847_v57  ;;  %v11533_v57 = vld [vmem:[#allocation7 + $0xac4] ss:$16 sps:$4 sm:$0xff]  }
 0x422   :  { %6671 = vmatpush1.bf16.msra.mxu0 %v11483_v1  ;;  %8215 = vmatpush1.bf16.msra.mxu1 %v11486_v41  ;;  %v11522_v1 = vld [vmem:[#allocation7 + $0xa88] ss:$16 sps:$4 sm:$0xff]   ;;  %v11527_v41 = vld [vmem:[#allocation7 + $0xaa4] ss:$16 sps:$4 sm:$0xff]  }
 0x423   :  { %6672 = vmatprep.subr.bf16.mxu0 %v11491_v55  ;;  %8216 = vmatprep.subr.bf16.mxu1 %v11494_v5  ;;  %v14861_v55 = vld [vmem:[#allocation118_spill] sm:$0xff] }
 0x424   :  { %v11528_v5 = vld [vmem:[#allocation7 + $0xaa8] ss:$16 sps:$4 sm:$0xff]  }
 0x426   :  { %6673 = vmatpush1.bf16.msra.mxu0 %v11489_v44  ;;  %8217 = vmatpush1.bf16.msra.mxu1 %v11492_v56  ;;  %v11536_v44 = vld [vmem:[#allocation7 + $0xacc] ss:$16 sps:$4 sm:$0xff]   ;;  %v11531_v56 = vld [vmem:[#allocation7 + $0xac0] ss:$16 sps:$4 sm:$0xff]  }
 0x427   :  { %6835 = vmatprep.subr.bf16.mxu0 %v11497_v28  ;;  %8379 = vmatprep.subr.bf16.mxu1 %v11500_v31  ;;  %v11534_v28 = vld [vmem:[#allocation7 + $0xac8] ss:$16 sps:$4 sm:$0xff]   ;;  %v11539_v31 = vld [vmem:[#allocation7 + $0xae4] ss:$16 sps:$4 sm:$0xff]  }
 0x428   :  { %6562 = vmatmul.mubr.bf16.gmra.mrb[32].mxu0 %v14848_v35  ;;  %8106 = vmatmul.mubr.bf16.gmra.mrb[32].mxu1 %v14848_v35  ;;  %v14862_v35 = vld [vmem:[#allocation121_spill] sm:$0xff] }
 0x429   :  { %6571 = vmatprep.mubr.bf16.mxu0 %v14849_v33  ;;  %8115 = vmatprep.mubr.bf16.mxu1 %v14849_v33  ;;  %v11542_v33 = vld [vmem:[#allocation7 + $0xaec] ss:$16 sps:$4 sm:$0xff]  }
 0x430   :  { %6572 = vmatmul.mubr.bf16.gmra.mrb[36].mxu0 %v14850_v45  ;;  %8116 = vmatmul.mubr.bf16.gmra.mrb[36].mxu1 %v14850_v45  ;;  %v11537_v45 = vld [vmem:[#allocation7 + $0xae0] ss:$16 sps:$4 sm:$0xff]  }
 0x431   :  { %6581 = vmatprep.mubr.bf16.mxu0 %v14851_v6  ;;  %8125 = vmatprep.mubr.bf16.mxu1 %v14851_v6  ;;  %v11540_v6 = vld [vmem:[#allocation7 + $0xae8] ss:$16 sps:$4 sm:$0xff]  }
 0x438   :  { %6582 = vmatmul.mubr.bf16.gmra.mrb[40].mxu0 %v14852_v22  ;;  %8126 = vmatmul.mubr.bf16.gmra.mrb[40].mxu1 %v14852_v22  ;;  %v11545_v22 = vld [vmem:[#allocation7 + $0xb04] ss:$16 sps:$4 sm:$0xff]  }
 0x439   :  { %6591 = vmatprep.mubr.bf16.mxu0 %v14853_v15  ;;  %8135 = vmatprep.mubr.bf16.mxu1 %v14853_v15  ;;  %v11548_v15 = vld [vmem:[#allocation7 + $0xb0c] ss:$16 sps:$4 sm:$0xff]  }
 0x440   :  { %6592 = vmatmul.mubr.bf16.gmra.mrb[44].mxu0 %v14854_v38  ;;  %8136 = vmatmul.mubr.bf16.gmra.mrb[44].mxu1 %v14854_v38  ;;  %v11543_v38 = vld [vmem:[#allocation7 + $0xb00] ss:$16 sps:$4 sm:$0xff]  }
 0x441   :  { %6601 = vmatprep.mubr.bf16.mxu0 %v13035_v42  ;;  %8145 = vmatprep.mubr.bf16.mxu1 %v13035_v42  ;;  %v11495_v42 = vld [vmem:[#allocation7 + $0xa00] ss:$16 sps:$4 sm:$0xff]  }
 0x448   :  { %6602 = vmatmul.mubr.bf16.gmra.mrb[48].mxu0 %v14855_v40  ;;  %8146 = vmatmul.mubr.bf16.gmra.mrb[48].mxu1 %v14855_v40  ;;  %v11546_v40 = vld [vmem:[#allocation7 + $0xb08] ss:$16 sps:$4 sm:$0xff]  }
 0x449   :  { %6611 = vmatprep.mubr.bf16.mxu0 %v14856_v17  ;;  %8155 = vmatprep.mubr.bf16.mxu1 %v14856_v17  ;;  %v11551_v17 = vld [vmem:[#allocation7 + $0xb24] ss:$16 sps:$4 sm:$0xff]  }
 0x450   :  { %6612 = vmatmul.mubr.bf16.gmra.mrb[52].mxu0 %v14857_v3  ;;  %8156 = vmatmul.mubr.bf16.gmra.mrb[52].mxu1 %v14857_v3  ;;  %v14864_v3 = vld [vmem:[#allocation124_spill] sm:$0xff] }
 0x451   :  { %6621 = vmatprep.mubr.bf16.mxu0 %v14858_v36  ;;  %8165 = vmatprep.mubr.bf16.mxu1 %v14858_v36  ;;  %v11554_v36 = vld [vmem:[#allocation7 + $0xb2c] ss:$16 sps:$4 sm:$0xff]  }
 0x458   :  { %6622 = vmatmul.mubr.bf16.gmra.mrb[56].mxu0 %v14859_v27  ;;  %8166 = vmatmul.mubr.bf16.gmra.mrb[56].mxu1 %v14859_v27  ;;  %v14865_v27 = vld [vmem:[#allocation130_spill] sm:$0xff] }
 0x459   :  { %6631 = vmatprep.mubr.bf16.mxu0 %v13113_v34  ;;  %8175 = vmatprep.mubr.bf16.mxu1 %v13113_v34  ;;  %v11501_v34 = vld [vmem:[#allocation7 + $0xa20] ss:$16 sps:$4 sm:$0xff]  }
 0x460   :  { %6632 = vmatmul.mubr.bf16.gmra.mrb[60].mxu0 %v13109_v25  ;;  %8176 = vmatmul.mubr.bf16.gmra.mrb[60].mxu1 %v13109_v25  ;;  %v11504_v25 = vld [vmem:[#allocation7 + $0xa28] ss:$16 sps:$4 sm:$0xff]  }
 0x461   :  { %6674 = vmatprep.mubr.bf16.mxu0 %v13133_v19  ;;  %8218 = vmatprep.mubr.bf16.mxu1 %v13133_v19  ;;  %v11512_v19 = vld [vmem:[#allocation7 + $0xa4c] ss:$16 sps:$4 sm:$0xff]  }
 0x468   :  { %6675 = vmatmul.mubr.bf16.vlgmr.msra.gmra.mrb[0].mxu0 %v13128_v58  ;;  %8219 = vmatmul.mubr.bf16.vlgmr.msra.gmra.mrb[0].mxu1 %v13128_v58  ;;  %v11518_v58 = vld [vmem:[#allocation7 + $0xa6c] ss:$16 sps:$4 sm:$0xff]  }
 0x469   :  { %6684 = vmatprep.mubr.bf16.mxu0 %v13155_v54  ;;  %6836 = vmatpush1.bf16.msra.mxu0 %v11495_v42  ;;  %v11549_v42 = vld [vmem:[#allocation7 + $0xb20] ss:$16 sps:$4 sm:$0xff]  }
 0x46a   :  { %8228 = vmatprep.mubr.bf16.mxu1 %v13155_v54  ;;  %8380 = vmatpush1.bf16.msra.mxu1 %v11498_v10  ;;  %v11513_v54 = vld [vmem:[#allocation7 + $0xa60] ss:$16 sps:$4 sm:$0xff]   ;;  %v11552_v10 = vld [vmem:[#allocation7 + $0xb28] ss:$16 sps:$4 sm:$0xff]  }
 0x46b   :  { %6837 = vmatprep.subr.bf16.mxu0 %v11503_v12  ;;  %8381 = vmatprep.subr.bf16.mxu1 %v11506_v0  ;;  %v11557_v12 = vld [vmem:[#allocation7 + $0xb44] ss:$16 sps:$4 sm:$0xff]   ;;  %v11560_v0 = vld [vmem:[#allocation7 + $0xb4c] ss:$16 sps:$4 sm:$0xff]  }
 0x46d   :  { %6838 = vmatpush1.bf16.msra.mxu0 %v11501_v34  ;;  %v11555_v34 = vld [vmem:[#allocation7 + $0xb40] ss:$16 sps:$4 sm:$0xff]  }
 0x46e   :  { %8382 = vmatpush1.bf16.msra.mxu1 %v11504_v25  ;;  %6839 = vmatprep.subr.bf16.mxu0 %v11509_v32  ;;  %v11558_v25 = vld [vmem:[#allocation7 + $0xb48] ss:$16 sps:$4 sm:$0xff]   ;;  %v11563_v32 = vld [vmem:[#allocation7 + $0xb64] ss:$16 sps:$4 sm:$0xff]  }
 0x46f   :  { %8383 = vmatprep.subr.bf16.mxu1 %v11512_v19  ;;  %v14866_v19 = vld [vmem:[#allocation128_spill] sm:$0xff] }
 0x470   :  { %6685 = vmatmul.mubr.bf16.gmra.mrb[4].mxu0 %v14860_v29  ;;  %8229 = vmatmul.mubr.bf16.gmra.mrb[4].mxu1 %v14860_v29  ;;  %v11569_v29 = vld [vmem:[#allocation7 + $0xb84] ss:$16 sps:$4 sm:$0xff]  }
 0x471   :  { %6694 = vmatprep.mubr.bf16.mxu0 %v13177_v39  ;;  %8238 = vmatprep.mubr.bf16.mxu1 %v13177_v39  ;;  %v11525_v39 = vld [vmem:[#allocation7 + $0xaa0] ss:$16 sps:$4 sm:$0xff]  }
 0x472   :  { %6840 = vmatpush1.bf16.msra.mxu0 %v11507_v16  ;;  %8384 = vmatpush1.bf16.msra.mxu1 %v11510_v26  ;;  %v11566_v16 = vld [vmem:[#allocation7 + $0xb6c] ss:$16 sps:$4 sm:$0xff]   ;;  %v11561_v26 = vld [vmem:[#allocation7 + $0xb60] ss:$16 sps:$4 sm:$0xff]  }
 0x473   :  { %6841 = vmatprep.subr.bf16.mxu0 %v11515_v24  ;;  %8385 = vmatprep.subr.bf16.mxu1 %v11518_v58  ;;  %v11564_v24 = vld [vmem:[#allocation7 + $0xb68] ss:$16 sps:$4 sm:$0xff]   ;;  %v11572_v58 = vld [vmem:[#allocation7 + $0xb8c] ss:$16 sps:$4 sm:$0xff]  }
 0x476   :  { %6842 = vmatpush1.bf16.msra.mxu0 %v11513_v54  ;;  %8386 = vmatpush1.bf16.msra.mxu1 %v11516_v11  ;;  %v11567_v54 = vld [vmem:[#allocation7 + $0xb80] ss:$16 sps:$4 sm:$0xff]   ;;  %v11570_v11 = vld [vmem:[#allocation7 + $0xb88] ss:$16 sps:$4 sm:$0xff]  }
 0x477   :  { %6843 = vmatprep.subr.bf16.mxu0 %v11521_v7  ;;  %8387 = vmatprep.subr.bf16.mxu1 %v11524_v60  ;;  %v11575_v7 = vld [vmem:[#allocation7 + $0xba4] ss:$16 sps:$4 sm:$0xff]   ;;  %v11578_v60 = vld [vmem:[#allocation7 + $0xbac] ss:$16 sps:$4 sm:$0xff]  }
 0x478   :  { %6695 = vmatmul.mubr.bf16.gmra.mrb[8].mxu0 %v14861_v55  ;;  %8239 = vmatmul.mubr.bf16.gmra.mrb[8].mxu1 %v14861_v55  ;;  %v11579_v55 = vld [vmem:[#allocation7 + $0xbc0] ss:$16 sps:$4 sm:$0xff]  }
 0x479   :  { %6704 = vmatprep.mubr.bf16.mxu0 %v13199_v62  ;;  %8248 = vmatprep.mubr.bf16.mxu1 %v13199_v62  ;;  %v14863_v62 = vld [vmem:[#allocation126_spill] sm:$0xff] }
 0x47a   :  { %6844 = vmatpush1.bf16.msra.mxu0 %v11519_v13  ;;  %8388 = vmatpush1.bf16.msra.mxu1 %v11522_v1  ;;  %v11576_v13 = vld [vmem:[#allocation7 + $0xba8] ss:$16 sps:$4 sm:$0xff]   ;;  %v11581_v1 = vld [vmem:[#allocation7 + $0xbc4] ss:$16 sps:$4 sm:$0xff]  }
 0x47b   :  { %6845 = vmatprep.subr.bf16.mxu0 %v11527_v41  ;;  %8389 = vmatprep.subr.bf16.mxu1 %v11530_v2  ;;  %v11584_v41 = vld [vmem:[#allocation7 + $0xbcc] ss:$16 sps:$4 sm:$0xff]   ;;  %v11582_v2 = vld [vmem:[#allocation7 + $0xbc8] ss:$16 sps:$4 sm:$0xff]  }
 0x47e   :  { %6846 = vmatpush1.bf16.msra.mxu0 %v11525_v39  ;;  %8390 = vmatpush1.bf16.msra.mxu1 %v11528_v5  ;;  %v11587_v39 = vld [vmem:[#allocation7 + $0xbe4] ss:$16 sps:$4 sm:$0xff]   ;;  %v11588_v5 = vld [vmem:[#allocation7 + $0xbe8] ss:$16 sps:$4 sm:$0xff]  }
 0x47f   :  { %6847 = vmatprep.subr.bf16.mxu0 %v11533_v57  ;;  %8391 = vmatprep.subr.bf16.mxu1 %v11536_v44  ;;  %v11593_v57 = vld [vmem:[#allocation7 + $0xc04] ss:$16 sps:$4 sm:$0xff]   ;;  %v11596_v44 = vld [vmem:[#allocation7 + $0xc0c] ss:$16 sps:$4 sm:$0xff]  }
 0x480   :  { %6705 = vmatmul.mubr.bf16.gmra.mrb[12].mxu0 %v14862_v35  ;;  %8249 = vmatmul.mubr.bf16.gmra.mrb[12].mxu1 %v14862_v35  ;;  %v14876_v35 = vld [vmem:[#allocation117_spill] sm:$0xff] }
 0x481   :  { %6714 = vmatprep.mubr.bf16.mxu0 %v14863_v62  ;;  %8258 = vmatprep.mubr.bf16.mxu1 %v14863_v62  ;;  %v11600_v62 = vld [vmem:[#allocation7 + $0xc28] ss:$16 sps:$4 sm:$0xff]  }
 0x482   :  { %6848 = vmatpush1.bf16.msra.mxu0 %v11531_v56  ;;  %8392 = vmatpush1.bf16.msra.mxu1 %v11534_v28  ;;  %v11599_v56 = vld [vmem:[#allocation7 + $0xc24] ss:$16 sps:$4 sm:$0xff]  }
 0x483   :  { %6849 = vmatprep.subr.bf16.mxu0 %v11539_v31  ;;  %8393 = vmatprep.subr.bf16.mxu1 %v11542_v33  ;;  %v14875_v28 = vld [vmem:[#allocation113_spill] sm:$0xff]  ;;  %v11602_v31 = vld [vmem:[#allocation7 + $0xc2c] ss:$16 sps:$4 sm:$0xff]  }
 0x484   :  { %v11597_v33 = vld [vmem:[#allocation7 + $0xc20] ss:$16 sps:$4 sm:$0xff]  }
 0x486   :  { %6850 = vmatpush1.bf16.msra.mxu0 %v11537_v45  ;;  %8394 = vmatpush1.bf16.msra.mxu1 %v11540_v6  ;;  %v11605_v45 = vld [vmem:[#allocation7 + $0xc44] ss:$16 sps:$4 sm:$0xff]   ;;  %v11608_v6 = vld [vmem:[#allocation7 + $0xc4c] ss:$16 sps:$4 sm:$0xff]  }
 0x487   :  { %6851 = vmatprep.subr.bf16.mxu0 %v11545_v22  ;;  %8395 = vmatprep.subr.bf16.mxu1 %v11548_v15  ;;  %v11603_v22 = vld [vmem:[#allocation7 + $0xc40] ss:$16 sps:$4 sm:$0xff]   ;;  %v11606_v15 = vld [vmem:[#allocation7 + $0xc48] ss:$16 sps:$4 sm:$0xff]  }
 0x488   :  { %6715 = vmatmul.mubr.bf16.gmra.mrb[16].mxu0 %v14864_v3  ;;  %8259 = vmatmul.mubr.bf16.gmra.mrb[16].mxu1 %v14864_v3  ;;  %v14878_v3 = vld [vmem:[#allocation120_spill] sm:$0xff] }
 0x489   :  { %6724 = vmatprep.mubr.bf16.mxu0 %v14865_v27  ;;  %8268 = vmatprep.mubr.bf16.mxu1 %v14865_v27  ;;  %v11612_v27 = vld [vmem:[#allocation7 + $0xc68] ss:$16 sps:$4 sm:$0xff]  }
 0x48a   :  { %6852 = vmatpush1.bf16.msra.mxu0 %v11543_v38  ;;  %8396 = vmatpush1.bf16.msra.mxu1 %v11546_v40  ;;  %v11611_v38 = vld [vmem:[#allocation7 + $0xc64] ss:$16 sps:$4 sm:$0xff]   ;;  %v14877_v40 = vld [vmem:[#allocation116_spill] sm:$0xff] }
 0x48b   :  { %6853 = vmatprep.subr.bf16.mxu0 %v11551_v17  ;;  %8397 = vmatprep.subr.bf16.mxu1 %v11554_v36  ;;  %v11614_v17 = vld [vmem:[#allocation7 + $0xc6c] ss:$16 sps:$4 sm:$0xff]   ;;  %v11609_v36 = vld [vmem:[#allocation7 + $0xc60] ss:$16 sps:$4 sm:$0xff]  }
 0x48e   :  { %6854 = vmatpush1.bf16.msra.mxu0 %v11549_v42  ;;  %8398 = vmatpush1.bf16.msra.mxu1 %v11552_v10  ;;  %v11617_v42 = vld [vmem:[#allocation7 + $0xc84] ss:$16 sps:$4 sm:$0xff]   ;;  %v11620_v10 = vld [vmem:[#allocation7 + $0xc8c] ss:$16 sps:$4 sm:$0xff]  }
 0x48f   :  { %6855 = vmatprep.subr.bf16.mxu0 %v11557_v12  ;;  %8399 = vmatprep.subr.bf16.mxu1 %v11560_v0  ;;  %v11615_v12 = vld [vmem:[#allocation7 + $0xc80] ss:$16 sps:$4 sm:$0xff]   ;;  %v11618_v0 = vld [vmem:[#allocation7 + $0xc88] ss:$16 sps:$4 sm:$0xff]  }
 0x490   :  { %6725 = vmatmul.mubr.bf16.gmra.mrb[20].mxu0 %v14866_v19  ;;  %8269 = vmatmul.mubr.bf16.gmra.mrb[20].mxu1 %v14866_v19  ;;  %v14880_v19 = vld [vmem:[#allocation123_spill] sm:$0xff] }
 0x491   :  { %6734 = vmatprep.mubr.bf16.mxu0 %v13261_v52  ;;  %8278 = vmatprep.mubr.bf16.mxu1 %v13261_v52  ;;  %v11573_v52 = vld [vmem:[#allocation7 + $0xba0] ss:$16 sps:$4 sm:$0xff]  }
 0x492   :  { %6856 = vmatpush1.bf16.msra.mxu0 %v11555_v34  ;;  %8400 = vmatpush1.bf16.msra.mxu1 %v11558_v25  ;;  %v11623_v34 = vld [vmem:[#allocation7 + $0xca4] ss:$16 sps:$4 sm:$0xff]  }
 0x493   :  { %6857 = vmatprep.subr.bf16.mxu0 %v11563_v32  ;;  %8401 = vmatprep.subr.bf16.mxu1 %v11566_v16  ;;  %v14879_v25 = vld [vmem:[#allocation119_spill] sm:$0xff]  ;;  %v11626_v32 = vld [vmem:[#allocation7 + $0xcac] ss:$16 sps:$4 sm:$0xff]  }
 0x494   :  { %v11621_v16 = vld [vmem:[#allocation7 + $0xca0] ss:$16 sps:$4 sm:$0xff]  }
 0x496   :  { %6858 = vmatpush1.bf16.msra.mxu0 %v11561_v26  ;;  %8402 = vmatpush1.bf16.msra.mxu1 %v11564_v24  ;;  %v11624_v26 = vld [vmem:[#allocation7 + $0xca8] ss:$16 sps:$4 sm:$0xff]   ;;  %v11629_v24 = vld [vmem:[#allocation7 + $0xcc4] ss:$16 sps:$4 sm:$0xff]  }
 0x497   :  { %6859 = vmatprep.subr.bf16.mxu0 %v11569_v29  ;;  %8403 = vmatprep.subr.bf16.mxu1 %v11572_v58  ;;  %v11632_v29 = vld [vmem:[#allocation7 + $0xccc] ss:$16 sps:$4 sm:$0xff]   ;;  %v11627_v58 = vld [vmem:[#allocation7 + $0xcc0] ss:$16 sps:$4 sm:$0xff]  }
 0x498   :  { %6735 = vmatmul.mubr.bf16.gmra.mrb[24].mxu0 %v13256_v49  ;;  %8279 = vmatmul.mubr.bf16.gmra.mrb[24].mxu1 %v13256_v49  ;;  %v11590_v49 = vld [vmem:[#allocation7 + $0xbec] ss:$16 sps:$4 sm:$0xff]  }
 0x499   :  { %6744 = vmatprep.mubr.bf16.mxu0 %v13281_v51  ;;  %8288 = vmatprep.mubr.bf16.mxu1 %v13281_v51  ;;  %v11585_v51 = vld [vmem:[#allocation7 + $0xbe0] ss:$16 sps:$4 sm:$0xff]  }
 0x49a   :  { %6860 = vmatpush1.bf16.msra.mxu0 %v11567_v54  ;;  %8404 = vmatpush1.bf16.msra.mxu1 %v11570_v11  ;;  %v11630_v54 = vld [vmem:[#allocation7 + $0xcc8] ss:$16 sps:$4 sm:$0xff]   ;;  %v11635_v11 = vld [vmem:[#allocation7 + $0xce4] ss:$16 sps:$4 sm:$0xff]  }
 0x49b   :  { %6861 = vmatprep.subr.bf16.mxu0 %v11575_v7  ;;  %8405 = vmatprep.subr.bf16.mxu1 %v11578_v60  ;;  %v14881_v7 = vld [vmem:[#allocation122_spill] sm:$0xff] }
 0x49c   :  { %v11638_v60 = vld [vmem:[#allocation7 + $0xcec] ss:$16 sps:$4 sm:$0xff]  }
 0x49e   :  { %6862 = vmatpush1.bf16.msra.mxu0 %v11573_v52  ;;  %8406 = vmatpush1.bf16.msra.mxu1 %v11576_v13  ;;  %v14882_v52 = vld [vmem:[#allocation127_spill] sm:$0xff] }
 0x49f   :  { %6863 = vmatprep.subr.bf16.mxu0 %v11581_v1  ;;  %8407 = vmatprep.subr.bf16.mxu1 %v11584_v41  ;;  %v11633_v13 = vld [vmem:[#allocation7 + $0xce0] ss:$16 sps:$4 sm:$0xff]   ;;  %v11636_v1 = vld [vmem:[#allocation7 + $0xce8] ss:$16 sps:$4 sm:$0xff]   ;;  %v11641_v41 = vld [vmem:[#allocation7 + $0xd04] ss:$16 sps:$4 sm:$0xff]  }
 0x4a0   :  { %6745 = vmatmul.mubr.bf16.gmra.mrb[28].mxu0 %v13276_v37  ;;  %8289 = vmatmul.mubr.bf16.gmra.mrb[28].mxu1 %v13276_v37  ;;  %v14867_v37 = vld [vmem:[#allocation144_spill] sm:$0xff] }
 0x4a1   :  { %6754 = vmatprep.mubr.bf16.mxu0 %v13301_v53  ;;  %8298 = vmatprep.mubr.bf16.mxu1 %v13301_v53  ;;  %v14869_v53 = vld [vmem:[#allocation35_spill] sm:$0xff] }
 0x4a2   :  { %6864 = vmatpush1.bf16.msra.mxu0 %v11579_v55  ;;  %8408 = vmatpush1.bf16.msra.mxu1 %v11582_v2  ;;  %v11644_v55 = vld [vmem:[#allocation7 + $0xd0c] ss:$16 sps:$4 sm:$0xff]   ;;  %v11639_v2 = vld [vmem:[#allocation7 + $0xd00] ss:$16 sps:$4 sm:$0xff]  }
 0x4a3   :  { %6865 = vmatprep.subr.bf16.mxu0 %v11587_v39  ;;  %8409 = vmatprep.subr.bf16.mxu1 %v11590_v49  ;;  %v11642_v39 = vld [vmem:[#allocation7 + $0xd08] ss:$16 sps:$4 sm:$0xff]   ;;  %v11647_v49 = vld [vmem:[#allocation7 + $0xd24] ss:$16 sps:$4 sm:$0xff]  }
 0x4a6   :  { %6866 = vmatpush1.bf16.msra.mxu0 %v11585_v51  ;;  %8410 = vmatpush1.bf16.msra.mxu1 %v11588_v5  ;;  %v14883_v51 = vld [vmem:[#allocation125_spill] sm:$0xff]  ;;  %v11650_v5 = vld [vmem:[#allocation7 + $0xd2c] ss:$16 sps:$4 sm:$0xff]  }
 0x4a7   :  { %7028 = vmatprep.subr.bf16.mxu0 %v11593_v57  ;;  %8572 = vmatprep.subr.bf16.mxu1 %v11596_v44  ;;  %v14884_v57 = vld [vmem:[#allocation131_spill] sm:$0xff] }
 0x4a8   :  { %6755 = vmatmul.mubr.bf16.gmra.mrb[32].mxu0 %v13296_v46  ;;  %8299 = vmatmul.mubr.bf16.gmra.mrb[32].mxu1 %v13296_v46  ;;  %v14868_v46 = vld [vmem:[#allocation147_spill] sm:$0xff] }
 0x4a9   :  { %6764 = vmatprep.mubr.bf16.mxu0 %v13321_v21  ;;  %8308 = vmatprep.mubr.bf16.mxu1 %v13321_v21  ;;  %v14871_v21 = vld [vmem:[#allocation38_spill] sm:$0xff]  ;;  %v11645_v44 = vld [vmem:[#allocation7 + $0xd20] ss:$16 sps:$4 sm:$0xff]  }
 0x4b0   :  { %6765 = vmatmul.mubr.bf16.gmra.mrb[36].mxu0 %v13316_v47  ;;  %8309 = vmatmul.mubr.bf16.gmra.mrb[36].mxu1 %v13316_v47  ;;  %v14870_v47 = vld [vmem:[#allocation149_spill] sm:$0xff] }
 0x4b1   :  { %6774 = vmatprep.mubr.bf16.mxu0 %v13341_v59  ;;  %8318 = vmatprep.mubr.bf16.mxu1 %v13341_v59  ;;  %v14873_v59 = vld [vmem:[#allocation42_spill] sm:$0xff] }
 0x4b8   :  { %6775 = vmatmul.mubr.bf16.gmra.mrb[40].mxu0 %v13336_v4  ;;  %8319 = vmatmul.mubr.bf16.gmra.mrb[40].mxu1 %v13336_v4  ;;  %v14872_v4 = vld [vmem:[#allocation151_spill] sm:$0xff] }
 0x4b9   :  { %6784 = vmatprep.mubr.bf16.mxu0 %v13361_v23  ;;  %8328 = vmatprep.mubr.bf16.mxu1 %v13361_v23  ;;  %v11591_v23 = vld [vmem:[#allocation7 + $0xc00] ss:$16 sps:$4 sm:$0xff]  }
 0x4c0   :  { %6785 = vmatmul.mubr.bf16.gmra.mrb[44].mxu0 %v13356_v20  ;;  %8329 = vmatmul.mubr.bf16.gmra.mrb[44].mxu1 %v13356_v20  ;;  %v14874_v20 = vld [vmem:[#allocation114_spill] sm:$0xff] }
 0x4c1   :  { %6794 = vmatprep.mubr.bf16.mxu0 %v13381_v50  ;;  %8338 = vmatprep.mubr.bf16.mxu1 %v13381_v50  ;;  %v11594_v50 = vld [vmem:[#allocation7 + $0xc08] ss:$16 sps:$4 sm:$0xff]  }
 0x4c8   :  { %6795 = vmatmul.mubr.bf16.gmra.mrb[48].mxu0 %v14867_v37  ;;  %8339 = vmatmul.mubr.bf16.gmra.mrb[48].mxu1 %v14867_v37  ;;  %v11648_v37 = vld [vmem:[#allocation7 + $0xd28] ss:$16 sps:$4 sm:$0xff]  }
 0x4c9   :  { %6804 = vmatprep.mubr.bf16.mxu0 %v14868_v46  ;;  %8348 = vmatprep.mubr.bf16.mxu1 %v14868_v46  ;;  %v11653_v46 = vld [vmem:[#allocation7 + $0xd44] ss:$16 sps:$4 sm:$0xff]  }
 0x4d0   :  { %6805 = vmatmul.mubr.bf16.gmra.mrb[52].mxu0 %v14869_v53  ;;  %8349 = vmatmul.mubr.bf16.gmra.mrb[52].mxu1 %v14869_v53  ;;  %v11656_v53 = vld [vmem:[#allocation7 + $0xd4c] ss:$16 sps:$4 sm:$0xff]  }
 0x4d1   :  { %6814 = vmatprep.mubr.bf16.mxu0 %v14870_v47  ;;  %8358 = vmatprep.mubr.bf16.mxu1 %v14870_v47  ;;  %v11651_v47 = vld [vmem:[#allocation7 + $0xd40] ss:$16 sps:$4 sm:$0xff]  }
 0x4d8   :  { %6815 = vmatmul.mubr.bf16.gmra.mrb[56].mxu0 %v14871_v21  ;;  %8359 = vmatmul.mubr.bf16.gmra.mrb[56].mxu1 %v14871_v21  ;;  %v11654_v21 = vld [vmem:[#allocation7 + $0xd48] ss:$16 sps:$4 sm:$0xff]  }
 0x4d9   :  { %6824 = vmatprep.mubr.bf16.mxu0 %v14872_v4  ;;  %8368 = vmatprep.mubr.bf16.mxu1 %v14872_v4  ;;  %v11659_v4 = vld [vmem:[#allocation7 + $0xd64] ss:$16 sps:$4 sm:$0xff]  }
 0x4e0   :  { %6825 = vmatmul.mubr.bf16.gmra.mrb[60].mxu0 %v14873_v59  ;;  %8369 = vmatmul.mubr.bf16.gmra.mrb[60].mxu1 %v14873_v59  ;;  %v14885_v59 = vld [vmem:[#allocation129_spill] sm:$0xff] }
 0x4e1   :  { %6867 = vmatprep.mubr.bf16.mxu0 %v14874_v20  ;;  %8411 = vmatprep.mubr.bf16.mxu1 %v14874_v20  ;;  %v11662_v20 = vld [vmem:[#allocation7 + $0xd6c] ss:$16 sps:$4 sm:$0xff]  }
 0x4e8   :  { %6868 = vmatmul.mubr.bf16.vlgmr.msra.gmra.mrb[0].mxu0 %v14875_v28  ;;  %8412 = vmatmul.mubr.bf16.vlgmr.msra.gmra.mrb[0].mxu1 %v14875_v28  ;;  %v11665_v28 = vld [vmem:[#allocation7 + $0xd84] ss:$16 sps:$4 sm:$0xff]  }
 0x4e9   :  { %6877 = vmatprep.mubr.bf16.mxu0 %v14876_v35  ;;  %7029 = vmatpush1.bf16.msra.mxu0 %v11591_v23  ;;  %v14886_v23 = vld [vmem:[#allocation133_spill] sm:$0xff] }
 0x4ea   :  { %8421 = vmatprep.mubr.bf16.mxu1 %v14876_v35  ;;  %8573 = vmatpush1.bf16.msra.mxu1 %v11594_v50  ;;  %v11657_v50 = vld [vmem:[#allocation7 + $0xd60] ss:$16 sps:$4 sm:$0xff]  }
 0x4eb   :  { %7030 = vmatprep.subr.bf16.mxu0 %v11599_v56  ;;  %8574 = vmatprep.subr.bf16.mxu1 %v11602_v31  ;;  %v11660_v56 = vld [vmem:[#allocation7 + $0xd68] ss:$16 sps:$4 sm:$0xff]   ;;  %v11668_v31 = vld [vmem:[#allocation7 + $0xd8c] ss:$16 sps:$4 sm:$0xff]   ;;  %v11663_v35 = vld [vmem:[#allocation7 + $0xd80] ss:$16 sps:$4 sm:$0xff]  }
 0x4ed   :  { %7031 = vmatpush1.bf16.msra.mxu0 %v11597_v33  ;;  %v11666_v33 = vld [vmem:[#allocation7 + $0xd88] ss:$16 sps:$4 sm:$0xff]  }
 0x4ee   :  { %8575 = vmatpush1.bf16.msra.mxu1 %v11600_v62  ;;  %7032 = vmatprep.subr.bf16.mxu0 %v11605_v45  ;;  %v11671_v62 = vld [vmem:[#allocation7 + $0xda4] ss:$16 sps:$4 sm:$0xff]   ;;  %v14887_v45 = vld [vmem:[#allocation132_spill] sm:$0xff] }
 0x4ef   :  { %8576 = vmatprep.subr.bf16.mxu1 %v11608_v6  ;;  %v11674_v6 = vld [vmem:[#allocation7 + $0xdac] ss:$16 sps:$4 sm:$0xff]  }
 0x4f0   :  { %6878 = vmatmul.mubr.bf16.gmra.mrb[4].mxu0 %v14877_v40  ;;  %8422 = vmatmul.mubr.bf16.gmra.mrb[4].mxu1 %v14877_v40  ;;  %v11677_v40 = vld [vmem:[#allocation7 + $0xdc4] ss:$16 sps:$4 sm:$0xff]  }
 0x4f1   :  { %6887 = vmatprep.mubr.bf16.mxu0 %v14878_v3  ;;  %8431 = vmatprep.mubr.bf16.mxu1 %v14878_v3  ;;  %v11675_v3 = vld [vmem:[#allocation7 + $0xdc0] ss:$16 sps:$4 sm:$0xff]  }
 0x4f2   :  { %7033 = vmatpush1.bf16.msra.mxu0 %v11603_v22  ;;  %8577 = vmatpush1.bf16.msra.mxu1 %v11606_v15  ;;  %v14888_v22 = vld [vmem:[#allocation135_spill] sm:$0xff] }
 0x4f3   :  { %7034 = vmatprep.subr.bf16.mxu0 %v11611_v38  ;;  %8578 = vmatprep.subr.bf16.mxu1 %v11614_v17  ;;  %v11669_v15 = vld [vmem:[#allocation7 + $0xda0] ss:$16 sps:$4 sm:$0xff]   ;;  %v11672_v38 = vld [vmem:[#allocation7 + $0xda8] ss:$16 sps:$4 sm:$0xff]   ;;  %v11680_v17 = vld [vmem:[#allocation7 + $0xdcc] ss:$16 sps:$4 sm:$0xff]  }
 0x4f6   :  { %7035 = vmatpush1.bf16.msra.mxu0 %v11609_v36  ;;  %8579 = vmatpush1.bf16.msra.mxu1 %v11612_v27  ;;  %v11678_v36 = vld [vmem:[#allocation7 + $0xdc8] ss:$16 sps:$4 sm:$0xff]   ;;  %v11683_v27 = vld [vmem:[#allocation7 + $0xde4] ss:$16 sps:$4 sm:$0xff]  }
 0x4f7   :  { %7036 = vmatprep.subr.bf16.mxu0 %v11617_v42  ;;  %8580 = vmatprep.subr.bf16.mxu1 %v11620_v10  ;;  %v14889_v42 = vld [vmem:[#allocation134_spill] sm:$0xff] }
 0x4f8   :  { %6888 = vmatmul.mubr.bf16.gmra.mrb[8].mxu0 %v14879_v25  ;;  %8432 = vmatmul.mubr.bf16.gmra.mrb[8].mxu1 %v14879_v25  ;;  %v11686_v10 = vld [vmem:[#allocation7 + $0xdec] ss:$16 sps:$4 sm:$0xff]   ;;  %v11689_v25 = vld [vmem:[#allocation7 + $0xe04] ss:$16 sps:$4 sm:$0xff]  }
 0x4f9   :  { %6897 = vmatprep.mubr.bf16.mxu0 %v14880_v19  ;;  %8441 = vmatprep.mubr.bf16.mxu1 %v14880_v19  ;;  %v14891_v19 = vld [vmem:[#allocation136_spill] sm:$0xff] }
 0x4fa   :  { %7037 = vmatpush1.bf16.msra.mxu0 %v11615_v12  ;;  %8581 = vmatpush1.bf16.msra.mxu1 %v11618_v0  ;;  %v14890_v12 = vld [vmem:[#allocation137_spill] sm:$0xff] }
 0x4fb   :  { %7038 = vmatprep.subr.bf16.mxu0 %v11623_v34  ;;  %8582 = vmatprep.subr.bf16.mxu1 %v11626_v32  ;;  %v11681_v0 = vld [vmem:[#allocation7 + $0xde0] ss:$16 sps:$4 sm:$0xff]   ;;  %v11684_v34 = vld [vmem:[#allocation7 + $0xde8] ss:$16 sps:$4 sm:$0xff]   ;;  %v11692_v32 = vld [vmem:[#allocation7 + $0xe0c] ss:$16 sps:$4 sm:$0xff]  }
 0x4fe   :  { %7039 = vmatpush1.bf16.msra.mxu0 %v11621_v16  ;;  %8583 = vmatpush1.bf16.msra.mxu1 %v11624_v26  ;;  %v14892_v16 = vld [vmem:[#allocation139_spill] sm:$0xff]  ;;  %v14893_v26 = vld [vmem:[#allocation138_spill] sm:$0xff] }
 0x4ff   :  { %7040 = vmatprep.subr.bf16.mxu0 %v11629_v24  ;;  %8584 = vmatprep.subr.bf16.mxu1 %v11632_v29  ;;  %v14894_v24 = vld [vmem:[#allocation141_spill] sm:$0xff]  ;;  %v14895_v29 = vld [vmem:[#allocation140_spill] sm:$0xff] }
 0x500   :  { %6898 = vmatmul.mubr.bf16.gmra.mrb[12].mxu0 %v14881_v7  ;;  %8442 = vmatmul.mubr.bf16.gmra.mrb[12].mxu1 %v14881_v7  ;;  %v14899_v7 = vld [vmem:[#allocation145_spill] sm:$0xff] }
 0x501   :  { %6907 = vmatprep.mubr.bf16.mxu0 %v14882_v52  ;;  %8451 = vmatprep.mubr.bf16.mxu1 %v14882_v52  ;;  %v14901_v52 = vld [vmem:[#allocation39_spill] sm:$0xff] }
 0x502   :  { %7041 = vmatpush1.bf16.msra.mxu0 %v11627_v58  ;;  %8585 = vmatpush1.bf16.msra.mxu1 %v11630_v54  ;;  %v14896_v58 = vld [vmem:[#allocation143_spill] sm:$0xff]  ;;  %v14897_v54 = vld [vmem:[#allocation142_spill] sm:$0xff] }
 0x503   :  { %7042 = vmatprep.subr.bf16.mxu0 %v11635_v11  ;;  %8586 = vmatprep.subr.bf16.mxu1 %v11638_v60  ;;  %v14898_v11 = vld [vmem:[#allocation146_spill] sm:$0xff]  ;;  %v14900_v60 = vld [vmem:[#allocation148_spill] sm:$0xff] }
 0x506   :  { %7043 = vmatpush1.bf16.msra.mxu0 %v11633_v13  ;;  %8587 = vmatpush1.bf16.msra.mxu1 %v11636_v1  ;;  %v14902_v13 = vld [vmem:[#allocation150_spill] sm:$0xff]  ;;  %v14903_v1 = vld [vmem:[#allocation43_spill] sm:$0xff] }
 0x507   :  { %7044 = vmatprep.subr.bf16.mxu0 %v11641_v41  ;;  %8588 = vmatprep.subr.bf16.mxu1 %v11644_v55  ;;  %v14904_v41 = vld [vmem:[#allocation152_spill] sm:$0xff]  ;;  %v14905_v55 = vld [vmem:[#allocation47_spill] sm:$0xff] }
 0x508   :  { %6908 = vmatmul.mubr.bf16.gmra.mrb[16].mxu0 %v14883_v51  ;;  %8452 = vmatmul.mubr.bf16.gmra.mrb[16].mxu1 %v14883_v51  ;;  %v11695_v51 = vld [vmem:[#allocation7 + $0xe24] ss:$16 sps:$4 sm:$0xff]  }
 0x509   :  { %6917 = vmatprep.mubr.bf16.mxu0 %v14884_v57  ;;  %8461 = vmatprep.mubr.bf16.mxu1 %v14884_v57  ;;  %v11698_v57 = vld [vmem:[#allocation7 + $0xe2c] ss:$16 sps:$4 sm:$0xff]  }
 0x50a   :  { %7045 = vmatpush1.bf16.msra.mxu0 %v11639_v2  ;;  %8589 = vmatpush1.bf16.msra.mxu1 %v11642_v39  ;;  %v14906_v2 = vld [vmem:[#allocation153_spill] sm:$0xff] }
 0x50b   :  { %7046 = vmatprep.subr.bf16.mxu0 %v11647_v49  ;;  %8590 = vmatprep.subr.bf16.mxu1 %v11650_v5  ;;  %v11687_v39 = vld [vmem:[#allocation7 + $0xe00] ss:$16 sps:$4 sm:$0xff]   ;;  %v11690_v49 = vld [vmem:[#allocation7 + $0xe08] ss:$16 sps:$4 sm:$0xff]  }
 0x50c   :  { %v14907_v5 = vld [vmem:[#allocation46_spill] sm:$0xff] }
 0x50e   :  { %7047 = vmatpush1.bf16.msra.mxu0 %v11645_v44  ;;  %8591 = vmatpush1.bf16.msra.mxu1 %v11648_v37  ;;  %v14908_v44 = vld [vmem:[#allocation155_spill] sm:$0xff] }
 0x50f   :  { %7048 = vmatprep.subr.bf16.mxu0 %v11653_v46  ;;  %8592 = vmatprep.subr.bf16.mxu1 %v11656_v53  ;;  %v11693_v37 = vld [vmem:[#allocation7 + $0xe20] ss:$16 sps:$4 sm:$0xff]   ;;  %v11696_v46 = vld [vmem:[#allocation7 + $0xe28] ss:$16 sps:$4 sm:$0xff]   ;;  %v11701_v53 = vld [vmem:[#allocation7 + $0xe44] ss:$16 sps:$4 sm:$0xff]  }
 0x510   :  { %6918 = vmatmul.mubr.bf16.gmra.mrb[20].mxu0 %v14885_v59  ;;  %8462 = vmatmul.mubr.bf16.gmra.mrb[20].mxu1 %v14885_v59  ;;  %v11707_v59 = vld [vmem:[#allocation7 + $0xe64] ss:$16 sps:$4 sm:$0xff]  }
 0x511   :  { %6927 = vmatprep.mubr.bf16.mxu0 %v14886_v23  ;;  %8471 = vmatprep.mubr.bf16.mxu1 %v14886_v23  ;;  %v11710_v23 = vld [vmem:[#allocation7 + $0xe6c] ss:$16 sps:$4 sm:$0xff]  }
 0x512   :  { %7049 = vmatpush1.bf16.msra.mxu0 %v11651_v47  ;;  %8593 = vmatpush1.bf16.msra.mxu1 %v11654_v21  ;;  %v11704_v47 = vld [vmem:[#allocation7 + $0xe4c] ss:$16 sps:$4 sm:$0xff]   ;;  %v11699_v21 = vld [vmem:[#allocation7 + $0xe40] ss:$16 sps:$4 sm:$0xff]  }
 0x513   :  { %7050 = vmatprep.subr.bf16.mxu0 %v11659_v4  ;;  %8594 = vmatprep.subr.bf16.mxu1 %v11662_v20  ;;  %v11702_v4 = vld [vmem:[#allocation7 + $0xe48] ss:$16 sps:$4 sm:$0xff]  }
 0x514   :  { %v14909_v20 = vld [vmem:[#allocation50_spill] sm:$0xff] }
 0x516   :  { %7051 = vmatpush1.bf16.msra.mxu0 %v11657_v50  ;;  %8595 = vmatpush1.bf16.msra.mxu1 %v11660_v56  ;;  %v14910_v50 = vld [vmem:[#allocation157_spill] sm:$0xff] }
 0x517   :  { %7052 = vmatprep.subr.bf16.mxu0 %v11665_v28  ;;  %8596 = vmatprep.subr.bf16.mxu1 %v11668_v31  ;;  %v11705_v56 = vld [vmem:[#allocation7 + $0xe60] ss:$16 sps:$4 sm:$0xff]   ;;  %v11708_v28 = vld [vmem:[#allocation7 + $0xe68] ss:$16 sps:$4 sm:$0xff]   ;;  %v11713_v31 = vld [vmem:[#allocation7 + $0xe84] ss:$16 sps:$4 sm:$0xff]  }
 0x518   :  { %6928 = vmatmul.mubr.bf16.gmra.mrb[24].mxu0 %v14887_v45  ;;  %8472 = vmatmul.mubr.bf16.gmra.mrb[24].mxu1 %v14887_v45  ;;  %v11719_v45 = vld [vmem:[#allocation7 + $0xea4] ss:$16 sps:$4 sm:$0xff]  }
 0x519   :  { %6937 = vmatprep.mubr.bf16.mxu0 %v14888_v22  ;;  %8481 = vmatprep.mubr.bf16.mxu1 %v14888_v22  ;;  %v11722_v22 = vld [vmem:[#allocation7 + $0xeac] ss:$16 sps:$4 sm:$0xff]  }
 0x51a   :  { %7053 = vmatpush1.bf16.msra.mxu0 %v11663_v35  ;;  %8597 = vmatpush1.bf16.msra.mxu1 %v11666_v33  ;;  %v11716_v35 = vld [vmem:[#allocation7 + $0xe8c] ss:$16 sps:$4 sm:$0xff]   ;;  %v11711_v33 = vld [vmem:[#allocation7 + $0xe80] ss:$16 sps:$4 sm:$0xff]  }
 0x51b   :  { %7054 = vmatprep.subr.bf16.mxu0 %v11671_v62  ;;  %8598 = vmatprep.subr.bf16.mxu1 %v11674_v6  ;;  %v11714_v62 = vld [vmem:[#allocation7 + $0xe88] ss:$16 sps:$4 sm:$0xff]  }
 0x51c   :  { %v14911_v6 = vld [vmem:[#allocation54_spill] sm:$0xff] }
 0x51e   :  { %7055 = vmatpush1.bf16.msra.mxu0 %v11669_v15  ;;  %8599 = vmatpush1.bf16.msra.mxu1 %v11672_v38  ;;  %v14912_v15 = vld [vmem:[#allocation159_spill] sm:$0xff] }
 0x51f   :  { %7056 = vmatprep.subr.bf16.mxu0 %v11677_v40  ;;  %8600 = vmatprep.subr.bf16.mxu1 %v11680_v17  ;;  %v11717_v38 = vld [vmem:[#allocation7 + $0xea0] ss:$16 sps:$4 sm:$0xff]   ;;  %v11720_v40 = vld [vmem:[#allocation7 + $0xea8] ss:$16 sps:$4 sm:$0xff]   ;;  %v11725_v17 = vld [vmem:[#allocation7 + $0xec4] ss:$16 sps:$4 sm:$0xff]  }
 0x520   :  { %6938 = vmatmul.mubr.bf16.gmra.mrb[28].mxu0 %v14889_v42  ;;  %8482 = vmatmul.mubr.bf16.gmra.mrb[28].mxu1 %v14889_v42  ;;  %v11731_v42 = vld [vmem:[#allocation7 + $0xee4] ss:$16 sps:$4 sm:$0xff]  }
 0x521   :  { %6947 = vmatprep.mubr.bf16.mxu0 %v14890_v12  ;;  %8491 = vmatprep.mubr.bf16.mxu1 %v14890_v12  ;;  %v11734_v12 = vld [vmem:[#allocation7 + $0xeec] ss:$16 sps:$4 sm:$0xff]  }
 0x522   :  { %7057 = vmatpush1.bf16.msra.mxu0 %v11675_v3  ;;  %8601 = vmatpush1.bf16.msra.mxu1 %v11678_v36  ;;  %v11728_v3 = vld [vmem:[#allocation7 + $0xecc] ss:$16 sps:$4 sm:$0xff]   ;;  %v11723_v36 = vld [vmem:[#allocation7 + $0xec0] ss:$16 sps:$4 sm:$0xff]  }
 0x523   :  { %7058 = vmatprep.subr.bf16.mxu0 %v11683_v27  ;;  %8602 = vmatprep.subr.bf16.mxu1 %v11686_v10  ;;  %v11726_v27 = vld [vmem:[#allocation7 + $0xec8] ss:$16 sps:$4 sm:$0xff]  }
 0x524   :  { %v14913_v10 = vld [vmem:[#allocation58_spill] sm:$0xff] }
 0x526   :  { %7059 = vmatpush1.bf16.msra.mxu0 %v11681_v0  ;;  %8603 = vmatpush1.bf16.msra.mxu1 %v11684_v34  ;;  %v14914_v0 = vld [vmem:[#allocation161_spill] sm:$0xff] }
 0x527   :  { %7221 = vmatprep.subr.bf16.mxu0 %v11689_v25  ;;  %8765 = vmatprep.subr.bf16.mxu1 %v11692_v32  ;;  %v11729_v34 = vld [vmem:[#allocation7 + $0xee0] ss:$16 sps:$4 sm:$0xff]   ;;  %v11732_v25 = vld [vmem:[#allocation7 + $0xee8] ss:$16 sps:$4 sm:$0xff]   ;;  %v11737_v32 = vld [vmem:[#allocation7 + $0xf04] ss:$16 sps:$4 sm:$0xff]  }
 0x528   :  { %6948 = vmatmul.mubr.bf16.gmra.mrb[32].mxu0 %v14891_v19  ;;  %8492 = vmatmul.mubr.bf16.gmra.mrb[32].mxu1 %v14891_v19  ;;  %v11740_v19 = vld [vmem:[#allocation7 + $0xf0c] ss:$16 sps:$4 sm:$0xff]  }
 0x529   :  { %6957 = vmatprep.mubr.bf16.mxu0 %v14892_v16  ;;  %8501 = vmatprep.mubr.bf16.mxu1 %v14892_v16  ;;  %v11735_v16 = vld [vmem:[#allocation7 + $0xf00] ss:$16 sps:$4 sm:$0xff]  }
 0x530   :  { %6958 = vmatmul.mubr.bf16.gmra.mrb[36].mxu0 %v14893_v26  ;;  %8502 = vmatmul.mubr.bf16.gmra.mrb[36].mxu1 %v14893_v26  ;;  %v11738_v26 = vld [vmem:[#allocation7 + $0xf08] ss:$16 sps:$4 sm:$0xff]  }
 0x531   :  { %6967 = vmatprep.mubr.bf16.mxu0 %v14894_v24  ;;  %8511 = vmatprep.mubr.bf16.mxu1 %v14894_v24  ;;  %v11743_v24 = vld [vmem:[#allocation7 + $0xf24] ss:$16 sps:$4 sm:$0xff]  }
 0x538   :  { %6968 = vmatmul.mubr.bf16.gmra.mrb[40].mxu0 %v14895_v29  ;;  %8512 = vmatmul.mubr.bf16.gmra.mrb[40].mxu1 %v14895_v29  ;;  %v14915_v29 = vld [vmem:[#allocation62_spill] sm:$0xff] }
 0x539   :  { %6977 = vmatprep.mubr.bf16.mxu0 %v14896_v58  ;;  %8521 = vmatprep.mubr.bf16.mxu1 %v14896_v58  ;;  %v11746_v58 = vld [vmem:[#allocation7 + $0xf2c] ss:$16 sps:$4 sm:$0xff]  }
 0x540   :  { %6978 = vmatmul.mubr.bf16.gmra.mrb[44].mxu0 %v14897_v54  ;;  %8522 = vmatmul.mubr.bf16.gmra.mrb[44].mxu1 %v14897_v54  ;;  %v14916_v54 = vld [vmem:[#allocation163_spill] sm:$0xff] }
 0x541   :  { %6987 = vmatprep.mubr.bf16.mxu0 %v14898_v11  ;;  %8531 = vmatprep.mubr.bf16.mxu1 %v14898_v11  ;;  %v11741_v11 = vld [vmem:[#allocation7 + $0xf20] ss:$16 sps:$4 sm:$0xff]  }
 0x548   :  { %6988 = vmatmul.mubr.bf16.gmra.mrb[48].mxu0 %v14899_v7  ;;  %8532 = vmatmul.mubr.bf16.gmra.mrb[48].mxu1 %v14899_v7  ;;  %v11744_v7 = vld [vmem:[#allocation7 + $0xf28] ss:$16 sps:$4 sm:$0xff]  }
 0x549   :  { %6997 = vmatprep.mubr.bf16.mxu0 %v14900_v60  ;;  %8541 = vmatprep.mubr.bf16.mxu1 %v14900_v60  ;;  %v11749_v60 = vld [vmem:[#allocation7 + $0xf44] ss:$16 sps:$4 sm:$0xff]  }
 0x550   :  { %6998 = vmatmul.mubr.bf16.gmra.mrb[52].mxu0 %v14901_v52  ;;  %8542 = vmatmul.mubr.bf16.gmra.mrb[52].mxu1 %v14901_v52  ;;  %v11752_v52 = vld [vmem:[#allocation7 + $0xf4c] ss:$16 sps:$4 sm:$0xff]  }
 0x551   :  { %7007 = vmatprep.mubr.bf16.mxu0 %v14902_v13  ;;  %8551 = vmatprep.mubr.bf16.mxu1 %v14902_v13  ;;  %v11747_v13 = vld [vmem:[#allocation7 + $0xf40] ss:$16 sps:$4 sm:$0xff]  }
 0x558   :  { %7008 = vmatmul.mubr.bf16.gmra.mrb[56].mxu0 %v14903_v1  ;;  %8552 = vmatmul.mubr.bf16.gmra.mrb[56].mxu1 %v14903_v1  ;;  %v11750_v1 = vld [vmem:[#allocation7 + $0xf48] ss:$16 sps:$4 sm:$0xff]  }
 0x559   :  { %7017 = vmatprep.mubr.bf16.mxu0 %v14904_v41  ;;  %8561 = vmatprep.mubr.bf16.mxu1 %v14904_v41  ;;  %v11755_v41 = vld [vmem:[#allocation7 + $0xf64] ss:$16 sps:$4 sm:$0xff]  }
 0x560   :  { %7018 = vmatmul.mubr.bf16.gmra.mrb[60].mxu0 %v14905_v55  ;;  %8562 = vmatmul.mubr.bf16.gmra.mrb[60].mxu1 %v14905_v55  ;;  %v14917_v55 = vld [vmem:[#allocation19_spill] sm:$0xff] }
 0x561   :  { %7060 = vmatprep.mubr.bf16.mxu0 %v14906_v2  ;;  %8604 = vmatprep.mubr.bf16.mxu1 %v14906_v2  ;;  %v11758_v2 = vld [vmem:[#allocation7 + $0xf6c] ss:$16 sps:$4 sm:$0xff]  }
 0x568   :  { %7061 = vmatmul.mubr.bf16.vlgmr.msra.gmra.mrb[0].mxu0 %v14907_v5  ;;  %8605 = vmatmul.mubr.bf16.vlgmr.msra.gmra.mrb[0].mxu1 %v14907_v5  ;;  %v11761_v5 = vld [vmem:[#allocation7 + $0xf84] ss:$16 sps:$4 sm:$0xff]  }
 0x569   :  { %7070 = vmatprep.mubr.bf16.mxu0 %v14908_v44  ;;  %7222 = vmatpush1.bf16.msra.mxu0 %v11687_v39  ;;  %v14918_v39 = vld [vmem:[#allocation165_spill] sm:$0xff] }
 0x56a   :  { %8614 = vmatprep.mubr.bf16.mxu1 %v14908_v44  ;;  %8766 = vmatpush1.bf16.msra.mxu1 %v11690_v49  ;;  %v11753_v49 = vld [vmem:[#allocation7 + $0xf60] ss:$16 sps:$4 sm:$0xff]  }
 0x56b   :  { %7223 = vmatprep.subr.bf16.mxu0 %v11695_v51  ;;  %8767 = vmatprep.subr.bf16.mxu1 %v11698_v57  ;;  %v11756_v51 = vld [vmem:[#allocation7 + $0xf68] ss:$16 sps:$4 sm:$0xff]   ;;  %v11764_v57 = vld [vmem:[#allocation7 + $0xf8c] ss:$16 sps:$4 sm:$0xff]   ;;  %v11759_v44 = vld [vmem:[#allocation7 + $0xf80] ss:$16 sps:$4 sm:$0xff]  }
 0x56d   :  { %7224 = vmatpush1.bf16.msra.mxu0 %v11693_v37  ;;  %v11762_v37 = vld [vmem:[#allocation7 + $0xf88] ss:$16 sps:$4 sm:$0xff]  }
 0x56e   :  { %8768 = vmatpush1.bf16.msra.mxu1 %v11696_v46  ;;  %7225 = vmatprep.subr.bf16.mxu0 %v11701_v53  ;;  %v11767_v46 = vld [vmem:[#allocation7 + $0xfa4] ss:$16 sps:$4 sm:$0xff]  }
 0x56f   :  { %8769 = vmatprep.subr.bf16.mxu1 %v11704_v47  ;;  %v14919_v53 = vld [vmem:[#allocation21_spill] sm:$0xff]  ;;  %v11770_v47 = vld [vmem:[#allocation7 + $0xfac] ss:$16 sps:$4 sm:$0xff]  }
 0x570   :  { %7071 = vmatmul.mubr.bf16.gmra.mrb[4].mxu0 %v14909_v20  ;;  %8615 = vmatmul.mubr.bf16.gmra.mrb[4].mxu1 %v14909_v20  ;;  %v11773_v20 = vld [vmem:[#allocation7 + $0xfc4] ss:$16 sps:$4 sm:$0xff]  }
 0x571   :  { %7080 = vmatprep.mubr.bf16.mxu0 %v14910_v50  ;;  %8624 = vmatprep.mubr.bf16.mxu1 %v14910_v50  ;;  %v11771_v50 = vld [vmem:[#allocation7 + $0xfc0] ss:$16 sps:$4 sm:$0xff]  }
 0x572   :  { %7226 = vmatpush1.bf16.msra.mxu0 %v11699_v21  ;;  %8770 = vmatpush1.bf16.msra.mxu1 %v11702_v4  ;;  %v14920_v21 = vld [vmem:[#allocation167_spill] sm:$0xff] }
 0x573   :  { %7227 = vmatprep.subr.bf16.mxu0 %v11707_v59  ;;  %8771 = vmatprep.subr.bf16.mxu1 %v11710_v23  ;;  %v11765_v4 = vld [vmem:[#allocation7 + $0xfa0] ss:$16 sps:$4 sm:$0xff]   ;;  %v11768_v59 = vld [vmem:[#allocation7 + $0xfa8] ss:$16 sps:$4 sm:$0xff]   ;;  %v11776_v23 = vld [vmem:[#allocation7 + $0xfcc] ss:$16 sps:$4 sm:$0xff]  }
 0x576   :  { %7228 = vmatpush1.bf16.msra.mxu0 %v11705_v56  ;;  %8772 = vmatpush1.bf16.msra.mxu1 %v11708_v28  ;;  %v11774_v56 = vld [vmem:[#allocation7 + $0xfc8] ss:$16 sps:$4 sm:$0xff]   ;;  %v11779_v28 = vld [vmem:[#allocation7 + $0xfe4] ss:$16 sps:$4 sm:$0xff]  }
 0x577   :  { %7229 = vmatprep.subr.bf16.mxu0 %v11713_v31  ;;  %8773 = vmatprep.subr.bf16.mxu1 %v11716_v35  ;;  %v14921_v31 = vld [vmem:[#allocation23_spill] sm:$0xff]  ;;  %v11782_v35 = vld [vmem:[#allocation7 + $0xfec] ss:$16 sps:$4 sm:$0xff]  }
 0x578   :  { %7081 = vmatmul.mubr.bf16.gmra.mrb[8].mxu0 %v14911_v6  ;;  %8625 = vmatmul.mubr.bf16.gmra.mrb[8].mxu1 %v14911_v6  ;;  %v14923_v6 = vld [vmem:[#allocation25_spill] sm:$0xff] }
 0x579   :  { %7090 = vmatprep.mubr.bf16.mxu0 %v14912_v15  ;;  %8634 = vmatprep.mubr.bf16.mxu1 %v14912_v15  ;;  %v14925_v15 = vld [vmem:[#allocation27_spill] sm:$0xff] }
 0x57a   :  { %7230 = vmatpush1.bf16.msra.mxu0 %v11711_v33  ;;  %8774 = vmatpush1.bf16.msra.mxu1 %v11714_v62  ;;  %v14922_v33 = vld [vmem:[#allocation169_spill] sm:$0xff] }
 0x57b   :  { %7231 = vmatprep.subr.bf16.mxu0 %v11719_v45  ;;  %8775 = vmatprep.subr.bf16.mxu1 %v11722_v22  ;;  %v11777_v62 = vld [vmem:[#allocation7 + $0xfe0] ss:$16 sps:$4 sm:$0xff]   ;;  %v11780_v45 = vld [vmem:[#allocation7 + $0xfe8] ss:$16 sps:$4 sm:$0xff]  }
 0x57c   :  { %v14924_v22 = vld [vmem:[#allocation171_spill] sm:$0xff] }
 0x57e   :  { %7232 = vmatpush1.bf16.msra.mxu0 %v11717_v38  ;;  %8776 = vmatpush1.bf16.msra.mxu1 %v11720_v40  ;;  %v14926_v38 = vld [vmem:[#allocation173_spill] sm:$0xff] }
 0x57f   :  { %7233 = vmatprep.subr.bf16.mxu0 %v11725_v17  ;;  %8777 = vmatprep.subr.bf16.mxu1 %v11728_v3  ;;  %v14927_v40 = vld [vmem:[#allocation29_spill] sm:$0xff]  ;;  %v14928_v17 = vld [vmem:[#allocation175_spill] sm:$0xff] }
 0x580   :  { %7091 = vmatmul.mubr.bf16.gmra.mrb[12].mxu0 %v14913_v10  ;;  %8635 = vmatmul.mubr.bf16.gmra.mrb[12].mxu1 %v14913_v10  ;;  %v14929_v3 = vld [vmem:[#allocation31_spill] sm:$0xff]  ;;  %v14940_v10 = vld [vmem:[#allocation20_spill] sm:$0xff] }
 0x581   :  { %7100 = vmatprep.mubr.bf16.mxu0 %v14914_v0  ;;  %8644 = vmatprep.mubr.bf16.mxu1 %v14914_v0  ;;  %v14942_v0 = vld [vmem:[#allocation22_spill] sm:$0xff] }
 0x582   :  { %7234 = vmatpush1.bf16.msra.mxu0 %v11723_v36  ;;  %8778 = vmatpush1.bf16.msra.mxu1 %v11726_v27  ;;  %v14930_v36 = vld [vmem:[#allocation40_spill] sm:$0xff]  ;;  %v14938_v27 = vld [vmem:[#allocation63_spill] sm:$0xff] }
 0x583   :  { %7235 = vmatprep.subr.bf16.mxu0 %v11731_v42  ;;  %8779 = vmatprep.subr.bf16.mxu1 %v11734_v12  ;;  %v14939_v42 = vld [vmem:[#allocation162_spill] sm:$0xff]  ;;  %v14941_v12 = vld [vmem:[#allocation164_spill] sm:$0xff] }
 0x586   :  { %7236 = vmatpush1.bf16.msra.mxu0 %v11729_v34  ;;  %8780 = vmatpush1.bf16.msra.mxu1 %v11732_v25  ;;  %v14943_v34 = vld [vmem:[#allocation166_spill] sm:$0xff]  ;;  %v14944_v25 = vld [vmem:[#allocation24_spill] sm:$0xff] }
 0x587   :  { %7237 = vmatprep.subr.bf16.mxu0 %v11737_v32  ;;  %8781 = vmatprep.subr.bf16.mxu1 %v11740_v19  ;;  %v14945_v32 = vld [vmem:[#allocation168_spill] sm:$0xff]  ;;  %v14946_v19 = vld [vmem:[#allocation26_spill] sm:$0xff] }
 0x588   :  { %7101 = vmatmul.mubr.bf16.gmra.mrb[16].mxu0 %v14915_v29  ;;  %8645 = vmatmul.mubr.bf16.gmra.mrb[16].mxu1 %v14915_v29  ;;  %v14950_v29 = vld [vmem:[#allocation30_spill] sm:$0xff] }
 0x589   :  { %7110 = vmatprep.mubr.bf16.mxu0 %v14916_v54  ;;  %8654 = vmatprep.mubr.bf16.mxu1 %v14916_v54  ;;  %v14952_v54 = vld [vmem:[#allocation32_spill] sm:$0xff] }
 0x58a   :  { %7238 = vmatpush1.bf16.msra.mxu0 %v11735_v16  ;;  %8782 = vmatpush1.bf16.msra.mxu1 %v11738_v26  ;;  %v14947_v16 = vld [vmem:[#allocation170_spill] sm:$0xff]  ;;  %v14948_v26 = vld [vmem:[#allocation28_spill] sm:$0xff] }
 0x58b   :  { %7239 = vmatprep.subr.bf16.mxu0 %v11743_v24  ;;  %8783 = vmatprep.subr.bf16.mxu1 %v11746_v58  ;;  %v14949_v24 = vld [vmem:[#allocation172_spill] sm:$0xff]  ;;  %v14951_v58 = vld [vmem:[#allocation174_spill] sm:$0xff] }
 0x58e   :  { %7240 = vmatpush1.bf16.msra.mxu0 %v11741_v11  ;;  %8784 = vmatpush1.bf16.msra.mxu1 %v11744_v7  ;;  %v14953_v11 = vld [vmem:[#allocation176_spill] sm:$0xff]  ;;  %v14954_v7 = vld [vmem:[#allocation34_spill] sm:$0xff] }
 0x58f   :  { %7241 = vmatprep.subr.bf16.mxu0 %v11749_v60  ;;  %8785 = vmatprep.subr.bf16.mxu1 %v11752_v52  ;;  %v14955_v60 = vld [vmem:[#allocation37_spill] sm:$0xff] }
 0x590   :  { %7111 = vmatmul.mubr.bf16.gmra.mrb[20].mxu0 %v14917_v55  ;;  %8655 = vmatmul.mubr.bf16.gmra.mrb[20].mxu1 %v14917_v55  ;;  %v14956_v52 = vld [vmem:[#allocation33_spill] sm:$0xff] }
 0x591   :  { %7120 = vmatprep.mubr.bf16.mxu0 %v14918_v39  ;;  %8664 = vmatprep.mubr.bf16.mxu1 %v14918_v39  ;;  %v14960_v55 = vld [vmem:[#allocation45_spill] sm:$0xff]  ;;  %v14961_v39 = vld [vmem:[#allocation15_spill] sm:$0xff] }
 0x592   :  { %7242 = vmatpush1.bf16.msra.mxu0 %v11747_v13  ;;  %8786 = vmatpush1.bf16.msra.mxu1 %v11750_v1  ;;  %v14957_v13 = vld [vmem:[#allocation41_spill] sm:$0xff]  ;;  %v14958_v1 = vld [vmem:[#allocation36_spill] sm:$0xff] }
 0x593   :  { %7243 = vmatprep.subr.bf16.mxu0 %v11755_v41  ;;  %8787 = vmatprep.subr.bf16.mxu1 %v11758_v2  ;;  %v14959_v41 = vld [vmem:[#allocation177_spill] sm:$0xff] }
 0x594   :  { %v3288_v2 = vld [vmem:[#allocation8] sm:$0xf] }
 0x596   :  { %7244 = vmatpush1.bf16.msra.mxu0 %v11753_v49  ;;  %8788 = vmatpush1.bf16.msra.mxu1 %v11756_v51  ;;  %v14184_v49 = vrot.slane %v3288_v2, %v14961_v39  ;;  %v14962_v51 = vld [vmem:[#allocation16_spill] sm:$0xff] }
 0x597   :  { %7245 = vmatprep.subr.bf16.mxu0 %v11761_v5  ;;  %8789 = vmatprep.subr.bf16.mxu1 %v11764_v57  ;;  %v14187_v5 = vrot.slane %v3288_v2, %v14962_v51  ;;  %v14963_v57 = vld [vmem:[#allocation17_spill] sm:$0xff] }
 0x598   :  { %7121 = vmatmul.mubr.bf16.gmra.mrb[24].mxu0 %v14919_v53  ;;  %8665 = vmatmul.mubr.bf16.gmra.mrb[24].mxu1 %v14919_v53 }
 0x599   :  { %7130 = vmatprep.mubr.bf16.mxu0 %v14920_v21  ;;  %8674 = vmatprep.mubr.bf16.mxu1 %v14920_v21 }
 0x59a   :  { %7246 = vmatpush1.bf16.msra.mxu0 %v11759_v44  ;;  %8790 = vmatpush1.bf16.msra.mxu1 %v11762_v37  ;;  %v14190_v44 = vrot.slane %v3288_v2, %v14963_v57  ;;  %v14964_v37 = vld [vmem:[#allocation18_spill] sm:$0xff] }
 0x59b   :  { %7247 = vmatprep.subr.bf16.mxu0 %v11767_v46  ;;  %8791 = vmatprep.subr.bf16.mxu1 %v11770_v47  ;;  %v14193_v46 = vrot.slane %v3288_v2, %v14964_v37  ;;  %v11911_v47 = vmov 1966171168  }
 0x59e   :  { %7248 = vmatpush1.bf16.msra.mxu0 %v11765_v4  ;;  %8792 = vmatpush1.bf16.msra.mxu1 %v11768_v59 }
 0x59f   :  { %7249 = vmatprep.subr.bf16.mxu0 %v11773_v20  ;;  %8793 = vmatprep.subr.bf16.mxu1 %v11776_v23 }
 0x5a0   :  { %7131 = vmatmul.mubr.bf16.gmra.mrb[28].mxu0 %v14921_v31  ;;  %8675 = vmatmul.mubr.bf16.gmra.mrb[28].mxu1 %v14921_v31 }
 0x5a1   :  { %7140 = vmatprep.mubr.bf16.mxu0 %v14922_v33  ;;  %8684 = vmatprep.mubr.bf16.mxu1 %v14922_v33 }
 0x5a2   :  { %7250 = vmatpush1.bf16.msra.mxu0 %v11771_v50  ;;  %8794 = vmatpush1.bf16.msra.mxu1 %v11774_v56 }
 0x5a3   :  { %7251 = vmatprep.subr.bf16.mxu0 %v11779_v28  ;;  %8795 = vmatprep.subr.bf16.mxu1 %v11782_v35 }
 0x5a6   :  { %7252 = vmatpush1.bf16.msra.mxu0 %v11777_v62  ;;  %8796 = vmatpush1.bf16.msra.mxu1 %v11780_v45 }
 0x5a8   :  { %7141 = vmatmul.mubr.bf16.gmra.mrb[32].mxu0 %v14923_v6  ;;  %8685 = vmatmul.mubr.bf16.gmra.mrb[32].mxu1 %v14923_v6 }
 0x5a9   :  { %7150 = vmatprep.mubr.bf16.mxu0 %v14924_v22  ;;  %8694 = vmatprep.mubr.bf16.mxu1 %v14924_v22 }
 0x5b0   :  { %7151 = vmatmul.mubr.bf16.gmra.mrb[36].mxu0 %v14925_v15  ;;  %8695 = vmatmul.mubr.bf16.gmra.mrb[36].mxu1 %v14925_v15 }
 0x5b1   :  { %7160 = vmatprep.mubr.bf16.mxu0 %v14926_v38  ;;  %8704 = vmatprep.mubr.bf16.mxu1 %v14926_v38 }
 0x5b8   :  { %7161 = vmatmul.mubr.bf16.gmra.mrb[40].mxu0 %v14927_v40  ;;  %8705 = vmatmul.mubr.bf16.gmra.mrb[40].mxu1 %v14927_v40 }
 0x5b9   :  { %7170 = vmatprep.mubr.bf16.mxu0 %v14928_v17  ;;  %8714 = vmatprep.mubr.bf16.mxu1 %v14928_v17  ;;  %v14203_v17 = vld.sshfl [vmem:[#allocation10] sm:$0x33 pattern:$0x75316420] }
 0x5c0   :  { %7171 = vmatmul.mubr.bf16.gmra.mrb[44].mxu0 %v14929_v3  ;;  %8715 = vmatmul.mubr.bf16.gmra.mrb[44].mxu1 %v14929_v3  ;;  %v14965_v3 = vld [vmem:[#allocation14_spill] sm:$0xff] }
 0x5c1   :  { %7180 = vmatprep.mubr.bf16.mxu0 %v13717_v61  ;;  %8724 = vmatprep.mubr.bf16.mxu1 %v13717_v61  ;;  %v14932_v61 = vld [vmem:[#allocation51_spill] sm:$0xff] }
 0x5c8   :  { %7181 = vmatmul.mubr.bf16.gmra.mrb[48].mxu0 %v13712_v8  ;;  %8725 = vmatmul.mubr.bf16.gmra.mrb[48].mxu1 %v13712_v8  ;;  %v14931_v8 = vld [vmem:[#allocation154_spill] sm:$0xff] }
 0x5c9   :  { %7190 = vmatprep.mubr.bf16.mxu0 %v13737_v9  ;;  %8734 = vmatprep.mubr.bf16.mxu1 %v13737_v9  ;;  %v14934_v9 = vld [vmem:[#allocation55_spill] sm:$0xff] }
 0x5d0   :  { %7191 = vmatmul.mubr.bf16.gmra.mrb[52].mxu0 %v13732_v30  ;;  %8735 = vmatmul.mubr.bf16.gmra.mrb[52].mxu1 %v13732_v30  ;;  %v14933_v30 = vld [vmem:[#allocation156_spill] sm:$0xff] }
 0x5d1   :  { %7200 = vmatprep.mubr.bf16.mxu0 %v13757_v18  ;;  %8744 = vmatprep.mubr.bf16.mxu1 %v13757_v18  ;;  %v14935_v18 = vld [vmem:[#allocation158_spill] sm:$0xff] }
 0x5d8   :  { %7201 = vmatmul.mubr.bf16.gmra.mrb[56].mxu0 %v14930_v36  ;;  %8745 = vmatmul.mubr.bf16.gmra.mrb[56].mxu1 %v14930_v36 }
 0x5d9   :  { %7210 = vmatprep.mubr.bf16.mxu0 %v13777_v43  ;;  %8754 = vmatprep.mubr.bf16.mxu1 %v13777_v43  ;;  %v14937_v43 = vld [vmem:[#allocation160_spill] sm:$0xff] }
 0x5e0   :  { %7211 = vmatmul.mubr.bf16.gmra.mrb[60].mxu0 %v13772_v63  ;;  %8755 = vmatmul.mubr.bf16.gmra.mrb[60].mxu1 %v13772_v63  ;;  %v14936_v63 = vld [vmem:[#allocation59_spill] sm:$0xff] }
 0x5e1   :  { %7253 = vmatprep.mubr.bf16.mxu0 %v14931_v8  ;;  %8797 = vmatprep.mubr.bf16.mxu1 %v14931_v8 }
 0x5e8   :  { %7254 = vmatmul.mubr.bf16.vlgmr.msra.gmra.mrb[0].mxu0 %v14932_v61  ;;  %8798 = vmatmul.mubr.bf16.vlgmr.msra.gmra.mrb[0].mxu1 %v14932_v61 }
 0x5e9   :  { %7263 = vmatprep.mubr.bf16.mxu0 %v14933_v30  ;;  %8807 = vmatprep.mubr.bf16.mxu1 %v14933_v30 }
 0x5f0   :  { %7264 = vmatmul.mubr.bf16.gmra.mrb[4].mxu0 %v14934_v9  ;;  %8808 = vmatmul.mubr.bf16.gmra.mrb[4].mxu1 %v14934_v9  ;;  %v9169_v9 = vcombine.high %v14203_v17, %v14203_v17 }
 0x5f1   :  { %7273 = vmatprep.mubr.bf16.mxu0 %v14935_v18  ;;  %8817 = vmatprep.mubr.bf16.mxu1 %v14935_v18 }
 0x5f8   :  { %7274 = vmatmul.mubr.bf16.gmra.mrb[8].mxu0 %v14936_v63  ;;  %8818 = vmatmul.mubr.bf16.gmra.mrb[8].mxu1 %v14936_v63 }
 0x5f9   :  { %7283 = vmatprep.mubr.bf16.mxu0 %v14937_v43  ;;  %8827 = vmatprep.mubr.bf16.mxu1 %v14937_v43 }
 0x600   :  { %7284 = vmatmul.mubr.bf16.gmra.mrb[12].mxu0 %v14938_v27  ;;  %8828 = vmatmul.mubr.bf16.gmra.mrb[12].mxu1 %v14938_v27 }
 0x601   :  { %7293 = vmatprep.mubr.bf16.mxu0 %v14939_v42  ;;  %8837 = vmatprep.mubr.bf16.mxu1 %v14939_v42 }
 0x608   :  { %7294 = vmatmul.mubr.bf16.gmra.mrb[16].mxu0 %v14940_v10  ;;  %8838 = vmatmul.mubr.bf16.gmra.mrb[16].mxu1 %v14940_v10 }
 0x609   :  { %7303 = vmatprep.mubr.bf16.mxu0 %v14941_v12  ;;  %8847 = vmatprep.mubr.bf16.mxu1 %v14941_v12 }
 0x610   :  { %7304 = vmatmul.mubr.bf16.gmra.mrb[20].mxu0 %v14942_v0  ;;  %8848 = vmatmul.mubr.bf16.gmra.mrb[20].mxu1 %v14942_v0 }
 0x611   :  { %7313 = vmatprep.mubr.bf16.mxu0 %v14943_v34  ;;  %8857 = vmatprep.mubr.bf16.mxu1 %v14943_v34 }
 0x618   :  { %7314 = vmatmul.mubr.bf16.gmra.mrb[24].mxu0 %v14944_v25  ;;  %8858 = vmatmul.mubr.bf16.gmra.mrb[24].mxu1 %v14944_v25 }
 0x619   :  { %7323 = vmatprep.mubr.bf16.mxu0 %v14945_v32  ;;  %8867 = vmatprep.mubr.bf16.mxu1 %v14945_v32 }
 0x620   :  { %7324 = vmatmul.mubr.bf16.gmra.mrb[28].mxu0 %v14946_v19  ;;  %8868 = vmatmul.mubr.bf16.gmra.mrb[28].mxu1 %v14946_v19 }
 0x621   :  { %7333 = vmatprep.mubr.bf16.mxu0 %v14947_v16  ;;  %8877 = vmatprep.mubr.bf16.mxu1 %v14947_v16 }
 0x628   :  { %7334 = vmatmul.mubr.bf16.gmra.mrb[32].mxu0 %v14948_v26  ;;  %8878 = vmatmul.mubr.bf16.gmra.mrb[32].mxu1 %v14948_v26 }
 0x629   :  { %7343 = vmatprep.mubr.bf16.mxu0 %v14949_v24  ;;  %8887 = vmatprep.mubr.bf16.mxu1 %v14949_v24 }
 0x630   :  { %7344 = vmatmul.mubr.bf16.gmra.mrb[36].mxu0 %v14950_v29  ;;  %8888 = vmatmul.mubr.bf16.gmra.mrb[36].mxu1 %v14950_v29 }
 0x631   :  { %7353 = vmatprep.mubr.bf16.mxu0 %v14951_v58  ;;  %8897 = vmatprep.mubr.bf16.mxu1 %v14951_v58 }
 0x638   :  { %7354 = vmatmul.mubr.bf16.gmra.mrb[40].mxu0 %v14952_v54  ;;  %8898 = vmatmul.mubr.bf16.gmra.mrb[40].mxu1 %v14952_v54 }
 0x639   :  { %7363 = vmatprep.mubr.bf16.mxu0 %v14953_v11  ;;  %8907 = vmatprep.mubr.bf16.mxu1 %v14953_v11 }
 0x640   :  { %7364 = vmatmul.mubr.bf16.gmra.mrb[44].mxu0 %v14954_v7  ;;  %8908 = vmatmul.mubr.bf16.gmra.mrb[44].mxu1 %v14954_v7 }
 0x641   :  { %7373 = vmatprep.mubr.bf16.mxu0 %v14955_v60  ;;  %8917 = vmatprep.mubr.bf16.mxu1 %v14955_v60  ;;  %v9151_v60 = vld [vmem:[#allocation2] sm:$0x1] }
 0x642   :  { %9154 = vperm.xlu0 %11014, %v9151_v60  }
 0x648   :  { %7374 = vmatmul.mubr.bf16.gmra.mrb[48].mxu0 %v14956_v52  ;;  %8918 = vmatmul.mubr.bf16.gmra.mrb[48].mxu1 %v14956_v52 }
 0x649   :  { %7383 = vmatprep.mubr.bf16.mxu0 %v14957_v13  ;;  %8927 = vmatprep.mubr.bf16.mxu1 %v14957_v13 }
 0x650   :  { %7384 = vmatmul.mubr.bf16.gmra.mrb[52].mxu0 %v14958_v1  ;;  %8928 = vmatmul.mubr.bf16.gmra.mrb[52].mxu1 %v14958_v1 }
 0x651   :  { %7393 = vmatprep.mubr.bf16.mxu0 %v14959_v41  ;;  %8937 = vmatprep.mubr.bf16.mxu1 %v14959_v41 }
 0x658   :  { %7394 = vmatmul.mubr.bf16.gmra.mrb[56].mxu0 %v14960_v55  ;;  %8938 = vmatmul.mubr.bf16.gmra.mrb[56].mxu1 %v14960_v55 }
 0x659   :  { %7403 = vmatprep.mubr.bf16.mxu0 %v13779_v14  ;;  %8947 = vmatprep.mubr.bf16.mxu1 %v13779_v14  ;;  %v9171_v14 = vunpack.c.l.s4 %v11911_v47 }
 0x65b   :  { %v9172_v56 = vunpack.c.0.s8 %v9171_v14 }
 0x65d   :  { %v14206_v36 = vsub.s32 %v9172_v56, %v14965_v3 }
 0x65f   :  { %v9183_v12 = vrot.slane %v9169_v9, %v14206_v36 }
 0x660   :  { %7404 = vmatmul.mubr.bf16.gmra.mrb[60].mxu0 %v13775_v48  ;;  %8948 = vmatmul.mubr.bf16.gmra.mrb[60].mxu1 %v13775_v48 }
 0x661   :  { %9222 = vmatprep.mubr.bf16.mxu1 %v9183_v12  ;;  %v9185_v29 = vcombine.high %v9183_v12, %v9183_v12 }
 0x663   :  { %9263 = vmatprep.mubr.bf16.mxu0 %v9185_v29 }
 0x6bb   :  { %v7255_v53 = vpop.f32.mrb[0].mxu0  ;;  %v8799_v4 = vpop.f32.mrb[0].mxu1 }
 0x6bc   :  { %v9975_v21 = vadd.f32 %v7255_v53, %v14184_v49  ;;  %v7257_v48 = vpop.f32.mrb[1].mxu0  ;;  %v10039_v59 = vadd.f32 %v8799_v4, %v14187_v5  ;;  %v8801_v23 = vpop.f32.mrb[1].mxu1 }
 0x6bd   :  { %v9976_v20 = vadd.f32 %v7257_v48, %v14190_v44  ;;  %v7259_v50 = vpop.f32.mrb[2].mxu0  ;;  %v10040_v28 = vadd.f32 %v8801_v23, %v14193_v46  ;;  %v8803_v35 = vpop.f32.mrb[2].mxu1 }
 0x6be   :  { %v9977_v31 = vadd.f32 %v7259_v50, %v14184_v49  ;;  %v7261_v33 = vpop.f32.mrb[3].mxu0  ;;  %v8958_v62 = vmax.f32 %v9975_v21, 0.0  ;;  %v10041_v45 = vadd.f32 %v8803_v35, %v14187_v5  ;;  %v8805_v22 = vpop.f32.mrb[3].mxu1  ;;  %v8960_v15 = vmax.f32 %v10039_v59, 0.0 }
 0x6bf   :  { %v9978_v6 = vadd.f32 %v7261_v33, %v14190_v44  ;;  %v10042_v40 = vadd.f32 %v8805_v22, %v14193_v46  ;;  %v8959_v8 = vmax.f32 %v9976_v20, 0.0  ;;  %v8961_v18 = vmax.f32 %v10040_v28, 0.0 }
 0x6c0   :  { %v8962_v38 = vmax.f32 %v9977_v31, 0.0  ;;  %v8964_v61 = vmax.f32 %v10041_v45, 0.0 }
 0x6c1   :  { %v8963_v30 = vmax.f32 %v9978_v6, 0.0  ;;  %v8965_v43 = vmax.f32 %v10042_v40, 0.0 }
 0x6c2   :  { %v9087_v63 = vpack.c.bf16 %v8962_v38, %v8958_v62  ;;  %v9089_v27 = vpack.c.bf16 %v8964_v61, %v8960_v15 }
 0x6c3   :  { %v9088_v42 = vpack.c.bf16 %v8963_v30, %v8959_v8  ;;  %v7265_v10 = vpop.f32.mrb[4].mxu0  ;;  %v9090_v0 = vpack.c.bf16 %v8965_v43, %v8961_v18  ;;  %v8809_v25 = vpop.f32.mrb[4].mxu1 }
 0x6c4   :  { %v9979_v34 = vadd.f32 %v7265_v10, %v14184_v49  ;;  %v7267_v32 = vpop.f32.mrb[5].mxu0  ;;  %v10043_v19 = vadd.f32 %v8809_v25, %v14187_v5  ;;  %v8811_v26 = vpop.f32.mrb[5].mxu1 }
 0x6c5   :  { %v9980_v16 = vadd.f32 %v7267_v32, %v14190_v44  ;;  %v7269_v24 = vpop.f32.mrb[6].mxu0  ;;  %9190 = vmatprep.subr.bf16.mxu1 %v9088_v42  ;;  %v10044_v58 = vadd.f32 %v8811_v26, %v14193_v46  ;;  %v8813_v11 = vpop.f32.mrb[6].mxu1  ;;  %9231 = vmatprep.subr.bf16.mxu0 %v9090_v0 }
 0x6c6   :  { %v9981_v54 = vadd.f32 %v7269_v24, %v14184_v49  ;;  %v7271_v7 = vpop.f32.mrb[7].mxu0  ;;  %9191 = vmatpush1.bf16.xpose.msra.mxu1 %v9087_v63  ;;  %v10045_v52 = vadd.f32 %v8813_v11, %v14187_v5  ;;  %v8815_v1 = vpop.f32.mrb[7].mxu1  ;;  %9232 = vmatpush1.bf16.xpose.msra.mxu0 %v9089_v27  ;;  %v8966_v41 = vmax.f32 %v9979_v34, 0.0  ;;  %v8968_v51 = vmax.f32 %v10043_v19, 0.0 }
 0x6c7   :  { %v9982_v13 = vadd.f32 %v7271_v7, %v14190_v44  ;;  %v10046_v2 = vadd.f32 %v8815_v1, %v14193_v46  ;;  %v8967_v57 = vmax.f32 %v9980_v16, 0.0  ;;  %v8969_v47 = vmax.f32 %v10044_v58, 0.0 }
 0x6c8   :  { %v8970_v55 = vmax.f32 %v9981_v54, 0.0  ;;  %v8972_v37 = vmax.f32 %v10045_v52, 0.0 }
 0x6c9   :  { %v8971_v53 = vmax.f32 %v9982_v13, 0.0  ;;  %v8973_v21 = vmax.f32 %v10046_v2, 0.0 }
 0x6ca   :  { %v9091_v14 = vpack.c.bf16 %v8970_v55, %v8966_v41  ;;  %v9093_v4 = vpack.c.bf16 %v8972_v37, %v8968_v51 }
 0x6cb   :  { %v9092_v48 = vpack.c.bf16 %v8971_v53, %v8967_v57  ;;  %v7275_v59 = vpop.f32.mrb[8].mxu0  ;;  %v9094_v20 = vpack.c.bf16 %v8973_v21, %v8969_v47  ;;  %v8819_v50 = vpop.f32.mrb[8].mxu1 }
 0x6cc   :  { %v9983_v23 = vadd.f32 %v7275_v59, %v14184_v49  ;;  %v7277_v56 = vpop.f32.mrb[9].mxu0  ;;  %v10047_v28 = vadd.f32 %v8819_v50, %v14187_v5  ;;  %v8821_v35 = vpop.f32.mrb[9].mxu1 }
 0x6cd   :  { %v9984_v31 = vadd.f32 %v7277_v56, %v14190_v44  ;;  %v7279_v33 = vpop.f32.mrb[10].mxu0  ;;  %9192 = vmatprep.subr.bf16.mxu1 %v9092_v48  ;;  %v10048_v62 = vadd.f32 %v8821_v35, %v14193_v46  ;;  %v8823_v6 = vpop.f32.mrb[10].mxu1  ;;  %9233 = vmatprep.subr.bf16.mxu0 %v9094_v20 }
 0x6ce   :  { %v9985_v45 = vadd.f32 %v7279_v33, %v14184_v49  ;;  %v7281_v22 = vpop.f32.mrb[11].mxu0  ;;  %9193 = vmatpush1.bf16.xpose.msra.mxu1 %v9091_v14  ;;  %v10049_v15 = vadd.f32 %v8823_v6, %v14187_v5  ;;  %v8825_v40 = vpop.f32.mrb[11].mxu1  ;;  %9234 = vmatpush1.bf16.xpose.msra.mxu0 %v9093_v4  ;;  %v8974_v3 = vmax.f32 %v9983_v23, 0.0  ;;  %v8976_v30 = vmax.f32 %v10047_v28, 0.0 }
 0x6cf   :  { %v9986_v38 = vadd.f32 %v7281_v22, %v14190_v44  ;;  %v10050_v61 = vadd.f32 %v8825_v40, %v14193_v46  ;;  %v8975_v9 = vmax.f32 %v9984_v31, 0.0  ;;  %v8977_v43 = vmax.f32 %v10048_v62, 0.0 }
 0x6d0   :  { %v8978_v8 = vmax.f32 %v9985_v45, 0.0  ;;  %v8980_v18 = vmax.f32 %v10049_v15, 0.0 }
 0x6d1   :  { %v8979_v63 = vmax.f32 %v9986_v38, 0.0  ;;  %v8981_v42 = vmax.f32 %v10050_v61, 0.0 }
 0x6d2   :  { %v9095_v27 = vpack.c.bf16 %v8978_v8, %v8974_v3  ;;  %v9097_v10 = vpack.c.bf16 %v8980_v18, %v8976_v30 }
 0x6d3   :  { %v9096_v12 = vpack.c.bf16 %v8979_v63, %v8975_v9  ;;  %v7285_v0 = vpop.f32.mrb[12].mxu0  ;;  %v9098_v34 = vpack.c.bf16 %v8981_v42, %v8977_v43  ;;  %v8829_v32 = vpop.f32.mrb[12].mxu1 }
 0x6d4   :  { %v9987_v25 = vadd.f32 %v7285_v0, %v14184_v49  ;;  %v7287_v19 = vpop.f32.mrb[13].mxu0  ;;  %v10051_v16 = vadd.f32 %v8829_v32, %v14187_v5  ;;  %v8831_v24 = vpop.f32.mrb[13].mxu1 }
 0x6d5   :  { %v9988_v26 = vadd.f32 %v7287_v19, %v14190_v44  ;;  %v7289_v29 = vpop.f32.mrb[14].mxu0  ;;  %9194 = vmatprep.subr.bf16.mxu1 %v9096_v12  ;;  %v10052_v58 = vadd.f32 %v8831_v24, %v14193_v46  ;;  %v8833_v11 = vpop.f32.mrb[14].mxu1  ;;  %9235 = vmatprep.subr.bf16.mxu0 %v9098_v34 }
 0x6d6   :  { %v9989_v54 = vadd.f32 %v7289_v29, %v14184_v49  ;;  %v7291_v7 = vpop.f32.mrb[15].mxu0  ;;  %9195 = vmatpush1.bf16.xpose.msra.mxu1 %v9095_v27  ;;  %v10053_v60 = vadd.f32 %v8833_v11, %v14187_v5  ;;  %v8835_v13 = vpop.f32.mrb[15].mxu1  ;;  %9236 = vmatpush1.bf16.xpose.msra.mxu0 %v9097_v10  ;;  %v8982_v1 = vmax.f32 %v9987_v25, 0.0  ;;  %v8984_v2 = vmax.f32 %v10051_v16, 0.0 }
 0x6d7   :  { %v9990_v52 = vadd.f32 %v7291_v7, %v14190_v44  ;;  %v10054_v55 = vadd.f32 %v8835_v13, %v14193_v46  ;;  %v8983_v51 = vmax.f32 %v9988_v26, 0.0  ;;  %v8985_v53 = vmax.f32 %v10052_v58, 0.0 }
 0x6d8   :  { %v8986_v41 = vmax.f32 %v9989_v54, 0.0  ;;  %v8988_v57 = vmax.f32 %v10053_v60, 0.0 }
 0x6d9   :  { %v8987_v37 = vmax.f32 %v9990_v52, 0.0  ;;  %v8989_v14 = vmax.f32 %v10054_v55, 0.0 }
 0x6da   :  { %v9099_v47 = vpack.c.bf16 %v8986_v41, %v8982_v1  ;;  %v9101_v21 = vpack.c.bf16 %v8988_v57, %v8984_v2 }
 0x6db   :  { %v9100_v4 = vpack.c.bf16 %v8987_v37, %v8983_v51  ;;  %v7295_v48 = vpop.f32.mrb[16].mxu0  ;;  %v9102_v59 = vpack.c.bf16 %v8989_v14, %v8985_v53  ;;  %v8839_v23 = vpop.f32.mrb[16].mxu1 }
 0x6dc   :  { %v9991_v20 = vadd.f32 %v7295_v48, %v14184_v49  ;;  %v7297_v50 = vpop.f32.mrb[17].mxu0  ;;  %v10055_v56 = vadd.f32 %v8839_v23, %v14187_v5  ;;  %v8841_v31 = vpop.f32.mrb[17].mxu1 }
 0x6dd   :  { %v9992_v28 = vadd.f32 %v7297_v50, %v14190_v44  ;;  %v7299_v35 = vpop.f32.mrb[18].mxu0  ;;  %9196 = vmatprep.subr.bf16.mxu1 %v9100_v4  ;;  %v10056_v33 = vadd.f32 %v8841_v31, %v14193_v46  ;;  %v8843_v45 = vpop.f32.mrb[18].mxu1  ;;  %9237 = vmatprep.subr.bf16.mxu0 %v9102_v59 }
 0x6de   :  { %v9993_v62 = vadd.f32 %v7299_v35, %v14184_v49  ;;  %v7301_v6 = vpop.f32.mrb[19].mxu0  ;;  %9197 = vmatpush1.bf16.xpose.msra.mxu1 %v9099_v47  ;;  %v10057_v22 = vadd.f32 %v8843_v45, %v14187_v5  ;;  %v8845_v38 = vpop.f32.mrb[19].mxu1  ;;  %9238 = vmatpush1.bf16.xpose.msra.mxu0 %v9101_v21  ;;  %v8990_v40 = vmax.f32 %v9991_v20, 0.0  ;;  %v8992_v61 = vmax.f32 %v10055_v56, 0.0 }
 0x6df   :  { %v9994_v15 = vadd.f32 %v7301_v6, %v14190_v44  ;;  %v10058_v8 = vadd.f32 %v8845_v38, %v14193_v46  ;;  %v8991_v30 = vmax.f32 %v9992_v28, 0.0  ;;  %v8993_v63 = vmax.f32 %v10056_v33, 0.0 }
 0x6e0   :  { %v8994_v3 = vmax.f32 %v9993_v62, 0.0  ;;  %v8996_v9 = vmax.f32 %v10057_v22, 0.0 }
 0x6e1   :  { %v8995_v18 = vmax.f32 %v9994_v15, 0.0  ;;  %v8997_v27 = vmax.f32 %v10058_v8, 0.0 }
 0x6e2   :  { %v9103_v43 = vpack.c.bf16 %v8994_v3, %v8990_v40  ;;  %v9105_v42 = vpack.c.bf16 %v8996_v9, %v8992_v61 }
 0x6e3   :  { %v9104_v10 = vpack.c.bf16 %v8995_v18, %v8991_v30  ;;  %v7305_v12 = vpop.f32.mrb[20].mxu0  ;;  %v9106_v0 = vpack.c.bf16 %v8997_v27, %v8993_v63  ;;  %v8849_v25 = vpop.f32.mrb[20].mxu1 }
 0x6e4   :  { %v9995_v34 = vadd.f32 %v7305_v12, %v14184_v49  ;;  %v7307_v32 = vpop.f32.mrb[21].mxu0  ;;  %v10059_v19 = vadd.f32 %v8849_v25, %v14187_v5  ;;  %v8851_v26 = vpop.f32.mrb[21].mxu1 }
 0x6e5   :  { %v9996_v16 = vadd.f32 %v7307_v32, %v14190_v44  ;;  %v7309_v24 = vpop.f32.mrb[22].mxu0  ;;  %9198 = vmatprep.subr.bf16.mxu1 %v9104_v10  ;;  %v10060_v29 = vadd.f32 %v8851_v26, %v14193_v46  ;;  %v8853_v54 = vpop.f32.mrb[22].mxu1  ;;  %9239 = vmatprep.subr.bf16.mxu0 %v9106_v0 }
 0x6e6   :  { %v9997_v58 = vadd.f32 %v7309_v24, %v14184_v49  ;;  %v7311_v11 = vpop.f32.mrb[23].mxu0  ;;  %9199 = vmatpush1.bf16.xpose.msra.mxu1 %v9103_v43  ;;  %v10061_v7 = vadd.f32 %v8853_v54, %v14187_v5  ;;  %v8855_v52 = vpop.f32.mrb[23].mxu1  ;;  %9240 = vmatpush1.bf16.xpose.msra.mxu0 %v9105_v42  ;;  %v8998_v13 = vmax.f32 %v9995_v34, 0.0  ;;  %v9000_v55 = vmax.f32 %v10059_v19, 0.0 }
 0x6e7   :  { %v9998_v60 = vadd.f32 %v7311_v11, %v14190_v44  ;;  %v10062_v41 = vadd.f32 %v8855_v52, %v14193_v46  ;;  %v8999_v2 = vmax.f32 %v9996_v16, 0.0  ;;  %v9001_v37 = vmax.f32 %v10060_v29, 0.0 }
 0x6e8   :  { %v9002_v1 = vmax.f32 %v9997_v58, 0.0  ;;  %v9004_v51 = vmax.f32 %v10061_v7, 0.0 }
 0x6e9   :  { %v9003_v57 = vmax.f32 %v9998_v60, 0.0  ;;  %v9005_v47 = vmax.f32 %v10062_v41, 0.0 }
 0x6ea   :  { %v9107_v53 = vpack.c.bf16 %v9002_v1, %v8998_v13  ;;  %v9109_v14 = vpack.c.bf16 %v9004_v51, %v9000_v55 }
 0x6eb   :  { %v9108_v21 = vpack.c.bf16 %v9003_v57, %v8999_v2  ;;  %v7315_v4 = vpop.f32.mrb[24].mxu0  ;;  %v9110_v48 = vpack.c.bf16 %v9005_v47, %v9001_v37  ;;  %v8859_v20 = vpop.f32.mrb[24].mxu1 }
 0x6ec   :  { %v9999_v59 = vadd.f32 %v7315_v4, %v14184_v49  ;;  %v7317_v23 = vpop.f32.mrb[25].mxu0  ;;  %v10063_v50 = vadd.f32 %v8859_v20, %v14187_v5  ;;  %v8861_v28 = vpop.f32.mrb[25].mxu1 }
 0x6ed   :  { %v10000_v56 = vadd.f32 %v7317_v23, %v14190_v44  ;;  %v7319_v31 = vpop.f32.mrb[26].mxu0  ;;  %9200 = vmatprep.subr.bf16.mxu1 %v9108_v21  ;;  %v10064_v35 = vadd.f32 %v8861_v28, %v14193_v46  ;;  %v8863_v62 = vpop.f32.mrb[26].mxu1  ;;  %9241 = vmatprep.subr.bf16.mxu0 %v9110_v48 }
 0x6ee   :  { %v10001_v33 = vadd.f32 %v7319_v31, %v14184_v49  ;;  %v7321_v45 = vpop.f32.mrb[27].mxu0  ;;  %9201 = vmatpush1.bf16.xpose.msra.mxu1 %v9107_v53  ;;  %v10065_v6 = vadd.f32 %v8863_v62, %v14187_v5  ;;  %v8865_v15 = vpop.f32.mrb[27].mxu1  ;;  %9242 = vmatpush1.bf16.xpose.msra.mxu0 %v9109_v14  ;;  %v9006_v38 = vmax.f32 %v9999_v59, 0.0  ;;  %v9008_v8 = vmax.f32 %v10063_v50, 0.0 }
 0x6ef   :  { %v10002_v22 = vadd.f32 %v7321_v45, %v14190_v44  ;;  %v10066_v3 = vadd.f32 %v8865_v15, %v14193_v46  ;;  %v9007_v61 = vmax.f32 %v10000_v56, 0.0  ;;  %v9009_v18 = vmax.f32 %v10064_v35, 0.0 }
 0x6f0   :  { %v9010_v40 = vmax.f32 %v10001_v33, 0.0  ;;  %v9012_v30 = vmax.f32 %v10065_v6, 0.0 }
 0x6f1   :  { %v9011_v9 = vmax.f32 %v10002_v22, 0.0  ;;  %v9013_v43 = vmax.f32 %v10066_v3, 0.0 }
 0x6f2   :  { %v9111_v63 = vpack.c.bf16 %v9010_v40, %v9006_v38  ;;  %v9113_v27 = vpack.c.bf16 %v9012_v30, %v9008_v8 }
 0x6f3   :  { %v9112_v42 = vpack.c.bf16 %v9011_v9, %v9007_v61  ;;  %v7325_v10 = vpop.f32.mrb[28].mxu0  ;;  %v9114_v12 = vpack.c.bf16 %v9013_v43, %v9009_v18  ;;  %v8869_v34 = vpop.f32.mrb[28].mxu1 }
 0x6f4   :  { %v10003_v0 = vadd.f32 %v7325_v10, %v14184_v49  ;;  %v7327_v25 = vpop.f32.mrb[29].mxu0  ;;  %v10067_v32 = vadd.f32 %v8869_v34, %v14187_v5  ;;  %v8871_v16 = vpop.f32.mrb[29].mxu1 }
 0x6f5   :  { %v10004_v19 = vadd.f32 %v7327_v25, %v14190_v44  ;;  %v7329_v26 = vpop.f32.mrb[30].mxu0  ;;  %9202 = vmatprep.subr.bf16.mxu1 %v9112_v42  ;;  %v10068_v24 = vadd.f32 %v8871_v16, %v14193_v46  ;;  %v8873_v58 = vpop.f32.mrb[30].mxu1  ;;  %9243 = vmatprep.subr.bf16.mxu0 %v9114_v12 }
 0x6f6   :  { %v10005_v29 = vadd.f32 %v7329_v26, %v14184_v49  ;;  %v7331_v54 = vpop.f32.mrb[31].mxu0  ;;  %9203 = vmatpush1.bf16.xpose.msra.mxu1 %v9111_v63  ;;  %v10069_v11 = vadd.f32 %v8873_v58, %v14187_v5  ;;  %v8875_v60 = vpop.f32.mrb[31].mxu1  ;;  %9244 = vmatpush1.bf16.xpose.msra.mxu0 %v9113_v27  ;;  %v9014_v52 = vmax.f32 %v10003_v0, 0.0  ;;  %v9016_v41 = vmax.f32 %v10067_v32, 0.0 }
 0x6f7   :  { %v10006_v7 = vadd.f32 %v7331_v54, %v14190_v44  ;;  %v10070_v1 = vadd.f32 %v8875_v60, %v14193_v46  ;;  %v9015_v55 = vmax.f32 %v10004_v19, 0.0  ;;  %v9017_v57 = vmax.f32 %v10068_v24, 0.0 }
 0x6f8   :  { %v9018_v13 = vmax.f32 %v10005_v29, 0.0  ;;  %v9020_v2 = vmax.f32 %v10069_v11, 0.0 }
 0x6f9   :  { %v9019_v51 = vmax.f32 %v10006_v7, 0.0  ;;  %v9021_v53 = vmax.f32 %v10070_v1, 0.0 }
 0x6fa   :  { %v9115_v37 = vpack.c.bf16 %v9018_v13, %v9014_v52  ;;  %v9117_v47 = vpack.c.bf16 %v9020_v2, %v9016_v41 }
 0x6fb   :  { %v9116_v14 = vpack.c.bf16 %v9019_v51, %v9015_v55  ;;  %v7335_v21 = vpop.f32.mrb[32].mxu0  ;;  %v9118_v4 = vpack.c.bf16 %v9021_v53, %v9017_v57  ;;  %v8879_v59 = vpop.f32.mrb[32].mxu1 }
 0x6fc   :  { %v10007_v48 = vadd.f32 %v7335_v21, %v14184_v49  ;;  %v7337_v20 = vpop.f32.mrb[33].mxu0  ;;  %v10071_v23 = vadd.f32 %v8879_v59, %v14187_v5  ;;  %v8881_v56 = vpop.f32.mrb[33].mxu1 }
 0x6fd   :  { %v10008_v50 = vadd.f32 %v7337_v20, %v14190_v44  ;;  %v7339_v28 = vpop.f32.mrb[34].mxu0  ;;  %9204 = vmatprep.subr.bf16.mxu1 %v9116_v14  ;;  %v10072_v31 = vadd.f32 %v8881_v56, %v14193_v46  ;;  %v8883_v33 = vpop.f32.mrb[34].mxu1  ;;  %9245 = vmatprep.subr.bf16.mxu0 %v9118_v4 }
 0x6fe   :  { %v10009_v35 = vadd.f32 %v7339_v28, %v14184_v49  ;;  %v7341_v62 = vpop.f32.mrb[35].mxu0  ;;  %9205 = vmatpush1.bf16.xpose.msra.mxu1 %v9115_v37  ;;  %v10073_v45 = vadd.f32 %v8883_v33, %v14187_v5  ;;  %v8885_v22 = vpop.f32.mrb[35].mxu1  ;;  %9246 = vmatpush1.bf16.xpose.msra.mxu0 %v9117_v47  ;;  %v9022_v15 = vmax.f32 %v10007_v48, 0.0  ;;  %v9024_v3 = vmax.f32 %v10071_v23, 0.0 }
 0x6ff   :  { %v10010_v6 = vadd.f32 %v7341_v62, %v14190_v44  ;;  %v10074_v40 = vadd.f32 %v8885_v22, %v14193_v46  ;;  %v9023_v8 = vmax.f32 %v10008_v50, 0.0  ;;  %v9025_v9 = vmax.f32 %v10072_v31, 0.0 }
 0x700   :  { %v9026_v38 = vmax.f32 %v10009_v35, 0.0  ;;  %v9028_v61 = vmax.f32 %v10073_v45, 0.0 }
 0x701   :  { %v9027_v30 = vmax.f32 %v10010_v6, 0.0  ;;  %v9029_v63 = vmax.f32 %v10074_v40, 0.0 }
 0x702   :  { %v9119_v18 = vpack.c.bf16 %v9026_v38, %v9022_v15  ;;  %v9121_v43 = vpack.c.bf16 %v9028_v61, %v9024_v3 }
 0x703   :  { %v9120_v27 = vpack.c.bf16 %v9027_v30, %v9023_v8  ;;  %v7345_v42 = vpop.f32.mrb[36].mxu0  ;;  %v9122_v10 = vpack.c.bf16 %v9029_v63, %v9025_v9  ;;  %v8889_v0 = vpop.f32.mrb[36].mxu1 }
 0x704   :  { %v10011_v12 = vadd.f32 %v7345_v42, %v14184_v49  ;;  %v7347_v34 = vpop.f32.mrb[37].mxu0  ;;  %v10075_v25 = vadd.f32 %v8889_v0, %v14187_v5  ;;  %v8891_v19 = vpop.f32.mrb[37].mxu1 }
 0x705   :  { %v10012_v32 = vadd.f32 %v7347_v34, %v14190_v44  ;;  %v7349_v16 = vpop.f32.mrb[38].mxu0  ;;  %9206 = vmatprep.subr.bf16.mxu1 %v9120_v27  ;;  %v10076_v26 = vadd.f32 %v8891_v19, %v14193_v46  ;;  %v8893_v29 = vpop.f32.mrb[38].mxu1  ;;  %9247 = vmatprep.subr.bf16.mxu0 %v9122_v10 }
 0x706   :  { %v10013_v24 = vadd.f32 %v7349_v16, %v14184_v49  ;;  %v7351_v58 = vpop.f32.mrb[39].mxu0  ;;  %9207 = vmatpush1.bf16.xpose.msra.mxu1 %v9119_v18  ;;  %v10077_v54 = vadd.f32 %v8893_v29, %v14187_v5  ;;  %v8895_v7 = vpop.f32.mrb[39].mxu1  ;;  %9248 = vmatpush1.bf16.xpose.msra.mxu0 %v9121_v43  ;;  %v9030_v60 = vmax.f32 %v10011_v12, 0.0  ;;  %v9032_v1 = vmax.f32 %v10075_v25, 0.0 }
 0x707   :  { %v10014_v11 = vadd.f32 %v7351_v58, %v14190_v44  ;;  %v10078_v13 = vadd.f32 %v8895_v7, %v14193_v46  ;;  %v9031_v41 = vmax.f32 %v10012_v32, 0.0  ;;  %v9033_v51 = vmax.f32 %v10076_v26, 0.0 }
 0x708   :  { %v9034_v52 = vmax.f32 %v10013_v24, 0.0  ;;  %v9036_v55 = vmax.f32 %v10077_v54, 0.0 }
 0x709   :  { %v9035_v2 = vmax.f32 %v10014_v11, 0.0  ;;  %v9037_v37 = vmax.f32 %v10078_v13, 0.0 }
 0x70a   :  { %v9123_v57 = vpack.c.bf16 %v9034_v52, %v9030_v60  ;;  %v9125_v53 = vpack.c.bf16 %v9036_v55, %v9032_v1 }
 0x70b   :  { %v9124_v47 = vpack.c.bf16 %v9035_v2, %v9031_v41  ;;  %v7355_v14 = vpop.f32.mrb[40].mxu0  ;;  %v9126_v21 = vpack.c.bf16 %v9037_v37, %v9033_v51  ;;  %v8899_v48 = vpop.f32.mrb[40].mxu1 }
 0x70c   :  { %v10015_v4 = vadd.f32 %v7355_v14, %v14184_v49  ;;  %v7357_v59 = vpop.f32.mrb[41].mxu0  ;;  %v10079_v20 = vadd.f32 %v8899_v48, %v14187_v5  ;;  %v8901_v50 = vpop.f32.mrb[41].mxu1 }
 0x70d   :  { %v10016_v23 = vadd.f32 %v7357_v59, %v14190_v44  ;;  %v7359_v56 = vpop.f32.mrb[42].mxu0  ;;  %9208 = vmatprep.subr.bf16.mxu1 %v9124_v47  ;;  %v10080_v28 = vadd.f32 %v8901_v50, %v14193_v46  ;;  %v8903_v35 = vpop.f32.mrb[42].mxu1  ;;  %9249 = vmatprep.subr.bf16.mxu0 %v9126_v21 }
 0x70e   :  { %v10017_v31 = vadd.f32 %v7359_v56, %v14184_v49  ;;  %v7361_v33 = vpop.f32.mrb[43].mxu0  ;;  %9209 = vmatpush1.bf16.xpose.msra.mxu1 %v9123_v57  ;;  %v10081_v62 = vadd.f32 %v8903_v35, %v14187_v5  ;;  %v8905_v6 = vpop.f32.mrb[43].mxu1  ;;  %9250 = vmatpush1.bf16.xpose.msra.mxu0 %v9125_v53  ;;  %v9038_v22 = vmax.f32 %v10015_v4, 0.0  ;;  %v9040_v40 = vmax.f32 %v10079_v20, 0.0 }
 0x70f   :  { %v10018_v45 = vadd.f32 %v7361_v33, %v14190_v44  ;;  %v10082_v38 = vadd.f32 %v8905_v6, %v14193_v46  ;;  %v9039_v3 = vmax.f32 %v10016_v23, 0.0  ;;  %v9041_v30 = vmax.f32 %v10080_v28, 0.0 }
 0x710   :  { %v9042_v15 = vmax.f32 %v10017_v31, 0.0  ;;  %v9044_v8 = vmax.f32 %v10081_v62, 0.0 }
 0x711   :  { %v9043_v61 = vmax.f32 %v10018_v45, 0.0  ;;  %v9045_v18 = vmax.f32 %v10082_v38, 0.0 }
 0x712   :  { %v9127_v9 = vpack.c.bf16 %v9042_v15, %v9038_v22  ;;  %v9129_v63 = vpack.c.bf16 %v9044_v8, %v9040_v40 }
 0x713   :  { %v9128_v43 = vpack.c.bf16 %v9043_v61, %v9039_v3  ;;  %v7365_v27 = vpop.f32.mrb[44].mxu0  ;;  %v9130_v42 = vpack.c.bf16 %v9045_v18, %v9041_v30  ;;  %v8909_v12 = vpop.f32.mrb[44].mxu1 }
 0x714   :  { %v10019_v10 = vadd.f32 %v7365_v27, %v14184_v49  ;;  %v7367_v0 = vpop.f32.mrb[45].mxu0  ;;  %v10083_v34 = vadd.f32 %v8909_v12, %v14187_v5  ;;  %v8911_v32 = vpop.f32.mrb[45].mxu1 }
 0x715   :  { %v10020_v25 = vadd.f32 %v7367_v0, %v14190_v44  ;;  %v7369_v19 = vpop.f32.mrb[46].mxu0  ;;  %9210 = vmatprep.subr.bf16.mxu1 %v9128_v43  ;;  %v10084_v16 = vadd.f32 %v8911_v32, %v14193_v46  ;;  %v8913_v24 = vpop.f32.mrb[46].mxu1  ;;  %9251 = vmatprep.subr.bf16.mxu0 %v9130_v42 }
 0x716   :  { %v10021_v26 = vadd.f32 %v7369_v19, %v14184_v49  ;;  %v7371_v29 = vpop.f32.mrb[47].mxu0  ;;  %9211 = vmatpush1.bf16.xpose.msra.mxu1 %v9127_v9  ;;  %v10085_v58 = vadd.f32 %v8913_v24, %v14187_v5  ;;  %v8915_v11 = vpop.f32.mrb[47].mxu1  ;;  %9252 = vmatpush1.bf16.xpose.msra.mxu0 %v9129_v63  ;;  %v9046_v7 = vmax.f32 %v10019_v10, 0.0  ;;  %v9048_v13 = vmax.f32 %v10083_v34, 0.0 }
 0x717   :  { %v10022_v54 = vadd.f32 %v7371_v29, %v14190_v44  ;;  %v10086_v52 = vadd.f32 %v8915_v11, %v14193_v46  ;;  %v9047_v1 = vmax.f32 %v10020_v25, 0.0  ;;  %v9049_v2 = vmax.f32 %v10084_v16, 0.0 }
 0x718   :  { %v9050_v60 = vmax.f32 %v10021_v26, 0.0  ;;  %v9052_v41 = vmax.f32 %v10085_v58, 0.0 }
 0x719   :  { %v9051_v55 = vmax.f32 %v10022_v54, 0.0  ;;  %v9053_v57 = vmax.f32 %v10086_v52, 0.0 }
 0x71a   :  { %v9131_v51 = vpack.c.bf16 %v9050_v60, %v9046_v7  ;;  %v9133_v37 = vpack.c.bf16 %v9052_v41, %v9048_v13 }
 0x71b   :  { %v9132_v53 = vpack.c.bf16 %v9051_v55, %v9047_v1  ;;  %v7375_v47 = vpop.f32.mrb[48].mxu0  ;;  %v9134_v14 = vpack.c.bf16 %v9053_v57, %v9049_v2  ;;  %v8919_v4 = vpop.f32.mrb[48].mxu1 }
 0x71c   :  { %v10023_v21 = vadd.f32 %v7375_v47, %v14184_v49  ;;  %v7377_v48 = vpop.f32.mrb[49].mxu0  ;;  %v10087_v59 = vadd.f32 %v8919_v4, %v14187_v5  ;;  %v8921_v23 = vpop.f32.mrb[49].mxu1 }
 0x71d   :  { %v10024_v20 = vadd.f32 %v7377_v48, %v14190_v44  ;;  %v7379_v50 = vpop.f32.mrb[50].mxu0  ;;  %9212 = vmatprep.subr.bf16.mxu1 %v9132_v53  ;;  %v10088_v56 = vadd.f32 %v8921_v23, %v14193_v46  ;;  %v8923_v31 = vpop.f32.mrb[50].mxu1  ;;  %9253 = vmatprep.subr.bf16.mxu0 %v9134_v14 }
 0x71e   :  { %v10025_v28 = vadd.f32 %v7379_v50, %v14184_v49  ;;  %v7381_v35 = vpop.f32.mrb[51].mxu0  ;;  %9213 = vmatpush1.bf16.xpose.msra.mxu1 %v9131_v51  ;;  %v10089_v33 = vadd.f32 %v8923_v31, %v14187_v5  ;;  %v8925_v45 = vpop.f32.mrb[51].mxu1  ;;  %9254 = vmatpush1.bf16.xpose.msra.mxu0 %v9133_v37  ;;  %v9054_v6 = vmax.f32 %v10023_v21, 0.0  ;;  %v9056_v38 = vmax.f32 %v10087_v59, 0.0 }
 0x71f   :  { %v10026_v62 = vadd.f32 %v7381_v35, %v14190_v44  ;;  %v10090_v15 = vadd.f32 %v8925_v45, %v14193_v46  ;;  %v9055_v40 = vmax.f32 %v10024_v20, 0.0  ;;  %v9057_v61 = vmax.f32 %v10088_v56, 0.0 }
 0x720   :  { %v9058_v22 = vmax.f32 %v10025_v28, 0.0  ;;  %v9060_v3 = vmax.f32 %v10089_v33, 0.0 }
 0x721   :  { %v9059_v8 = vmax.f32 %v10026_v62, 0.0  ;;  %v9061_v9 = vmax.f32 %v10090_v15, 0.0 }
 0x722   :  { %v9135_v30 = vpack.c.bf16 %v9058_v22, %v9054_v6  ;;  %v9137_v18 = vpack.c.bf16 %v9060_v3, %v9056_v38 }
 0x723   :  { %v9136_v63 = vpack.c.bf16 %v9059_v8, %v9055_v40  ;;  %v7385_v43 = vpop.f32.mrb[52].mxu0  ;;  %v9138_v27 = vpack.c.bf16 %v9061_v9, %v9057_v61  ;;  %v8929_v10 = vpop.f32.mrb[52].mxu1 }
 0x724   :  { %v10027_v42 = vadd.f32 %v7385_v43, %v14184_v49  ;;  %v7387_v12 = vpop.f32.mrb[53].mxu0  ;;  %v10091_v0 = vadd.f32 %v8929_v10, %v14187_v5  ;;  %v8931_v25 = vpop.f32.mrb[53].mxu1 }
 0x725   :  { %v10028_v34 = vadd.f32 %v7387_v12, %v14190_v44  ;;  %v7389_v32 = vpop.f32.mrb[54].mxu0  ;;  %9214 = vmatprep.subr.bf16.mxu1 %v9136_v63  ;;  %v10092_v19 = vadd.f32 %v8931_v25, %v14193_v46  ;;  %v8933_v26 = vpop.f32.mrb[54].mxu1  ;;  %9255 = vmatprep.subr.bf16.mxu0 %v9138_v27 }
 0x726   :  { %v10029_v16 = vadd.f32 %v7389_v32, %v14184_v49  ;;  %v7391_v24 = vpop.f32.mrb[55].mxu0  ;;  %9215 = vmatpush1.bf16.xpose.msra.mxu1 %v9135_v30  ;;  %v10093_v29 = vadd.f32 %v8933_v26, %v14187_v5  ;;  %v8935_v54 = vpop.f32.mrb[55].mxu1  ;;  %9256 = vmatpush1.bf16.xpose.msra.mxu0 %v9137_v18  ;;  %v9062_v11 = vmax.f32 %v10027_v42, 0.0  ;;  %v9064_v52 = vmax.f32 %v10091_v0, 0.0 }
 0x727   :  { %v10030_v58 = vadd.f32 %v7391_v24, %v14190_v44  ;;  %v10094_v60 = vadd.f32 %v8935_v54, %v14193_v46  ;;  %v9063_v13 = vmax.f32 %v10028_v34, 0.0  ;;  %v9065_v55 = vmax.f32 %v10092_v19, 0.0 }
 0x728   :  { %v9066_v7 = vmax.f32 %v10029_v16, 0.0  ;;  %v9068_v1 = vmax.f32 %v10093_v29, 0.0 }
 0x729   :  { %v9067_v41 = vmax.f32 %v10030_v58, 0.0  ;;  %v9069_v51 = vmax.f32 %v10094_v60, 0.0 }
 0x72a   :  { %v9139_v2 = vpack.c.bf16 %v9066_v7, %v9062_v11  ;;  %v9141_v57 = vpack.c.bf16 %v9068_v1, %v9064_v52 }
 0x72b   :  { %v9140_v37 = vpack.c.bf16 %v9067_v41, %v9063_v13  ;;  %v7395_v53 = vpop.f32.mrb[56].mxu0  ;;  %v9142_v47 = vpack.c.bf16 %v9069_v51, %v9065_v55  ;;  %v8939_v21 = vpop.f32.mrb[56].mxu1 }
 0x72c   :  { %v10031_v14 = vadd.f32 %v7395_v53, %v14184_v49  ;;  %v7397_v4 = vpop.f32.mrb[57].mxu0  ;;  %v10095_v48 = vadd.f32 %v8939_v21, %v14187_v5  ;;  %v8941_v20 = vpop.f32.mrb[57].mxu1 }
 0x72d   :  { %v10032_v59 = vadd.f32 %v7397_v4, %v14190_v44  ;;  %v7399_v23 = vpop.f32.mrb[58].mxu0  ;;  %9216 = vmatprep.subr.bf16.mxu1 %v9140_v37  ;;  %v10096_v50 = vadd.f32 %v8941_v20, %v14193_v46  ;;  %v8943_v28 = vpop.f32.mrb[58].mxu1  ;;  %9257 = vmatprep.subr.bf16.mxu0 %v9142_v47 }
 0x72e   :  { %v10033_v56 = vadd.f32 %v7399_v23, %v14184_v49  ;;  %v7401_v31 = vpop.f32.mrb[59].mxu0  ;;  %9217 = vmatpush1.bf16.xpose.msra.mxu1 %v9139_v2  ;;  %v10097_v35 = vadd.f32 %v8943_v28, %v14187_v5  ;;  %v8945_v62 = vpop.f32.mrb[59].mxu1  ;;  %9258 = vmatpush1.bf16.xpose.msra.mxu0 %v9141_v57  ;;  %v9070_v45 = vmax.f32 %v10031_v14, 0.0  ;;  %v9072_v15 = vmax.f32 %v10095_v48, 0.0 }
 0x72f   :  { %v10034_v33 = vadd.f32 %v7401_v31, %v14190_v44  ;;  %v10098_v22 = vadd.f32 %v8945_v62, %v14193_v46  ;;  %v9071_v38 = vmax.f32 %v10032_v59, 0.0  ;;  %v9073_v8 = vmax.f32 %v10096_v50, 0.0 }
 0x730   :  { %v9074_v6 = vmax.f32 %v10033_v56, 0.0  ;;  %v9076_v40 = vmax.f32 %v10097_v35, 0.0  ;;  %v14966_v35 = vlaneseq }
 0x731   :  { %v9075_v3 = vmax.f32 %v10034_v33, 0.0  ;;  %v9077_v30 = vmax.f32 %v10098_v22, 0.0 }
 0x732   :  { %v9143_v61 = vpack.c.bf16 %v9074_v6, %v9070_v45  ;;  %v9145_v9 = vpack.c.bf16 %v9076_v40, %v9072_v15  ;;  %vm9292_vm1 = vcmp.lt.s32.totalorder %v14966_v35, 256 }
 0x733   :  { %v9144_v18 = vpack.c.bf16 %v9075_v3, %v9071_v38  ;;  %v7405_v63 = vpop.f32.mrb[60].mxu0  ;;  %v9146_v43 = vpack.c.bf16 %v9077_v30, %v9073_v8  ;;  %v8949_v42 = vpop.f32.mrb[60].mxu1 }
 0x734   :  { %v10035_v27 = vadd.f32 %v7405_v63, %v14184_v49  ;;  %v7407_v10 = vpop.f32.mrb[61].mxu0  ;;  %v10099_v12 = vadd.f32 %v8949_v42, %v14187_v5  ;;  %v8951_v34 = vpop.f32.mrb[61].mxu1 }
 0x735   :  { %v10036_v0 = vadd.f32 %v7407_v10, %v14190_v44  ;;  %v7409_v25 = vpop.f32.mrb[62].mxu0  ;;  %9218 = vmatprep.subr.bf16.mxu1 %v9144_v18  ;;  %v10100_v32 = vadd.f32 %v8951_v34, %v14193_v46  ;;  %v8953_v16 = vpop.f32.mrb[62].mxu1  ;;  %9259 = vmatprep.subr.bf16.mxu0 %v9146_v43 }
 0x736   :  { %v10037_v19 = vadd.f32 %v7409_v25, %v14184_v49  ;;  %v7411_v26 = vpop.f32.mrb[63].mxu0  ;;  %9219 = vmatpush1.bf16.xpose.msra.mxu1 %v9143_v61  ;;  %v10101_v24 = vadd.f32 %v8953_v16, %v14187_v5  ;;  %v8955_v58 = vpop.f32.mrb[63].mxu1  ;;  %9260 = vmatpush1.bf16.xpose.msra.mxu0 %v9145_v9  ;;  %v9078_v54 = vmax.f32 %v10035_v27, 0.0  ;;  %v9080_v60 = vmax.f32 %v10099_v12, 0.0 }
 0x737   :  { %v10038_v29 = vadd.f32 %v7411_v26, %v14190_v44  ;;  %v10102_v7 = vadd.f32 %v8955_v58, %v14193_v46  ;;  %v9079_v52 = vmax.f32 %v10036_v0, 0.0  ;;  %v9081_v41 = vmax.f32 %v10100_v32, 0.0  ;;  %v9155_v46 = vpop.permute.xlu0 %9154 }
 0x738   :  { %v9082_v11 = vmax.f32 %v10037_v19, 0.0  ;;  %v9084_v13 = vmax.f32 %v10101_v24, 0.0  ;;  %v9176_v5 = vrot.slane %v14203_v17, %v14206_v36  ;;  %v9160_v37 = vrot.slane %v9155_v46, %v14961_v39 }
 0x739   :  { %v9083_v1 = vmax.f32 %v10038_v29, 0.0  ;;  %v9085_v55 = vmax.f32 %v10102_v7, 0.0 }
 0x73a   :  { %v9147_v49 = vpack.c.bf16 %v9082_v11, %v9078_v54  ;;  %v9149_v2 = vpack.c.bf16 %v9084_v13, %v9080_v60  ;;  %v9184_v44 = vcombine.high %v9176_v5, %v9176_v5 }
 0x73b   :  { %v9148_v51 = vpack.c.bf16 %v9083_v1, %v9079_v52  ;;  %v9150_v57 = vpack.c.bf16 %v9085_v55, %v9081_v41 }
 0x73d   :  { %9220 = vmatprep.subr.bf16.mxu1 %v9148_v51  ;;  %9261 = vmatprep.subr.bf16.mxu0 %v9150_v57 }
 0x73e   :  { %9221 = vmatpush1.bf16.xpose.msra.mxu1 %v9147_v49  ;;  %9262 = vmatpush1.bf16.xpose.msra.mxu0 %v9149_v2 }
 0x745   :  { %9223 = vmatmul.mubr.bf16.vlgmr.msra.gmra.mrb[64].mxu1 %v9176_v5  ;;  %9264 = vmatmul.mubr.bf16.vlgmr.msra.gmra.mrb[64].mxu0 %v9184_v44 }
 0x818   :  { %v9224_v53 = vpop.f32.mrb[64].mxu1  ;;  %v9265_v14 = vpop.f32.mrb[64].mxu0 }
 0x819   :  { %v9225_v47 = vadd.f32 %v9224_v53, %v9160_v37  ;;  %v9226_v21 = vpop.f32.mrb[65].mxu1  ;;  %v9267_v48 = vpop.f32.mrb[65].mxu0 }
 0x81a   :  { %v9227_v4 = vadd.f32 %v9226_v21, %v9160_v37  ;;  %v9228_v59 = vpop.f32.mrb[66].mxu1  ;;  %v9269_v23 = vpop.f32.mrb[66].mxu0 }
 0x81b   :  { %v9266_v20 = vadd.f32 %v9265_v14, %v9225_v47  ;;  %v9229_v50 = vpop.f32.mrb[67].mxu1  ;;  %v9270_v28 = vpop.f32.mrb[67].mxu0 }
 0x81c   :  { %v9268_v56 = vadd.f32 %v9267_v48, %v9227_v4 }
 0x81e   :  { %v9274_v17 = vcombine.low %v9266_v20, %v9268_v56 }
 0x820   :  { %v9281_v31 = vrot.slane %v9274_v17, %v14206_v36 }
 0x822   :  { %v9288_v33 = vrot.slane %v9281_v31, %v14206_v36 }
 0x824   :  { %9294 = vst.msk [vmem:[%s14347_s7] sm:$0x3] %vm9292_vm1, %v9288_v33 }
 0x825   :  { %9299 = vsyncpa [#allocation4], 1 }
 0x826   :  { %9300 = vsyncpa [#allocation6], 1 }
 0x827   :  { %9301 = vsyncpa [#allocation9], 1 }

</bundles_post_ra>
